<compile_context>
chip_gen: v5e
topology: v5e:2x2
jax: 0.10.0
libtpu: 0.0.40
codegen_flags: <defaults>
</compile_context>

<pallas_src>
import math
from functools import partial

import jax
import jax.numpy as jnp
from jax.experimental import pallas as pl
from jax.experimental.pallas import tpu as pltpu

# ----------------------------- config ---------------------------------------
HIDDEN = 64
NUM_HEADS = 4
HEAD_DIM = HIDDEN // NUM_HEADS
MLP_DIM = 4 * HIDDEN
PATCH = 16
IMG_RES = 32
VIT_DEPTH = 2
BERT_LAYERS = 4
FUSION_LAYER = 2            # layers >= this have cross-attention
VOCAB = 32
MAX_POS = 16
TEXT_LEN = 8
TEXT_BATCH = 2
IMG_BATCH = 2 * TEXT_BATCH  # NLVR: two images per text example

_ATTN_KEYS = ("q_w", "q_b", "k_w", "k_b", "v_w", "v_b", "o_w", "o_b", "ln_g", "ln_b")


def _as2d(a):
    return a.reshape(1, -1) if a.ndim == 1 else a


# ----------------------- in-kernel math helpers ------------------------------
def _mm(a, b, trans_b=False):
    """bf16 MXU matmul with f32 accumulation."""
    a16 = a.astype(jnp.bfloat16)
    b16 = b.astype(jnp.bfloat16)
    dims = (((1,), (1 if trans_b else 0,)), ((), ()))
    return jax.lax.dot_general(a16, b16, dims, preferred_element_type=jnp.float32)


def _ln_f32(x, g, b, eps):
    mean = jnp.mean(x, axis=-1, keepdims=True)
    var = jnp.mean((x - mean) ** 2, axis=-1, keepdims=True)
    return (x - mean) * jax.lax.rsqrt(var + eps) * g + b


def _gelu(x):
    # TODO(synk): PyTorch BERT/ViT use exact erf-GELU; tanh approximation here.
    c = math.sqrt(2.0 / math.pi)
    return 0.5 * x * (1.0 + jnp.tanh(c * (x + 0.044715 * x * x * x)))


def _sdpa(q, k, v, add_mask):
    """Per-head scaled-dot-product attention on f32 (S, HIDDEN) activations.

    add_mask: optional (1, Sk) additive mask broadcast over queries/heads.
    """
    scale = HEAD_DIM ** -0.5
    ctx = []
    for h in range(NUM_HEADS):
        sl = slice(h * HEAD_DIM, (h + 1) * HEAD_DIM)
        s = _mm(q[:, sl], k[:, sl], trans_b=True) * scale          # (Sq, Sk)
        if add_mask is not None:
            s = s + add_mask
        s = s - jnp.max(s, axis=-1, keepdims=True)
        p = jnp.exp(s)
        p = p * pl.reciprocal(jnp.sum(p, axis=-1, keepdims=True), approx=True)
        ctx.append(_mm(p, v[:, sl]))                               # (Sq, Dh)
    return jnp.concatenate(ctx, axis=-1)                           # (Sq, HIDDEN)


def _bert_attention(x_q, x_kv, add_mask, prm):
    """BERT-style attention block: projections, SDPA, out-proj, residual + LN."""
    q_w, q_b, k_w, k_b, v_w, v_b, o_w, o_b, ln_g, ln_b = prm
    q = _mm(x_q, q_w[...]) + q_b[...]
    k = _mm(x_kv, k_w[...]) + k_b[...]
    v = _mm(x_kv, v_w[...]) + v_b[...]
    ctx = _sdpa(q, k, v, add_mask)
    out = _mm(ctx, o_w[...]) + o_b[...]
    return _ln_f32(out + x_q, ln_g[...], ln_b[...], 1e-12)


# ----------------------------- Pallas kernels --------------------------------
def _vit_block_kernel(x_ref, ln1_g, ln1_b, q_w, q_b, k_w, k_b, v_w, v_b,
                      proj_w, proj_b, ln2_g, ln2_b, fc1_w, fc1_b, fc2_w, fc2_b,
                      o_ref):
    """One pre-LN ViT block for a single image (grid iterates over batch)."""
    x = x_ref[0].astype(jnp.float32)                               # (S, D)
    h = _ln_f32(x, ln1_g[...], ln1_b[...], 1e-6)
    q = _mm(h, q_w[...]) + q_b[...]
    k = _mm(h, k_w[...]) + k_b[...]
    v = _mm(h, v_w[...]) + v_b[...]
    ctx = _sdpa(q, k, v, None)                                     # no mask in ViT
    x = x + _mm(ctx, proj_w[...]) + proj_b[...]
    h = _ln_f32(x, ln2_g[...], ln2_b[...], 1e-6)
    h = _gelu(_mm(h, fc1_w[...]) + fc1_b[...])
    x = x + _mm(h, fc2_w[...]) + fc2_b[...]
    o_ref[0] = x.astype(o_ref.dtype)


def _bert_layer_kernel(*refs, has_cross):
    """One full BERT layer (self-attn [+ cross-attn] + FFN) for one example."""
    refs = list(refs)
    x_ref = refs.pop(0)
    mask_ref = refs.pop(0)
    img_ref = refs.pop(0) if has_cross else None
    self_p = [refs.pop(0) for _ in range(10)]
    cross_p = [refs.pop(0) for _ in range(10)] if has_cross else None
    f1_w, f1_b, f2_w, f2_b, oln_g, oln_b = [refs.pop(0) for _ in range(6)]
    (o_ref,) = refs

    x = x_ref[0].astype(jnp.float32)                               # (S, D)
    add_mask = mask_ref[0].astype(jnp.float32)                     # (1, S)
    x = _bert_attention(x, x, add_mask, self_p)
    if has_cross:
        # image_atts is all-ones -> additive mask is identically zero -> skipped.
        img = img_ref[0].astype(jnp.float32)                       # (S_img, D)
        x = _bert_attention(x, img, None, cross_p)
    h = _gelu(_mm(x, f1_w[...]) + f1_b[...])
    h = _mm(h, f2_w[...]) + f2_b[...]
    x = _ln_f32(x + h, oln_g[...], oln_b[...], 1e-12)
    o_ref[0] = x.astype(o_ref.dtype)


def _linear_kernel(x_ref, w_ref, b_ref, o_ref, *, activation):
    y = _mm(x_ref[...].astype(jnp.float32), w_ref[...]) + b_ref[...]
    if activation == "relu":
        y = jnp.maximum(y, 0.0)
    elif activation == "gelu":
        y = _gelu(y)
    o_ref[...] = y.astype(o_ref.dtype)


def _layernorm_kernel(x_ref, g_ref, b_ref, o_ref, *, eps):
    x = x_ref[...].astype(jnp.float32)
    o_ref[...] = _ln_f32(x, g_ref[...], b_ref[...], eps).astype(o_ref.dtype)


def _cls_head_kernel(x_ref, w1_ref, b1_ref, w2_ref, b2_ref, onehot_ref,
                     pred_ref, loss_ref):
    """Linear -> ReLU -> Linear(2) -> cross-entropy, fused."""
    x = x_ref[...].astype(jnp.float32)                             # (B, D)
    h = jnp.maximum(_mm(x, w1_ref[...]) + b1_ref[...], 0.0)
    logits = _mm(h, w2_ref[...]) + b2_ref[...]                     # (B, 2)
    pred_ref[...] = logits.astype(pred_ref.dtype)
    m = jnp.max(logits, axis=-1, keepdims=True)
    lse = m + jnp.log(jnp.sum(jnp.exp(logits - m), axis=-1, keepdims=True))
    nll = lse - jnp.sum(logits * onehot_ref[...], axis=-1, keepdims=True)  # (B,1)
    loss_ref[...] = jnp.sum(nll, axis=0, keepdims=True) * (1.0 / x.shape[0])


# ----------------------------- kernel wrappers --------------------------------
_ARB = pltpu.CompilerParams(dimension_semantics=("arbitrary",))
_PAR = pltpu.CompilerParams(dimension_semantics=("parallel",))


def linear(x, w, b, activation="none"):
    M, K = x.shape
    _, N = w.shape
    return pl.pallas_call(
        partial(_linear_kernel, activation=activation),
        out_shape=jax.ShapeDtypeStruct((M, N), jnp.float32),
        grid=(1,),
        in_specs=[pl.BlockSpec((M, K), lambda i: (0, 0)),
                  pl.BlockSpec((K, N), lambda i: (0, 0)),
                  pl.BlockSpec((1, N), lambda i: (0, 0))],
        out_specs=pl.BlockSpec((M, N), lambda i: (0, 0)),
        compiler_params=_ARB,
    )(x, w, b.reshape(1, N))


def layernorm(x, g, b, eps):
    M, D = x.shape
    return pl.pallas_call(
        partial(_layernorm_kernel, eps=eps),
        out_shape=jax.ShapeDtypeStruct((M, D), jnp.float32),
        grid=(1,),
        in_specs=[pl.BlockSpec((M, D), lambda i: (0, 0)),
                  pl.BlockSpec((1, D), lambda i: (0, 0)),
                  pl.BlockSpec((1, D), lambda i: (0, 0))],
        out_specs=pl.BlockSpec((M, D), lambda i: (0, 0)),
        compiler_params=_ARB,
    )(x, g.reshape(1, D), b.reshape(1, D))


def vit_block(p, x):
    B, S, D = x.shape
    # Split the fused qkv weight outside the kernel (static slices) so in-kernel
    # matmuls stay lane-dense.
    q_w = p["qkv_w"][:, :HIDDEN]
    k_w = p["qkv_w"][:, HIDDEN:2 * HIDDEN]
    v_w = p["qkv_w"][:, 2 * HIDDEN:]
    q_b = p["qkv_b"][:HIDDEN]
    k_b = p["qkv_b"][HIDDEN:2 * HIDDEN]
    v_b = p["qkv_b"][2 * HIDDEN:]
    weights = [p["ln1_g"], p["ln1_b"], q_w, q_b, k_w, k_b, v_w, v_b,
               p["proj_w"], p["proj_b"], p["ln2_g"], p["ln2_b"],
               p["fc1_w"], p["fc1_b"], p["fc2_w"], p["fc2_b"]]
    weights = [_as2d(a) for a in weights]
    in_specs = ([pl.BlockSpec((1, S, D), lambda b: (b, 0, 0))] +
                [pl.BlockSpec(a.shape, lambda b: (0, 0)) for a in weights])
    return pl.pallas_call(
        _vit_block_kernel,
        out_shape=jax.ShapeDtypeStruct((B, S, D), jnp.float32),
        grid=(B,),
        in_specs=in_specs,
        out_specs=pl.BlockSpec((1, S, D), lambda b: (b, 0, 0)),
        compiler_params=_PAR,
    )(x, *weights)


def bert_layer_call(p, x, add_mask, img):
    B, S, D = x.shape
    has_cross = img is not None

    inputs = [x, add_mask]
    in_specs = [pl.BlockSpec((1, S, D), lambda b: (b, 0, 0)),
                pl.BlockSpec((1, 1, S), lambda b: (b, 0, 0))]
    if has_cross:
        S_img = img.shape[1]
        inputs.append(img)
        in_specs.append(pl.BlockSpec((1, S_img, D), lambda b: (b, 0, 0)))

    def add_params(arrs):
        for a in arrs:
            a = _as2d(a)
            inputs.append(a)
            in_specs.append(pl.BlockSpec(a.shape, lambda b: (0, 0)))

    add_params([p["self"][k] for k in _ATTN_KEYS])
    if has_cross:
        add_params([p["cross"][k] for k in _ATTN_KEYS])
    add_params([p["ffn_w1"], p["ffn_b1"], p["ffn_w2"], p["ffn_b2"],
                p["out_ln_g"], p["out_ln_b"]])

    return pl.pallas_call(
        partial(_bert_layer_kernel, has_cross=has_cross),
        out_shape=jax.ShapeDtypeStruct((B, S, D), jnp.float32),
        grid=(B,),
        in_specs=in_specs,
        out_specs=pl.BlockSpec((1, S, D), lambda b: (b, 0, 0)),
        compiler_params=_PAR,
    )(*inputs)


def cls_head_and_loss(params, x, onehot):
    B, D = x.shape
    return pl.pallas_call(
        _cls_head_kernel,
        out_shape=(jax.ShapeDtypeStruct((B, 2), jnp.float32),
                   jax.ShapeDtypeStruct((1, 1), jnp.float32)),
        grid=(1,),
        in_specs=[pl.BlockSpec((B, D), lambda i: (0, 0)),
                  pl.BlockSpec((D, D), lambda i: (0, 0)),
                  pl.BlockSpec((1, D), lambda i: (0, 0)),
                  pl.BlockSpec((D, 2), lambda i: (0, 0)),
                  pl.BlockSpec((1, 2), lambda i: (0, 0)),
                  pl.BlockSpec((B, 2), lambda i: (0, 0))],
        out_specs=(pl.BlockSpec((B, 2), lambda i: (0, 0)),
                   pl.BlockSpec((1, 1), lambda i: (0, 0))),
        compiler_params=_ARB,
    )(x, params["cls_w1"], params["cls_b1"].reshape(1, -1),
      params["cls_w2"], params["cls_b2"].reshape(1, -1), onehot)


# ----------------------------- model glue (plain JAX) -------------------------
def vit_forward(p, image):
    # image: NCHW.  Patch-embed Conv2d(stride=patch) == patch extraction + matmul.
    B, C, H, W = image.shape
    nh, nw = H // PATCH, W // PATCH
    patches = image.reshape(B, C, nh, PATCH, nw, PATCH)
    patches = patches.transpose(0, 2, 4, 1, 3, 5).reshape(B * nh * nw, C * PATCH * PATCH)
    x = linear(patches, p["patch_w"], p["patch_b"]).reshape(B, nh * nw, HIDDEN)
    cls = jnp.broadcast_to(p["cls_token"], (B, 1, HIDDEN))
    x = jnp.concatenate([cls, x], axis=1)
    x = x + p["pos_embed"]
    for blk in p["blocks"]:
        x = vit_block(blk, x)
    B2, S, D = x.shape
    x = layernorm(x.reshape(B2 * S, D), p["norm_g"], p["norm_b"], 1e-6)
    return x.reshape(B2, S, D)


def bert_forward(p, input_ids, attention_mask, image0, image1):
    B, S = input_ids.shape
    word = jnp.take(p["word_emb"], input_ids, axis=0)              # embedding gather (glue)
    pos = p["pos_emb"][:S][None]
    typ = p["type_emb"][0][None, None]
    emb = word + pos + typ
    x = layernorm(emb.reshape(B * S, HIDDEN), p["emb_ln_g"], p["emb_ln_b"], 1e-12)
    x = x.reshape(B, S, HIDDEN)

    # Compact additive self-attention mask: (B, 1, S), broadcast inside the kernel.
    add_mask = ((1.0 - attention_mask.astype(jnp.float32)) * -10000.0)[:, None, :]

    for li, layer in enumerate(p["layers"]):
        if li >= FUSION_LAYER:
            # NLVR BertLayer: encoder_hidden_states[(layer - fusion_layer) % 2]
            img = image0 if (li - FUSION_LAYER) % 2 == 0 else image1
        else:
            img = None
        x = bert_layer_call(layer, x, add_mask, img)
    return x


def albef_forward(params, image, input_ids, attention_mask, targets, train=True):
    image_embeds = vit_forward(params["vit"], image)               # (2B, 1+npatch, H)
    nb = targets.shape[0]
    image0, image1 = image_embeds[:nb], image_embeds[nb:]
    last_hidden = bert_forward(params["bert"], input_ids, attention_mask, image0, image1)
    cls = last_hidden[:, 0, :]
    onehot = jax.nn.one_hot(targets, 2, dtype=jnp.float32)
    prediction, loss = cls_head_and_loss(params, cls, onehot)
    # TODO(synk): distillation branch (momentum encoders, KL term) not implemented
    #             (distill=False in this synthetic config).
    if train:
        # distill=False branch: loss = F.cross_entropy(prediction, targets)
        return loss[0, 0]
    return prediction


# ----------------------------- parameter init --------------------------------
class KeyGen:
    def __init__(self, key):
        self.key = key

    def __call__(self):
        self.key, sub = jax.random.split(self.key)
        return sub


def _dense(kg, fan_in, fan_out):
    w = jax.random.normal(kg(), (fan_in, fan_out), jnp.float32) * 0.02
    b = jnp.zeros((fan_out,), jnp.float32)
    return w, b


def _ln_params():
    return jnp.ones((HIDDEN,), jnp.float32), jnp.zeros((HIDDEN,), jnp.float32)


def _attn_params(kg):
    q_w, q_b = _dense(kg, HIDDEN, HIDDEN)
    k_w, k_b = _dense(kg, HIDDEN, HIDDEN)
    v_w, v_b = _dense(kg, HIDDEN, HIDDEN)
    o_w, o_b = _dense(kg, HIDDEN, HIDDEN)
    ln_g, ln_b = _ln_params()
    return dict(q_w=q_w, q_b=q_b, k_w=k_w, k_b=k_b, v_w=v_w, v_b=v_b,
                o_w=o_w, o_b=o_b, ln_g=ln_g, ln_b=ln_b)


def init_params(seed=0):
    kg = KeyGen(jax.random.PRNGKey(seed))
    # --- ViT ---
    patch_w, patch_b = _dense(kg, 3 * PATCH * PATCH, HIDDEN)
    n_tok = (IMG_RES // PATCH) ** 2 + 1
    vit = dict(
        patch_w=patch_w, patch_b=patch_b,
        cls_token=jax.random.normal(kg(), (1, 1, HIDDEN), jnp.float32) * 0.02,
        pos_embed=jax.random.normal(kg(), (1, n_tok, HIDDEN), jnp.float32) * 0.02,
        blocks=[], norm_g=jnp.ones((HIDDEN,), jnp.float32),
        norm_b=jnp.zeros((HIDDEN,), jnp.float32),
    )
    for _ in range(VIT_DEPTH):
        qkv_w, qkv_b = _dense(kg, HIDDEN, 3 * HIDDEN)
        proj_w, proj_b = _dense(kg, HIDDEN, HIDDEN)
        fc1_w, fc1_b = _dense(kg, HIDDEN, MLP_DIM)
        fc2_w, fc2_b = _dense(kg, MLP_DIM, HIDDEN)
        ln1_g, ln1_b = _ln_params()
        ln2_g, ln2_b = _ln_params()
        vit["blocks"].append(dict(
            ln1_g=ln1_g, ln1_b=ln1_b, qkv_w=qkv_w, qkv_b=qkv_b,
            proj_w=proj_w, proj_b=proj_b, ln2_g=ln2_g, ln2_b=ln2_b,
            fc1_w=fc1_w, fc1_b=fc1_b, fc2_w=fc2_w, fc2_b=fc2_b))

    # --- BERT ---
    emb_ln_g, emb_ln_b = _ln_params()
    bert = dict(
        word_emb=jax.random.normal(kg(), (VOCAB, HIDDEN), jnp.float32) * 0.02,
        pos_emb=jax.random.normal(kg(), (MAX_POS, HIDDEN), jnp.float32) * 0.02,
        type_emb=jax.random.normal(kg(), (2, HIDDEN), jnp.float32) * 0.02,
        emb_ln_g=emb_ln_g, emb_ln_b=emb_ln_b, layers=[],
    )
    for li in range(BERT_LAYERS):
        ffn_w1, ffn_b1 = _dense(kg, HIDDEN, MLP_DIM)
        ffn_w2, ffn_b2 = _dense(kg, MLP_DIM, HIDDEN)
        out_ln_g, out_ln_b = _ln_params()
        layer = dict(self=_attn_params(kg), ffn_w1=ffn_w1, ffn_b1=ffn_b1,
                     ffn_w2=ffn_w2, ffn_b2=ffn_b2,
                     out_ln_g=out_ln_g, out_ln_b=out_ln_b)
        if li >= FUSION_LAYER:
            layer["cross"] = _attn_params(kg)
        bert["layers"].append(layer)
    # share_cross_attention: K/V weights tied across consecutive fusion-layer pairs
    for li in range(FUSION_LAYER, BERT_LAYERS - 1, 2):
        src = bert["layers"][li + 1]["cross"]
        dst = bert["layers"][li]["cross"]
        for name in ("k_w", "k_b", "v_w", "v_b"):
            dst[name] = src[name]

    # --- cls head ---
    cls_w1, cls_b1 = _dense(kg, HIDDEN, HIDDEN)
    cls_w2, cls_b2 = _dense(kg, HIDDEN, 2)
    return dict(vit=vit, bert=bert, cls_w1=cls_w1, cls_b1=cls_b1,
                cls_w2=cls_w2, cls_b2=cls_b2)


# ----------------------------- main -------------------------------------------
if __name__ == "__main__":
    params = init_params(0)
    key = jax.random.PRNGKey(0)
    k_img, k_txt = jax.random.split(key)
    image = jax.random.normal(k_img, (IMG_BATCH, 3, IMG_RES, IMG_RES), jnp.float32)
    input_ids = jax.random.randint(k_txt, (TEXT_BATCH, TEXT_LEN), 0, VOCAB, jnp.int32)
    attention_mask = jnp.ones((TEXT_BATCH, TEXT_LEN), jnp.int32)
    targets = jnp.array([0, 1], jnp.int32)

    loss_fn = jax.jit(lambda p, im, ids, am, tg: albef_forward(p, im, ids, am, tg, train=True))
    pred_fn = jax.jit(lambda p, im, ids, am, tg: albef_forward(p, im, ids, am, tg, train=False))

    loss = loss_fn(params, image, input_ids, attention_mask, targets)
    pred = pred_fn(params, image, input_ids, attention_mask, targets)
    jax.block_until_ready((loss, pred))
    print("KERNEL_OK")
</pallas_src>

<mosaic_0001>
module attributes {stable_mosaic.version = 11 : i64} {
  func.func @_bert_layer_kernel(%arg0: i32, %arg1: memref<1x8x64xf32, #tpu.memory_space<vmem>>, %arg2: memref<1x1x8xf32, #tpu.memory_space<vmem>>, %arg3: memref<64x64xf32, #tpu.memory_space<vmem>>, %arg4: memref<1x64xf32, #tpu.memory_space<vmem>>, %arg5: memref<64x64xf32, #tpu.memory_space<vmem>>, %arg6: memref<1x64xf32, #tpu.memory_space<vmem>>, %arg7: memref<64x64xf32, #tpu.memory_space<vmem>>, %arg8: memref<1x64xf32, #tpu.memory_space<vmem>>, %arg9: memref<64x64xf32, #tpu.memory_space<vmem>>, %arg10: memref<1x64xf32, #tpu.memory_space<vmem>>, %arg11: memref<1x64xf32, #tpu.memory_space<vmem>>, %arg12: memref<1x64xf32, #tpu.memory_space<vmem>>, %arg13: memref<64x256xf32, #tpu.memory_space<vmem>>, %arg14: memref<1x256xf32, #tpu.memory_space<vmem>>, %arg15: memref<256x64xf32, #tpu.memory_space<vmem>>, %arg16: memref<1x64xf32, #tpu.memory_space<vmem>>, %arg17: memref<1x64xf32, #tpu.memory_space<vmem>>, %arg18: memref<1x64xf32, #tpu.memory_space<vmem>>, %arg19: memref<1x8x64xf32, #tpu.memory_space<vmem>>) attributes {dimension_semantics = [#tpu.dimension_semantics<parallel>], iteration_bounds = array<i64: 2>, scalar_prefetch = 0 : i64, scratch_operands = 0 : i64, tpu.core_type = #tpu.core_type<tc>, window_params = [{transform_indices = @transform_0, window_bounds = array<i64: 1, 8, 64>}, {transform_indices = @transform_1, window_bounds = array<i64: 1, 1, 8>}, {pipeline_mode = #tpu.pipeline_mode<synchronous>, transform_indices = @transform_2, window_bounds = array<i64: 64, 64>}, {pipeline_mode = #tpu.pipeline_mode<synchronous>, transform_indices = @transform_3, window_bounds = array<i64: 1, 64>}, {pipeline_mode = #tpu.pipeline_mode<synchronous>, transform_indices = @transform_4, window_bounds = array<i64: 64, 64>}, {pipeline_mode = #tpu.pipeline_mode<synchronous>, transform_indices = @transform_5, window_bounds = array<i64: 1, 64>}, {pipeline_mode = #tpu.pipeline_mode<synchronous>, transform_indices = @transform_6, window_bounds = array<i64: 64, 64>}, {pipeline_mode = #tpu.pipeline_mode<synchronous>, transform_indices = @transform_7, window_bounds = array<i64: 1, 64>}, {pipeline_mode = #tpu.pipeline_mode<synchronous>, transform_indices = @transform_8, window_bounds = array<i64: 64, 64>}, {pipeline_mode = #tpu.pipeline_mode<synchronous>, transform_indices = @transform_9, window_bounds = array<i64: 1, 64>}, {pipeline_mode = #tpu.pipeline_mode<synchronous>, transform_indices = @transform_10, window_bounds = array<i64: 1, 64>}, {pipeline_mode = #tpu.pipeline_mode<synchronous>, transform_indices = @transform_11, window_bounds = array<i64: 1, 64>}, {pipeline_mode = #tpu.pipeline_mode<synchronous>, transform_indices = @transform_12, window_bounds = array<i64: 64, 256>}, {pipeline_mode = #tpu.pipeline_mode<synchronous>, transform_indices = @transform_13, window_bounds = array<i64: 1, 256>}, {pipeline_mode = #tpu.pipeline_mode<synchronous>, transform_indices = @transform_14, window_bounds = array<i64: 256, 64>}, {pipeline_mode = #tpu.pipeline_mode<synchronous>, transform_indices = @transform_15, window_bounds = array<i64: 1, 64>}, {pipeline_mode = #tpu.pipeline_mode<synchronous>, transform_indices = @transform_16, window_bounds = array<i64: 1, 64>}, {pipeline_mode = #tpu.pipeline_mode<synchronous>, transform_indices = @transform_17, window_bounds = array<i64: 1, 64>}, {transform_indices = @transform_18, window_bounds = array<i64: 1, 8, 64>}]} {
    %c0 = arith.constant 0 : index
    %c0_0 = arith.constant 0 : index
    %c0_1 = arith.constant 0 : index
    %0 = vector.load %arg1[%c0, %c0_0, %c0_1] : memref<1x8x64xf32, #tpu.memory_space<vmem>>, vector<1x8x64xf32>
    %1 = vector.shape_cast %0 : vector<1x8x64xf32> to vector<8x64xf32>
    %c0_2 = arith.constant 0 : index
    %c0_3 = arith.constant 0 : index
    %c0_4 = arith.constant 0 : index
    %2 = vector.load %arg2[%c0_2, %c0_3, %c0_4] : memref<1x1x8xf32, #tpu.memory_space<vmem>>, vector<1x1x8xf32>
    %3 = vector.shape_cast %2 : vector<1x1x8xf32> to vector<1x8xf32>
    %c0_5 = arith.constant 0 : index
    %c0_6 = arith.constant 0 : index
    %4 = vector.load %arg3[%c0_5, %c0_6] : memref<64x64xf32, #tpu.memory_space<vmem>>, vector<64x64xf32>
    %5 = arith.truncf %1 : vector<8x64xf32> to vector<8x64xbf16>
    %6 = arith.truncf %4 : vector<64x64xf32> to vector<64x64xbf16>
    %cst = arith.constant dense<0.000000e+00> : vector<8x64xf32>
    %7 = tpu.matmul %5, %6, %cst {dimension_numbers = #tpu.dot_dimension_numbers<[1], [0], [0], [1], [0, 0, 1, 1], [], []>} : vector<8x64xbf16>, vector<64x64xbf16>, vector<8x64xf32> -> vector<8x64xf32>
    %c0_7 = arith.constant 0 : index
    %c0_8 = arith.constant 0 : index
    %8 = vector.load %arg4[%c0_7, %c0_8] : memref<1x64xf32, #tpu.memory_space<vmem>>, vector<1x64xf32>
    %9 = vector.broadcast %8 : vector<1x64xf32> to vector<8x64xf32>
    %10 = arith.addf %7, %9 : vector<8x64xf32>
    %c0_9 = arith.constant 0 : index
    %c0_10 = arith.constant 0 : index
    %11 = vector.load %arg5[%c0_9, %c0_10] : memref<64x64xf32, #tpu.memory_space<vmem>>, vector<64x64xf32>
    %12 = arith.truncf %1 : vector<8x64xf32> to vector<8x64xbf16>
    %13 = arith.truncf %11 : vector<64x64xf32> to vector<64x64xbf16>
    %cst_11 = arith.constant dense<0.000000e+00> : vector<8x64xf32>
    %14 = tpu.matmul %12, %13, %cst_11 {dimension_numbers = #tpu.dot_dimension_numbers<[1], [0], [0], [1], [0, 0, 1, 1], [], []>} : vector<8x64xbf16>, vector<64x64xbf16>, vector<8x64xf32> -> vector<8x64xf32>
    %c0_12 = arith.constant 0 : index
    %c0_13 = arith.constant 0 : index
    %15 = vector.load %arg6[%c0_12, %c0_13] : memref<1x64xf32, #tpu.memory_space<vmem>>, vector<1x64xf32>
    %16 = vector.broadcast %15 : vector<1x64xf32> to vector<8x64xf32>
    %17 = arith.addf %14, %16 : vector<8x64xf32>
    %c0_14 = arith.constant 0 : index
    %c0_15 = arith.constant 0 : index
    %18 = vector.load %arg7[%c0_14, %c0_15] : memref<64x64xf32, #tpu.memory_space<vmem>>, vector<64x64xf32>
    %19 = arith.truncf %1 : vector<8x64xf32> to vector<8x64xbf16>
    %20 = arith.truncf %18 : vector<64x64xf32> to vector<64x64xbf16>
    %cst_16 = arith.constant dense<0.000000e+00> : vector<8x64xf32>
    %21 = tpu.matmul %19, %20, %cst_16 {dimension_numbers = #tpu.dot_dimension_numbers<[1], [0], [0], [1], [0, 0, 1, 1], [], []>} : vector<8x64xbf16>, vector<64x64xbf16>, vector<8x64xf32> -> vector<8x64xf32>
    %c0_17 = arith.constant 0 : index
    %c0_18 = arith.constant 0 : index
    %22 = vector.load %arg8[%c0_17, %c0_18] : memref<1x64xf32, #tpu.memory_space<vmem>>, vector<1x64xf32>
    %23 = vector.broadcast %22 : vector<1x64xf32> to vector<8x64xf32>
    %24 = arith.addf %21, %23 : vector<8x64xf32>
    %25 = vector.extract_strided_slice %10 {offsets = [0, 0], sizes = [8, 16], strides = [1, 1]} : vector<8x64xf32> to vector<8x16xf32>
    %26 = vector.extract_strided_slice %17 {offsets = [0, 0], sizes = [8, 16], strides = [1, 1]} : vector<8x64xf32> to vector<8x16xf32>
    %27 = arith.truncf %25 : vector<8x16xf32> to vector<8x16xbf16>
    %28 = arith.truncf %26 : vector<8x16xf32> to vector<8x16xbf16>
    %cst_19 = arith.constant dense<0.000000e+00> : vector<8x8xf32>
    %29 = tpu.matmul %27, %28, %cst_19 {dimension_numbers = #tpu.dot_dimension_numbers<[1], [1], [0], [0], [0, 0, 1, 0], [], []>} : vector<8x16xbf16>, vector<8x16xbf16>, vector<8x8xf32> -> vector<8x8xf32>
    %cst_20 = arith.constant 2.500000e-01 : f32
    %30 = vector.broadcast %cst_20 : f32 to vector<8x8xf32>
    %31 = arith.mulf %29, %30 : vector<8x8xf32>
    %32 = vector.broadcast %3 : vector<1x8xf32> to vector<8x8xf32>
    %33 = arith.addf %31, %32 : vector<8x8xf32>
    %cst_21 = arith.constant dense<0xFF800000> : vector<8xf32>
    %34 = vector.multi_reduction <maximumf>, %33, %cst_21 [1] : vector<8x8xf32> to vector<8xf32>
    %35 = vector.shape_cast %34 : vector<8xf32> to vector<8x1xf32>
    %36 = vector.broadcast %35 : vector<8x1xf32> to vector<8x8xf32>
    %37 = arith.subf %33, %36 : vector<8x8xf32>
    %38 = math.exp %37 : vector<8x8xf32>
    %cst_22 = arith.constant dense<0.000000e+00> : vector<8xf32>
    %39 = vector.multi_reduction <add>, %38, %cst_22 [1] : vector<8x8xf32> to vector<8xf32>
    %40 = vector.shape_cast %39 : vector<8xf32> to vector<8x1xf32>
    %41 = tpu.reciprocal %40 {approx = true} : vector<8x1xf32> -> vector<8x1xf32>
    %42 = vector.broadcast %41 : vector<8x1xf32> to vector<8x8xf32>
    %43 = arith.mulf %38, %42 : vector<8x8xf32>
    %44 = vector.extract_strided_slice %24 {offsets = [0, 0], sizes = [8, 16], strides = [1, 1]} : vector<8x64xf32> to vector<8x16xf32>
    %45 = arith.truncf %43 : vector<8x8xf32> to vector<8x8xbf16>
    %46 = arith.truncf %44 : vector<8x16xf32> to vector<8x16xbf16>
    %cst_23 = arith.constant dense<0.000000e+00> : vector<8x16xf32>
    %47 = tpu.matmul %45, %46, %cst_23 {dimension_numbers = #tpu.dot_dimension_numbers<[1], [0], [0], [1], [0, 0, 1, 1], [], []>} : vector<8x8xbf16>, vector<8x16xbf16>, vector<8x16xf32> -> vector<8x16xf32>
    %48 = vector.extract_strided_slice %10 {offsets = [0, 16], sizes = [8, 16], strides = [1, 1]} : vector<8x64xf32> to vector<8x16xf32>
    %49 = vector.extract_strided_slice %17 {offsets = [0, 16], sizes = [8, 16], strides = [1, 1]} : vector<8x64xf32> to vector<8x16xf32>
    %50 = arith.truncf %48 : vector<8x16xf32> to vector<8x16xbf16>
    %51 = arith.truncf %49 : vector<8x16xf32> to vector<8x16xbf16>
    %cst_24 = arith.constant dense<0.000000e+00> : vector<8x8xf32>
    %52 = tpu.matmul %50, %51, %cst_24 {dimension_numbers = #tpu.dot_dimension_numbers<[1], [1], [0], [0], [0, 0, 1, 0], [], []>} : vector<8x16xbf16>, vector<8x16xbf16>, vector<8x8xf32> -> vector<8x8xf32>
    %cst_25 = arith.constant 2.500000e-01 : f32
    %53 = vector.broadcast %cst_25 : f32 to vector<8x8xf32>
    %54 = arith.mulf %52, %53 : vector<8x8xf32>
    %55 = vector.broadcast %3 : vector<1x8xf32> to vector<8x8xf32>
    %56 = arith.addf %54, %55 : vector<8x8xf32>
    %cst_26 = arith.constant dense<0xFF800000> : vector<8xf32>
    %57 = vector.multi_reduction <maximumf>, %56, %cst_26 [1] : vector<8x8xf32> to vector<8xf32>
    %58 = vector.shape_cast %57 : vector<8xf32> to vector<8x1xf32>
    %59 = vector.broadcast %58 : vector<8x1xf32> to vector<8x8xf32>
    %60 = arith.subf %56, %59 : vector<8x8xf32>
    %61 = math.exp %60 : vector<8x8xf32>
    %cst_27 = arith.constant dense<0.000000e+00> : vector<8xf32>
    %62 = vector.multi_reduction <add>, %61, %cst_27 [1] : vector<8x8xf32> to vector<8xf32>
    %63 = vector.shape_cast %62 : vector<8xf32> to vector<8x1xf32>
    %64 = tpu.reciprocal %63 {approx = true} : vector<8x1xf32> -> vector<8x1xf32>
    %65 = vector.broadcast %64 : vector<8x1xf32> to vector<8x8xf32>
    %66 = arith.mulf %61, %65 : vector<8x8xf32>
    %67 = vector.extract_strided_slice %24 {offsets = [0, 16], sizes = [8, 16], strides = [1, 1]} : vector<8x64xf32> to vector<8x16xf32>
    %68 = arith.truncf %66 : vector<8x8xf32> to vector<8x8xbf16>
    %69 = arith.truncf %67 : vector<8x16xf32> to vector<8x16xbf16>
    %cst_28 = arith.constant dense<0.000000e+00> : vector<8x16xf32>
    %70 = tpu.matmul %68, %69, %cst_28 {dimension_numbers = #tpu.dot_dimension_numbers<[1], [0], [0], [1], [0, 0, 1, 1], [], []>} : vector<8x8xbf16>, vector<8x16xbf16>, vector<8x16xf32> -> vector<8x16xf32>
    %71 = vector.extract_strided_slice %10 {offsets = [0, 32], sizes = [8, 16], strides = [1, 1]} : vector<8x64xf32> to vector<8x16xf32>
    %72 = vector.extract_strided_slice %17 {offsets = [0, 32], sizes = [8, 16], strides = [1, 1]} : vector<8x64xf32> to vector<8x16xf32>
    %73 = arith.truncf %71 : vector<8x16xf32> to vector<8x16xbf16>
    %74 = arith.truncf %72 : vector<8x16xf32> to vector<8x16xbf16>
    %cst_29 = arith.constant dense<0.000000e+00> : vector<8x8xf32>
    %75 = tpu.matmul %73, %74, %cst_29 {dimension_numbers = #tpu.dot_dimension_numbers<[1], [1], [0], [0], [0, 0, 1, 0], [], []>} : vector<8x16xbf16>, vector<8x16xbf16>, vector<8x8xf32> -> vector<8x8xf32>
    %cst_30 = arith.constant 2.500000e-01 : f32
    %76 = vector.broadcast %cst_30 : f32 to vector<8x8xf32>
    %77 = arith.mulf %75, %76 : vector<8x8xf32>
    %78 = vector.broadcast %3 : vector<1x8xf32> to vector<8x8xf32>
    %79 = arith.addf %77, %78 : vector<8x8xf32>
    %cst_31 = arith.constant dense<0xFF800000> : vector<8xf32>
    %80 = vector.multi_reduction <maximumf>, %79, %cst_31 [1] : vector<8x8xf32> to vector<8xf32>
    %81 = vector.shape_cast %80 : vector<8xf32> to vector<8x1xf32>
    %82 = vector.broadcast %81 : vector<8x1xf32> to vector<8x8xf32>
    %83 = arith.subf %79, %82 : vector<8x8xf32>
    %84 = math.exp %83 : vector<8x8xf32>
    %cst_32 = arith.constant dense<0.000000e+00> : vector<8xf32>
    %85 = vector.multi_reduction <add>, %84, %cst_32 [1] : vector<8x8xf32> to vector<8xf32>
    %86 = vector.shape_cast %85 : vector<8xf32> to vector<8x1xf32>
    %87 = tpu.reciprocal %86 {approx = true} : vector<8x1xf32> -> vector<8x1xf32>
    %88 = vector.broadcast %87 : vector<8x1xf32> to vector<8x8xf32>
    %89 = arith.mulf %84, %88 : vector<8x8xf32>
    %90 = vector.extract_strided_slice %24 {offsets = [0, 32], sizes = [8, 16], strides = [1, 1]} : vector<8x64xf32> to vector<8x16xf32>
    %91 = arith.truncf %89 : vector<8x8xf32> to vector<8x8xbf16>
    %92 = arith.truncf %90 : vector<8x16xf32> to vector<8x16xbf16>
    %cst_33 = arith.constant dense<0.000000e+00> : vector<8x16xf32>
    %93 = tpu.matmul %91, %92, %cst_33 {dimension_numbers = #tpu.dot_dimension_numbers<[1], [0], [0], [1], [0, 0, 1, 1], [], []>} : vector<8x8xbf16>, vector<8x16xbf16>, vector<8x16xf32> -> vector<8x16xf32>
    %94 = vector.extract_strided_slice %10 {offsets = [0, 48], sizes = [8, 16], strides = [1, 1]} : vector<8x64xf32> to vector<8x16xf32>
    %95 = vector.extract_strided_slice %17 {offsets = [0, 48], sizes = [8, 16], strides = [1, 1]} : vector<8x64xf32> to vector<8x16xf32>
    %96 = arith.truncf %94 : vector<8x16xf32> to vector<8x16xbf16>
    %97 = arith.truncf %95 : vector<8x16xf32> to vector<8x16xbf16>
    %cst_34 = arith.constant dense<0.000000e+00> : vector<8x8xf32>
    %98 = tpu.matmul %96, %97, %cst_34 {dimension_numbers = #tpu.dot_dimension_numbers<[1], [1], [0], [0], [0, 0, 1, 0], [], []>} : vector<8x16xbf16>, vector<8x16xbf16>, vector<8x8xf32> -> vector<8x8xf32>
    %cst_35 = arith.constant 2.500000e-01 : f32
    %99 = vector.broadcast %cst_35 : f32 to vector<8x8xf32>
    %100 = arith.mulf %98, %99 : vector<8x8xf32>
    %101 = vector.broadcast %3 : vector<1x8xf32> to vector<8x8xf32>
    %102 = arith.addf %100, %101 : vector<8x8xf32>
    %cst_36 = arith.constant dense<0xFF800000> : vector<8xf32>
    %103 = vector.multi_reduction <maximumf>, %102, %cst_36 [1] : vector<8x8xf32> to vector<8xf32>
    %104 = vector.shape_cast %103 : vector<8xf32> to vector<8x1xf32>
    %105 = vector.broadcast %104 : vector<8x1xf32> to vector<8x8xf32>
    %106 = arith.subf %102, %105 : vector<8x8xf32>
    %107 = math.exp %106 : vector<8x8xf32>
    %cst_37 = arith.constant dense<0.000000e+00> : vector<8xf32>
    %108 = vector.multi_reduction <add>, %107, %cst_37 [1] : vector<8x8xf32> to vector<8xf32>
    %109 = vector.shape_cast %108 : vector<8xf32> to vector<8x1xf32>
    %110 = tpu.reciprocal %109 {approx = true} : vector<8x1xf32> -> vector<8x1xf32>
    %111 = vector.broadcast %110 : vector<8x1xf32> to vector<8x8xf32>
    %112 = arith.mulf %107, %111 : vector<8x8xf32>
    %113 = vector.extract_strided_slice %24 {offsets = [0, 48], sizes = [8, 16], strides = [1, 1]} : vector<8x64xf32> to vector<8x16xf32>
    %114 = arith.truncf %112 : vector<8x8xf32> to vector<8x8xbf16>
    %115 = arith.truncf %113 : vector<8x16xf32> to vector<8x16xbf16>
    %cst_38 = arith.constant dense<0.000000e+00> : vector<8x16xf32>
    %116 = tpu.matmul %114, %115, %cst_38 {dimension_numbers = #tpu.dot_dimension_numbers<[1], [0], [0], [1], [0, 0, 1, 1], [], []>} : vector<8x8xbf16>, vector<8x16xbf16>, vector<8x16xf32> -> vector<8x16xf32>
    %117 = tpu.concatenate %47, %70, %93, %116 in 1 : vector<8x16xf32>, vector<8x16xf32>, vector<8x16xf32>, vector<8x16xf32> -> vector<8x64xf32>
    %c0_39 = arith.constant 0 : index
    %c0_40 = arith.constant 0 : index
    %118 = vector.load %arg9[%c0_39, %c0_40] : memref<64x64xf32, #tpu.memory_space<vmem>>, vector<64x64xf32>
    %119 = arith.truncf %117 : vector<8x64xf32> to vector<8x64xbf16>
    %120 = arith.truncf %118 : vector<64x64xf32> to vector<64x64xbf16>
    %cst_41 = arith.constant dense<0.000000e+00> : vector<8x64xf32>
    %121 = tpu.matmul %119, %120, %cst_41 {dimension_numbers = #tpu.dot_dimension_numbers<[1], [0], [0], [1], [0, 0, 1, 1], [], []>} : vector<8x64xbf16>, vector<64x64xbf16>, vector<8x64xf32> -> vector<8x64xf32>
    %c0_42 = arith.constant 0 : index
    %c0_43 = arith.constant 0 : index
    %122 = vector.load %arg10[%c0_42, %c0_43] : memref<1x64xf32, #tpu.memory_space<vmem>>, vector<1x64xf32>
    %123 = vector.broadcast %122 : vector<1x64xf32> to vector<8x64xf32>
    %124 = arith.addf %121, %123 : vector<8x64xf32>
    %125 = arith.addf %124, %1 : vector<8x64xf32>
    %c0_44 = arith.constant 0 : index
    %c0_45 = arith.constant 0 : index
    %126 = vector.load %arg11[%c0_44, %c0_45] : memref<1x64xf32, #tpu.memory_space<vmem>>, vector<1x64xf32>
    %c0_46 = arith.constant 0 : index
    %c0_47 = arith.constant 0 : index
    %127 = vector.load %arg12[%c0_46, %c0_47] : memref<1x64xf32, #tpu.memory_space<vmem>>, vector<1x64xf32>
    %cst_48 = arith.constant dense<0.000000e+00> : vector<8xf32>
    %128 = vector.multi_reduction <add>, %125, %cst_48 [1] : vector<8x64xf32> to vector<8xf32>
    %129 = vector.shape_cast %128 : vector<8xf32> to vector<8x1xf32>
    %cst_49 = arith.constant 6.400000e+01 : f32
    %130 = vector.broadcast %cst_49 : f32 to vector<8x1xf32>
    %131 = arith.divf %129, %130 : vector<8x1xf32>
    %132 = vector.broadcast %131 : vector<8x1xf32> to vector<8x64xf32>
    %133 = arith.subf %125, %132 : vector<8x64xf32>
    %134 = arith.mulf %133, %133 : vector<8x64xf32>
    %cst_50 = arith.constant dense<0.000000e+00> : vector<8xf32>
    %135 = vector.multi_reduction <add>, %134, %cst_50 [1] : vector<8x64xf32> to vector<8xf32>
    %136 = vector.shape_cast %135 : vector<8xf32> to vector<8x1xf32>
    %cst_51 = arith.constant 6.400000e+01 : f32
    %137 = vector.broadcast %cst_51 : f32 to vector<8x1xf32>
    %138 = arith.divf %136, %137 : vector<8x1xf32>
    %139 = vector.broadcast %131 : vector<8x1xf32> to vector<8x64xf32>
    %140 = arith.subf %125, %139 : vector<8x64xf32>
    %cst_52 = arith.constant 9.99999996E-13 : f32
    %141 = vector.broadcast %cst_52 : f32 to vector<8x1xf32>
    %142 = arith.addf %138, %141 : vector<8x1xf32>
    %143 = math.rsqrt %142 : vector<8x1xf32>
    %144 = vector.broadcast %143 : vector<8x1xf32> to vector<8x64xf32>
    %145 = arith.mulf %140, %144 : vector<8x64xf32>
    %146 = vector.broadcast %126 : vector<1x64xf32> to vector<8x64xf32>
    %147 = arith.mulf %145, %146 : vector<8x64xf32>
    %148 = vector.broadcast %127 : vector<1x64xf32> to vector<8x64xf32>
    %149 = arith.addf %147, %148 : vector<8x64xf32>
    %c0_53 = arith.constant 0 : index
    %c0_54 = arith.constant 0 : index
    %150 = vector.load %arg13[%c0_53, %c0_54] : memref<64x256xf32, #tpu.memory_space<vmem>>, vector<64x256xf32>
    %151 = arith.truncf %149 : vector<8x64xf32> to vector<8x64xbf16>
    %152 = arith.truncf %150 : vector<64x256xf32> to vector<64x256xbf16>
    %cst_55 = arith.constant dense<0.000000e+00> : vector<8x256xf32>
    %153 = tpu.matmul %151, %152, %cst_55 {dimension_numbers = #tpu.dot_dimension_numbers<[1], [0], [0], [1], [0, 0, 1, 1], [], []>} : vector<8x64xbf16>, vector<64x256xbf16>, vector<8x256xf32> -> vector<8x256xf32>
    %c0_56 = arith.constant 0 : index
    %c0_57 = arith.constant 0 : index
    %154 = vector.load %arg14[%c0_56, %c0_57] : memref<1x256xf32, #tpu.memory_space<vmem>>, vector<1x256xf32>
    %155 = vector.broadcast %154 : vector<1x256xf32> to vector<8x256xf32>
    %156 = arith.addf %153, %155 : vector<8x256xf32>
    %cst_58 = arith.constant 5.000000e-01 : f32
    %157 = vector.broadcast %cst_58 : f32 to vector<8x256xf32>
    %158 = arith.mulf %157, %156 : vector<8x256xf32>
    %cst_59 = arith.constant 4.471500e-02 : f32
    %159 = vector.broadcast %cst_59 : f32 to vector<8x256xf32>
    %160 = arith.mulf %159, %156 : vector<8x256xf32>
    %161 = arith.mulf %160, %156 : vector<8x256xf32>
    %162 = arith.mulf %161, %156 : vector<8x256xf32>
    %163 = arith.addf %156, %162 : vector<8x256xf32>
    %cst_60 = arith.constant 0.797884583 : f32
    %164 = vector.broadcast %cst_60 : f32 to vector<8x256xf32>
    %165 = arith.mulf %164, %163 : vector<8x256xf32>
    %166 = math.tanh %165 : vector<8x256xf32>
    %cst_61 = arith.constant 1.000000e+00 : f32
    %167 = vector.broadcast %cst_61 : f32 to vector<8x256xf32>
    %168 = arith.addf %167, %166 : vector<8x256xf32>
    %169 = arith.mulf %158, %168 : vector<8x256xf32>
    %c0_62 = arith.constant 0 : index
    %c0_63 = arith.constant 0 : index
    %170 = vector.load %arg15[%c0_62, %c0_63] : memref<256x64xf32, #tpu.memory_space<vmem>>, vector<256x64xf32>
    %171 = arith.truncf %169 : vector<8x256xf32> to vector<8x256xbf16>
    %172 = arith.truncf %170 : vector<256x64xf32> to vector<256x64xbf16>
    %cst_64 = arith.constant dense<0.000000e+00> : vector<8x64xf32>
    %173 = tpu.matmul %171, %172, %cst_64 {dimension_numbers = #tpu.dot_dimension_numbers<[1], [0], [0], [1], [0, 0, 1, 1], [], []>} : vector<8x256xbf16>, vector<256x64xbf16>, vector<8x64xf32> -> vector<8x64xf32>
    %c0_65 = arith.constant 0 : index
    %c0_66 = arith.constant 0 : index
    %174 = vector.load %arg16[%c0_65, %c0_66] : memref<1x64xf32, #tpu.memory_space<vmem>>, vector<1x64xf32>
    %175 = vector.broadcast %174 : vector<1x64xf32> to vector<8x64xf32>
    %176 = arith.addf %173, %175 : vector<8x64xf32>
    %177 = arith.addf %149, %176 : vector<8x64xf32>
    %c0_67 = arith.constant 0 : index
    %c0_68 = arith.constant 0 : index
    %178 = vector.load %arg17[%c0_67, %c0_68] : memref<1x64xf32, #tpu.memory_space<vmem>>, vector<1x64xf32>
    %c0_69 = arith.constant 0 : index
    %c0_70 = arith.constant 0 : index
    %179 = vector.load %arg18[%c0_69, %c0_70] : memref<1x64xf32, #tpu.memory_space<vmem>>, vector<1x64xf32>
    %cst_71 = arith.constant dense<0.000000e+00> : vector<8xf32>
    %180 = vector.multi_reduction <add>, %177, %cst_71 [1] : vector<8x64xf32> to vector<8xf32>
    %181 = vector.shape_cast %180 : vector<8xf32> to vector<8x1xf32>
    %cst_72 = arith.constant 6.400000e+01 : f32
    %182 = vector.broadcast %cst_72 : f32 to vector<8x1xf32>
    %183 = arith.divf %181, %182 : vector<8x1xf32>
    %184 = vector.broadcast %183 : vector<8x1xf32> to vector<8x64xf32>
    %185 = arith.subf %177, %184 : vector<8x64xf32>
    %186 = arith.mulf %185, %185 : vector<8x64xf32>
    %cst_73 = arith.constant dense<0.000000e+00> : vector<8xf32>
    %187 = vector.multi_reduction <add>, %186, %cst_73 [1] : vector<8x64xf32> to vector<8xf32>
    %188 = vector.shape_cast %187 : vector<8xf32> to vector<8x1xf32>
    %cst_74 = arith.constant 6.400000e+01 : f32
    %189 = vector.broadcast %cst_74 : f32 to vector<8x1xf32>
    %190 = arith.divf %188, %189 : vector<8x1xf32>
    %191 = vector.broadcast %183 : vector<8x1xf32> to vector<8x64xf32>
    %192 = arith.subf %177, %191 : vector<8x64xf32>
    %cst_75 = arith.constant 9.99999996E-13 : f32
    %193 = vector.broadcast %cst_75 : f32 to vector<8x1xf32>
    %194 = arith.addf %190, %193 : vector<8x1xf32>
    %195 = math.rsqrt %194 : vector<8x1xf32>
    %196 = vector.broadcast %195 : vector<8x1xf32> to vector<8x64xf32>
    %197 = arith.mulf %192, %196 : vector<8x64xf32>
    %198 = vector.broadcast %178 : vector<1x64xf32> to vector<8x64xf32>
    %199 = arith.mulf %197, %198 : vector<8x64xf32>
    %200 = vector.broadcast %179 : vector<1x64xf32> to vector<8x64xf32>
    %201 = arith.addf %199, %200 : vector<8x64xf32>
    %c0_76 = arith.constant 0 : index
    %c0_77 = arith.constant 0 : index
    %c0_78 = arith.constant 0 : index
    %202 = vector.load %arg19[%c0_76, %c0_77, %c0_78] : memref<1x8x64xf32, #tpu.memory_space<vmem>>, vector<1x8x64xf32>
    %203 = vector.shape_cast %202 : vector<1x8x64xf32> to vector<8x64xf32>
    %204 = vector.shape_cast %201 : vector<8x64xf32> to vector<1x8x64xf32>
    tpu.vector_store %arg19[%c0_76, %c0_77, %c0_78], %204 {strides = array<i32>} : memref<1x8x64xf32, #tpu.memory_space<vmem>>, vector<1x8x64xf32>,
    return
  }
  func.func @transform_0(%arg0: i32) -> (i32, i32, i32) {
    %c0_i32 = arith.constant 0 : i32
    %c0_i32_0 = arith.constant 0 : i32
    %c0_i32_1 = arith.constant 0 : i32
    return %arg0, %c0_i32, %c0_i32_0 : i32, i32, i32
  }
  func.func @transform_1(%arg0: i32) -> (i32, i32, i32) {
    %c0_i32 = arith.constant 0 : i32
    %c0_i32_0 = arith.constant 0 : i32
    %c0_i32_1 = arith.constant 0 : i32
    return %arg0, %c0_i32, %c0_i32_0 : i32, i32, i32
  }
  func.func @transform_2(%arg0: i32) -> (i32, i32) {
    %c0_i32 = arith.constant 0 : i32
    %c0_i32_0 = arith.constant 0 : i32
    %c0_i32_1 = arith.constant 0 : i32
    return %c0_i32, %c0_i32_0 : i32, i32
  }
  func.func @transform_3(%arg0: i32) -> (i32, i32) {
    %c0_i32 = arith.constant 0 : i32
    %c0_i32_0 = arith.constant 0 : i32
    %c0_i32_1 = arith.constant 0 : i32
    return %c0_i32, %c0_i32_0 : i32, i32
  }
  func.func @transform_4(%arg0: i32) -> (i32, i32) {
    %c0_i32 = arith.constant 0 : i32
    %c0_i32_0 = arith.constant 0 : i32
    %c0_i32_1 = arith.constant 0 : i32
    return %c0_i32, %c0_i32_0 : i32, i32
  }
  func.func @transform_5(%arg0: i32) -> (i32, i32) {
    %c0_i32 = arith.constant 0 : i32
    %c0_i32_0 = arith.constant 0 : i32
    %c0_i32_1 = arith.constant 0 : i32
    return %c0_i32, %c0_i32_0 : i32, i32
  }
  func.func @transform_6(%arg0: i32) -> (i32, i32) {
    %c0_i32 = arith.constant 0 : i32
    %c0_i32_0 = arith.constant 0 : i32
    %c0_i32_1 = arith.constant 0 : i32
    return %c0_i32, %c0_i32_0 : i32, i32
  }
  func.func @transform_7(%arg0: i32) -> (i32, i32) {
    %c0_i32 = arith.constant 0 : i32
    %c0_i32_0 = arith.constant 0 : i32
    %c0_i32_1 = arith.constant 0 : i32
    return %c0_i32, %c0_i32_0 : i32, i32
  }
  func.func @transform_8(%arg0: i32) -> (i32, i32) {
    %c0_i32 = arith.constant 0 : i32
    %c0_i32_0 = arith.constant 0 : i32
    %c0_i32_1 = arith.constant 0 : i32
    return %c0_i32, %c0_i32_0 : i32, i32
  }
  func.func @transform_9(%arg0: i32) -> (i32, i32) {
    %c0_i32 = arith.constant 0 : i32
    %c0_i32_0 = arith.constant 0 : i32
    %c0_i32_1 = arith.constant 0 : i32
    return %c0_i32, %c0_i32_0 : i32, i32
  }
  func.func @transform_10(%arg0: i32) -> (i32, i32) {
    %c0_i32 = arith.constant 0 : i32
    %c0_i32_0 = arith.constant 0 : i32
    %c0_i32_1 = arith.constant 0 : i32
    return %c0_i32, %c0_i32_0 : i32, i32
  }
  func.func @transform_11(%arg0: i32) -> (i32, i32) {
    %c0_i32 = arith.constant 0 : i32
    %c0_i32_0 = arith.constant 0 : i32
    %c0_i32_1 = arith.constant 0 : i32
    return %c0_i32, %c0_i32_0 : i32, i32
  }
  func.func @transform_12(%arg0: i32) -> (i32, i32) {
    %c0_i32 = arith.constant 0 : i32
    %c0_i32_0 = arith.constant 0 : i32
    %c0_i32_1 = arith.constant 0 : i32
    return %c0_i32, %c0_i32_0 : i32, i32
  }
  func.func @transform_13(%arg0: i32) -> (i32, i32) {
    %c0_i32 = arith.constant 0 : i32
    %c0_i32_0 = arith.constant 0 : i32
    %c0_i32_1 = arith.constant 0 : i32
    return %c0_i32, %c0_i32_0 : i32, i32
  }
  func.func @transform_14(%arg0: i32) -> (i32, i32) {
    %c0_i32 = arith.constant 0 : i32
    %c0_i32_0 = arith.constant 0 : i32
    %c0_i32_1 = arith.constant 0 : i32
    return %c0_i32, %c0_i32_0 : i32, i32
  }
  func.func @transform_15(%arg0: i32) -> (i32, i32) {
    %c0_i32 = arith.constant 0 : i32
    %c0_i32_0 = arith.constant 0 : i32
    %c0_i32_1 = arith.constant 0 : i32
    return %c0_i32, %c0_i32_0 : i32, i32
  }
  func.func @transform_16(%arg0: i32) -> (i32, i32) {
    %c0_i32 = arith.constant 0 : i32
    %c0_i32_0 = arith.constant 0 : i32
    %c0_i32_1 = arith.constant 0 : i32
    return %c0_i32, %c0_i32_0 : i32, i32
  }
  func.func @transform_17(%arg0: i32) -> (i32, i32) {
    %c0_i32 = arith.constant 0 : i32
    %c0_i32_0 = arith.constant 0 : i32
    %c0_i32_1 = arith.constant 0 : i32
    return %c0_i32, %c0_i32_0 : i32, i32
  }
  func.func @transform_18(%arg0: i32) -> (i32, i32, i32) {
    %c0_i32 = arith.constant 0 : i32
    %c0_i32_0 = arith.constant 0 : i32
    %c0_i32_1 = arith.constant 0 : i32
    return %arg0, %c0_i32, %c0_i32_0 : i32, i32, i32
  }
}

module attributes {stable_mosaic.version = 11 : i64} {
  func.func @_layernorm_kernel(%arg0: i32, %arg1: memref<16x64xf32, #tpu.memory_space<vmem>>, %arg2: memref<1x64xf32, #tpu.memory_space<vmem>>, %arg3: memref<1x64xf32, #tpu.memory_space<vmem>>, %arg4: memref<16x64xf32, #tpu.memory_space<vmem>>) attributes {dimension_semantics = [#tpu.dimension_semantics<arbitrary>], iteration_bounds = array<i64: 1>, scalar_prefetch = 0 : i64, scratch_operands = 0 : i64, tpu.core_type = #tpu.core_type<tc>, window_params = [{pipeline_mode = #tpu.pipeline_mode<synchronous>, transform_indices = @transform_0, window_bounds = array<i64: 16, 64>}, {pipeline_mode = #tpu.pipeline_mode<synchronous>, transform_indices = @transform_1, window_bounds = array<i64: 1, 64>}, {pipeline_mode = #tpu.pipeline_mode<synchronous>, transform_indices = @transform_2, window_bounds = array<i64: 1, 64>}, {pipeline_mode = #tpu.pipeline_mode<synchronous>, transform_indices = @transform_3, window_bounds = array<i64: 16, 64>}]} {
    %c0 = arith.constant 0 : index
    %c0_0 = arith.constant 0 : index
    %0 = vector.load %arg1[%c0, %c0_0] : memref<16x64xf32, #tpu.memory_space<vmem>>, vector<16x64xf32>
    %c0_1 = arith.constant 0 : index
    %c0_2 = arith.constant 0 : index
    %1 = vector.load %arg2[%c0_1, %c0_2] : memref<1x64xf32, #tpu.memory_space<vmem>>, vector<1x64xf32>
    %c0_3 = arith.constant 0 : index
    %c0_4 = arith.constant 0 : index
    %2 = vector.load %arg3[%c0_3, %c0_4] : memref<1x64xf32, #tpu.memory_space<vmem>>, vector<1x64xf32>
    %cst = arith.constant dense<0.000000e+00> : vector<16xf32>
    %3 = vector.multi_reduction <add>, %0, %cst [1] : vector<16x64xf32> to vector<16xf32>
    %4 = vector.shape_cast %3 : vector<16xf32> to vector<16x1xf32>
    %cst_5 = arith.constant 6.400000e+01 : f32
    %5 = vector.broadcast %cst_5 : f32 to vector<16x1xf32>
    %6 = arith.divf %4, %5 : vector<16x1xf32>
    %7 = vector.broadcast %6 : vector<16x1xf32> to vector<16x64xf32>
    %8 = arith.subf %0, %7 : vector<16x64xf32>
    %9 = arith.mulf %8, %8 : vector<16x64xf32>
    %cst_6 = arith.constant dense<0.000000e+00> : vector<16xf32>
    %10 = vector.multi_reduction <add>, %9, %cst_6 [1] : vector<16x64xf32> to vector<16xf32>
    %11 = vector.shape_cast %10 : vector<16xf32> to vector<16x1xf32>
    %cst_7 = arith.constant 6.400000e+01 : f32
    %12 = vector.broadcast %cst_7 : f32 to vector<16x1xf32>
    %13 = arith.divf %11, %12 : vector<16x1xf32>
    %14 = vector.broadcast %6 : vector<16x1xf32> to vector<16x64xf32>
    %15 = arith.subf %0, %14 : vector<16x64xf32>
    %cst_8 = arith.constant 9.99999996E-13 : f32
    %16 = vector.broadcast %cst_8 : f32 to vector<16x1xf32>
    %17 = arith.addf %13, %16 : vector<16x1xf32>
    %18 = math.rsqrt %17 : vector<16x1xf32>
    %19 = vector.broadcast %18 : vector<16x1xf32> to vector<16x64xf32>
    %20 = arith.mulf %15, %19 : vector<16x64xf32>
    %21 = vector.broadcast %1 : vector<1x64xf32> to vector<16x64xf32>
    %22 = arith.mulf %20, %21 : vector<16x64xf32>
    %23 = vector.broadcast %2 : vector<1x64xf32> to vector<16x64xf32>
    %24 = arith.addf %22, %23 : vector<16x64xf32>
    %c0_9 = arith.constant 0 : index
    %c0_10 = arith.constant 0 : index
    %25 = vector.load %arg4[%c0_9, %c0_10] : memref<16x64xf32, #tpu.memory_space<vmem>>, vector<16x64xf32>
    tpu.vector_store %arg4[%c0_9, %c0_10], %24 {strides = array<i32>} : memref<16x64xf32, #tpu.memory_space<vmem>>, vector<16x64xf32>,
    return
  }
  func.func @transform_0(%arg0: i32) -> (i32, i32) {
    %c0_i32 = arith.constant 0 : i32
    %c0_i32_0 = arith.constant 0 : i32
    %c0_i32_1 = arith.constant 0 : i32
    return %c0_i32, %c0_i32_0 : i32, i32
  }
  func.func @transform_1(%arg0: i32) -> (i32, i32) {
    %c0_i32 = arith.constant 0 : i32
    %c0_i32_0 = arith.constant 0 : i32
    %c0_i32_1 = arith.constant 0 : i32
    return %c0_i32, %c0_i32_0 : i32, i32
  }
  func.func @transform_2(%arg0: i32) -> (i32, i32) {
    %c0_i32 = arith.constant 0 : i32
    %c0_i32_0 = arith.constant 0 : i32
    %c0_i32_1 = arith.constant 0 : i32
    return %c0_i32, %c0_i32_0 : i32, i32
  }
  func.func @transform_3(%arg0: i32) -> (i32, i32) {
    %c0_i32 = arith.constant 0 : i32
    %c0_i32_0 = arith.constant 0 : i32
    %c0_i32_1 = arith.constant 0 : i32
    return %c0_i32, %c0_i32_0 : i32, i32
  }
}

module attributes {stable_mosaic.version = 11 : i64} {
  func.func @_bert_layer_kernel(%arg0: i32, %arg1: memref<1x8x64xf32, #tpu.memory_space<vmem>>, %arg2: memref<1x1x8xf32, #tpu.memory_space<vmem>>, %arg3: memref<64x64xf32, #tpu.memory_space<vmem>>, %arg4: memref<1x64xf32, #tpu.memory_space<vmem>>, %arg5: memref<64x64xf32, #tpu.memory_space<vmem>>, %arg6: memref<1x64xf32, #tpu.memory_space<vmem>>, %arg7: memref<64x64xf32, #tpu.memory_space<vmem>>, %arg8: memref<1x64xf32, #tpu.memory_space<vmem>>, %arg9: memref<64x64xf32, #tpu.memory_space<vmem>>, %arg10: memref<1x64xf32, #tpu.memory_space<vmem>>, %arg11: memref<1x64xf32, #tpu.memory_space<vmem>>, %arg12: memref<1x64xf32, #tpu.memory_space<vmem>>, %arg13: memref<64x256xf32, #tpu.memory_space<vmem>>, %arg14: memref<1x256xf32, #tpu.memory_space<vmem>>, %arg15: memref<256x64xf32, #tpu.memory_space<vmem>>, %arg16: memref<1x64xf32, #tpu.memory_space<vmem>>, %arg17: memref<1x64xf32, #tpu.memory_space<vmem>>, %arg18: memref<1x64xf32, #tpu.memory_space<vmem>>, %arg19: memref<1x8x64xf32, #tpu.memory_space<vmem>>) attributes {dimension_semantics = [#tpu.dimension_semantics<parallel>], iteration_bounds = array<i64: 2>, scalar_prefetch = 0 : i64, scratch_operands = 0 : i64, tpu.core_type = #tpu.core_type<tc>, window_params = [{transform_indices = @transform_0, window_bounds = array<i64: 1, 8, 64>}, {transform_indices = @transform_1, window_bounds = array<i64: 1, 1, 8>}, {pipeline_mode = #tpu.pipeline_mode<synchronous>, transform_indices = @transform_2, window_bounds = array<i64: 64, 64>}, {pipeline_mode = #tpu.pipeline_mode<synchronous>, transform_indices = @transform_3, window_bounds = array<i64: 1, 64>}, {pipeline_mode = #tpu.pipeline_mode<synchronous>, transform_indices = @transform_4, window_bounds = array<i64: 64, 64>}, {pipeline_mode = #tpu.pipeline_mode<synchronous>, transform_indices = @transform_5, window_bounds = array<i64: 1, 64>}, {pipeline_mode = #tpu.pipeline_mode<synchronous>, transform_indices = @transform_6, window_bounds = array<i64: 64, 64>}, {pipeline_mode = #tpu.pipeline_mode<synchronous>, transform_indices = @transform_7, window_bounds = array<i64: 1, 64>}, {pipeline_mode = #tpu.pipeline_mode<synchronous>, transform_indices = @transform_8, window_bounds = array<i64: 64, 64>}, {pipeline_mode = #tpu.pipeline_mode<synchronous>, transform_indices = @transform_9, window_bounds = array<i64: 1, 64>}, {pipeline_mode = #tpu.pipeline_mode<synchronous>, transform_indices = @transform_10, window_bounds = array<i64: 1, 64>}, {pipeline_mode = #tpu.pipeline_mode<synchronous>, transform_indices = @transform_11, window_bounds = array<i64: 1, 64>}, {pipeline_mode = #tpu.pipeline_mode<synchronous>, transform_indices = @transform_12, window_bounds = array<i64: 64, 256>}, {pipeline_mode = #tpu.pipeline_mode<synchronous>, transform_indices = @transform_13, window_bounds = array<i64: 1, 256>}, {pipeline_mode = #tpu.pipeline_mode<synchronous>, transform_indices = @transform_14, window_bounds = array<i64: 256, 64>}, {pipeline_mode = #tpu.pipeline_mode<synchronous>, transform_indices = @transform_15, window_bounds = array<i64: 1, 64>}, {pipeline_mode = #tpu.pipeline_mode<synchronous>, transform_indices = @transform_16, window_bounds = array<i64: 1, 64>}, {pipeline_mode = #tpu.pipeline_mode<synchronous>, transform_indices = @transform_17, window_bounds = array<i64: 1, 64>}, {transform_indices = @transform_18, window_bounds = array<i64: 1, 8, 64>}]} {
    %c0 = arith.constant 0 : index
    %c0_0 = arith.constant 0 : index
    %c0_1 = arith.constant 0 : index
    %0 = vector.load %arg1[%c0, %c0_0, %c0_1] : memref<1x8x64xf32, #tpu.memory_space<vmem>>, vector<1x8x64xf32>
    %1 = vector.shape_cast %0 : vector<1x8x64xf32> to vector<8x64xf32>
    %c0_2 = arith.constant 0 : index
    %c0_3 = arith.constant 0 : index
    %c0_4 = arith.constant 0 : index
    %2 = vector.load %arg2[%c0_2, %c0_3, %c0_4] : memref<1x1x8xf32, #tpu.memory_space<vmem>>, vector<1x1x8xf32>
    %3 = vector.shape_cast %2 : vector<1x1x8xf32> to vector<1x8xf32>
    %c0_5 = arith.constant 0 : index
    %c0_6 = arith.constant 0 : index
    %4 = vector.load %arg3[%c0_5, %c0_6] : memref<64x64xf32, #tpu.memory_space<vmem>>, vector<64x64xf32>
    %5 = arith.truncf %1 : vector<8x64xf32> to vector<8x64xbf16>
    %6 = arith.truncf %4 : vector<64x64xf32> to vector<64x64xbf16>
    %cst = arith.constant dense<0.000000e+00> : vector<8x64xf32>
    %7 = tpu.matmul %5, %6, %cst {dimension_numbers = #tpu.dot_dimension_numbers<[1], [0], [0], [1], [0, 0, 1, 1], [], []>} : vector<8x64xbf16>, vector<64x64xbf16>, vector<8x64xf32> -> vector<8x64xf32>
    %c0_7 = arith.constant 0 : index
    %c0_8 = arith.constant 0 : index
    %8 = vector.load %arg4[%c0_7, %c0_8] : memref<1x64xf32, #tpu.memory_space<vmem>>, vector<1x64xf32>
    %9 = vector.broadcast %8 : vector<1x64xf32> to vector<8x64xf32>
    %10 = arith.addf %7, %9 : vector<8x64xf32>
    %c0_9 = arith.constant 0 : index
    %c0_10 = arith.constant 0 : index
    %11 = vector.load %arg5[%c0_9, %c0_10] : memref<64x64xf32, #tpu.memory_space<vmem>>, vector<64x64xf32>
    %12 = arith.truncf %1 : vector<8x64xf32> to vector<8x64xbf16>
    %13 = arith.truncf %11 : vector<64x64xf32> to vector<64x64xbf16>
    %cst_11 = arith.constant dense<0.000000e+00> : vector<8x64xf32>
    %14 = tpu.matmul %12, %13, %cst_11 {dimension_numbers = #tpu.dot_dimension_numbers<[1], [0], [0], [1], [0, 0, 1, 1], [], []>} : vector<8x64xbf16>, vector<64x64xbf16>, vector<8x64xf32> -> vector<8x64xf32>
    %c0_12 = arith.constant 0 : index
    %c0_13 = arith.constant 0 : index
    %15 = vector.load %arg6[%c0_12, %c0_13] : memref<1x64xf32, #tpu.memory_space<vmem>>, vector<1x64xf32>
    %16 = vector.broadcast %15 : vector<1x64xf32> to vector<8x64xf32>
    %17 = arith.addf %14, %16 : vector<8x64xf32>
    %c0_14 = arith.constant 0 : index
    %c0_15 = arith.constant 0 : index
    %18 = vector.load %arg7[%c0_14, %c0_15] : memref<64x64xf32, #tpu.memory_space<vmem>>, vector<64x64xf32>
    %19 = arith.truncf %1 : vector<8x64xf32> to vector<8x64xbf16>
    %20 = arith.truncf %18 : vector<64x64xf32> to vector<64x64xbf16>
    %cst_16 = arith.constant dense<0.000000e+00> : vector<8x64xf32>
    %21 = tpu.matmul %19, %20, %cst_16 {dimension_numbers = #tpu.dot_dimension_numbers<[1], [0], [0], [1], [0, 0, 1, 1], [], []>} : vector<8x64xbf16>, vector<64x64xbf16>, vector<8x64xf32> -> vector<8x64xf32>
    %c0_17 = arith.constant 0 : index
    %c0_18 = arith.constant 0 : index
    %22 = vector.load %arg8[%c0_17, %c0_18] : memref<1x64xf32, #tpu.memory_space<vmem>>, vector<1x64xf32>
    %23 = vector.broadcast %22 : vector<1x64xf32> to vector<8x64xf32>
    %24 = arith.addf %21, %23 : vector<8x64xf32>
    %25 = vector.extract_strided_slice %10 {offsets = [0, 0], sizes = [8, 16], strides = [1, 1]} : vector<8x64xf32> to vector<8x16xf32>
    %26 = vector.extract_strided_slice %17 {offsets = [0, 0], sizes = [8, 16], strides = [1, 1]} : vector<8x64xf32> to vector<8x16xf32>
    %27 = arith.truncf %25 : vector<8x16xf32> to vector<8x16xbf16>
    %28 = arith.truncf %26 : vector<8x16xf32> to vector<8x16xbf16>
    %cst_19 = arith.constant dense<0.000000e+00> : vector<8x8xf32>
    %29 = tpu.matmul %27, %28, %cst_19 {dimension_numbers = #tpu.dot_dimension_numbers<[1], [1], [0], [0], [0, 0, 1, 0], [], []>} : vector<8x16xbf16>, vector<8x16xbf16>, vector<8x8xf32> -> vector<8x8xf32>
    %cst_20 = arith.constant 2.500000e-01 : f32
    %30 = vector.broadcast %cst_20 : f32 to vector<8x8xf32>
    %31 = arith.mulf %29, %30 : vector<8x8xf32>
    %32 = vector.broadcast %3 : vector<1x8xf32> to vector<8x8xf32>
    %33 = arith.addf %31, %32 : vector<8x8xf32>
    %cst_21 = arith.constant dense<0xFF800000> : vector<8xf32>
    %34 = vector.multi_reduction <maximumf>, %33, %cst_21 [1] : vector<8x8xf32> to vector<8xf32>
    %35 = vector.shape_cast %34 : vector<8xf32> to vector<8x1xf32>
    %36 = vector.broadcast %35 : vector<8x1xf32> to vector<8x8xf32>
    %37 = arith.subf %33, %36 : vector<8x8xf32>
    %38 = math.exp %37 : vector<8x8xf32>
    %cst_22 = arith.constant dense<0.000000e+00> : vector<8xf32>
    %39 = vector.multi_reduction <add>, %38, %cst_22 [1] : vector<8x8xf32> to vector<8xf32>
    %40 = vector.shape_cast %39 : vector<8xf32> to vector<8x1xf32>
    %41 = tpu.reciprocal %40 {approx = true} : vector<8x1xf32> -> vector<8x1xf32>
    %42 = vector.broadcast %41 : vector<8x1xf32> to vector<8x8xf32>
    %43 = arith.mulf %38, %42 : vector<8x8xf32>
    %44 = vector.extract_strided_slice %24 {offsets = [0, 0], sizes = [8, 16], strides = [1, 1]} : vector<8x64xf32> to vector<8x16xf32>
    %45 = arith.truncf %43 : vector<8x8xf32> to vector<8x8xbf16>
    %46 = arith.truncf %44 : vector<8x16xf32> to vector<8x16xbf16>
    %cst_23 = arith.constant dense<0.000000e+00> : vector<8x16xf32>
    %47 = tpu.matmul %45, %46, %cst_23 {dimension_numbers = #tpu.dot_dimension_numbers<[1], [0], [0], [1], [0, 0, 1, 1], [], []>} : vector<8x8xbf16>, vector<8x16xbf16>, vector<8x16xf32> -> vector<8x16xf32>
    %48 = vector.extract_strided_slice %10 {offsets = [0, 16], sizes = [8, 16], strides = [1, 1]} : vector<8x64xf32> to vector<8x16xf32>
    %49 = vector.extract_strided_slice %17 {offsets = [0, 16], sizes = [8, 16], strides = [1, 1]} : vector<8x64xf32> to vector<8x16xf32>
    %50 = arith.truncf %48 : vector<8x16xf32> to vector<8x16xbf16>
    %51 = arith.truncf %49 : vector<8x16xf32> to vector<8x16xbf16>
    %cst_24 = arith.constant dense<0.000000e+00> : vector<8x8xf32>
    %52 = tpu.matmul %50, %51, %cst_24 {dimension_numbers = #tpu.dot_dimension_numbers<[1], [1], [0], [0], [0, 0, 1, 0], [], []>} : vector<8x16xbf16>, vector<8x16xbf16>, vector<8x8xf32> -> vector<8x8xf32>
    %cst_25 = arith.constant 2.500000e-01 : f32
    %53 = vector.broadcast %cst_25 : f32 to vector<8x8xf32>
    %54 = arith.mulf %52, %53 : vector<8x8xf32>
    %55 = vector.broadcast %3 : vector<1x8xf32> to vector<8x8xf32>
    %56 = arith.addf %54, %55 : vector<8x8xf32>
    %cst_26 = arith.constant dense<0xFF800000> : vector<8xf32>
    %57 = vector.multi_reduction <maximumf>, %56, %cst_26 [1] : vector<8x8xf32> to vector<8xf32>
    %58 = vector.shape_cast %57 : vector<8xf32> to vector<8x1xf32>
    %59 = vector.broadcast %58 : vector<8x1xf32> to vector<8x8xf32>
    %60 = arith.subf %56, %59 : vector<8x8xf32>
    %61 = math.exp %60 : vector<8x8xf32>
    %cst_27 = arith.constant dense<0.000000e+00> : vector<8xf32>
    %62 = vector.multi_reduction <add>, %61, %cst_27 [1] : vector<8x8xf32> to vector<8xf32>
    %63 = vector.shape_cast %62 : vector<8xf32> to vector<8x1xf32>
    %64 = tpu.reciprocal %63 {approx = true} : vector<8x1xf32> -> vector<8x1xf32>
    %65 = vector.broadcast %64 : vector<8x1xf32> to vector<8x8xf32>
    %66 = arith.mulf %61, %65 : vector<8x8xf32>
    %67 = vector.extract_strided_slice %24 {offsets = [0, 16], sizes = [8, 16], strides = [1, 1]} : vector<8x64xf32> to vector<8x16xf32>
    %68 = arith.truncf %66 : vector<8x8xf32> to vector<8x8xbf16>
    %69 = arith.truncf %67 : vector<8x16xf32> to vector<8x16xbf16>
    %cst_28 = arith.constant dense<0.000000e+00> : vector<8x16xf32>
    %70 = tpu.matmul %68, %69, %cst_28 {dimension_numbers = #tpu.dot_dimension_numbers<[1], [0], [0], [1], [0, 0, 1, 1], [], []>} : vector<8x8xbf16>, vector<8x16xbf16>, vector<8x16xf32> -> vector<8x16xf32>
    %71 = vector.extract_strided_slice %10 {offsets = [0, 32], sizes = [8, 16], strides = [1, 1]} : vector<8x64xf32> to vector<8x16xf32>
    %72 = vector.extract_strided_slice %17 {offsets = [0, 32], sizes = [8, 16], strides = [1, 1]} : vector<8x64xf32> to vector<8x16xf32>
    %73 = arith.truncf %71 : vector<8x16xf32> to vector<8x16xbf16>
    %74 = arith.truncf %72 : vector<8x16xf32> to vector<8x16xbf16>
    %cst_29 = arith.constant dense<0.000000e+00> : vector<8x8xf32>
    %75 = tpu.matmul %73, %74, %cst_29 {dimension_numbers = #tpu.dot_dimension_numbers<[1], [1], [0], [0], [0, 0, 1, 0], [], []>} : vector<8x16xbf16>, vector<8x16xbf16>, vector<8x8xf32> -> vector<8x8xf32>
    %cst_30 = arith.constant 2.500000e-01 : f32
    %76 = vector.broadcast %cst_30 : f32 to vector<8x8xf32>
    %77 = arith.mulf %75, %76 : vector<8x8xf32>
    %78 = vector.broadcast %3 : vector<1x8xf32> to vector<8x8xf32>
    %79 = arith.addf %77, %78 : vector<8x8xf32>
    %cst_31 = arith.constant dense<0xFF800000> : vector<8xf32>
    %80 = vector.multi_reduction <maximumf>, %79, %cst_31 [1] : vector<8x8xf32> to vector<8xf32>
    %81 = vector.shape_cast %80 : vector<8xf32> to vector<8x1xf32>
    %82 = vector.broadcast %81 : vector<8x1xf32> to vector<8x8xf32>
    %83 = arith.subf %79, %82 : vector<8x8xf32>
    %84 = math.exp %83 : vector<8x8xf32>
    %cst_32 = arith.constant dense<0.000000e+00> : vector<8xf32>
    %85 = vector.multi_reduction <add>, %84, %cst_32 [1] : vector<8x8xf32> to vector<8xf32>
    %86 = vector.shape_cast %85 : vector<8xf32> to vector<8x1xf32>
    %87 = tpu.reciprocal %86 {approx = true} : vector<8x1xf32> -> vector<8x1xf32>
    %88 = vector.broadcast %87 : vector<8x1xf32> to vector<8x8xf32>
    %89 = arith.mulf %84, %88 : vector<8x8xf32>
    %90 = vector.extract_strided_slice %24 {offsets = [0, 32], sizes = [8, 16], strides = [1, 1]} : vector<8x64xf32> to vector<8x16xf32>
    %91 = arith.truncf %89 : vector<8x8xf32> to vector<8x8xbf16>
    %92 = arith.truncf %90 : vector<8x16xf32> to vector<8x16xbf16>
    %cst_33 = arith.constant dense<0.000000e+00> : vector<8x16xf32>
    %93 = tpu.matmul %91, %92, %cst_33 {dimension_numbers = #tpu.dot_dimension_numbers<[1], [0], [0], [1], [0, 0, 1, 1], [], []>} : vector<8x8xbf16>, vector<8x16xbf16>, vector<8x16xf32> -> vector<8x16xf32>
    %94 = vector.extract_strided_slice %10 {offsets = [0, 48], sizes = [8, 16], strides = [1, 1]} : vector<8x64xf32> to vector<8x16xf32>
    %95 = vector.extract_strided_slice %17 {offsets = [0, 48], sizes = [8, 16], strides = [1, 1]} : vector<8x64xf32> to vector<8x16xf32>
    %96 = arith.truncf %94 : vector<8x16xf32> to vector<8x16xbf16>
    %97 = arith.truncf %95 : vector<8x16xf32> to vector<8x16xbf16>
    %cst_34 = arith.constant dense<0.000000e+00> : vector<8x8xf32>
    %98 = tpu.matmul %96, %97, %cst_34 {dimension_numbers = #tpu.dot_dimension_numbers<[1], [1], [0], [0], [0, 0, 1, 0], [], []>} : vector<8x16xbf16>, vector<8x16xbf16>, vector<8x8xf32> -> vector<8x8xf32>
    %cst_35 = arith.constant 2.500000e-01 : f32
    %99 = vector.broadcast %cst_35 : f32 to vector<8x8xf32>
    %100 = arith.mulf %98, %99 : vector<8x8xf32>
    %101 = vector.broadcast %3 : vector<1x8xf32> to vector<8x8xf32>
    %102 = arith.addf %100, %101 : vector<8x8xf32>
    %cst_36 = arith.constant dense<0xFF800000> : vector<8xf32>
    %103 = vector.multi_reduction <maximumf>, %102, %cst_36 [1] : vector<8x8xf32> to vector<8xf32>
    %104 = vector.shape_cast %103 : vector<8xf32> to vector<8x1xf32>
    %105 = vector.broadcast %104 : vector<8x1xf32> to vector<8x8xf32>
    %106 = arith.subf %102, %105 : vector<8x8xf32>
    %107 = math.exp %106 : vector<8x8xf32>
    %cst_37 = arith.constant dense<0.000000e+00> : vector<8xf32>
    %108 = vector.multi_reduction <add>, %107, %cst_37 [1] : vector<8x8xf32> to vector<8xf32>
    %109 = vector.shape_cast %108 : vector<8xf32> to vector<8x1xf32>
    %110 = tpu.reciprocal %109 {approx = true} : vector<8x1xf32> -> vector<8x1xf32>
    %111 = vector.broadcast %110 : vector<8x1xf32> to vector<8x8xf32>
    %112 = arith.mulf %107, %111 : vector<8x8xf32>
    %113 = vector.extract_strided_slice %24 {offsets = [0, 48], sizes = [8, 16], strides = [1, 1]} : vector<8x64xf32> to vector<8x16xf32>
    %114 = arith.truncf %112 : vector<8x8xf32> to vector<8x8xbf16>
    %115 = arith.truncf %113 : vector<8x16xf32> to vector<8x16xbf16>
    %cst_38 = arith.constant dense<0.000000e+00> : vector<8x16xf32>
    %116 = tpu.matmul %114, %115, %cst_38 {dimension_numbers = #tpu.dot_dimension_numbers<[1], [0], [0], [1], [0, 0, 1, 1], [], []>} : vector<8x8xbf16>, vector<8x16xbf16>, vector<8x16xf32> -> vector<8x16xf32>
    %117 = tpu.concatenate %47, %70, %93, %116 in 1 : vector<8x16xf32>, vector<8x16xf32>, vector<8x16xf32>, vector<8x16xf32> -> vector<8x64xf32>
    %c0_39 = arith.constant 0 : index
    %c0_40 = arith.constant 0 : index
    %118 = vector.load %arg9[%c0_39, %c0_40] : memref<64x64xf32, #tpu.memory_space<vmem>>, vector<64x64xf32>
    %119 = arith.truncf %117 : vector<8x64xf32> to vector<8x64xbf16>
    %120 = arith.truncf %118 : vector<64x64xf32> to vector<64x64xbf16>
    %cst_41 = arith.constant dense<0.000000e+00> : vector<8x64xf32>
    %121 = tpu.matmul %119, %120, %cst_41 {dimension_numbers = #tpu.dot_dimension_numbers<[1], [0], [0], [1], [0, 0, 1, 1], [], []>} : vector<8x64xbf16>, vector<64x64xbf16>, vector<8x64xf32> -> vector<8x64xf32>
    %c0_42 = arith.constant 0 : index
    %c0_43 = arith.constant 0 : index
    %122 = vector.load %arg10[%c0_42, %c0_43] : memref<1x64xf32, #tpu.memory_space<vmem>>, vector<1x64xf32>
    %123 = vector.broadcast %122 : vector<1x64xf32> to vector<8x64xf32>
    %124 = arith.addf %121, %123 : vector<8x64xf32>
    %125 = arith.addf %124, %1 : vector<8x64xf32>
    %c0_44 = arith.constant 0 : index
    %c0_45 = arith.constant 0 : index
    %126 = vector.load %arg11[%c0_44, %c0_45] : memref<1x64xf32, #tpu.memory_space<vmem>>, vector<1x64xf32>
    %c0_46 = arith.constant 0 : index
    %c0_47 = arith.constant 0 : index
    %127 = vector.load %arg12[%c0_46, %c0_47] : memref<1x64xf32, #tpu.memory_space<vmem>>, vector<1x64xf32>
    %cst_48 = arith.constant dense<0.000000e+00> : vector<8xf32>
    %128 = vector.multi_reduction <add>, %125, %cst_48 [1] : vector<8x64xf32> to vector<8xf32>
    %129 = vector.shape_cast %128 : vector<8xf32> to vector<8x1xf32>
    %cst_49 = arith.constant 6.400000e+01 : f32
    %130 = vector.broadcast %cst_49 : f32 to vector<8x1xf32>
    %131 = arith.divf %129, %130 : vector<8x1xf32>
    %132 = vector.broadcast %131 : vector<8x1xf32> to vector<8x64xf32>
    %133 = arith.subf %125, %132 : vector<8x64xf32>
    %134 = arith.mulf %133, %133 : vector<8x64xf32>
    %cst_50 = arith.constant dense<0.000000e+00> : vector<8xf32>
    %135 = vector.multi_reduction <add>, %134, %cst_50 [1] : vector<8x64xf32> to vector<8xf32>
    %136 = vector.shape_cast %135 : vector<8xf32> to vector<8x1xf32>
    %cst_51 = arith.constant 6.400000e+01 : f32
    %137 = vector.broadcast %cst_51 : f32 to vector<8x1xf32>
    %138 = arith.divf %136, %137 : vector<8x1xf32>
    %139 = vector.broadcast %131 : vector<8x1xf32> to vector<8x64xf32>
    %140 = arith.subf %125, %139 : vector<8x64xf32>
    %cst_52 = arith.constant 9.99999996E-13 : f32
    %141 = vector.broadcast %cst_52 : f32 to vector<8x1xf32>
    %142 = arith.addf %138, %141 : vector<8x1xf32>
    %143 = math.rsqrt %142 : vector<8x1xf32>
    %144 = vector.broadcast %143 : vector<8x1xf32> to vector<8x64xf32>
    %145 = arith.mulf %140, %144 : vector<8x64xf32>
    %146 = vector.broadcast %126 : vector<1x64xf32> to vector<8x64xf32>
    %147 = arith.mulf %145, %146 : vector<8x64xf32>
    %148 = vector.broadcast %127 : vector<1x64xf32> to vector<8x64xf32>
    %149 = arith.addf %147, %148 : vector<8x64xf32>
    %c0_53 = arith.constant 0 : index
    %c0_54 = arith.constant 0 : index
    %150 = vector.load %arg13[%c0_53, %c0_54] : memref<64x256xf32, #tpu.memory_space<vmem>>, vector<64x256xf32>
    %151 = arith.truncf %149 : vector<8x64xf32> to vector<8x64xbf16>
    %152 = arith.truncf %150 : vector<64x256xf32> to vector<64x256xbf16>
    %cst_55 = arith.constant dense<0.000000e+00> : vector<8x256xf32>
    %153 = tpu.matmul %151, %152, %cst_55 {dimension_numbers = #tpu.dot_dimension_numbers<[1], [0], [0], [1], [0, 0, 1, 1], [], []>} : vector<8x64xbf16>, vector<64x256xbf16>, vector<8x256xf32> -> vector<8x256xf32>
    %c0_56 = arith.constant 0 : index
    %c0_57 = arith.constant 0 : index
    %154 = vector.load %arg14[%c0_56, %c0_57] : memref<1x256xf32, #tpu.memory_space<vmem>>, vector<1x256xf32>
    %155 = vector.broadcast %154 : vector<1x256xf32> to vector<8x256xf32>
    %156 = arith.addf %153, %155 : vector<8x256xf32>
    %cst_58 = arith.constant 5.000000e-01 : f32
    %157 = vector.broadcast %cst_58 : f32 to vector<8x256xf32>
    %158 = arith.mulf %157, %156 : vector<8x256xf32>
    %cst_59 = arith.constant 4.471500e-02 : f32
    %159 = vector.broadcast %cst_59 : f32 to vector<8x256xf32>
    %160 = arith.mulf %159, %156 : vector<8x256xf32>
    %161 = arith.mulf %160, %156 : vector<8x256xf32>
    %162 = arith.mulf %161, %156 : vector<8x256xf32>
    %163 = arith.addf %156, %162 : vector<8x256xf32>
    %cst_60 = arith.constant 0.797884583 : f32
    %164 = vector.broadcast %cst_60 : f32 to vector<8x256xf32>
    %165 = arith.mulf %164, %163 : vector<8x256xf32>
    %166 = math.tanh %165 : vector<8x256xf32>
    %cst_61 = arith.constant 1.000000e+00 : f32
    %167 = vector.broadcast %cst_61 : f32 to vector<8x256xf32>
    %168 = arith.addf %167, %166 : vector<8x256xf32>
    %169 = arith.mulf %158, %168 : vector<8x256xf32>
    %c0_62 = arith.constant 0 : index
    %c0_63 = arith.constant 0 : index
    %170 = vector.load %arg15[%c0_62, %c0_63] : memref<256x64xf32, #tpu.memory_space<vmem>>, vector<256x64xf32>
    %171 = arith.truncf %169 : vector<8x256xf32> to vector<8x256xbf16>
    %172 = arith.truncf %170 : vector<256x64xf32> to vector<256x64xbf16>
    %cst_64 = arith.constant dense<0.000000e+00> : vector<8x64xf32>
    %173 = tpu.matmul %171, %172, %cst_64 {dimension_numbers = #tpu.dot_dimension_numbers<[1], [0], [0], [1], [0, 0, 1, 1], [], []>} : vector<8x256xbf16>, vector<256x64xbf16>, vector<8x64xf32> -> vector<8x64xf32>
    %c0_65 = arith.constant 0 : index
    %c0_66 = arith.constant 0 : index
    %174 = vector.load %arg16[%c0_65, %c0_66] : memref<1x64xf32, #tpu.memory_space<vmem>>, vector<1x64xf32>
    %175 = vector.broadcast %174 : vector<1x64xf32> to vector<8x64xf32>
    %176 = arith.addf %173, %175 : vector<8x64xf32>
    %177 = arith.addf %149, %176 : vector<8x64xf32>
    %c0_67 = arith.constant 0 : index
    %c0_68 = arith.constant 0 : index
    %178 = vector.load %arg17[%c0_67, %c0_68] : memref<1x64xf32, #tpu.memory_space<vmem>>, vector<1x64xf32>
    %c0_69 = arith.constant 0 : index
    %c0_70 = arith.constant 0 : index
    %179 = vector.load %arg18[%c0_69, %c0_70] : memref<1x64xf32, #tpu.memory_space<vmem>>, vector<1x64xf32>
    %cst_71 = arith.constant dense<0.000000e+00> : vector<8xf32>
    %180 = vector.multi_reduction <add>, %177, %cst_71 [1] : vector<8x64xf32> to vector<8xf32>
    %181 = vector.shape_cast %180 : vector<8xf32> to vector<8x1xf32>
    %cst_72 = arith.constant 6.400000e+01 : f32
    %182 = vector.broadcast %cst_72 : f32 to vector<8x1xf32>
    %183 = arith.divf %181, %182 : vector<8x1xf32>
    %184 = vector.broadcast %183 : vector<8x1xf32> to vector<8x64xf32>
    %185 = arith.subf %177, %184 : vector<8x64xf32>
    %186 = arith.mulf %185, %185 : vector<8x64xf32>
    %cst_73 = arith.constant dense<0.000000e+00> : vector<8xf32>
    %187 = vector.multi_reduction <add>, %186, %cst_73 [1] : vector<8x64xf32> to vector<8xf32>
    %188 = vector.shape_cast %187 : vector<8xf32> to vector<8x1xf32>
    %cst_74 = arith.constant 6.400000e+01 : f32
    %189 = vector.broadcast %cst_74 : f32 to vector<8x1xf32>
    %190 = arith.divf %188, %189 : vector<8x1xf32>
    %191 = vector.broadcast %183 : vector<8x1xf32> to vector<8x64xf32>
    %192 = arith.subf %177, %191 : vector<8x64xf32>
    %cst_75 = arith.constant 9.99999996E-13 : f32
    %193 = vector.broadcast %cst_75 : f32 to vector<8x1xf32>
    %194 = arith.addf %190, %193 : vector<8x1xf32>
    %195 = math.rsqrt %194 : vector<8x1xf32>
    %196 = vector.broadcast %195 : vector<8x1xf32> to vector<8x64xf32>
    %197 = arith.mulf %192, %196 : vector<8x64xf32>
    %198 = vector.broadcast %178 : vector<1x64xf32> to vector<8x64xf32>
    %199 = arith.mulf %197, %198 : vector<8x64xf32>
    %200 = vector.broadcast %179 : vector<1x64xf32> to vector<8x64xf32>
    %201 = arith.addf %199, %200 : vector<8x64xf32>
    %c0_76 = arith.constant 0 : index
    %c0_77 = arith.constant 0 : index
    %c0_78 = arith.constant 0 : index
    %202 = vector.load %arg19[%c0_76, %c0_77, %c0_78] : memref<1x8x64xf32, #tpu.memory_space<vmem>>, vector<1x8x64xf32>
    %203 = vector.shape_cast %202 : vector<1x8x64xf32> to vector<8x64xf32>
    %204 = vector.shape_cast %201 : vector<8x64xf32> to vector<1x8x64xf32>
    tpu.vector_store %arg19[%c0_76, %c0_77, %c0_78], %204 {strides = array<i32>} : memref<1x8x64xf32, #tpu.memory_space<vmem>>, vector<1x8x64xf32>,
    return
  }
  func.func @transform_0(%arg0: i32) -> (i32, i32, i32) {
    %c0_i32 = arith.constant 0 : i32
    %c0_i32_0 = arith.constant 0 : i32
    %c0_i32_1 = arith.constant 0 : i32
    return %arg0, %c0_i32, %c0_i32_0 : i32, i32, i32
  }
  func.func @transform_1(%arg0: i32) -> (i32, i32, i32) {
    %c0_i32 = arith.constant 0 : i32
    %c0_i32_0 = arith.constant 0 : i32
    %c0_i32_1 = arith.constant 0 : i32
    return %arg0, %c0_i32, %c0_i32_0 : i32, i32, i32
  }
  func.func @transform_2(%arg0: i32) -> (i32, i32) {
    %c0_i32 = arith.constant 0 : i32
    %c0_i32_0 = arith.constant 0 : i32
    %c0_i32_1 = arith.constant 0 : i32
    return %c0_i32, %c0_i32_0 : i32, i32
  }
  func.func @transform_3(%arg0: i32) -> (i32, i32) {
    %c0_i32 = arith.constant 0 : i32
    %c0_i32_0 = arith.constant 0 : i32
    %c0_i32_1 = arith.constant 0 : i32
    return %c0_i32, %c0_i32_0 : i32, i32
  }
  func.func @transform_4(%arg0: i32) -> (i32, i32) {
    %c0_i32 = arith.constant 0 : i32
    %c0_i32_0 = arith.constant 0 : i32
    %c0_i32_1 = arith.constant 0 : i32
    return %c0_i32, %c0_i32_0 : i32, i32
  }
  func.func @transform_5(%arg0: i32) -> (i32, i32) {
    %c0_i32 = arith.constant 0 : i32
    %c0_i32_0 = arith.constant 0 : i32
    %c0_i32_1 = arith.constant 0 : i32
    return %c0_i32, %c0_i32_0 : i32, i32
  }
  func.func @transform_6(%arg0: i32) -> (i32, i32) {
    %c0_i32 = arith.constant 0 : i32
    %c0_i32_0 = arith.constant 0 : i32
    %c0_i32_1 = arith.constant 0 : i32
    return %c0_i32, %c0_i32_0 : i32, i32
  }
  func.func @transform_7(%arg0: i32) -> (i32, i32) {
    %c0_i32 = arith.constant 0 : i32
    %c0_i32_0 = arith.constant 0 : i32
    %c0_i32_1 = arith.constant 0 : i32
    return %c0_i32, %c0_i32_0 : i32, i32
  }
  func.func @transform_8(%arg0: i32) -> (i32, i32) {
    %c0_i32 = arith.constant 0 : i32
    %c0_i32_0 = arith.constant 0 : i32
    %c0_i32_1 = arith.constant 0 : i32
    return %c0_i32, %c0_i32_0 : i32, i32
  }
  func.func @transform_9(%arg0: i32) -> (i32, i32) {
    %c0_i32 = arith.constant 0 : i32
    %c0_i32_0 = arith.constant 0 : i32
    %c0_i32_1 = arith.constant 0 : i32
    return %c0_i32, %c0_i32_0 : i32, i32
  }
  func.func @transform_10(%arg0: i32) -> (i32, i32) {
    %c0_i32 = arith.constant 0 : i32
    %c0_i32_0 = arith.constant 0 : i32
    %c0_i32_1 = arith.constant 0 : i32
    return %c0_i32, %c0_i32_0 : i32, i32
  }
  func.func @transform_11(%arg0: i32) -> (i32, i32) {
    %c0_i32 = arith.constant 0 : i32
    %c0_i32_0 = arith.constant 0 : i32
    %c0_i32_1 = arith.constant 0 : i32
    return %c0_i32, %c0_i32_0 : i32, i32
  }
  func.func @transform_12(%arg0: i32) -> (i32, i32) {
    %c0_i32 = arith.constant 0 : i32
    %c0_i32_0 = arith.constant 0 : i32
    %c0_i32_1 = arith.constant 0 : i32
    return %c0_i32, %c0_i32_0 : i32, i32
  }
  func.func @transform_13(%arg0: i32) -> (i32, i32) {
    %c0_i32 = arith.constant 0 : i32
    %c0_i32_0 = arith.constant 0 : i32
    %c0_i32_1 = arith.constant 0 : i32
    return %c0_i32, %c0_i32_0 : i32, i32
  }
  func.func @transform_14(%arg0: i32) -> (i32, i32) {
    %c0_i32 = arith.constant 0 : i32
    %c0_i32_0 = arith.constant 0 : i32
    %c0_i32_1 = arith.constant 0 : i32
    return %c0_i32, %c0_i32_0 : i32, i32
  }
  func.func @transform_15(%arg0: i32) -> (i32, i32) {
    %c0_i32 = arith.constant 0 : i32
    %c0_i32_0 = arith.constant 0 : i32
    %c0_i32_1 = arith.constant 0 : i32
    return %c0_i32, %c0_i32_0 : i32, i32
  }
  func.func @transform_16(%arg0: i32) -> (i32, i32) {
    %c0_i32 = arith.constant 0 : i32
    %c0_i32_0 = arith.constant 0 : i32
    %c0_i32_1 = arith.constant 0 : i32
    return %c0_i32, %c0_i32_0 : i32, i32
  }
  func.func @transform_17(%arg0: i32) -> (i32, i32) {
    %c0_i32 = arith.constant 0 : i32
    %c0_i32_0 = arith.constant 0 : i32
    %c0_i32_1 = arith.constant 0 : i32
    return %c0_i32, %c0_i32_0 : i32, i32
  }
  func.func @transform_18(%arg0: i32) -> (i32, i32, i32) {
    %c0_i32 = arith.constant 0 : i32
    %c0_i32_0 = arith.constant 0 : i32
    %c0_i32_1 = arith.constant 0 : i32
    return %arg0, %c0_i32, %c0_i32_0 : i32, i32, i32
  }
}

module attributes {stable_mosaic.version = 11 : i64} {
  func.func @_linear_kernel(%arg0: i32, %arg1: memref<16x768xf32, #tpu.memory_space<vmem>>, %arg2: memref<768x64xf32, #tpu.memory_space<vmem>>, %arg3: memref<1x64xf32, #tpu.memory_space<vmem>>, %arg4: memref<16x64xf32, #tpu.memory_space<vmem>>) attributes {dimension_semantics = [#tpu.dimension_semantics<arbitrary>], iteration_bounds = array<i64: 1>, scalar_prefetch = 0 : i64, scratch_operands = 0 : i64, tpu.core_type = #tpu.core_type<tc>, window_params = [{pipeline_mode = #tpu.pipeline_mode<synchronous>, transform_indices = @transform_0, window_bounds = array<i64: 16, 768>}, {pipeline_mode = #tpu.pipeline_mode<synchronous>, transform_indices = @transform_1, window_bounds = array<i64: 768, 64>}, {pipeline_mode = #tpu.pipeline_mode<synchronous>, transform_indices = @transform_2, window_bounds = array<i64: 1, 64>}, {pipeline_mode = #tpu.pipeline_mode<synchronous>, transform_indices = @transform_3, window_bounds = array<i64: 16, 64>}]} {
    %c0 = arith.constant 0 : index
    %c0_0 = arith.constant 0 : index
    %0 = vector.load %arg1[%c0, %c0_0] : memref<16x768xf32, #tpu.memory_space<vmem>>, vector<16x768xf32>
    %c0_1 = arith.constant 0 : index
    %c0_2 = arith.constant 0 : index
    %1 = vector.load %arg2[%c0_1, %c0_2] : memref<768x64xf32, #tpu.memory_space<vmem>>, vector<768x64xf32>
    %2 = arith.truncf %0 : vector<16x768xf32> to vector<16x768xbf16>
    %3 = arith.truncf %1 : vector<768x64xf32> to vector<768x64xbf16>
    %cst = arith.constant dense<0.000000e+00> : vector<16x64xf32>
    %4 = tpu.matmul %2, %3, %cst {dimension_numbers = #tpu.dot_dimension_numbers<[1], [0], [0], [1], [0, 0, 1, 1], [], []>} : vector<16x768xbf16>, vector<768x64xbf16>, vector<16x64xf32> -> vector<16x64xf32>
    %c0_3 = arith.constant 0 : index
    %c0_4 = arith.constant 0 : index
    %5 = vector.load %arg3[%c0_3, %c0_4] : memref<1x64xf32, #tpu.memory_space<vmem>>, vector<1x64xf32>
    %6 = vector.broadcast %5 : vector<1x64xf32> to vector<16x64xf32>
    %7 = arith.addf %4, %6 : vector<16x64xf32>
    %c0_5 = arith.constant 0 : index
    %c0_6 = arith.constant 0 : index
    %8 = vector.load %arg4[%c0_5, %c0_6] : memref<16x64xf32, #tpu.memory_space<vmem>>, vector<16x64xf32>
    tpu.vector_store %arg4[%c0_5, %c0_6], %7 {strides = array<i32>} : memref<16x64xf32, #tpu.memory_space<vmem>>, vector<16x64xf32>,
    return
  }
  func.func @transform_0(%arg0: i32) -> (i32, i32) {
    %c0_i32 = arith.constant 0 : i32
    %c0_i32_0 = arith.constant 0 : i32
    %c0_i32_1 = arith.constant 0 : i32
    return %c0_i32, %c0_i32_0 : i32, i32
  }
  func.func @transform_1(%arg0: i32) -> (i32, i32) {
    %c0_i32 = arith.constant 0 : i32
    %c0_i32_0 = arith.constant 0 : i32
    %c0_i32_1 = arith.constant 0 : i32
    return %c0_i32, %c0_i32_0 : i32, i32
  }
  func.func @transform_2(%arg0: i32) -> (i32, i32) {
    %c0_i32 = arith.constant 0 : i32
    %c0_i32_0 = arith.constant 0 : i32
    %c0_i32_1 = arith.constant 0 : i32
    return %c0_i32, %c0_i32_0 : i32, i32
  }
  func.func @transform_3(%arg0: i32) -> (i32, i32) {
    %c0_i32 = arith.constant 0 : i32
    %c0_i32_0 = arith.constant 0 : i32
    %c0_i32_1 = arith.constant 0 : i32
    return %c0_i32, %c0_i32_0 : i32, i32
  }
}

module attributes {stable_mosaic.version = 11 : i64} {
  func.func @_layernorm_kernel(%arg0: i32, %arg1: memref<20x64xf32, #tpu.memory_space<vmem>>, %arg2: memref<1x64xf32, #tpu.memory_space<vmem>>, %arg3: memref<1x64xf32, #tpu.memory_space<vmem>>, %arg4: memref<20x64xf32, #tpu.memory_space<vmem>>) attributes {dimension_semantics = [#tpu.dimension_semantics<arbitrary>], iteration_bounds = array<i64: 1>, scalar_prefetch = 0 : i64, scratch_operands = 0 : i64, tpu.core_type = #tpu.core_type<tc>, window_params = [{pipeline_mode = #tpu.pipeline_mode<synchronous>, transform_indices = @transform_0, window_bounds = array<i64: 20, 64>}, {pipeline_mode = #tpu.pipeline_mode<synchronous>, transform_indices = @transform_1, window_bounds = array<i64: 1, 64>}, {pipeline_mode = #tpu.pipeline_mode<synchronous>, transform_indices = @transform_2, window_bounds = array<i64: 1, 64>}, {pipeline_mode = #tpu.pipeline_mode<synchronous>, transform_indices = @transform_3, window_bounds = array<i64: 20, 64>}]} {
    %c0 = arith.constant 0 : index
    %c0_0 = arith.constant 0 : index
    %0 = vector.load %arg1[%c0, %c0_0] : memref<20x64xf32, #tpu.memory_space<vmem>>, vector<20x64xf32>
    %c0_1 = arith.constant 0 : index
    %c0_2 = arith.constant 0 : index
    %1 = vector.load %arg2[%c0_1, %c0_2] : memref<1x64xf32, #tpu.memory_space<vmem>>, vector<1x64xf32>
    %c0_3 = arith.constant 0 : index
    %c0_4 = arith.constant 0 : index
    %2 = vector.load %arg3[%c0_3, %c0_4] : memref<1x64xf32, #tpu.memory_space<vmem>>, vector<1x64xf32>
    %cst = arith.constant dense<0.000000e+00> : vector<20xf32>
    %3 = vector.multi_reduction <add>, %0, %cst [1] : vector<20x64xf32> to vector<20xf32>
    %4 = vector.shape_cast %3 : vector<20xf32> to vector<20x1xf32>
    %cst_5 = arith.constant 6.400000e+01 : f32
    %5 = vector.broadcast %cst_5 : f32 to vector<20x1xf32>
    %6 = arith.divf %4, %5 : vector<20x1xf32>
    %7 = vector.broadcast %6 : vector<20x1xf32> to vector<20x64xf32>
    %8 = arith.subf %0, %7 : vector<20x64xf32>
    %9 = arith.mulf %8, %8 : vector<20x64xf32>
    %cst_6 = arith.constant dense<0.000000e+00> : vector<20xf32>
    %10 = vector.multi_reduction <add>, %9, %cst_6 [1] : vector<20x64xf32> to vector<20xf32>
    %11 = vector.shape_cast %10 : vector<20xf32> to vector<20x1xf32>
    %cst_7 = arith.constant 6.400000e+01 : f32
    %12 = vector.broadcast %cst_7 : f32 to vector<20x1xf32>
    %13 = arith.divf %11, %12 : vector<20x1xf32>
    %14 = vector.broadcast %6 : vector<20x1xf32> to vector<20x64xf32>
    %15 = arith.subf %0, %14 : vector<20x64xf32>
    %cst_8 = arith.constant 9.99999997E-7 : f32
    %16 = vector.broadcast %cst_8 : f32 to vector<20x1xf32>
    %17 = arith.addf %13, %16 : vector<20x1xf32>
    %18 = math.rsqrt %17 : vector<20x1xf32>
    %19 = vector.broadcast %18 : vector<20x1xf32> to vector<20x64xf32>
    %20 = arith.mulf %15, %19 : vector<20x64xf32>
    %21 = vector.broadcast %1 : vector<1x64xf32> to vector<20x64xf32>
    %22 = arith.mulf %20, %21 : vector<20x64xf32>
    %23 = vector.broadcast %2 : vector<1x64xf32> to vector<20x64xf32>
    %24 = arith.addf %22, %23 : vector<20x64xf32>
    %c0_9 = arith.constant 0 : index
    %c0_10 = arith.constant 0 : index
    %25 = vector.load %arg4[%c0_9, %c0_10] : memref<20x64xf32, #tpu.memory_space<vmem>>, vector<20x64xf32>
    tpu.vector_store %arg4[%c0_9, %c0_10], %24 {strides = array<i32>} : memref<20x64xf32, #tpu.memory_space<vmem>>, vector<20x64xf32>,
    return
  }
  func.func @transform_0(%arg0: i32) -> (i32, i32) {
    %c0_i32 = arith.constant 0 : i32
    %c0_i32_0 = arith.constant 0 : i32
    %c0_i32_1 = arith.constant 0 : i32
    return %c0_i32, %c0_i32_0 : i32, i32
  }
  func.func @transform_1(%arg0: i32) -> (i32, i32) {
    %c0_i32 = arith.constant 0 : i32
    %c0_i32_0 = arith.constant 0 : i32
    %c0_i32_1 = arith.constant 0 : i32
    return %c0_i32, %c0_i32_0 : i32, i32
  }
  func.func @transform_2(%arg0: i32) -> (i32, i32) {
    %c0_i32 = arith.constant 0 : i32
    %c0_i32_0 = arith.constant 0 : i32
    %c0_i32_1 = arith.constant 0 : i32
    return %c0_i32, %c0_i32_0 : i32, i32
  }
  func.func @transform_3(%arg0: i32) -> (i32, i32) {
    %c0_i32 = arith.constant 0 : i32
    %c0_i32_0 = arith.constant 0 : i32
    %c0_i32_1 = arith.constant 0 : i32
    return %c0_i32, %c0_i32_0 : i32, i32
  }
}

module attributes {stable_mosaic.version = 11 : i64} {
  func.func @_vit_block_kernel(%arg0: i32, %arg1: memref<1x5x64xf32, #tpu.memory_space<vmem>>, %arg2: memref<1x64xf32, #tpu.memory_space<vmem>>, %arg3: memref<1x64xf32, #tpu.memory_space<vmem>>, %arg4: memref<64x64xf32, #tpu.memory_space<vmem>>, %arg5: memref<1x64xf32, #tpu.memory_space<vmem>>, %arg6: memref<64x64xf32, #tpu.memory_space<vmem>>, %arg7: memref<1x64xf32, #tpu.memory_space<vmem>>, %arg8: memref<64x64xf32, #tpu.memory_space<vmem>>, %arg9: memref<1x64xf32, #tpu.memory_space<vmem>>, %arg10: memref<64x64xf32, #tpu.memory_space<vmem>>, %arg11: memref<1x64xf32, #tpu.memory_space<vmem>>, %arg12: memref<1x64xf32, #tpu.memory_space<vmem>>, %arg13: memref<1x64xf32, #tpu.memory_space<vmem>>, %arg14: memref<64x256xf32, #tpu.memory_space<vmem>>, %arg15: memref<1x256xf32, #tpu.memory_space<vmem>>, %arg16: memref<256x64xf32, #tpu.memory_space<vmem>>, %arg17: memref<1x64xf32, #tpu.memory_space<vmem>>, %arg18: memref<1x5x64xf32, #tpu.memory_space<vmem>>) attributes {dimension_semantics = [#tpu.dimension_semantics<parallel>], iteration_bounds = array<i64: 4>, scalar_prefetch = 0 : i64, scratch_operands = 0 : i64, tpu.core_type = #tpu.core_type<tc>, window_params = [{transform_indices = @transform_0, window_bounds = array<i64: 1, 5, 64>}, {pipeline_mode = #tpu.pipeline_mode<synchronous>, transform_indices = @transform_1, window_bounds = array<i64: 1, 64>}, {pipeline_mode = #tpu.pipeline_mode<synchronous>, transform_indices = @transform_2, window_bounds = array<i64: 1, 64>}, {pipeline_mode = #tpu.pipeline_mode<synchronous>, transform_indices = @transform_3, window_bounds = array<i64: 64, 64>}, {pipeline_mode = #tpu.pipeline_mode<synchronous>, transform_indices = @transform_4, window_bounds = array<i64: 1, 64>}, {pipeline_mode = #tpu.pipeline_mode<synchronous>, transform_indices = @transform_5, window_bounds = array<i64: 64, 64>}, {pipeline_mode = #tpu.pipeline_mode<synchronous>, transform_indices = @transform_6, window_bounds = array<i64: 1, 64>}, {pipeline_mode = #tpu.pipeline_mode<synchronous>, transform_indices = @transform_7, window_bounds = array<i64: 64, 64>}, {pipeline_mode = #tpu.pipeline_mode<synchronous>, transform_indices = @transform_8, window_bounds = array<i64: 1, 64>}, {pipeline_mode = #tpu.pipeline_mode<synchronous>, transform_indices = @transform_9, window_bounds = array<i64: 64, 64>}, {pipeline_mode = #tpu.pipeline_mode<synchronous>, transform_indices = @transform_10, window_bounds = array<i64: 1, 64>}, {pipeline_mode = #tpu.pipeline_mode<synchronous>, transform_indices = @transform_11, window_bounds = array<i64: 1, 64>}, {pipeline_mode = #tpu.pipeline_mode<synchronous>, transform_indices = @transform_12, window_bounds = array<i64: 1, 64>}, {pipeline_mode = #tpu.pipeline_mode<synchronous>, transform_indices = @transform_13, window_bounds = array<i64: 64, 256>}, {pipeline_mode = #tpu.pipeline_mode<synchronous>, transform_indices = @transform_14, window_bounds = array<i64: 1, 256>}, {pipeline_mode = #tpu.pipeline_mode<synchronous>, transform_indices = @transform_15, window_bounds = array<i64: 256, 64>}, {pipeline_mode = #tpu.pipeline_mode<synchronous>, transform_indices = @transform_16, window_bounds = array<i64: 1, 64>}, {transform_indices = @transform_17, window_bounds = array<i64: 1, 5, 64>}]} {
    %c0 = arith.constant 0 : index
    %c0_0 = arith.constant 0 : index
    %c0_1 = arith.constant 0 : index
    %0 = vector.load %arg1[%c0, %c0_0, %c0_1] : memref<1x5x64xf32, #tpu.memory_space<vmem>>, vector<1x5x64xf32>
    %1 = vector.shape_cast %0 : vector<1x5x64xf32> to vector<5x64xf32>
    %c0_2 = arith.constant 0 : index
    %c0_3 = arith.constant 0 : index
    %2 = vector.load %arg2[%c0_2, %c0_3] : memref<1x64xf32, #tpu.memory_space<vmem>>, vector<1x64xf32>
    %c0_4 = arith.constant 0 : index
    %c0_5 = arith.constant 0 : index
    %3 = vector.load %arg3[%c0_4, %c0_5] : memref<1x64xf32, #tpu.memory_space<vmem>>, vector<1x64xf32>
    %cst = arith.constant dense<0.000000e+00> : vector<5xf32>
    %4 = vector.multi_reduction <add>, %1, %cst [1] : vector<5x64xf32> to vector<5xf32>
    %5 = vector.shape_cast %4 : vector<5xf32> to vector<5x1xf32>
    %cst_6 = arith.constant 6.400000e+01 : f32
    %6 = vector.broadcast %cst_6 : f32 to vector<5x1xf32>
    %7 = arith.divf %5, %6 : vector<5x1xf32>
    %8 = vector.broadcast %7 : vector<5x1xf32> to vector<5x64xf32>
    %9 = arith.subf %1, %8 : vector<5x64xf32>
    %10 = arith.mulf %9, %9 : vector<5x64xf32>
    %cst_7 = arith.constant dense<0.000000e+00> : vector<5xf32>
    %11 = vector.multi_reduction <add>, %10, %cst_7 [1] : vector<5x64xf32> to vector<5xf32>
    %12 = vector.shape_cast %11 : vector<5xf32> to vector<5x1xf32>
    %cst_8 = arith.constant 6.400000e+01 : f32
    %13 = vector.broadcast %cst_8 : f32 to vector<5x1xf32>
    %14 = arith.divf %12, %13 : vector<5x1xf32>
    %15 = vector.broadcast %7 : vector<5x1xf32> to vector<5x64xf32>
    %16 = arith.subf %1, %15 : vector<5x64xf32>
    %cst_9 = arith.constant 9.99999997E-7 : f32
    %17 = vector.broadcast %cst_9 : f32 to vector<5x1xf32>
    %18 = arith.addf %14, %17 : vector<5x1xf32>
    %19 = math.rsqrt %18 : vector<5x1xf32>
    %20 = vector.broadcast %19 : vector<5x1xf32> to vector<5x64xf32>
    %21 = arith.mulf %16, %20 : vector<5x64xf32>
    %22 = vector.broadcast %2 : vector<1x64xf32> to vector<5x64xf32>
    %23 = arith.mulf %21, %22 : vector<5x64xf32>
    %24 = vector.broadcast %3 : vector<1x64xf32> to vector<5x64xf32>
    %25 = arith.addf %23, %24 : vector<5x64xf32>
    %c0_10 = arith.constant 0 : index
    %c0_11 = arith.constant 0 : index
    %26 = vector.load %arg4[%c0_10, %c0_11] : memref<64x64xf32, #tpu.memory_space<vmem>>, vector<64x64xf32>
    %27 = arith.truncf %25 : vector<5x64xf32> to vector<5x64xbf16>
    %28 = arith.truncf %26 : vector<64x64xf32> to vector<64x64xbf16>
    %cst_12 = arith.constant dense<0.000000e+00> : vector<5x64xf32>
    %29 = tpu.matmul %27, %28, %cst_12 {dimension_numbers = #tpu.dot_dimension_numbers<[1], [0], [0], [1], [0, 0, 1, 1], [], []>} : vector<5x64xbf16>, vector<64x64xbf16>, vector<5x64xf32> -> vector<5x64xf32>
    %c0_13 = arith.constant 0 : index
    %c0_14 = arith.constant 0 : index
    %30 = vector.load %arg5[%c0_13, %c0_14] : memref<1x64xf32, #tpu.memory_space<vmem>>, vector<1x64xf32>
    %31 = vector.broadcast %30 : vector<1x64xf32> to vector<5x64xf32>
    %32 = arith.addf %29, %31 : vector<5x64xf32>
    %c0_15 = arith.constant 0 : index
    %c0_16 = arith.constant 0 : index
    %33 = vector.load %arg6[%c0_15, %c0_16] : memref<64x64xf32, #tpu.memory_space<vmem>>, vector<64x64xf32>
    %34 = arith.truncf %25 : vector<5x64xf32> to vector<5x64xbf16>
    %35 = arith.truncf %33 : vector<64x64xf32> to vector<64x64xbf16>
    %cst_17 = arith.constant dense<0.000000e+00> : vector<5x64xf32>
    %36 = tpu.matmul %34, %35, %cst_17 {dimension_numbers = #tpu.dot_dimension_numbers<[1], [0], [0], [1], [0, 0, 1, 1], [], []>} : vector<5x64xbf16>, vector<64x64xbf16>, vector<5x64xf32> -> vector<5x64xf32>
    %c0_18 = arith.constant 0 : index
    %c0_19 = arith.constant 0 : index
    %37 = vector.load %arg7[%c0_18, %c0_19] : memref<1x64xf32, #tpu.memory_space<vmem>>, vector<1x64xf32>
    %38 = vector.broadcast %37 : vector<1x64xf32> to vector<5x64xf32>
    %39 = arith.addf %36, %38 : vector<5x64xf32>
    %c0_20 = arith.constant 0 : index
    %c0_21 = arith.constant 0 : index
    %40 = vector.load %arg8[%c0_20, %c0_21] : memref<64x64xf32, #tpu.memory_space<vmem>>, vector<64x64xf32>
    %41 = arith.truncf %25 : vector<5x64xf32> to vector<5x64xbf16>
    %42 = arith.truncf %40 : vector<64x64xf32> to vector<64x64xbf16>
    %cst_22 = arith.constant dense<0.000000e+00> : vector<5x64xf32>
    %43 = tpu.matmul %41, %42, %cst_22 {dimension_numbers = #tpu.dot_dimension_numbers<[1], [0], [0], [1], [0, 0, 1, 1], [], []>} : vector<5x64xbf16>, vector<64x64xbf16>, vector<5x64xf32> -> vector<5x64xf32>
    %c0_23 = arith.constant 0 : index
    %c0_24 = arith.constant 0 : index
    %44 = vector.load %arg9[%c0_23, %c0_24] : memref<1x64xf32, #tpu.memory_space<vmem>>, vector<1x64xf32>
    %45 = vector.broadcast %44 : vector<1x64xf32> to vector<5x64xf32>
    %46 = arith.addf %43, %45 : vector<5x64xf32>
    %47 = vector.extract_strided_slice %32 {offsets = [0, 0], sizes = [5, 16], strides = [1, 1]} : vector<5x64xf32> to vector<5x16xf32>
    %48 = vector.extract_strided_slice %39 {offsets = [0, 0], sizes = [5, 16], strides = [1, 1]} : vector<5x64xf32> to vector<5x16xf32>
    %49 = arith.truncf %47 : vector<5x16xf32> to vector<5x16xbf16>
    %50 = arith.truncf %48 : vector<5x16xf32> to vector<5x16xbf16>
    %cst_25 = arith.constant dense<0.000000e+00> : vector<5x5xf32>
    %51 = tpu.matmul %49, %50, %cst_25 {dimension_numbers = #tpu.dot_dimension_numbers<[1], [1], [0], [0], [0, 0, 1, 0], [], []>} : vector<5x16xbf16>, vector<5x16xbf16>, vector<5x5xf32> -> vector<5x5xf32>
    %cst_26 = arith.constant 2.500000e-01 : f32
    %52 = vector.broadcast %cst_26 : f32 to vector<5x5xf32>
    %53 = arith.mulf %51, %52 : vector<5x5xf32>
    %cst_27 = arith.constant dense<0xFF800000> : vector<5xf32>
    %54 = vector.multi_reduction <maximumf>, %53, %cst_27 [1] : vector<5x5xf32> to vector<5xf32>
    %55 = vector.shape_cast %54 : vector<5xf32> to vector<5x1xf32>
    %56 = vector.broadcast %55 : vector<5x1xf32> to vector<5x5xf32>
    %57 = arith.subf %53, %56 : vector<5x5xf32>
    %58 = math.exp %57 : vector<5x5xf32>
    %cst_28 = arith.constant dense<0.000000e+00> : vector<5xf32>
    %59 = vector.multi_reduction <add>, %58, %cst_28 [1] : vector<5x5xf32> to vector<5xf32>
    %60 = vector.shape_cast %59 : vector<5xf32> to vector<5x1xf32>
    %61 = tpu.reciprocal %60 {approx = true} : vector<5x1xf32> -> vector<5x1xf32>
    %62 = vector.broadcast %61 : vector<5x1xf32> to vector<5x5xf32>
    %63 = arith.mulf %58, %62 : vector<5x5xf32>
    %64 = vector.extract_strided_slice %46 {offsets = [0, 0], sizes = [5, 16], strides = [1, 1]} : vector<5x64xf32> to vector<5x16xf32>
    %65 = arith.truncf %63 : vector<5x5xf32> to vector<5x5xbf16>
    %66 = arith.truncf %64 : vector<5x16xf32> to vector<5x16xbf16>
    %cst_29 = arith.constant dense<0.000000e+00> : vector<5x16xf32>
    %67 = tpu.matmul %65, %66, %cst_29 {dimension_numbers = #tpu.dot_dimension_numbers<[1], [0], [0], [1], [0, 0, 1, 1], [], []>} : vector<5x5xbf16>, vector<5x16xbf16>, vector<5x16xf32> -> vector<5x16xf32>
    %68 = vector.extract_strided_slice %32 {offsets = [0, 16], sizes = [5, 16], strides = [1, 1]} : vector<5x64xf32> to vector<5x16xf32>
    %69 = vector.extract_strided_slice %39 {offsets = [0, 16], sizes = [5, 16], strides = [1, 1]} : vector<5x64xf32> to vector<5x16xf32>
    %70 = arith.truncf %68 : vector<5x16xf32> to vector<5x16xbf16>
    %71 = arith.truncf %69 : vector<5x16xf32> to vector<5x16xbf16>
    %cst_30 = arith.constant dense<0.000000e+00> : vector<5x5xf32>
    %72 = tpu.matmul %70, %71, %cst_30 {dimension_numbers = #tpu.dot_dimension_numbers<[1], [1], [0], [0], [0, 0, 1, 0], [], []>} : vector<5x16xbf16>, vector<5x16xbf16>, vector<5x5xf32> -> vector<5x5xf32>
    %cst_31 = arith.constant 2.500000e-01 : f32
    %73 = vector.broadcast %cst_31 : f32 to vector<5x5xf32>
    %74 = arith.mulf %72, %73 : vector<5x5xf32>
    %cst_32 = arith.constant dense<0xFF800000> : vector<5xf32>
    %75 = vector.multi_reduction <maximumf>, %74, %cst_32 [1] : vector<5x5xf32> to vector<5xf32>
    %76 = vector.shape_cast %75 : vector<5xf32> to vector<5x1xf32>
    %77 = vector.broadcast %76 : vector<5x1xf32> to vector<5x5xf32>
    %78 = arith.subf %74, %77 : vector<5x5xf32>
    %79 = math.exp %78 : vector<5x5xf32>
    %cst_33 = arith.constant dense<0.000000e+00> : vector<5xf32>
    %80 = vector.multi_reduction <add>, %79, %cst_33 [1] : vector<5x5xf32> to vector<5xf32>
    %81 = vector.shape_cast %80 : vector<5xf32> to vector<5x1xf32>
    %82 = tpu.reciprocal %81 {approx = true} : vector<5x1xf32> -> vector<5x1xf32>
    %83 = vector.broadcast %82 : vector<5x1xf32> to vector<5x5xf32>
    %84 = arith.mulf %79, %83 : vector<5x5xf32>
    %85 = vector.extract_strided_slice %46 {offsets = [0, 16], sizes = [5, 16], strides = [1, 1]} : vector<5x64xf32> to vector<5x16xf32>
    %86 = arith.truncf %84 : vector<5x5xf32> to vector<5x5xbf16>
    %87 = arith.truncf %85 : vector<5x16xf32> to vector<5x16xbf16>
    %cst_34 = arith.constant dense<0.000000e+00> : vector<5x16xf32>
    %88 = tpu.matmul %86, %87, %cst_34 {dimension_numbers = #tpu.dot_dimension_numbers<[1], [0], [0], [1], [0, 0, 1, 1], [], []>} : vector<5x5xbf16>, vector<5x16xbf16>, vector<5x16xf32> -> vector<5x16xf32>
    %89 = vector.extract_strided_slice %32 {offsets = [0, 32], sizes = [5, 16], strides = [1, 1]} : vector<5x64xf32> to vector<5x16xf32>
    %90 = vector.extract_strided_slice %39 {offsets = [0, 32], sizes = [5, 16], strides = [1, 1]} : vector<5x64xf32> to vector<5x16xf32>
    %91 = arith.truncf %89 : vector<5x16xf32> to vector<5x16xbf16>
    %92 = arith.truncf %90 : vector<5x16xf32> to vector<5x16xbf16>
    %cst_35 = arith.constant dense<0.000000e+00> : vector<5x5xf32>
    %93 = tpu.matmul %91, %92, %cst_35 {dimension_numbers = #tpu.dot_dimension_numbers<[1], [1], [0], [0], [0, 0, 1, 0], [], []>} : vector<5x16xbf16>, vector<5x16xbf16>, vector<5x5xf32> -> vector<5x5xf32>
    %cst_36 = arith.constant 2.500000e-01 : f32
    %94 = vector.broadcast %cst_36 : f32 to vector<5x5xf32>
    %95 = arith.mulf %93, %94 : vector<5x5xf32>
    %cst_37 = arith.constant dense<0xFF800000> : vector<5xf32>
    %96 = vector.multi_reduction <maximumf>, %95, %cst_37 [1] : vector<5x5xf32> to vector<5xf32>
    %97 = vector.shape_cast %96 : vector<5xf32> to vector<5x1xf32>
    %98 = vector.broadcast %97 : vector<5x1xf32> to vector<5x5xf32>
    %99 = arith.subf %95, %98 : vector<5x5xf32>
    %100 = math.exp %99 : vector<5x5xf32>
    %cst_38 = arith.constant dense<0.000000e+00> : vector<5xf32>
    %101 = vector.multi_reduction <add>, %100, %cst_38 [1] : vector<5x5xf32> to vector<5xf32>
    %102 = vector.shape_cast %101 : vector<5xf32> to vector<5x1xf32>
    %103 = tpu.reciprocal %102 {approx = true} : vector<5x1xf32> -> vector<5x1xf32>
    %104 = vector.broadcast %103 : vector<5x1xf32> to vector<5x5xf32>
    %105 = arith.mulf %100, %104 : vector<5x5xf32>
    %106 = vector.extract_strided_slice %46 {offsets = [0, 32], sizes = [5, 16], strides = [1, 1]} : vector<5x64xf32> to vector<5x16xf32>
    %107 = arith.truncf %105 : vector<5x5xf32> to vector<5x5xbf16>
    %108 = arith.truncf %106 : vector<5x16xf32> to vector<5x16xbf16>
    %cst_39 = arith.constant dense<0.000000e+00> : vector<5x16xf32>
    %109 = tpu.matmul %107, %108, %cst_39 {dimension_numbers = #tpu.dot_dimension_numbers<[1], [0], [0], [1], [0, 0, 1, 1], [], []>} : vector<5x5xbf16>, vector<5x16xbf16>, vector<5x16xf32> -> vector<5x16xf32>
    %110 = vector.extract_strided_slice %32 {offsets = [0, 48], sizes = [5, 16], strides = [1, 1]} : vector<5x64xf32> to vector<5x16xf32>
    %111 = vector.extract_strided_slice %39 {offsets = [0, 48], sizes = [5, 16], strides = [1, 1]} : vector<5x64xf32> to vector<5x16xf32>
    %112 = arith.truncf %110 : vector<5x16xf32> to vector<5x16xbf16>
    %113 = arith.truncf %111 : vector<5x16xf32> to vector<5x16xbf16>
    %cst_40 = arith.constant dense<0.000000e+00> : vector<5x5xf32>
    %114 = tpu.matmul %112, %113, %cst_40 {dimension_numbers = #tpu.dot_dimension_numbers<[1], [1], [0], [0], [0, 0, 1, 0], [], []>} : vector<5x16xbf16>, vector<5x16xbf16>, vector<5x5xf32> -> vector<5x5xf32>
    %cst_41 = arith.constant 2.500000e-01 : f32
    %115 = vector.broadcast %cst_41 : f32 to vector<5x5xf32>
    %116 = arith.mulf %114, %115 : vector<5x5xf32>
    %cst_42 = arith.constant dense<0xFF800000> : vector<5xf32>
    %117 = vector.multi_reduction <maximumf>, %116, %cst_42 [1] : vector<5x5xf32> to vector<5xf32>
    %118 = vector.shape_cast %117 : vector<5xf32> to vector<5x1xf32>
    %119 = vector.broadcast %118 : vector<5x1xf32> to vector<5x5xf32>
    %120 = arith.subf %116, %119 : vector<5x5xf32>
    %121 = math.exp %120 : vector<5x5xf32>
    %cst_43 = arith.constant dense<0.000000e+00> : vector<5xf32>
    %122 = vector.multi_reduction <add>, %121, %cst_43 [1] : vector<5x5xf32> to vector<5xf32>
    %123 = vector.shape_cast %122 : vector<5xf32> to vector<5x1xf32>
    %124 = tpu.reciprocal %123 {approx = true} : vector<5x1xf32> -> vector<5x1xf32>
    %125 = vector.broadcast %124 : vector<5x1xf32> to vector<5x5xf32>
    %126 = arith.mulf %121, %125 : vector<5x5xf32>
    %127 = vector.extract_strided_slice %46 {offsets = [0, 48], sizes = [5, 16], strides = [1, 1]} : vector<5x64xf32> to vector<5x16xf32>
    %128 = arith.truncf %126 : vector<5x5xf32> to vector<5x5xbf16>
    %129 = arith.truncf %127 : vector<5x16xf32> to vector<5x16xbf16>
    %cst_44 = arith.constant dense<0.000000e+00> : vector<5x16xf32>
    %130 = tpu.matmul %128, %129, %cst_44 {dimension_numbers = #tpu.dot_dimension_numbers<[1], [0], [0], [1], [0, 0, 1, 1], [], []>} : vector<5x5xbf16>, vector<5x16xbf16>, vector<5x16xf32> -> vector<5x16xf32>
    %131 = tpu.concatenate %67, %88, %109, %130 in 1 : vector<5x16xf32>, vector<5x16xf32>, vector<5x16xf32>, vector<5x16xf32> -> vector<5x64xf32>
    %c0_45 = arith.constant 0 : index
    %c0_46 = arith.constant 0 : index
    %132 = vector.load %arg10[%c0_45, %c0_46] : memref<64x64xf32, #tpu.memory_space<vmem>>, vector<64x64xf32>
    %133 = arith.truncf %131 : vector<5x64xf32> to vector<5x64xbf16>
    %134 = arith.truncf %132 : vector<64x64xf32> to vector<64x64xbf16>
    %cst_47 = arith.constant dense<0.000000e+00> : vector<5x64xf32>
    %135 = tpu.matmul %133, %134, %cst_47 {dimension_numbers = #tpu.dot_dimension_numbers<[1], [0], [0], [1], [0, 0, 1, 1], [], []>} : vector<5x64xbf16>, vector<64x64xbf16>, vector<5x64xf32> -> vector<5x64xf32>
    %136 = arith.addf %1, %135 : vector<5x64xf32>
    %c0_48 = arith.constant 0 : index
    %c0_49 = arith.constant 0 : index
    %137 = vector.load %arg11[%c0_48, %c0_49] : memref<1x64xf32, #tpu.memory_space<vmem>>, vector<1x64xf32>
    %138 = vector.broadcast %137 : vector<1x64xf32> to vector<5x64xf32>
    %139 = arith.addf %136, %138 : vector<5x64xf32>
    %c0_50 = arith.constant 0 : index
    %c0_51 = arith.constant 0 : index
    %140 = vector.load %arg12[%c0_50, %c0_51] : memref<1x64xf32, #tpu.memory_space<vmem>>, vector<1x64xf32>
    %c0_52 = arith.constant 0 : index
    %c0_53 = arith.constant 0 : index
    %141 = vector.load %arg13[%c0_52, %c0_53] : memref<1x64xf32, #tpu.memory_space<vmem>>, vector<1x64xf32>
    %cst_54 = arith.constant dense<0.000000e+00> : vector<5xf32>
    %142 = vector.multi_reduction <add>, %139, %cst_54 [1] : vector<5x64xf32> to vector<5xf32>
    %143 = vector.shape_cast %142 : vector<5xf32> to vector<5x1xf32>
    %cst_55 = arith.constant 6.400000e+01 : f32
    %144 = vector.broadcast %cst_55 : f32 to vector<5x1xf32>
    %145 = arith.divf %143, %144 : vector<5x1xf32>
    %146 = vector.broadcast %145 : vector<5x1xf32> to vector<5x64xf32>
    %147 = arith.subf %139, %146 : vector<5x64xf32>
    %148 = arith.mulf %147, %147 : vector<5x64xf32>
    %cst_56 = arith.constant dense<0.000000e+00> : vector<5xf32>
    %149 = vector.multi_reduction <add>, %148, %cst_56 [1] : vector<5x64xf32> to vector<5xf32>
    %150 = vector.shape_cast %149 : vector<5xf32> to vector<5x1xf32>
    %cst_57 = arith.constant 6.400000e+01 : f32
    %151 = vector.broadcast %cst_57 : f32 to vector<5x1xf32>
    %152 = arith.divf %150, %151 : vector<5x1xf32>
    %153 = vector.broadcast %145 : vector<5x1xf32> to vector<5x64xf32>
    %154 = arith.subf %139, %153 : vector<5x64xf32>
    %cst_58 = arith.constant 9.99999997E-7 : f32
    %155 = vector.broadcast %cst_58 : f32 to vector<5x1xf32>
    %156 = arith.addf %152, %155 : vector<5x1xf32>
    %157 = math.rsqrt %156 : vector<5x1xf32>
    %158 = vector.broadcast %157 : vector<5x1xf32> to vector<5x64xf32>
    %159 = arith.mulf %154, %158 : vector<5x64xf32>
    %160 = vector.broadcast %140 : vector<1x64xf32> to vector<5x64xf32>
    %161 = arith.mulf %159, %160 : vector<5x64xf32>
    %162 = vector.broadcast %141 : vector<1x64xf32> to vector<5x64xf32>
    %163 = arith.addf %161, %162 : vector<5x64xf32>
    %c0_59 = arith.constant 0 : index
    %c0_60 = arith.constant 0 : index
    %164 = vector.load %arg14[%c0_59, %c0_60] : memref<64x256xf32, #tpu.memory_space<vmem>>, vector<64x256xf32>
    %165 = arith.truncf %163 : vector<5x64xf32> to vector<5x64xbf16>
    %166 = arith.truncf %164 : vector<64x256xf32> to vector<64x256xbf16>
    %cst_61 = arith.constant dense<0.000000e+00> : vector<5x256xf32>
    %167 = tpu.matmul %165, %166, %cst_61 {dimension_numbers = #tpu.dot_dimension_numbers<[1], [0], [0], [1], [0, 0, 1, 1], [], []>} : vector<5x64xbf16>, vector<64x256xbf16>, vector<5x256xf32> -> vector<5x256xf32>
    %c0_62 = arith.constant 0 : index
    %c0_63 = arith.constant 0 : index
    %168 = vector.load %arg15[%c0_62, %c0_63] : memref<1x256xf32, #tpu.memory_space<vmem>>, vector<1x256xf32>
    %169 = vector.broadcast %168 : vector<1x256xf32> to vector<5x256xf32>
    %170 = arith.addf %167, %169 : vector<5x256xf32>
    %cst_64 = arith.constant 5.000000e-01 : f32
    %171 = vector.broadcast %cst_64 : f32 to vector<5x256xf32>
    %172 = arith.mulf %171, %170 : vector<5x256xf32>
    %cst_65 = arith.constant 4.471500e-02 : f32
    %173 = vector.broadcast %cst_65 : f32 to vector<5x256xf32>
    %174 = arith.mulf %173, %170 : vector<5x256xf32>
    %175 = arith.mulf %174, %170 : vector<5x256xf32>
    %176 = arith.mulf %175, %170 : vector<5x256xf32>
    %177 = arith.addf %170, %176 : vector<5x256xf32>
    %cst_66 = arith.constant 0.797884583 : f32
    %178 = vector.broadcast %cst_66 : f32 to vector<5x256xf32>
    %179 = arith.mulf %178, %177 : vector<5x256xf32>
    %180 = math.tanh %179 : vector<5x256xf32>
    %cst_67 = arith.constant 1.000000e+00 : f32
    %181 = vector.broadcast %cst_67 : f32 to vector<5x256xf32>
    %182 = arith.addf %181, %180 : vector<5x256xf32>
    %183 = arith.mulf %172, %182 : vector<5x256xf32>
    %c0_68 = arith.constant 0 : index
    %c0_69 = arith.constant 0 : index
    %184 = vector.load %arg16[%c0_68, %c0_69] : memref<256x64xf32, #tpu.memory_space<vmem>>, vector<256x64xf32>
    %185 = arith.truncf %183 : vector<5x256xf32> to vector<5x256xbf16>
    %186 = arith.truncf %184 : vector<256x64xf32> to vector<256x64xbf16>
    %cst_70 = arith.constant dense<0.000000e+00> : vector<5x64xf32>
    %187 = tpu.matmul %185, %186, %cst_70 {dimension_numbers = #tpu.dot_dimension_numbers<[1], [0], [0], [1], [0, 0, 1, 1], [], []>} : vector<5x256xbf16>, vector<256x64xbf16>, vector<5x64xf32> -> vector<5x64xf32>
    %188 = arith.addf %139, %187 : vector<5x64xf32>
    %c0_71 = arith.constant 0 : index
    %c0_72 = arith.constant 0 : index
    %189 = vector.load %arg17[%c0_71, %c0_72] : memref<1x64xf32, #tpu.memory_space<vmem>>, vector<1x64xf32>
    %190 = vector.broadcast %189 : vector<1x64xf32> to vector<5x64xf32>
    %191 = arith.addf %188, %190 : vector<5x64xf32>
    %c0_73 = arith.constant 0 : index
    %c0_74 = arith.constant 0 : index
    %c0_75 = arith.constant 0 : index
    %192 = vector.load %arg18[%c0_73, %c0_74, %c0_75] : memref<1x5x64xf32, #tpu.memory_space<vmem>>, vector<1x5x64xf32>
    %193 = vector.shape_cast %192 : vector<1x5x64xf32> to vector<5x64xf32>
    %194 = vector.shape_cast %191 : vector<5x64xf32> to vector<1x5x64xf32>
    tpu.vector_store %arg18[%c0_73, %c0_74, %c0_75], %194 {strides = array<i32>} : memref<1x5x64xf32, #tpu.memory_space<vmem>>, vector<1x5x64xf32>,
    return
  }
  func.func @transform_0(%arg0: i32) -> (i32, i32, i32) {
    %c0_i32 = arith.constant 0 : i32
    %c0_i32_0 = arith.constant 0 : i32
    %c0_i32_1 = arith.constant 0 : i32
    return %arg0, %c0_i32, %c0_i32_0 : i32, i32, i32
  }
  func.func @transform_1(%arg0: i32) -> (i32, i32) {
    %c0_i32 = arith.constant 0 : i32
    %c0_i32_0 = arith.constant 0 : i32
    %c0_i32_1 = arith.constant 0 : i32
    return %c0_i32, %c0_i32_0 : i32, i32
  }
  func.func @transform_2(%arg0: i32) -> (i32, i32) {
    %c0_i32 = arith.constant 0 : i32
    %c0_i32_0 = arith.constant 0 : i32
    %c0_i32_1 = arith.constant 0 : i32
    return %c0_i32, %c0_i32_0 : i32, i32
  }
  func.func @transform_3(%arg0: i32) -> (i32, i32) {
    %c0_i32 = arith.constant 0 : i32
    %c0_i32_0 = arith.constant 0 : i32
    %c0_i32_1 = arith.constant 0 : i32
    return %c0_i32, %c0_i32_0 : i32, i32
  }
  func.func @transform_4(%arg0: i32) -> (i32, i32) {
    %c0_i32 = arith.constant 0 : i32
    %c0_i32_0 = arith.constant 0 : i32
    %c0_i32_1 = arith.constant 0 : i32
    return %c0_i32, %c0_i32_0 : i32, i32
  }
  func.func @transform_5(%arg0: i32) -> (i32, i32) {
    %c0_i32 = arith.constant 0 : i32
    %c0_i32_0 = arith.constant 0 : i32
    %c0_i32_1 = arith.constant 0 : i32
    return %c0_i32, %c0_i32_0 : i32, i32
  }
  func.func @transform_6(%arg0: i32) -> (i32, i32) {
    %c0_i32 = arith.constant 0 : i32
    %c0_i32_0 = arith.constant 0 : i32
    %c0_i32_1 = arith.constant 0 : i32
    return %c0_i32, %c0_i32_0 : i32, i32
  }
  func.func @transform_7(%arg0: i32) -> (i32, i32) {
    %c0_i32 = arith.constant 0 : i32
    %c0_i32_0 = arith.constant 0 : i32
    %c0_i32_1 = arith.constant 0 : i32
    return %c0_i32, %c0_i32_0 : i32, i32
  }
  func.func @transform_8(%arg0: i32) -> (i32, i32) {
    %c0_i32 = arith.constant 0 : i32
    %c0_i32_0 = arith.constant 0 : i32
    %c0_i32_1 = arith.constant 0 : i32
    return %c0_i32, %c0_i32_0 : i32, i32
  }
  func.func @transform_9(%arg0: i32) -> (i32, i32) {
    %c0_i32 = arith.constant 0 : i32
    %c0_i32_0 = arith.constant 0 : i32
    %c0_i32_1 = arith.constant 0 : i32
    return %c0_i32, %c0_i32_0 : i32, i32
  }
  func.func @transform_10(%arg0: i32) -> (i32, i32) {
    %c0_i32 = arith.constant 0 : i32
    %c0_i32_0 = arith.constant 0 : i32
    %c0_i32_1 = arith.constant 0 : i32
    return %c0_i32, %c0_i32_0 : i32, i32
  }
  func.func @transform_11(%arg0: i32) -> (i32, i32) {
    %c0_i32 = arith.constant 0 : i32
    %c0_i32_0 = arith.constant 0 : i32
    %c0_i32_1 = arith.constant 0 : i32
    return %c0_i32, %c0_i32_0 : i32, i32
  }
  func.func @transform_12(%arg0: i32) -> (i32, i32) {
    %c0_i32 = arith.constant 0 : i32
    %c0_i32_0 = arith.constant 0 : i32
    %c0_i32_1 = arith.constant 0 : i32
    return %c0_i32, %c0_i32_0 : i32, i32
  }
  func.func @transform_13(%arg0: i32) -> (i32, i32) {
    %c0_i32 = arith.constant 0 : i32
    %c0_i32_0 = arith.constant 0 : i32
    %c0_i32_1 = arith.constant 0 : i32
    return %c0_i32, %c0_i32_0 : i32, i32
  }
  func.func @transform_14(%arg0: i32) -> (i32, i32) {
    %c0_i32 = arith.constant 0 : i32
    %c0_i32_0 = arith.constant 0 : i32
    %c0_i32_1 = arith.constant 0 : i32
    return %c0_i32, %c0_i32_0 : i32, i32
  }
  func.func @transform_15(%arg0: i32) -> (i32, i32) {
    %c0_i32 = arith.constant 0 : i32
    %c0_i32_0 = arith.constant 0 : i32
    %c0_i32_1 = arith.constant 0 : i32
    return %c0_i32, %c0_i32_0 : i32, i32
  }
  func.func @transform_16(%arg0: i32) -> (i32, i32) {
    %c0_i32 = arith.constant 0 : i32
    %c0_i32_0 = arith.constant 0 : i32
    %c0_i32_1 = arith.constant 0 : i32
    return %c0_i32, %c0_i32_0 : i32, i32
  }
  func.func @transform_17(%arg0: i32) -> (i32, i32, i32) {
    %c0_i32 = arith.constant 0 : i32
    %c0_i32_0 = arith.constant 0 : i32
    %c0_i32_1 = arith.constant 0 : i32
    return %arg0, %c0_i32, %c0_i32_0 : i32, i32, i32
  }
}

module attributes {stable_mosaic.version = 11 : i64} {
  func.func @_bert_layer_kernel(%arg0: i32, %arg1: memref<1x8x64xf32, #tpu.memory_space<vmem>>, %arg2: memref<1x1x8xf32, #tpu.memory_space<vmem>>, %arg3: memref<1x5x64xf32, #tpu.memory_space<vmem>>, %arg4: memref<64x64xf32, #tpu.memory_space<vmem>>, %arg5: memref<1x64xf32, #tpu.memory_space<vmem>>, %arg6: memref<64x64xf32, #tpu.memory_space<vmem>>, %arg7: memref<1x64xf32, #tpu.memory_space<vmem>>, %arg8: memref<64x64xf32, #tpu.memory_space<vmem>>, %arg9: memref<1x64xf32, #tpu.memory_space<vmem>>, %arg10: memref<64x64xf32, #tpu.memory_space<vmem>>, %arg11: memref<1x64xf32, #tpu.memory_space<vmem>>, %arg12: memref<1x64xf32, #tpu.memory_space<vmem>>, %arg13: memref<1x64xf32, #tpu.memory_space<vmem>>, %arg14: memref<64x64xf32, #tpu.memory_space<vmem>>, %arg15: memref<1x64xf32, #tpu.memory_space<vmem>>, %arg16: memref<64x64xf32, #tpu.memory_space<vmem>>, %arg17: memref<1x64xf32, #tpu.memory_space<vmem>>, %arg18: memref<64x64xf32, #tpu.memory_space<vmem>>, %arg19: memref<1x64xf32, #tpu.memory_space<vmem>>, %arg20: memref<64x64xf32, #tpu.memory_space<vmem>>, %arg21: memref<1x64xf32, #tpu.memory_space<vmem>>, %arg22: memref<1x64xf32, #tpu.memory_space<vmem>>, %arg23: memref<1x64xf32, #tpu.memory_space<vmem>>, %arg24: memref<64x256xf32, #tpu.memory_space<vmem>>, %arg25: memref<1x256xf32, #tpu.memory_space<vmem>>, %arg26: memref<256x64xf32, #tpu.memory_space<vmem>>, %arg27: memref<1x64xf32, #tpu.memory_space<vmem>>, %arg28: memref<1x64xf32, #tpu.memory_space<vmem>>, %arg29: memref<1x64xf32, #tpu.memory_space<vmem>>, %arg30: memref<1x8x64xf32, #tpu.memory_space<vmem>>) attributes {dimension_semantics = [#tpu.dimension_semantics<parallel>], iteration_bounds = array<i64: 2>, scalar_prefetch = 0 : i64, scratch_operands = 0 : i64, tpu.core_type = #tpu.core_type<tc>, window_params = [{transform_indices = @transform_0, window_bounds = array<i64: 1, 8, 64>}, {transform_indices = @transform_1, window_bounds = array<i64: 1, 1, 8>}, {transform_indices = @transform_2, window_bounds = array<i64: 1, 5, 64>}, {pipeline_mode = #tpu.pipeline_mode<synchronous>, transform_indices = @transform_3, window_bounds = array<i64: 64, 64>}, {pipeline_mode = #tpu.pipeline_mode<synchronous>, transform_indices = @transform_4, window_bounds = array<i64: 1, 64>}, {pipeline_mode = #tpu.pipeline_mode<synchronous>, transform_indices = @transform_5, window_bounds = array<i64: 64, 64>}, {pipeline_mode = #tpu.pipeline_mode<synchronous>, transform_indices = @transform_6, window_bounds = array<i64: 1, 64>}, {pipeline_mode = #tpu.pipeline_mode<synchronous>, transform_indices = @transform_7, window_bounds = array<i64: 64, 64>}, {pipeline_mode = #tpu.pipeline_mode<synchronous>, transform_indices = @transform_8, window_bounds = array<i64: 1, 64>}, {pipeline_mode = #tpu.pipeline_mode<synchronous>, transform_indices = @transform_9, window_bounds = array<i64: 64, 64>}, {pipeline_mode = #tpu.pipeline_mode<synchronous>, transform_indices = @transform_10, window_bounds = array<i64: 1, 64>}, {pipeline_mode = #tpu.pipeline_mode<synchronous>, transform_indices = @transform_11, window_bounds = array<i64: 1, 64>}, {pipeline_mode = #tpu.pipeline_mode<synchronous>, transform_indices = @transform_12, window_bounds = array<i64: 1, 64>}, {pipeline_mode = #tpu.pipeline_mode<synchronous>, transform_indices = @transform_13, window_bounds = array<i64: 64, 64>}, {pipeline_mode = #tpu.pipeline_mode<synchronous>, transform_indices = @transform_14, window_bounds = array<i64: 1, 64>}, {pipeline_mode = #tpu.pipeline_mode<synchronous>, transform_indices = @transform_15, window_bounds = array<i64: 64, 64>}, {pipeline_mode = #tpu.pipeline_mode<synchronous>, transform_indices = @transform_16, window_bounds = array<i64: 1, 64>}, {pipeline_mode = #tpu.pipeline_mode<synchronous>, transform_indices = @transform_17, window_bounds = array<i64: 64, 64>}, {pipeline_mode = #tpu.pipeline_mode<synchronous>, transform_indices = @transform_18, window_bounds = array<i64: 1, 64>}, {pipeline_mode = #tpu.pipeline_mode<synchronous>, transform_indices = @transform_19, window_bounds = array<i64: 64, 64>}, {pipeline_mode = #tpu.pipeline_mode<synchronous>, transform_indices = @transform_20, window_bounds = array<i64: 1, 64>}, {pipeline_mode = #tpu.pipeline_mode<synchronous>, transform_indices = @transform_21, window_bounds = array<i64: 1, 64>}, {pipeline_mode = #tpu.pipeline_mode<synchronous>, transform_indices = @transform_22, window_bounds = array<i64: 1, 64>}, {pipeline_mode = #tpu.pipeline_mode<synchronous>, transform_indices = @transform_23, window_bounds = array<i64: 64, 256>}, {pipeline_mode = #tpu.pipeline_mode<synchronous>, transform_indices = @transform_24, window_bounds = array<i64: 1, 256>}, {pipeline_mode = #tpu.pipeline_mode<synchronous>, transform_indices = @transform_25, window_bounds = array<i64: 256, 64>}, {pipeline_mode = #tpu.pipeline_mode<synchronous>, transform_indices = @transform_26, window_bounds = array<i64: 1, 64>}, {pipeline_mode = #tpu.pipeline_mode<synchronous>, transform_indices = @transform_27, window_bounds = array<i64: 1, 64>}, {pipeline_mode = #tpu.pipeline_mode<synchronous>, transform_indices = @transform_28, window_bounds = array<i64: 1, 64>}, {transform_indices = @transform_29, window_bounds = array<i64: 1, 8, 64>}]} {
    %c0 = arith.constant 0 : index
    %c0_0 = arith.constant 0 : index
    %c0_1 = arith.constant 0 : index
    %0 = vector.load %arg1[%c0, %c0_0, %c0_1] : memref<1x8x64xf32, #tpu.memory_space<vmem>>, vector<1x8x64xf32>
    %1 = vector.shape_cast %0 : vector<1x8x64xf32> to vector<8x64xf32>
    %c0_2 = arith.constant 0 : index
    %c0_3 = arith.constant 0 : index
    %c0_4 = arith.constant 0 : index
    %2 = vector.load %arg2[%c0_2, %c0_3, %c0_4] : memref<1x1x8xf32, #tpu.memory_space<vmem>>, vector<1x1x8xf32>
    %3 = vector.shape_cast %2 : vector<1x1x8xf32> to vector<1x8xf32>
    %c0_5 = arith.constant 0 : index
    %c0_6 = arith.constant 0 : index
    %4 = vector.load %arg4[%c0_5, %c0_6] : memref<64x64xf32, #tpu.memory_space<vmem>>, vector<64x64xf32>
    %5 = arith.truncf %1 : vector<8x64xf32> to vector<8x64xbf16>
    %6 = arith.truncf %4 : vector<64x64xf32> to vector<64x64xbf16>
    %cst = arith.constant dense<0.000000e+00> : vector<8x64xf32>
    %7 = tpu.matmul %5, %6, %cst {dimension_numbers = #tpu.dot_dimension_numbers<[1], [0], [0], [1], [0, 0, 1, 1], [], []>} : vector<8x64xbf16>, vector<64x64xbf16>, vector<8x64xf32> -> vector<8x64xf32>
    %c0_7 = arith.constant 0 : index
    %c0_8 = arith.constant 0 : index
    %8 = vector.load %arg5[%c0_7, %c0_8] : memref<1x64xf32, #tpu.memory_space<vmem>>, vector<1x64xf32>
    %9 = vector.broadcast %8 : vector<1x64xf32> to vector<8x64xf32>
    %10 = arith.addf %7, %9 : vector<8x64xf32>
    %c0_9 = arith.constant 0 : index
    %c0_10 = arith.constant 0 : index
    %11 = vector.load %arg6[%c0_9, %c0_10] : memref<64x64xf32, #tpu.memory_space<vmem>>, vector<64x64xf32>
    %12 = arith.truncf %1 : vector<8x64xf32> to vector<8x64xbf16>
    %13 = arith.truncf %11 : vector<64x64xf32> to vector<64x64xbf16>
    %cst_11 = arith.constant dense<0.000000e+00> : vector<8x64xf32>
    %14 = tpu.matmul %12, %13, %cst_11 {dimension_numbers = #tpu.dot_dimension_numbers<[1], [0], [0], [1], [0, 0, 1, 1], [], []>} : vector<8x64xbf16>, vector<64x64xbf16>, vector<8x64xf32> -> vector<8x64xf32>
    %c0_12 = arith.constant 0 : index
    %c0_13 = arith.constant 0 : index
    %15 = vector.load %arg7[%c0_12, %c0_13] : memref<1x64xf32, #tpu.memory_space<vmem>>, vector<1x64xf32>
    %16 = vector.broadcast %15 : vector<1x64xf32> to vector<8x64xf32>
    %17 = arith.addf %14, %16 : vector<8x64xf32>
    %c0_14 = arith.constant 0 : index
    %c0_15 = arith.constant 0 : index
    %18 = vector.load %arg8[%c0_14, %c0_15] : memref<64x64xf32, #tpu.memory_space<vmem>>, vector<64x64xf32>
    %19 = arith.truncf %1 : vector<8x64xf32> to vector<8x64xbf16>
    %20 = arith.truncf %18 : vector<64x64xf32> to vector<64x64xbf16>
    %cst_16 = arith.constant dense<0.000000e+00> : vector<8x64xf32>
    %21 = tpu.matmul %19, %20, %cst_16 {dimension_numbers = #tpu.dot_dimension_numbers<[1], [0], [0], [1], [0, 0, 1, 1], [], []>} : vector<8x64xbf16>, vector<64x64xbf16>, vector<8x64xf32> -> vector<8x64xf32>
    %c0_17 = arith.constant 0 : index
    %c0_18 = arith.constant 0 : index
    %22 = vector.load %arg9[%c0_17, %c0_18] : memref<1x64xf32, #tpu.memory_space<vmem>>, vector<1x64xf32>
    %23 = vector.broadcast %22 : vector<1x64xf32> to vector<8x64xf32>
    %24 = arith.addf %21, %23 : vector<8x64xf32>
    %25 = vector.extract_strided_slice %10 {offsets = [0, 0], sizes = [8, 16], strides = [1, 1]} : vector<8x64xf32> to vector<8x16xf32>
    %26 = vector.extract_strided_slice %17 {offsets = [0, 0], sizes = [8, 16], strides = [1, 1]} : vector<8x64xf32> to vector<8x16xf32>
    %27 = arith.truncf %25 : vector<8x16xf32> to vector<8x16xbf16>
    %28 = arith.truncf %26 : vector<8x16xf32> to vector<8x16xbf16>
    %cst_19 = arith.constant dense<0.000000e+00> : vector<8x8xf32>
    %29 = tpu.matmul %27, %28, %cst_19 {dimension_numbers = #tpu.dot_dimension_numbers<[1], [1], [0], [0], [0, 0, 1, 0], [], []>} : vector<8x16xbf16>, vector<8x16xbf16>, vector<8x8xf32> -> vector<8x8xf32>
    %cst_20 = arith.constant 2.500000e-01 : f32
    %30 = vector.broadcast %cst_20 : f32 to vector<8x8xf32>
    %31 = arith.mulf %29, %30 : vector<8x8xf32>
    %32 = vector.broadcast %3 : vector<1x8xf32> to vector<8x8xf32>
    %33 = arith.addf %31, %32 : vector<8x8xf32>
    %cst_21 = arith.constant dense<0xFF800000> : vector<8xf32>
    %34 = vector.multi_reduction <maximumf>, %33, %cst_21 [1] : vector<8x8xf32> to vector<8xf32>
    %35 = vector.shape_cast %34 : vector<8xf32> to vector<8x1xf32>
    %36 = vector.broadcast %35 : vector<8x1xf32> to vector<8x8xf32>
    %37 = arith.subf %33, %36 : vector<8x8xf32>
    %38 = math.exp %37 : vector<8x8xf32>
    %cst_22 = arith.constant dense<0.000000e+00> : vector<8xf32>
    %39 = vector.multi_reduction <add>, %38, %cst_22 [1] : vector<8x8xf32> to vector<8xf32>
    %40 = vector.shape_cast %39 : vector<8xf32> to vector<8x1xf32>
    %41 = tpu.reciprocal %40 {approx = true} : vector<8x1xf32> -> vector<8x1xf32>
    %42 = vector.broadcast %41 : vector<8x1xf32> to vector<8x8xf32>
    %43 = arith.mulf %38, %42 : vector<8x8xf32>
    %44 = vector.extract_strided_slice %24 {offsets = [0, 0], sizes = [8, 16], strides = [1, 1]} : vector<8x64xf32> to vector<8x16xf32>
    %45 = arith.truncf %43 : vector<8x8xf32> to vector<8x8xbf16>
    %46 = arith.truncf %44 : vector<8x16xf32> to vector<8x16xbf16>
    %cst_23 = arith.constant dense<0.000000e+00> : vector<8x16xf32>
    %47 = tpu.matmul %45, %46, %cst_23 {dimension_numbers = #tpu.dot_dimension_numbers<[1], [0], [0], [1], [0, 0, 1, 1], [], []>} : vector<8x8xbf16>, vector<8x16xbf16>, vector<8x16xf32> -> vector<8x16xf32>
    %48 = vector.extract_strided_slice %10 {offsets = [0, 16], sizes = [8, 16], strides = [1, 1]} : vector<8x64xf32> to vector<8x16xf32>
    %49 = vector.extract_strided_slice %17 {offsets = [0, 16], sizes = [8, 16], strides = [1, 1]} : vector<8x64xf32> to vector<8x16xf32>
    %50 = arith.truncf %48 : vector<8x16xf32> to vector<8x16xbf16>
    %51 = arith.truncf %49 : vector<8x16xf32> to vector<8x16xbf16>
    %cst_24 = arith.constant dense<0.000000e+00> : vector<8x8xf32>
    %52 = tpu.matmul %50, %51, %cst_24 {dimension_numbers = #tpu.dot_dimension_numbers<[1], [1], [0], [0], [0, 0, 1, 0], [], []>} : vector<8x16xbf16>, vector<8x16xbf16>, vector<8x8xf32> -> vector<8x8xf32>
    %cst_25 = arith.constant 2.500000e-01 : f32
    %53 = vector.broadcast %cst_25 : f32 to vector<8x8xf32>
    %54 = arith.mulf %52, %53 : vector<8x8xf32>
    %55 = vector.broadcast %3 : vector<1x8xf32> to vector<8x8xf32>
    %56 = arith.addf %54, %55 : vector<8x8xf32>
    %cst_26 = arith.constant dense<0xFF800000> : vector<8xf32>
    %57 = vector.multi_reduction <maximumf>, %56, %cst_26 [1] : vector<8x8xf32> to vector<8xf32>
    %58 = vector.shape_cast %57 : vector<8xf32> to vector<8x1xf32>
    %59 = vector.broadcast %58 : vector<8x1xf32> to vector<8x8xf32>
    %60 = arith.subf %56, %59 : vector<8x8xf32>
    %61 = math.exp %60 : vector<8x8xf32>
    %cst_27 = arith.constant dense<0.000000e+00> : vector<8xf32>
    %62 = vector.multi_reduction <add>, %61, %cst_27 [1] : vector<8x8xf32> to vector<8xf32>
    %63 = vector.shape_cast %62 : vector<8xf32> to vector<8x1xf32>
    %64 = tpu.reciprocal %63 {approx = true} : vector<8x1xf32> -> vector<8x1xf32>
    %65 = vector.broadcast %64 : vector<8x1xf32> to vector<8x8xf32>
    %66 = arith.mulf %61, %65 : vector<8x8xf32>
    %67 = vector.extract_strided_slice %24 {offsets = [0, 16], sizes = [8, 16], strides = [1, 1]} : vector<8x64xf32> to vector<8x16xf32>
    %68 = arith.truncf %66 : vector<8x8xf32> to vector<8x8xbf16>
    %69 = arith.truncf %67 : vector<8x16xf32> to vector<8x16xbf16>
    %cst_28 = arith.constant dense<0.000000e+00> : vector<8x16xf32>
    %70 = tpu.matmul %68, %69, %cst_28 {dimension_numbers = #tpu.dot_dimension_numbers<[1], [0], [0], [1], [0, 0, 1, 1], [], []>} : vector<8x8xbf16>, vector<8x16xbf16>, vector<8x16xf32> -> vector<8x16xf32>
    %71 = vector.extract_strided_slice %10 {offsets = [0, 32], sizes = [8, 16], strides = [1, 1]} : vector<8x64xf32> to vector<8x16xf32>
    %72 = vector.extract_strided_slice %17 {offsets = [0, 32], sizes = [8, 16], strides = [1, 1]} : vector<8x64xf32> to vector<8x16xf32>
    %73 = arith.truncf %71 : vector<8x16xf32> to vector<8x16xbf16>
    %74 = arith.truncf %72 : vector<8x16xf32> to vector<8x16xbf16>
    %cst_29 = arith.constant dense<0.000000e+00> : vector<8x8xf32>
    %75 = tpu.matmul %73, %74, %cst_29 {dimension_numbers = #tpu.dot_dimension_numbers<[1], [1], [0], [0], [0, 0, 1, 0], [], []>} : vector<8x16xbf16>, vector<8x16xbf16>, vector<8x8xf32> -> vector<8x8xf32>
    %cst_30 = arith.constant 2.500000e-01 : f32
    %76 = vector.broadcast %cst_30 : f32 to vector<8x8xf32>
    %77 = arith.mulf %75, %76 : vector<8x8xf32>
    %78 = vector.broadcast %3 : vector<1x8xf32> to vector<8x8xf32>
    %79 = arith.addf %77, %78 : vector<8x8xf32>
    %cst_31 = arith.constant dense<0xFF800000> : vector<8xf32>
    %80 = vector.multi_reduction <maximumf>, %79, %cst_31 [1] : vector<8x8xf32> to vector<8xf32>
    %81 = vector.shape_cast %80 : vector<8xf32> to vector<8x1xf32>
    %82 = vector.broadcast %81 : vector<8x1xf32> to vector<8x8xf32>
    %83 = arith.subf %79, %82 : vector<8x8xf32>
    %84 = math.exp %83 : vector<8x8xf32>
    %cst_32 = arith.constant dense<0.000000e+00> : vector<8xf32>
    %85 = vector.multi_reduction <add>, %84, %cst_32 [1] : vector<8x8xf32> to vector<8xf32>
    %86 = vector.shape_cast %85 : vector<8xf32> to vector<8x1xf32>
    %87 = tpu.reciprocal %86 {approx = true} : vector<8x1xf32> -> vector<8x1xf32>
    %88 = vector.broadcast %87 : vector<8x1xf32> to vector<8x8xf32>
    %89 = arith.mulf %84, %88 : vector<8x8xf32>
    %90 = vector.extract_strided_slice %24 {offsets = [0, 32], sizes = [8, 16], strides = [1, 1]} : vector<8x64xf32> to vector<8x16xf32>
    %91 = arith.truncf %89 : vector<8x8xf32> to vector<8x8xbf16>
    %92 = arith.truncf %90 : vector<8x16xf32> to vector<8x16xbf16>
    %cst_33 = arith.constant dense<0.000000e+00> : vector<8x16xf32>
    %93 = tpu.matmul %91, %92, %cst_33 {dimension_numbers = #tpu.dot_dimension_numbers<[1], [0], [0], [1], [0, 0, 1, 1], [], []>} : vector<8x8xbf16>, vector<8x16xbf16>, vector<8x16xf32> -> vector<8x16xf32>
    %94 = vector.extract_strided_slice %10 {offsets = [0, 48], sizes = [8, 16], strides = [1, 1]} : vector<8x64xf32> to vector<8x16xf32>
    %95 = vector.extract_strided_slice %17 {offsets = [0, 48], sizes = [8, 16], strides = [1, 1]} : vector<8x64xf32> to vector<8x16xf32>
    %96 = arith.truncf %94 : vector<8x16xf32> to vector<8x16xbf16>
    %97 = arith.truncf %95 : vector<8x16xf32> to vector<8x16xbf16>
    %cst_34 = arith.constant dense<0.000000e+00> : vector<8x8xf32>
    %98 = tpu.matmul %96, %97, %cst_34 {dimension_numbers = #tpu.dot_dimension_numbers<[1], [1], [0], [0], [0, 0, 1, 0], [], []>} : vector<8x16xbf16>, vector<8x16xbf16>, vector<8x8xf32> -> vector<8x8xf32>
    %cst_35 = arith.constant 2.500000e-01 : f32
    %99 = vector.broadcast %cst_35 : f32 to vector<8x8xf32>
    %100 = arith.mulf %98, %99 : vector<8x8xf32>
    %101 = vector.broadcast %3 : vector<1x8xf32> to vector<8x8xf32>
    %102 = arith.addf %100, %101 : vector<8x8xf32>
    %cst_36 = arith.constant dense<0xFF800000> : vector<8xf32>
    %103 = vector.multi_reduction <maximumf>, %102, %cst_36 [1] : vector<8x8xf32> to vector<8xf32>
    %104 = vector.shape_cast %103 : vector<8xf32> to vector<8x1xf32>
    %105 = vector.broadcast %104 : vector<8x1xf32> to vector<8x8xf32>
    %106 = arith.subf %102, %105 : vector<8x8xf32>
    %107 = math.exp %106 : vector<8x8xf32>
    %cst_37 = arith.constant dense<0.000000e+00> : vector<8xf32>
    %108 = vector.multi_reduction <add>, %107, %cst_37 [1] : vector<8x8xf32> to vector<8xf32>
    %109 = vector.shape_cast %108 : vector<8xf32> to vector<8x1xf32>
    %110 = tpu.reciprocal %109 {approx = true} : vector<8x1xf32> -> vector<8x1xf32>
    %111 = vector.broadcast %110 : vector<8x1xf32> to vector<8x8xf32>
    %112 = arith.mulf %107, %111 : vector<8x8xf32>
    %113 = vector.extract_strided_slice %24 {offsets = [0, 48], sizes = [8, 16], strides = [1, 1]} : vector<8x64xf32> to vector<8x16xf32>
    %114 = arith.truncf %112 : vector<8x8xf32> to vector<8x8xbf16>
    %115 = arith.truncf %113 : vector<8x16xf32> to vector<8x16xbf16>
    %cst_38 = arith.constant dense<0.000000e+00> : vector<8x16xf32>
    %116 = tpu.matmul %114, %115, %cst_38 {dimension_numbers = #tpu.dot_dimension_numbers<[1], [0], [0], [1], [0, 0, 1, 1], [], []>} : vector<8x8xbf16>, vector<8x16xbf16>, vector<8x16xf32> -> vector<8x16xf32>
    %117 = tpu.concatenate %47, %70, %93, %116 in 1 : vector<8x16xf32>, vector<8x16xf32>, vector<8x16xf32>, vector<8x16xf32> -> vector<8x64xf32>
    %c0_39 = arith.constant 0 : index
    %c0_40 = arith.constant 0 : index
    %118 = vector.load %arg10[%c0_39, %c0_40] : memref<64x64xf32, #tpu.memory_space<vmem>>, vector<64x64xf32>
    %119 = arith.truncf %117 : vector<8x64xf32> to vector<8x64xbf16>
    %120 = arith.truncf %118 : vector<64x64xf32> to vector<64x64xbf16>
    %cst_41 = arith.constant dense<0.000000e+00> : vector<8x64xf32>
    %121 = tpu.matmul %119, %120, %cst_41 {dimension_numbers = #tpu.dot_dimension_numbers<[1], [0], [0], [1], [0, 0, 1, 1], [], []>} : vector<8x64xbf16>, vector<64x64xbf16>, vector<8x64xf32> -> vector<8x64xf32>
    %c0_42 = arith.constant 0 : index
    %c0_43 = arith.constant 0 : index
    %122 = vector.load %arg11[%c0_42, %c0_43] : memref<1x64xf32, #tpu.memory_space<vmem>>, vector<1x64xf32>
    %123 = vector.broadcast %122 : vector<1x64xf32> to vector<8x64xf32>
    %124 = arith.addf %121, %123 : vector<8x64xf32>
    %125 = arith.addf %124, %1 : vector<8x64xf32>
    %c0_44 = arith.constant 0 : index
    %c0_45 = arith.constant 0 : index
    %126 = vector.load %arg12[%c0_44, %c0_45] : memref<1x64xf32, #tpu.memory_space<vmem>>, vector<1x64xf32>
    %c0_46 = arith.constant 0 : index
    %c0_47 = arith.constant 0 : index
    %127 = vector.load %arg13[%c0_46, %c0_47] : memref<1x64xf32, #tpu.memory_space<vmem>>, vector<1x64xf32>
    %cst_48 = arith.constant dense<0.000000e+00> : vector<8xf32>
    %128 = vector.multi_reduction <add>, %125, %cst_48 [1] : vector<8x64xf32> to vector<8xf32>
    %129 = vector.shape_cast %128 : vector<8xf32> to vector<8x1xf32>
    %cst_49 = arith.constant 6.400000e+01 : f32
    %130 = vector.broadcast %cst_49 : f32 to vector<8x1xf32>
    %131 = arith.divf %129, %130 : vector<8x1xf32>
    %132 = vector.broadcast %131 : vector<8x1xf32> to vector<8x64xf32>
    %133 = arith.subf %125, %132 : vector<8x64xf32>
    %134 = arith.mulf %133, %133 : vector<8x64xf32>
    %cst_50 = arith.constant dense<0.000000e+00> : vector<8xf32>
    %135 = vector.multi_reduction <add>, %134, %cst_50 [1] : vector<8x64xf32> to vector<8xf32>
    %136 = vector.shape_cast %135 : vector<8xf32> to vector<8x1xf32>
    %cst_51 = arith.constant 6.400000e+01 : f32
    %137 = vector.broadcast %cst_51 : f32 to vector<8x1xf32>
    %138 = arith.divf %136, %137 : vector<8x1xf32>
    %139 = vector.broadcast %131 : vector<8x1xf32> to vector<8x64xf32>
    %140 = arith.subf %125, %139 : vector<8x64xf32>
    %cst_52 = arith.constant 9.99999996E-13 : f32
    %141 = vector.broadcast %cst_52 : f32 to vector<8x1xf32>
    %142 = arith.addf %138, %141 : vector<8x1xf32>
    %143 = math.rsqrt %142 : vector<8x1xf32>
    %144 = vector.broadcast %143 : vector<8x1xf32> to vector<8x64xf32>
    %145 = arith.mulf %140, %144 : vector<8x64xf32>
    %146 = vector.broadcast %126 : vector<1x64xf32> to vector<8x64xf32>
    %147 = arith.mulf %145, %146 : vector<8x64xf32>
    %148 = vector.broadcast %127 : vector<1x64xf32> to vector<8x64xf32>
    %149 = arith.addf %147, %148 : vector<8x64xf32>
    %c0_53 = arith.constant 0 : index
    %c0_54 = arith.constant 0 : index
    %c0_55 = arith.constant 0 : index
    %150 = vector.load %arg3[%c0_53, %c0_54, %c0_55] : memref<1x5x64xf32, #tpu.memory_space<vmem>>, vector<1x5x64xf32>
    %151 = vector.shape_cast %150 : vector<1x5x64xf32> to vector<5x64xf32>
    %c0_56 = arith.constant 0 : index
    %c0_57 = arith.constant 0 : index
    %152 = vector.load %arg14[%c0_56, %c0_57] : memref<64x64xf32, #tpu.memory_space<vmem>>, vector<64x64xf32>
    %153 = arith.truncf %149 : vector<8x64xf32> to vector<8x64xbf16>
    %154 = arith.truncf %152 : vector<64x64xf32> to vector<64x64xbf16>
    %cst_58 = arith.constant dense<0.000000e+00> : vector<8x64xf32>
    %155 = tpu.matmul %153, %154, %cst_58 {dimension_numbers = #tpu.dot_dimension_numbers<[1], [0], [0], [1], [0, 0, 1, 1], [], []>} : vector<8x64xbf16>, vector<64x64xbf16>, vector<8x64xf32> -> vector<8x64xf32>
    %c0_59 = arith.constant 0 : index
    %c0_60 = arith.constant 0 : index
    %156 = vector.load %arg15[%c0_59, %c0_60] : memref<1x64xf32, #tpu.memory_space<vmem>>, vector<1x64xf32>
    %157 = vector.broadcast %156 : vector<1x64xf32> to vector<8x64xf32>
    %158 = arith.addf %155, %157 : vector<8x64xf32>
    %c0_61 = arith.constant 0 : index
    %c0_62 = arith.constant 0 : index
    %159 = vector.load %arg16[%c0_61, %c0_62] : memref<64x64xf32, #tpu.memory_space<vmem>>, vector<64x64xf32>
    %160 = arith.truncf %151 : vector<5x64xf32> to vector<5x64xbf16>
    %161 = arith.truncf %159 : vector<64x64xf32> to vector<64x64xbf16>
    %cst_63 = arith.constant dense<0.000000e+00> : vector<5x64xf32>
    %162 = tpu.matmul %160, %161, %cst_63 {dimension_numbers = #tpu.dot_dimension_numbers<[1], [0], [0], [1], [0, 0, 1, 1], [], []>} : vector<5x64xbf16>, vector<64x64xbf16>, vector<5x64xf32> -> vector<5x64xf32>
    %c0_64 = arith.constant 0 : index
    %c0_65 = arith.constant 0 : index
    %163 = vector.load %arg17[%c0_64, %c0_65] : memref<1x64xf32, #tpu.memory_space<vmem>>, vector<1x64xf32>
    %164 = vector.broadcast %163 : vector<1x64xf32> to vector<5x64xf32>
    %165 = arith.addf %162, %164 : vector<5x64xf32>
    %c0_66 = arith.constant 0 : index
    %c0_67 = arith.constant 0 : index
    %166 = vector.load %arg18[%c0_66, %c0_67] : memref<64x64xf32, #tpu.memory_space<vmem>>, vector<64x64xf32>
    %167 = arith.truncf %151 : vector<5x64xf32> to vector<5x64xbf16>
    %168 = arith.truncf %166 : vector<64x64xf32> to vector<64x64xbf16>
    %cst_68 = arith.constant dense<0.000000e+00> : vector<5x64xf32>
    %169 = tpu.matmul %167, %168, %cst_68 {dimension_numbers = #tpu.dot_dimension_numbers<[1], [0], [0], [1], [0, 0, 1, 1], [], []>} : vector<5x64xbf16>, vector<64x64xbf16>, vector<5x64xf32> -> vector<5x64xf32>
    %c0_69 = arith.constant 0 : index
    %c0_70 = arith.constant 0 : index
    %170 = vector.load %arg19[%c0_69, %c0_70] : memref<1x64xf32, #tpu.memory_space<vmem>>, vector<1x64xf32>
    %171 = vector.broadcast %170 : vector<1x64xf32> to vector<5x64xf32>
    %172 = arith.addf %169, %171 : vector<5x64xf32>
    %173 = vector.extract_strided_slice %158 {offsets = [0, 0], sizes = [8, 16], strides = [1, 1]} : vector<8x64xf32> to vector<8x16xf32>
    %174 = vector.extract_strided_slice %165 {offsets = [0, 0], sizes = [5, 16], strides = [1, 1]} : vector<5x64xf32> to vector<5x16xf32>
    %175 = arith.truncf %173 : vector<8x16xf32> to vector<8x16xbf16>
    %176 = arith.truncf %174 : vector<5x16xf32> to vector<5x16xbf16>
    %cst_71 = arith.constant dense<0.000000e+00> : vector<8x5xf32>
    %177 = tpu.matmul %175, %176, %cst_71 {dimension_numbers = #tpu.dot_dimension_numbers<[1], [1], [0], [0], [0, 0, 1, 0], [], []>} : vector<8x16xbf16>, vector<5x16xbf16>, vector<8x5xf32> -> vector<8x5xf32>
    %cst_72 = arith.constant 2.500000e-01 : f32
    %178 = vector.broadcast %cst_72 : f32 to vector<8x5xf32>
    %179 = arith.mulf %177, %178 : vector<8x5xf32>
    %cst_73 = arith.constant dense<0xFF800000> : vector<8xf32>
    %180 = vector.multi_reduction <maximumf>, %179, %cst_73 [1] : vector<8x5xf32> to vector<8xf32>
    %181 = vector.shape_cast %180 : vector<8xf32> to vector<8x1xf32>
    %182 = vector.broadcast %181 : vector<8x1xf32> to vector<8x5xf32>
    %183 = arith.subf %179, %182 : vector<8x5xf32>
    %184 = math.exp %183 : vector<8x5xf32>
    %cst_74 = arith.constant dense<0.000000e+00> : vector<8xf32>
    %185 = vector.multi_reduction <add>, %184, %cst_74 [1] : vector<8x5xf32> to vector<8xf32>
    %186 = vector.shape_cast %185 : vector<8xf32> to vector<8x1xf32>
    %187 = tpu.reciprocal %186 {approx = true} : vector<8x1xf32> -> vector<8x1xf32>
    %188 = vector.broadcast %187 : vector<8x1xf32> to vector<8x5xf32>
    %189 = arith.mulf %184, %188 : vector<8x5xf32>
    %190 = vector.extract_strided_slice %172 {offsets = [0, 0], sizes = [5, 16], strides = [1, 1]} : vector<5x64xf32> to vector<5x16xf32>
    %191 = arith.truncf %189 : vector<8x5xf32> to vector<8x5xbf16>
    %192 = arith.truncf %190 : vector<5x16xf32> to vector<5x16xbf16>
    %cst_75 = arith.constant dense<0.000000e+00> : vector<8x16xf32>
    %193 = tpu.matmul %191, %192, %cst_75 {dimension_numbers = #tpu.dot_dimension_numbers<[1], [0], [0], [1], [0, 0, 1, 1], [], []>} : vector<8x5xbf16>, vector<5x16xbf16>, vector<8x16xf32> -> vector<8x16xf32>
    %194 = vector.extract_strided_slice %158 {offsets = [0, 16], sizes = [8, 16], strides = [1, 1]} : vector<8x64xf32> to vector<8x16xf32>
    %195 = vector.extract_strided_slice %165 {offsets = [0, 16], sizes = [5, 16], strides = [1, 1]} : vector<5x64xf32> to vector<5x16xf32>
    %196 = arith.truncf %194 : vector<8x16xf32> to vector<8x16xbf16>
    %197 = arith.truncf %195 : vector<5x16xf32> to vector<5x16xbf16>
    %cst_76 = arith.constant dense<0.000000e+00> : vector<8x5xf32>
    %198 = tpu.matmul %196, %197, %cst_76 {dimension_numbers = #tpu.dot_dimension_numbers<[1], [1], [0], [0], [0, 0, 1, 0], [], []>} : vector<8x16xbf16>, vector<5x16xbf16>, vector<8x5xf32> -> vector<8x5xf32>
    %cst_77 = arith.constant 2.500000e-01 : f32
    %199 = vector.broadcast %cst_77 : f32 to vector<8x5xf32>
    %200 = arith.mulf %198, %199 : vector<8x5xf32>
    %cst_78 = arith.constant dense<0xFF800000> : vector<8xf32>
    %201 = vector.multi_reduction <maximumf>, %200, %cst_78 [1] : vector<8x5xf32> to vector<8xf32>
    %202 = vector.shape_cast %201 : vector<8xf32> to vector<8x1xf32>
    %203 = vector.broadcast %202 : vector<8x1xf32> to vector<8x5xf32>
    %204 = arith.subf %200, %203 : vector<8x5xf32>
    %205 = math.exp %204 : vector<8x5xf32>
    %cst_79 = arith.constant dense<0.000000e+00> : vector<8xf32>
    %206 = vector.multi_reduction <add>, %205, %cst_79 [1] : vector<8x5xf32> to vector<8xf32>
    %207 = vector.shape_cast %206 : vector<8xf32> to vector<8x1xf32>
    %208 = tpu.reciprocal %207 {approx = true} : vector<8x1xf32> -> vector<8x1xf32>
    %209 = vector.broadcast %208 : vector<8x1xf32> to vector<8x5xf32>
    %210 = arith.mulf %205, %209 : vector<8x5xf32>
    %211 = vector.extract_strided_slice %172 {offsets = [0, 16], sizes = [5, 16], strides = [1, 1]} : vector<5x64xf32> to vector<5x16xf32>
    %212 = arith.truncf %210 : vector<8x5xf32> to vector<8x5xbf16>
    %213 = arith.truncf %211 : vector<5x16xf32> to vector<5x16xbf16>
    %cst_80 = arith.constant dense<0.000000e+00> : vector<8x16xf32>
    %214 = tpu.matmul %212, %213, %cst_80 {dimension_numbers = #tpu.dot_dimension_numbers<[1], [0], [0], [1], [0, 0, 1, 1], [], []>} : vector<8x5xbf16>, vector<5x16xbf16>, vector<8x16xf32> -> vector<8x16xf32>
    %215 = vector.extract_strided_slice %158 {offsets = [0, 32], sizes = [8, 16], strides = [1, 1]} : vector<8x64xf32> to vector<8x16xf32>
    %216 = vector.extract_strided_slice %165 {offsets = [0, 32], sizes = [5, 16], strides = [1, 1]} : vector<5x64xf32> to vector<5x16xf32>
    %217 = arith.truncf %215 : vector<8x16xf32> to vector<8x16xbf16>
    %218 = arith.truncf %216 : vector<5x16xf32> to vector<5x16xbf16>
    %cst_81 = arith.constant dense<0.000000e+00> : vector<8x5xf32>
    %219 = tpu.matmul %217, %218, %cst_81 {dimension_numbers = #tpu.dot_dimension_numbers<[1], [1], [0], [0], [0, 0, 1, 0], [], []>} : vector<8x16xbf16>, vector<5x16xbf16>, vector<8x5xf32> -> vector<8x5xf32>
    %cst_82 = arith.constant 2.500000e-01 : f32
    %220 = vector.broadcast %cst_82 : f32 to vector<8x5xf32>
    %221 = arith.mulf %219, %220 : vector<8x5xf32>
    %cst_83 = arith.constant dense<0xFF800000> : vector<8xf32>
    %222 = vector.multi_reduction <maximumf>, %221, %cst_83 [1] : vector<8x5xf32> to vector<8xf32>
    %223 = vector.shape_cast %222 : vector<8xf32> to vector<8x1xf32>
    %224 = vector.broadcast %223 : vector<8x1xf32> to vector<8x5xf32>
    %225 = arith.subf %221, %224 : vector<8x5xf32>
    %226 = math.exp %225 : vector<8x5xf32>
    %cst_84 = arith.constant dense<0.000000e+00> : vector<8xf32>
    %227 = vector.multi_reduction <add>, %226, %cst_84 [1] : vector<8x5xf32> to vector<8xf32>
    %228 = vector.shape_cast %227 : vector<8xf32> to vector<8x1xf32>
    %229 = tpu.reciprocal %228 {approx = true} : vector<8x1xf32> -> vector<8x1xf32>
    %230 = vector.broadcast %229 : vector<8x1xf32> to vector<8x5xf32>
    %231 = arith.mulf %226, %230 : vector<8x5xf32>
    %232 = vector.extract_strided_slice %172 {offsets = [0, 32], sizes = [5, 16], strides = [1, 1]} : vector<5x64xf32> to vector<5x16xf32>
    %233 = arith.truncf %231 : vector<8x5xf32> to vector<8x5xbf16>
    %234 = arith.truncf %232 : vector<5x16xf32> to vector<5x16xbf16>
    %cst_85 = arith.constant dense<0.000000e+00> : vector<8x16xf32>
    %235 = tpu.matmul %233, %234, %cst_85 {dimension_numbers = #tpu.dot_dimension_numbers<[1], [0], [0], [1], [0, 0, 1, 1], [], []>} : vector<8x5xbf16>, vector<5x16xbf16>, vector<8x16xf32> -> vector<8x16xf32>
    %236 = vector.extract_strided_slice %158 {offsets = [0, 48], sizes = [8, 16], strides = [1, 1]} : vector<8x64xf32> to vector<8x16xf32>
    %237 = vector.extract_strided_slice %165 {offsets = [0, 48], sizes = [5, 16], strides = [1, 1]} : vector<5x64xf32> to vector<5x16xf32>
    %238 = arith.truncf %236 : vector<8x16xf32> to vector<8x16xbf16>
    %239 = arith.truncf %237 : vector<5x16xf32> to vector<5x16xbf16>
    %cst_86 = arith.constant dense<0.000000e+00> : vector<8x5xf32>
    %240 = tpu.matmul %238, %239, %cst_86 {dimension_numbers = #tpu.dot_dimension_numbers<[1], [1], [0], [0], [0, 0, 1, 0], [], []>} : vector<8x16xbf16>, vector<5x16xbf16>, vector<8x5xf32> -> vector<8x5xf32>
    %cst_87 = arith.constant 2.500000e-01 : f32
    %241 = vector.broadcast %cst_87 : f32 to vector<8x5xf32>
    %242 = arith.mulf %240, %241 : vector<8x5xf32>
    %cst_88 = arith.constant dense<0xFF800000> : vector<8xf32>
    %243 = vector.multi_reduction <maximumf>, %242, %cst_88 [1] : vector<8x5xf32> to vector<8xf32>
    %244 = vector.shape_cast %243 : vector<8xf32> to vector<8x1xf32>
    %245 = vector.broadcast %244 : vector<8x1xf32> to vector<8x5xf32>
    %246 = arith.subf %242, %245 : vector<8x5xf32>
    %247 = math.exp %246 : vector<8x5xf32>
    %cst_89 = arith.constant dense<0.000000e+00> : vector<8xf32>
    %248 = vector.multi_reduction <add>, %247, %cst_89 [1] : vector<8x5xf32> to vector<8xf32>
    %249 = vector.shape_cast %248 : vector<8xf32> to vector<8x1xf32>
    %250 = tpu.reciprocal %249 {approx = true} : vector<8x1xf32> -> vector<8x1xf32>
    %251 = vector.broadcast %250 : vector<8x1xf32> to vector<8x5xf32>
    %252 = arith.mulf %247, %251 : vector<8x5xf32>
    %253 = vector.extract_strided_slice %172 {offsets = [0, 48], sizes = [5, 16], strides = [1, 1]} : vector<5x64xf32> to vector<5x16xf32>
    %254 = arith.truncf %252 : vector<8x5xf32> to vector<8x5xbf16>
    %255 = arith.truncf %253 : vector<5x16xf32> to vector<5x16xbf16>
    %cst_90 = arith.constant dense<0.000000e+00> : vector<8x16xf32>
    %256 = tpu.matmul %254, %255, %cst_90 {dimension_numbers = #tpu.dot_dimension_numbers<[1], [0], [0], [1], [0, 0, 1, 1], [], []>} : vector<8x5xbf16>, vector<5x16xbf16>, vector<8x16xf32> -> vector<8x16xf32>
    %257 = tpu.concatenate %193, %214, %235, %256 in 1 : vector<8x16xf32>, vector<8x16xf32>, vector<8x16xf32>, vector<8x16xf32> -> vector<8x64xf32>
    %c0_91 = arith.constant 0 : index
    %c0_92 = arith.constant 0 : index
    %258 = vector.load %arg20[%c0_91, %c0_92] : memref<64x64xf32, #tpu.memory_space<vmem>>, vector<64x64xf32>
    %259 = arith.truncf %257 : vector<8x64xf32> to vector<8x64xbf16>
    %260 = arith.truncf %258 : vector<64x64xf32> to vector<64x64xbf16>
    %cst_93 = arith.constant dense<0.000000e+00> : vector<8x64xf32>
    %261 = tpu.matmul %259, %260, %cst_93 {dimension_numbers = #tpu.dot_dimension_numbers<[1], [0], [0], [1], [0, 0, 1, 1], [], []>} : vector<8x64xbf16>, vector<64x64xbf16>, vector<8x64xf32> -> vector<8x64xf32>
    %c0_94 = arith.constant 0 : index
    %c0_95 = arith.constant 0 : index
    %262 = vector.load %arg21[%c0_94, %c0_95] : memref<1x64xf32, #tpu.memory_space<vmem>>, vector<1x64xf32>
    %263 = vector.broadcast %262 : vector<1x64xf32> to vector<8x64xf32>
    %264 = arith.addf %261, %263 : vector<8x64xf32>
    %265 = arith.addf %264, %149 : vector<8x64xf32>
    %c0_96 = arith.constant 0 : index
    %c0_97 = arith.constant 0 : index
    %266 = vector.load %arg22[%c0_96, %c0_97] : memref<1x64xf32, #tpu.memory_space<vmem>>, vector<1x64xf32>
    %c0_98 = arith.constant 0 : index
    %c0_99 = arith.constant 0 : index
    %267 = vector.load %arg23[%c0_98, %c0_99] : memref<1x64xf32, #tpu.memory_space<vmem>>, vector<1x64xf32>
    %cst_100 = arith.constant dense<0.000000e+00> : vector<8xf32>
    %268 = vector.multi_reduction <add>, %265, %cst_100 [1] : vector<8x64xf32> to vector<8xf32>
    %269 = vector.shape_cast %268 : vector<8xf32> to vector<8x1xf32>
    %cst_101 = arith.constant 6.400000e+01 : f32
    %270 = vector.broadcast %cst_101 : f32 to vector<8x1xf32>
    %271 = arith.divf %269, %270 : vector<8x1xf32>
    %272 = vector.broadcast %271 : vector<8x1xf32> to vector<8x64xf32>
    %273 = arith.subf %265, %272 : vector<8x64xf32>
    %274 = arith.mulf %273, %273 : vector<8x64xf32>
    %cst_102 = arith.constant dense<0.000000e+00> : vector<8xf32>
    %275 = vector.multi_reduction <add>, %274, %cst_102 [1] : vector<8x64xf32> to vector<8xf32>
    %276 = vector.shape_cast %275 : vector<8xf32> to vector<8x1xf32>
    %cst_103 = arith.constant 6.400000e+01 : f32
    %277 = vector.broadcast %cst_103 : f32 to vector<8x1xf32>
    %278 = arith.divf %276, %277 : vector<8x1xf32>
    %279 = vector.broadcast %271 : vector<8x1xf32> to vector<8x64xf32>
    %280 = arith.subf %265, %279 : vector<8x64xf32>
    %cst_104 = arith.constant 9.99999996E-13 : f32
    %281 = vector.broadcast %cst_104 : f32 to vector<8x1xf32>
    %282 = arith.addf %278, %281 : vector<8x1xf32>
    %283 = math.rsqrt %282 : vector<8x1xf32>
    %284 = vector.broadcast %283 : vector<8x1xf32> to vector<8x64xf32>
    %285 = arith.mulf %280, %284 : vector<8x64xf32>
    %286 = vector.broadcast %266 : vector<1x64xf32> to vector<8x64xf32>
    %287 = arith.mulf %285, %286 : vector<8x64xf32>
    %288 = vector.broadcast %267 : vector<1x64xf32> to vector<8x64xf32>
    %289 = arith.addf %287, %288 : vector<8x64xf32>
    %c0_105 = arith.constant 0 : index
    %c0_106 = arith.constant 0 : index
    %290 = vector.load %arg24[%c0_105, %c0_106] : memref<64x256xf32, #tpu.memory_space<vmem>>, vector<64x256xf32>
    %291 = arith.truncf %289 : vector<8x64xf32> to vector<8x64xbf16>
    %292 = arith.truncf %290 : vector<64x256xf32> to vector<64x256xbf16>
    %cst_107 = arith.constant dense<0.000000e+00> : vector<8x256xf32>
    %293 = tpu.matmul %291, %292, %cst_107 {dimension_numbers = #tpu.dot_dimension_numbers<[1], [0], [0], [1], [0, 0, 1, 1], [], []>} : vector<8x64xbf16>, vector<64x256xbf16>, vector<8x256xf32> -> vector<8x256xf32>
    %c0_108 = arith.constant 0 : index
    %c0_109 = arith.constant 0 : index
    %294 = vector.load %arg25[%c0_108, %c0_109] : memref<1x256xf32, #tpu.memory_space<vmem>>, vector<1x256xf32>
    %295 = vector.broadcast %294 : vector<1x256xf32> to vector<8x256xf32>
    %296 = arith.addf %293, %295 : vector<8x256xf32>
    %cst_110 = arith.constant 5.000000e-01 : f32
    %297 = vector.broadcast %cst_110 : f32 to vector<8x256xf32>
    %298 = arith.mulf %297, %296 : vector<8x256xf32>
    %cst_111 = arith.constant 4.471500e-02 : f32
    %299 = vector.broadcast %cst_111 : f32 to vector<8x256xf32>
    %300 = arith.mulf %299, %296 : vector<8x256xf32>
    %301 = arith.mulf %300, %296 : vector<8x256xf32>
    %302 = arith.mulf %301, %296 : vector<8x256xf32>
    %303 = arith.addf %296, %302 : vector<8x256xf32>
    %cst_112 = arith.constant 0.797884583 : f32
    %304 = vector.broadcast %cst_112 : f32 to vector<8x256xf32>
    %305 = arith.mulf %304, %303 : vector<8x256xf32>
    %306 = math.tanh %305 : vector<8x256xf32>
    %cst_113 = arith.constant 1.000000e+00 : f32
    %307 = vector.broadcast %cst_113 : f32 to vector<8x256xf32>
    %308 = arith.addf %307, %306 : vector<8x256xf32>
    %309 = arith.mulf %298, %308 : vector<8x256xf32>
    %c0_114 = arith.constant 0 : index
    %c0_115 = arith.constant 0 : index
    %310 = vector.load %arg26[%c0_114, %c0_115] : memref<256x64xf32, #tpu.memory_space<vmem>>, vector<256x64xf32>
    %311 = arith.truncf %309 : vector<8x256xf32> to vector<8x256xbf16>
    %312 = arith.truncf %310 : vector<256x64xf32> to vector<256x64xbf16>
    %cst_116 = arith.constant dense<0.000000e+00> : vector<8x64xf32>
    %313 = tpu.matmul %311, %312, %cst_116 {dimension_numbers = #tpu.dot_dimension_numbers<[1], [0], [0], [1], [0, 0, 1, 1], [], []>} : vector<8x256xbf16>, vector<256x64xbf16>, vector<8x64xf32> -> vector<8x64xf32>
    %c0_117 = arith.constant 0 : index
    %c0_118 = arith.constant 0 : index
    %314 = vector.load %arg27[%c0_117, %c0_118] : memref<1x64xf32, #tpu.memory_space<vmem>>, vector<1x64xf32>
    %315 = vector.broadcast %314 : vector<1x64xf32> to vector<8x64xf32>
    %316 = arith.addf %313, %315 : vector<8x64xf32>
    %317 = arith.addf %289, %316 : vector<8x64xf32>
    %c0_119 = arith.constant 0 : index
    %c0_120 = arith.constant 0 : index
    %318 = vector.load %arg28[%c0_119, %c0_120] : memref<1x64xf32, #tpu.memory_space<vmem>>, vector<1x64xf32>
    %c0_121 = arith.constant 0 : index
    %c0_122 = arith.constant 0 : index
    %319 = vector.load %arg29[%c0_121, %c0_122] : memref<1x64xf32, #tpu.memory_space<vmem>>, vector<1x64xf32>
    %cst_123 = arith.constant dense<0.000000e+00> : vector<8xf32>
    %320 = vector.multi_reduction <add>, %317, %cst_123 [1] : vector<8x64xf32> to vector<8xf32>
    %321 = vector.shape_cast %320 : vector<8xf32> to vector<8x1xf32>
    %cst_124 = arith.constant 6.400000e+01 : f32
    %322 = vector.broadcast %cst_124 : f32 to vector<8x1xf32>
    %323 = arith.divf %321, %322 : vector<8x1xf32>
    %324 = vector.broadcast %323 : vector<8x1xf32> to vector<8x64xf32>
    %325 = arith.subf %317, %324 : vector<8x64xf32>
    %326 = arith.mulf %325, %325 : vector<8x64xf32>
    %cst_125 = arith.constant dense<0.000000e+00> : vector<8xf32>
    %327 = vector.multi_reduction <add>, %326, %cst_125 [1] : vector<8x64xf32> to vector<8xf32>
    %328 = vector.shape_cast %327 : vector<8xf32> to vector<8x1xf32>
    %cst_126 = arith.constant 6.400000e+01 : f32
    %329 = vector.broadcast %cst_126 : f32 to vector<8x1xf32>
    %330 = arith.divf %328, %329 : vector<8x1xf32>
    %331 = vector.broadcast %323 : vector<8x1xf32> to vector<8x64xf32>
    %332 = arith.subf %317, %331 : vector<8x64xf32>
    %cst_127 = arith.constant 9.99999996E-13 : f32
    %333 = vector.broadcast %cst_127 : f32 to vector<8x1xf32>
    %334 = arith.addf %330, %333 : vector<8x1xf32>
    %335 = math.rsqrt %334 : vector<8x1xf32>
    %336 = vector.broadcast %335 : vector<8x1xf32> to vector<8x64xf32>
    %337 = arith.mulf %332, %336 : vector<8x64xf32>
    %338 = vector.broadcast %318 : vector<1x64xf32> to vector<8x64xf32>
    %339 = arith.mulf %337, %338 : vector<8x64xf32>
    %340 = vector.broadcast %319 : vector<1x64xf32> to vector<8x64xf32>
    %341 = arith.addf %339, %340 : vector<8x64xf32>
    %c0_128 = arith.constant 0 : index
    %c0_129 = arith.constant 0 : index
    %c0_130 = arith.constant 0 : index
    %342 = vector.load %arg30[%c0_128, %c0_129, %c0_130] : memref<1x8x64xf32, #tpu.memory_space<vmem>>, vector<1x8x64xf32>
    %343 = vector.shape_cast %342 : vector<1x8x64xf32> to vector<8x64xf32>
    %344 = vector.shape_cast %341 : vector<8x64xf32> to vector<1x8x64xf32>
    tpu.vector_store %arg30[%c0_128, %c0_129, %c0_130], %344 {strides = array<i32>} : memref<1x8x64xf32, #tpu.memory_space<vmem>>, vector<1x8x64xf32>,
    return
  }
  func.func @transform_0(%arg0: i32) -> (i32, i32, i32) {
    %c0_i32 = arith.constant 0 : i32
    %c0_i32_0 = arith.constant 0 : i32
    %c0_i32_1 = arith.constant 0 : i32
    return %arg0, %c0_i32, %c0_i32_0 : i32, i32, i32
  }
  func.func @transform_1(%arg0: i32) -> (i32, i32, i32) {
    %c0_i32 = arith.constant 0 : i32
    %c0_i32_0 = arith.constant 0 : i32
    %c0_i32_1 = arith.constant 0 : i32
    return %arg0, %c0_i32, %c0_i32_0 : i32, i32, i32
  }
  func.func @transform_2(%arg0: i32) -> (i32, i32, i32) {
    %c0_i32 = arith.constant 0 : i32
    %c0_i32_0 = arith.constant 0 : i32
    %c0_i32_1 = arith.constant 0 : i32
    return %arg0, %c0_i32, %c0_i32_0 : i32, i32, i32
  }
  func.func @transform_3(%arg0: i32) -> (i32, i32) {
    %c0_i32 = arith.constant 0 : i32
    %c0_i32_0 = arith.constant 0 : i32
    %c0_i32_1 = arith.constant 0 : i32
    return %c0_i32, %c0_i32_0 : i32, i32
  }
  func.func @transform_4(%arg0: i32) -> (i32, i32) {
    %c0_i32 = arith.constant 0 : i32
    %c0_i32_0 = arith.constant 0 : i32
    %c0_i32_1 = arith.constant 0 : i32
    return %c0_i32, %c0_i32_0 : i32, i32
  }
  func.func @transform_5(%arg0: i32) -> (i32, i32) {
    %c0_i32 = arith.constant 0 : i32
    %c0_i32_0 = arith.constant 0 : i32
    %c0_i32_1 = arith.constant 0 : i32
    return %c0_i32, %c0_i32_0 : i32, i32
  }
  func.func @transform_6(%arg0: i32) -> (i32, i32) {
    %c0_i32 = arith.constant 0 : i32
    %c0_i32_0 = arith.constant 0 : i32
    %c0_i32_1 = arith.constant 0 : i32
    return %c0_i32, %c0_i32_0 : i32, i32
  }
  func.func @transform_7(%arg0: i32) -> (i32, i32) {
    %c0_i32 = arith.constant 0 : i32
    %c0_i32_0 = arith.constant 0 : i32
    %c0_i32_1 = arith.constant 0 : i32
    return %c0_i32, %c0_i32_0 : i32, i32
  }
  func.func @transform_8(%arg0: i32) -> (i32, i32) {
    %c0_i32 = arith.constant 0 : i32
    %c0_i32_0 = arith.constant 0 : i32
    %c0_i32_1 = arith.constant 0 : i32
    return %c0_i32, %c0_i32_0 : i32, i32
  }
  func.func @transform_9(%arg0: i32) -> (i32, i32) {
    %c0_i32 = arith.constant 0 : i32
    %c0_i32_0 = arith.constant 0 : i32
    %c0_i32_1 = arith.constant 0 : i32
    return %c0_i32, %c0_i32_0 : i32, i32
  }
  func.func @transform_10(%arg0: i32) -> (i32, i32) {
    %c0_i32 = arith.constant 0 : i32
    %c0_i32_0 = arith.constant 0 : i32
    %c0_i32_1 = arith.constant 0 : i32
    return %c0_i32, %c0_i32_0 : i32, i32
  }
  func.func @transform_11(%arg0: i32) -> (i32, i32) {
    %c0_i32 = arith.constant 0 : i32
    %c0_i32_0 = arith.constant 0 : i32
    %c0_i32_1 = arith.constant 0 : i32
    return %c0_i32, %c0_i32_0 : i32, i32
  }
  func.func @transform_12(%arg0: i32) -> (i32, i32) {
    %c0_i32 = arith.constant 0 : i32
    %c0_i32_0 = arith.constant 0 : i32
    %c0_i32_1 = arith.constant 0 : i32
    return %c0_i32, %c0_i32_0 : i32, i32
  }
  func.func @transform_13(%arg0: i32) -> (i32, i32) {
    %c0_i32 = arith.constant 0 : i32
    %c0_i32_0 = arith.constant 0 : i32
    %c0_i32_1 = arith.constant 0 : i32
    return %c0_i32, %c0_i32_0 : i32, i32
  }
  func.func @transform_14(%arg0: i32) -> (i32, i32) {
    %c0_i32 = arith.constant 0 : i32
    %c0_i32_0 = arith.constant 0 : i32
    %c0_i32_1 = arith.constant 0 : i32
    return %c0_i32, %c0_i32_0 : i32, i32
  }
  func.func @transform_15(%arg0: i32) -> (i32, i32) {
    %c0_i32 = arith.constant 0 : i32
    %c0_i32_0 = arith.constant 0 : i32
    %c0_i32_1 = arith.constant 0 : i32
    return %c0_i32, %c0_i32_0 : i32, i32
  }
  func.func @transform_16(%arg0: i32) -> (i32, i32) {
    %c0_i32 = arith.constant 0 : i32
    %c0_i32_0 = arith.constant 0 : i32
    %c0_i32_1 = arith.constant 0 : i32
    return %c0_i32, %c0_i32_0 : i32, i32
  }
  func.func @transform_17(%arg0: i32) -> (i32, i32) {
    %c0_i32 = arith.constant 0 : i32
    %c0_i32_0 = arith.constant 0 : i32
    %c0_i32_1 = arith.constant 0 : i32
    return %c0_i32, %c0_i32_0 : i32, i32
  }
  func.func @transform_18(%arg0: i32) -> (i32, i32) {
    %c0_i32 = arith.constant 0 : i32
    %c0_i32_0 = arith.constant 0 : i32
    %c0_i32_1 = arith.constant 0 : i32
    return %c0_i32, %c0_i32_0 : i32, i32
  }
  func.func @transform_19(%arg0: i32) -> (i32, i32) {
    %c0_i32 = arith.constant 0 : i32
    %c0_i32_0 = arith.constant 0 : i32
    %c0_i32_1 = arith.constant 0 : i32
    return %c0_i32, %c0_i32_0 : i32, i32
  }
  func.func @transform_20(%arg0: i32) -> (i32, i32) {
    %c0_i32 = arith.constant 0 : i32
    %c0_i32_0 = arith.constant 0 : i32
    %c0_i32_1 = arith.constant 0 : i32
    return %c0_i32, %c0_i32_0 : i32, i32
  }
  func.func @transform_21(%arg0: i32) -> (i32, i32) {
    %c0_i32 = arith.constant 0 : i32
    %c0_i32_0 = arith.constant 0 : i32
    %c0_i32_1 = arith.constant 0 : i32
    return %c0_i32, %c0_i32_0 : i32, i32
  }
  func.func @transform_22(%arg0: i32) -> (i32, i32) {
    %c0_i32 = arith.constant 0 : i32
    %c0_i32_0 = arith.constant 0 : i32
    %c0_i32_1 = arith.constant 0 : i32
    return %c0_i32, %c0_i32_0 : i32, i32
  }
  func.func @transform_23(%arg0: i32) -> (i32, i32) {
    %c0_i32 = arith.constant 0 : i32
    %c0_i32_0 = arith.constant 0 : i32
    %c0_i32_1 = arith.constant 0 : i32
    return %c0_i32, %c0_i32_0 : i32, i32
  }
  func.func @transform_24(%arg0: i32) -> (i32, i32) {
    %c0_i32 = arith.constant 0 : i32
    %c0_i32_0 = arith.constant 0 : i32
    %c0_i32_1 = arith.constant 0 : i32
    return %c0_i32, %c0_i32_0 : i32, i32
  }
  func.func @transform_25(%arg0: i32) -> (i32, i32) {
    %c0_i32 = arith.constant 0 : i32
    %c0_i32_0 = arith.constant 0 : i32
    %c0_i32_1 = arith.constant 0 : i32
    return %c0_i32, %c0_i32_0 : i32, i32
  }
  func.func @transform_26(%arg0: i32) -> (i32, i32) {
    %c0_i32 = arith.constant 0 : i32
    %c0_i32_0 = arith.constant 0 : i32
    %c0_i32_1 = arith.constant 0 : i32
    return %c0_i32, %c0_i32_0 : i32, i32
  }
  func.func @transform_27(%arg0: i32) -> (i32, i32) {
    %c0_i32 = arith.constant 0 : i32
    %c0_i32_0 = arith.constant 0 : i32
    %c0_i32_1 = arith.constant 0 : i32
    return %c0_i32, %c0_i32_0 : i32, i32
  }
  func.func @transform_28(%arg0: i32) -> (i32, i32) {
    %c0_i32 = arith.constant 0 : i32
    %c0_i32_0 = arith.constant 0 : i32
    %c0_i32_1 = arith.constant 0 : i32
    return %c0_i32, %c0_i32_0 : i32, i32
  }
  func.func @transform_29(%arg0: i32) -> (i32, i32, i32) {
    %c0_i32 = arith.constant 0 : i32
    %c0_i32_0 = arith.constant 0 : i32
    %c0_i32_1 = arith.constant 0 : i32
    return %arg0, %c0_i32, %c0_i32_0 : i32, i32, i32
  }
}

module attributes {stable_mosaic.version = 11 : i64} {
  func.func @_bert_layer_kernel(%arg0: i32, %arg1: memref<1x8x64xf32, #tpu.memory_space<vmem>>, %arg2: memref<1x1x8xf32, #tpu.memory_space<vmem>>, %arg3: memref<1x5x64xf32, #tpu.memory_space<vmem>>, %arg4: memref<64x64xf32, #tpu.memory_space<vmem>>, %arg5: memref<1x64xf32, #tpu.memory_space<vmem>>, %arg6: memref<64x64xf32, #tpu.memory_space<vmem>>, %arg7: memref<1x64xf32, #tpu.memory_space<vmem>>, %arg8: memref<64x64xf32, #tpu.memory_space<vmem>>, %arg9: memref<1x64xf32, #tpu.memory_space<vmem>>, %arg10: memref<64x64xf32, #tpu.memory_space<vmem>>, %arg11: memref<1x64xf32, #tpu.memory_space<vmem>>, %arg12: memref<1x64xf32, #tpu.memory_space<vmem>>, %arg13: memref<1x64xf32, #tpu.memory_space<vmem>>, %arg14: memref<64x64xf32, #tpu.memory_space<vmem>>, %arg15: memref<1x64xf32, #tpu.memory_space<vmem>>, %arg16: memref<64x64xf32, #tpu.memory_space<vmem>>, %arg17: memref<1x64xf32, #tpu.memory_space<vmem>>, %arg18: memref<64x64xf32, #tpu.memory_space<vmem>>, %arg19: memref<1x64xf32, #tpu.memory_space<vmem>>, %arg20: memref<64x64xf32, #tpu.memory_space<vmem>>, %arg21: memref<1x64xf32, #tpu.memory_space<vmem>>, %arg22: memref<1x64xf32, #tpu.memory_space<vmem>>, %arg23: memref<1x64xf32, #tpu.memory_space<vmem>>, %arg24: memref<64x256xf32, #tpu.memory_space<vmem>>, %arg25: memref<1x256xf32, #tpu.memory_space<vmem>>, %arg26: memref<256x64xf32, #tpu.memory_space<vmem>>, %arg27: memref<1x64xf32, #tpu.memory_space<vmem>>, %arg28: memref<1x64xf32, #tpu.memory_space<vmem>>, %arg29: memref<1x64xf32, #tpu.memory_space<vmem>>, %arg30: memref<1x8x64xf32, #tpu.memory_space<vmem>>) attributes {dimension_semantics = [#tpu.dimension_semantics<parallel>], iteration_bounds = array<i64: 2>, scalar_prefetch = 0 : i64, scratch_operands = 0 : i64, tpu.core_type = #tpu.core_type<tc>, window_params = [{transform_indices = @transform_0, window_bounds = array<i64: 1, 8, 64>}, {transform_indices = @transform_1, window_bounds = array<i64: 1, 1, 8>}, {transform_indices = @transform_2, window_bounds = array<i64: 1, 5, 64>}, {pipeline_mode = #tpu.pipeline_mode<synchronous>, transform_indices = @transform_3, window_bounds = array<i64: 64, 64>}, {pipeline_mode = #tpu.pipeline_mode<synchronous>, transform_indices = @transform_4, window_bounds = array<i64: 1, 64>}, {pipeline_mode = #tpu.pipeline_mode<synchronous>, transform_indices = @transform_5, window_bounds = array<i64: 64, 64>}, {pipeline_mode = #tpu.pipeline_mode<synchronous>, transform_indices = @transform_6, window_bounds = array<i64: 1, 64>}, {pipeline_mode = #tpu.pipeline_mode<synchronous>, transform_indices = @transform_7, window_bounds = array<i64: 64, 64>}, {pipeline_mode = #tpu.pipeline_mode<synchronous>, transform_indices = @transform_8, window_bounds = array<i64: 1, 64>}, {pipeline_mode = #tpu.pipeline_mode<synchronous>, transform_indices = @transform_9, window_bounds = array<i64: 64, 64>}, {pipeline_mode = #tpu.pipeline_mode<synchronous>, transform_indices = @transform_10, window_bounds = array<i64: 1, 64>}, {pipeline_mode = #tpu.pipeline_mode<synchronous>, transform_indices = @transform_11, window_bounds = array<i64: 1, 64>}, {pipeline_mode = #tpu.pipeline_mode<synchronous>, transform_indices = @transform_12, window_bounds = array<i64: 1, 64>}, {pipeline_mode = #tpu.pipeline_mode<synchronous>, transform_indices = @transform_13, window_bounds = array<i64: 64, 64>}, {pipeline_mode = #tpu.pipeline_mode<synchronous>, transform_indices = @transform_14, window_bounds = array<i64: 1, 64>}, {pipeline_mode = #tpu.pipeline_mode<synchronous>, transform_indices = @transform_15, window_bounds = array<i64: 64, 64>}, {pipeline_mode = #tpu.pipeline_mode<synchronous>, transform_indices = @transform_16, window_bounds = array<i64: 1, 64>}, {pipeline_mode = #tpu.pipeline_mode<synchronous>, transform_indices = @transform_17, window_bounds = array<i64: 64, 64>}, {pipeline_mode = #tpu.pipeline_mode<synchronous>, transform_indices = @transform_18, window_bounds = array<i64: 1, 64>}, {pipeline_mode = #tpu.pipeline_mode<synchronous>, transform_indices = @transform_19, window_bounds = array<i64: 64, 64>}, {pipeline_mode = #tpu.pipeline_mode<synchronous>, transform_indices = @transform_20, window_bounds = array<i64: 1, 64>}, {pipeline_mode = #tpu.pipeline_mode<synchronous>, transform_indices = @transform_21, window_bounds = array<i64: 1, 64>}, {pipeline_mode = #tpu.pipeline_mode<synchronous>, transform_indices = @transform_22, window_bounds = array<i64: 1, 64>}, {pipeline_mode = #tpu.pipeline_mode<synchronous>, transform_indices = @transform_23, window_bounds = array<i64: 64, 256>}, {pipeline_mode = #tpu.pipeline_mode<synchronous>, transform_indices = @transform_24, window_bounds = array<i64: 1, 256>}, {pipeline_mode = #tpu.pipeline_mode<synchronous>, transform_indices = @transform_25, window_bounds = array<i64: 256, 64>}, {pipeline_mode = #tpu.pipeline_mode<synchronous>, transform_indices = @transform_26, window_bounds = array<i64: 1, 64>}, {pipeline_mode = #tpu.pipeline_mode<synchronous>, transform_indices = @transform_27, window_bounds = array<i64: 1, 64>}, {pipeline_mode = #tpu.pipeline_mode<synchronous>, transform_indices = @transform_28, window_bounds = array<i64: 1, 64>}, {transform_indices = @transform_29, window_bounds = array<i64: 1, 8, 64>}]} {
    %c0 = arith.constant 0 : index
    %c0_0 = arith.constant 0 : index
    %c0_1 = arith.constant 0 : index
    %0 = vector.load %arg1[%c0, %c0_0, %c0_1] : memref<1x8x64xf32, #tpu.memory_space<vmem>>, vector<1x8x64xf32>
    %1 = vector.shape_cast %0 : vector<1x8x64xf32> to vector<8x64xf32>
    %c0_2 = arith.constant 0 : index
    %c0_3 = arith.constant 0 : index
    %c0_4 = arith.constant 0 : index
    %2 = vector.load %arg2[%c0_2, %c0_3, %c0_4] : memref<1x1x8xf32, #tpu.memory_space<vmem>>, vector<1x1x8xf32>
    %3 = vector.shape_cast %2 : vector<1x1x8xf32> to vector<1x8xf32>
    %c0_5 = arith.constant 0 : index
    %c0_6 = arith.constant 0 : index
    %4 = vector.load %arg4[%c0_5, %c0_6] : memref<64x64xf32, #tpu.memory_space<vmem>>, vector<64x64xf32>
    %5 = arith.truncf %1 : vector<8x64xf32> to vector<8x64xbf16>
    %6 = arith.truncf %4 : vector<64x64xf32> to vector<64x64xbf16>
    %cst = arith.constant dense<0.000000e+00> : vector<8x64xf32>
    %7 = tpu.matmul %5, %6, %cst {dimension_numbers = #tpu.dot_dimension_numbers<[1], [0], [0], [1], [0, 0, 1, 1], [], []>} : vector<8x64xbf16>, vector<64x64xbf16>, vector<8x64xf32> -> vector<8x64xf32>
    %c0_7 = arith.constant 0 : index
    %c0_8 = arith.constant 0 : index
    %8 = vector.load %arg5[%c0_7, %c0_8] : memref<1x64xf32, #tpu.memory_space<vmem>>, vector<1x64xf32>
    %9 = vector.broadcast %8 : vector<1x64xf32> to vector<8x64xf32>
    %10 = arith.addf %7, %9 : vector<8x64xf32>
    %c0_9 = arith.constant 0 : index
    %c0_10 = arith.constant 0 : index
    %11 = vector.load %arg6[%c0_9, %c0_10] : memref<64x64xf32, #tpu.memory_space<vmem>>, vector<64x64xf32>
    %12 = arith.truncf %1 : vector<8x64xf32> to vector<8x64xbf16>
    %13 = arith.truncf %11 : vector<64x64xf32> to vector<64x64xbf16>
    %cst_11 = arith.constant dense<0.000000e+00> : vector<8x64xf32>
    %14 = tpu.matmul %12, %13, %cst_11 {dimension_numbers = #tpu.dot_dimension_numbers<[1], [0], [0], [1], [0, 0, 1, 1], [], []>} : vector<8x64xbf16>, vector<64x64xbf16>, vector<8x64xf32> -> vector<8x64xf32>
    %c0_12 = arith.constant 0 : index
    %c0_13 = arith.constant 0 : index
    %15 = vector.load %arg7[%c0_12, %c0_13] : memref<1x64xf32, #tpu.memory_space<vmem>>, vector<1x64xf32>
    %16 = vector.broadcast %15 : vector<1x64xf32> to vector<8x64xf32>
    %17 = arith.addf %14, %16 : vector<8x64xf32>
    %c0_14 = arith.constant 0 : index
    %c0_15 = arith.constant 0 : index
    %18 = vector.load %arg8[%c0_14, %c0_15] : memref<64x64xf32, #tpu.memory_space<vmem>>, vector<64x64xf32>
    %19 = arith.truncf %1 : vector<8x64xf32> to vector<8x64xbf16>
    %20 = arith.truncf %18 : vector<64x64xf32> to vector<64x64xbf16>
    %cst_16 = arith.constant dense<0.000000e+00> : vector<8x64xf32>
    %21 = tpu.matmul %19, %20, %cst_16 {dimension_numbers = #tpu.dot_dimension_numbers<[1], [0], [0], [1], [0, 0, 1, 1], [], []>} : vector<8x64xbf16>, vector<64x64xbf16>, vector<8x64xf32> -> vector<8x64xf32>
    %c0_17 = arith.constant 0 : index
    %c0_18 = arith.constant 0 : index
    %22 = vector.load %arg9[%c0_17, %c0_18] : memref<1x64xf32, #tpu.memory_space<vmem>>, vector<1x64xf32>
    %23 = vector.broadcast %22 : vector<1x64xf32> to vector<8x64xf32>
    %24 = arith.addf %21, %23 : vector<8x64xf32>
    %25 = vector.extract_strided_slice %10 {offsets = [0, 0], sizes = [8, 16], strides = [1, 1]} : vector<8x64xf32> to vector<8x16xf32>
    %26 = vector.extract_strided_slice %17 {offsets = [0, 0], sizes = [8, 16], strides = [1, 1]} : vector<8x64xf32> to vector<8x16xf32>
    %27 = arith.truncf %25 : vector<8x16xf32> to vector<8x16xbf16>
    %28 = arith.truncf %26 : vector<8x16xf32> to vector<8x16xbf16>
    %cst_19 = arith.constant dense<0.000000e+00> : vector<8x8xf32>
    %29 = tpu.matmul %27, %28, %cst_19 {dimension_numbers = #tpu.dot_dimension_numbers<[1], [1], [0], [0], [0, 0, 1, 0], [], []>} : vector<8x16xbf16>, vector<8x16xbf16>, vector<8x8xf32> -> vector<8x8xf32>
    %cst_20 = arith.constant 2.500000e-01 : f32
    %30 = vector.broadcast %cst_20 : f32 to vector<8x8xf32>
    %31 = arith.mulf %29, %30 : vector<8x8xf32>
    %32 = vector.broadcast %3 : vector<1x8xf32> to vector<8x8xf32>
    %33 = arith.addf %31, %32 : vector<8x8xf32>
    %cst_21 = arith.constant dense<0xFF800000> : vector<8xf32>
    %34 = vector.multi_reduction <maximumf>, %33, %cst_21 [1] : vector<8x8xf32> to vector<8xf32>
    %35 = vector.shape_cast %34 : vector<8xf32> to vector<8x1xf32>
    %36 = vector.broadcast %35 : vector<8x1xf32> to vector<8x8xf32>
    %37 = arith.subf %33, %36 : vector<8x8xf32>
    %38 = math.exp %37 : vector<8x8xf32>
    %cst_22 = arith.constant dense<0.000000e+00> : vector<8xf32>
    %39 = vector.multi_reduction <add>, %38, %cst_22 [1] : vector<8x8xf32> to vector<8xf32>
    %40 = vector.shape_cast %39 : vector<8xf32> to vector<8x1xf32>
    %41 = tpu.reciprocal %40 {approx = true} : vector<8x1xf32> -> vector<8x1xf32>
    %42 = vector.broadcast %41 : vector<8x1xf32> to vector<8x8xf32>
    %43 = arith.mulf %38, %42 : vector<8x8xf32>
    %44 = vector.extract_strided_slice %24 {offsets = [0, 0], sizes = [8, 16], strides = [1, 1]} : vector<8x64xf32> to vector<8x16xf32>
    %45 = arith.truncf %43 : vector<8x8xf32> to vector<8x8xbf16>
    %46 = arith.truncf %44 : vector<8x16xf32> to vector<8x16xbf16>
    %cst_23 = arith.constant dense<0.000000e+00> : vector<8x16xf32>
    %47 = tpu.matmul %45, %46, %cst_23 {dimension_numbers = #tpu.dot_dimension_numbers<[1], [0], [0], [1], [0, 0, 1, 1], [], []>} : vector<8x8xbf16>, vector<8x16xbf16>, vector<8x16xf32> -> vector<8x16xf32>
    %48 = vector.extract_strided_slice %10 {offsets = [0, 16], sizes = [8, 16], strides = [1, 1]} : vector<8x64xf32> to vector<8x16xf32>
    %49 = vector.extract_strided_slice %17 {offsets = [0, 16], sizes = [8, 16], strides = [1, 1]} : vector<8x64xf32> to vector<8x16xf32>
    %50 = arith.truncf %48 : vector<8x16xf32> to vector<8x16xbf16>
    %51 = arith.truncf %49 : vector<8x16xf32> to vector<8x16xbf16>
    %cst_24 = arith.constant dense<0.000000e+00> : vector<8x8xf32>
    %52 = tpu.matmul %50, %51, %cst_24 {dimension_numbers = #tpu.dot_dimension_numbers<[1], [1], [0], [0], [0, 0, 1, 0], [], []>} : vector<8x16xbf16>, vector<8x16xbf16>, vector<8x8xf32> -> vector<8x8xf32>
    %cst_25 = arith.constant 2.500000e-01 : f32
    %53 = vector.broadcast %cst_25 : f32 to vector<8x8xf32>
    %54 = arith.mulf %52, %53 : vector<8x8xf32>
    %55 = vector.broadcast %3 : vector<1x8xf32> to vector<8x8xf32>
    %56 = arith.addf %54, %55 : vector<8x8xf32>
    %cst_26 = arith.constant dense<0xFF800000> : vector<8xf32>
    %57 = vector.multi_reduction <maximumf>, %56, %cst_26 [1] : vector<8x8xf32> to vector<8xf32>
    %58 = vector.shape_cast %57 : vector<8xf32> to vector<8x1xf32>
    %59 = vector.broadcast %58 : vector<8x1xf32> to vector<8x8xf32>
    %60 = arith.subf %56, %59 : vector<8x8xf32>
    %61 = math.exp %60 : vector<8x8xf32>
    %cst_27 = arith.constant dense<0.000000e+00> : vector<8xf32>
    %62 = vector.multi_reduction <add>, %61, %cst_27 [1] : vector<8x8xf32> to vector<8xf32>
    %63 = vector.shape_cast %62 : vector<8xf32> to vector<8x1xf32>
    %64 = tpu.reciprocal %63 {approx = true} : vector<8x1xf32> -> vector<8x1xf32>
    %65 = vector.broadcast %64 : vector<8x1xf32> to vector<8x8xf32>
    %66 = arith.mulf %61, %65 : vector<8x8xf32>
    %67 = vector.extract_strided_slice %24 {offsets = [0, 16], sizes = [8, 16], strides = [1, 1]} : vector<8x64xf32> to vector<8x16xf32>
    %68 = arith.truncf %66 : vector<8x8xf32> to vector<8x8xbf16>
    %69 = arith.truncf %67 : vector<8x16xf32> to vector<8x16xbf16>
    %cst_28 = arith.constant dense<0.000000e+00> : vector<8x16xf32>
    %70 = tpu.matmul %68, %69, %cst_28 {dimension_numbers = #tpu.dot_dimension_numbers<[1], [0], [0], [1], [0, 0, 1, 1], [], []>} : vector<8x8xbf16>, vector<8x16xbf16>, vector<8x16xf32> -> vector<8x16xf32>
    %71 = vector.extract_strided_slice %10 {offsets = [0, 32], sizes = [8, 16], strides = [1, 1]} : vector<8x64xf32> to vector<8x16xf32>
    %72 = vector.extract_strided_slice %17 {offsets = [0, 32], sizes = [8, 16], strides = [1, 1]} : vector<8x64xf32> to vector<8x16xf32>
    %73 = arith.truncf %71 : vector<8x16xf32> to vector<8x16xbf16>
    %74 = arith.truncf %72 : vector<8x16xf32> to vector<8x16xbf16>
    %cst_29 = arith.constant dense<0.000000e+00> : vector<8x8xf32>
    %75 = tpu.matmul %73, %74, %cst_29 {dimension_numbers = #tpu.dot_dimension_numbers<[1], [1], [0], [0], [0, 0, 1, 0], [], []>} : vector<8x16xbf16>, vector<8x16xbf16>, vector<8x8xf32> -> vector<8x8xf32>
    %cst_30 = arith.constant 2.500000e-01 : f32
    %76 = vector.broadcast %cst_30 : f32 to vector<8x8xf32>
    %77 = arith.mulf %75, %76 : vector<8x8xf32>
    %78 = vector.broadcast %3 : vector<1x8xf32> to vector<8x8xf32>
    %79 = arith.addf %77, %78 : vector<8x8xf32>
    %cst_31 = arith.constant dense<0xFF800000> : vector<8xf32>
    %80 = vector.multi_reduction <maximumf>, %79, %cst_31 [1] : vector<8x8xf32> to vector<8xf32>
    %81 = vector.shape_cast %80 : vector<8xf32> to vector<8x1xf32>
    %82 = vector.broadcast %81 : vector<8x1xf32> to vector<8x8xf32>
    %83 = arith.subf %79, %82 : vector<8x8xf32>
    %84 = math.exp %83 : vector<8x8xf32>
    %cst_32 = arith.constant dense<0.000000e+00> : vector<8xf32>
    %85 = vector.multi_reduction <add>, %84, %cst_32 [1] : vector<8x8xf32> to vector<8xf32>
    %86 = vector.shape_cast %85 : vector<8xf32> to vector<8x1xf32>
    %87 = tpu.reciprocal %86 {approx = true} : vector<8x1xf32> -> vector<8x1xf32>
    %88 = vector.broadcast %87 : vector<8x1xf32> to vector<8x8xf32>
    %89 = arith.mulf %84, %88 : vector<8x8xf32>
    %90 = vector.extract_strided_slice %24 {offsets = [0, 32], sizes = [8, 16], strides = [1, 1]} : vector<8x64xf32> to vector<8x16xf32>
    %91 = arith.truncf %89 : vector<8x8xf32> to vector<8x8xbf16>
    %92 = arith.truncf %90 : vector<8x16xf32> to vector<8x16xbf16>
    %cst_33 = arith.constant dense<0.000000e+00> : vector<8x16xf32>
    %93 = tpu.matmul %91, %92, %cst_33 {dimension_numbers = #tpu.dot_dimension_numbers<[1], [0], [0], [1], [0, 0, 1, 1], [], []>} : vector<8x8xbf16>, vector<8x16xbf16>, vector<8x16xf32> -> vector<8x16xf32>
    %94 = vector.extract_strided_slice %10 {offsets = [0, 48], sizes = [8, 16], strides = [1, 1]} : vector<8x64xf32> to vector<8x16xf32>
    %95 = vector.extract_strided_slice %17 {offsets = [0, 48], sizes = [8, 16], strides = [1, 1]} : vector<8x64xf32> to vector<8x16xf32>
    %96 = arith.truncf %94 : vector<8x16xf32> to vector<8x16xbf16>
    %97 = arith.truncf %95 : vector<8x16xf32> to vector<8x16xbf16>
    %cst_34 = arith.constant dense<0.000000e+00> : vector<8x8xf32>
    %98 = tpu.matmul %96, %97, %cst_34 {dimension_numbers = #tpu.dot_dimension_numbers<[1], [1], [0], [0], [0, 0, 1, 0], [], []>} : vector<8x16xbf16>, vector<8x16xbf16>, vector<8x8xf32> -> vector<8x8xf32>
    %cst_35 = arith.constant 2.500000e-01 : f32
    %99 = vector.broadcast %cst_35 : f32 to vector<8x8xf32>
    %100 = arith.mulf %98, %99 : vector<8x8xf32>
    %101 = vector.broadcast %3 : vector<1x8xf32> to vector<8x8xf32>
    %102 = arith.addf %100, %101 : vector<8x8xf32>
    %cst_36 = arith.constant dense<0xFF800000> : vector<8xf32>
    %103 = vector.multi_reduction <maximumf>, %102, %cst_36 [1] : vector<8x8xf32> to vector<8xf32>
    %104 = vector.shape_cast %103 : vector<8xf32> to vector<8x1xf32>
    %105 = vector.broadcast %104 : vector<8x1xf32> to vector<8x8xf32>
    %106 = arith.subf %102, %105 : vector<8x8xf32>
    %107 = math.exp %106 : vector<8x8xf32>
    %cst_37 = arith.constant dense<0.000000e+00> : vector<8xf32>
    %108 = vector.multi_reduction <add>, %107, %cst_37 [1] : vector<8x8xf32> to vector<8xf32>
    %109 = vector.shape_cast %108 : vector<8xf32> to vector<8x1xf32>
    %110 = tpu.reciprocal %109 {approx = true} : vector<8x1xf32> -> vector<8x1xf32>
    %111 = vector.broadcast %110 : vector<8x1xf32> to vector<8x8xf32>
    %112 = arith.mulf %107, %111 : vector<8x8xf32>
    %113 = vector.extract_strided_slice %24 {offsets = [0, 48], sizes = [8, 16], strides = [1, 1]} : vector<8x64xf32> to vector<8x16xf32>
    %114 = arith.truncf %112 : vector<8x8xf32> to vector<8x8xbf16>
    %115 = arith.truncf %113 : vector<8x16xf32> to vector<8x16xbf16>
    %cst_38 = arith.constant dense<0.000000e+00> : vector<8x16xf32>
    %116 = tpu.matmul %114, %115, %cst_38 {dimension_numbers = #tpu.dot_dimension_numbers<[1], [0], [0], [1], [0, 0, 1, 1], [], []>} : vector<8x8xbf16>, vector<8x16xbf16>, vector<8x16xf32> -> vector<8x16xf32>
    %117 = tpu.concatenate %47, %70, %93, %116 in 1 : vector<8x16xf32>, vector<8x16xf32>, vector<8x16xf32>, vector<8x16xf32> -> vector<8x64xf32>
    %c0_39 = arith.constant 0 : index
    %c0_40 = arith.constant 0 : index
    %118 = vector.load %arg10[%c0_39, %c0_40] : memref<64x64xf32, #tpu.memory_space<vmem>>, vector<64x64xf32>
    %119 = arith.truncf %117 : vector<8x64xf32> to vector<8x64xbf16>
    %120 = arith.truncf %118 : vector<64x64xf32> to vector<64x64xbf16>
    %cst_41 = arith.constant dense<0.000000e+00> : vector<8x64xf32>
    %121 = tpu.matmul %119, %120, %cst_41 {dimension_numbers = #tpu.dot_dimension_numbers<[1], [0], [0], [1], [0, 0, 1, 1], [], []>} : vector<8x64xbf16>, vector<64x64xbf16>, vector<8x64xf32> -> vector<8x64xf32>
    %c0_42 = arith.constant 0 : index
    %c0_43 = arith.constant 0 : index
    %122 = vector.load %arg11[%c0_42, %c0_43] : memref<1x64xf32, #tpu.memory_space<vmem>>, vector<1x64xf32>
    %123 = vector.broadcast %122 : vector<1x64xf32> to vector<8x64xf32>
    %124 = arith.addf %121, %123 : vector<8x64xf32>
    %125 = arith.addf %124, %1 : vector<8x64xf32>
    %c0_44 = arith.constant 0 : index
    %c0_45 = arith.constant 0 : index
    %126 = vector.load %arg12[%c0_44, %c0_45] : memref<1x64xf32, #tpu.memory_space<vmem>>, vector<1x64xf32>
    %c0_46 = arith.constant 0 : index
    %c0_47 = arith.constant 0 : index
    %127 = vector.load %arg13[%c0_46, %c0_47] : memref<1x64xf32, #tpu.memory_space<vmem>>, vector<1x64xf32>
    %cst_48 = arith.constant dense<0.000000e+00> : vector<8xf32>
    %128 = vector.multi_reduction <add>, %125, %cst_48 [1] : vector<8x64xf32> to vector<8xf32>
    %129 = vector.shape_cast %128 : vector<8xf32> to vector<8x1xf32>
    %cst_49 = arith.constant 6.400000e+01 : f32
    %130 = vector.broadcast %cst_49 : f32 to vector<8x1xf32>
    %131 = arith.divf %129, %130 : vector<8x1xf32>
    %132 = vector.broadcast %131 : vector<8x1xf32> to vector<8x64xf32>
    %133 = arith.subf %125, %132 : vector<8x64xf32>
    %134 = arith.mulf %133, %133 : vector<8x64xf32>
    %cst_50 = arith.constant dense<0.000000e+00> : vector<8xf32>
    %135 = vector.multi_reduction <add>, %134, %cst_50 [1] : vector<8x64xf32> to vector<8xf32>
    %136 = vector.shape_cast %135 : vector<8xf32> to vector<8x1xf32>
    %cst_51 = arith.constant 6.400000e+01 : f32
    %137 = vector.broadcast %cst_51 : f32 to vector<8x1xf32>
    %138 = arith.divf %136, %137 : vector<8x1xf32>
    %139 = vector.broadcast %131 : vector<8x1xf32> to vector<8x64xf32>
    %140 = arith.subf %125, %139 : vector<8x64xf32>
    %cst_52 = arith.constant 9.99999996E-13 : f32
    %141 = vector.broadcast %cst_52 : f32 to vector<8x1xf32>
    %142 = arith.addf %138, %141 : vector<8x1xf32>
    %143 = math.rsqrt %142 : vector<8x1xf32>
    %144 = vector.broadcast %143 : vector<8x1xf32> to vector<8x64xf32>
    %145 = arith.mulf %140, %144 : vector<8x64xf32>
    %146 = vector.broadcast %126 : vector<1x64xf32> to vector<8x64xf32>
    %147 = arith.mulf %145, %146 : vector<8x64xf32>
    %148 = vector.broadcast %127 : vector<1x64xf32> to vector<8x64xf32>
    %149 = arith.addf %147, %148 : vector<8x64xf32>
    %c0_53 = arith.constant 0 : index
    %c0_54 = arith.constant 0 : index
    %c0_55 = arith.constant 0 : index
    %150 = vector.load %arg3[%c0_53, %c0_54, %c0_55] : memref<1x5x64xf32, #tpu.memory_space<vmem>>, vector<1x5x64xf32>
    %151 = vector.shape_cast %150 : vector<1x5x64xf32> to vector<5x64xf32>
    %c0_56 = arith.constant 0 : index
    %c0_57 = arith.constant 0 : index
    %152 = vector.load %arg14[%c0_56, %c0_57] : memref<64x64xf32, #tpu.memory_space<vmem>>, vector<64x64xf32>
    %153 = arith.truncf %149 : vector<8x64xf32> to vector<8x64xbf16>
    %154 = arith.truncf %152 : vector<64x64xf32> to vector<64x64xbf16>
    %cst_58 = arith.constant dense<0.000000e+00> : vector<8x64xf32>
    %155 = tpu.matmul %153, %154, %cst_58 {dimension_numbers = #tpu.dot_dimension_numbers<[1], [0], [0], [1], [0, 0, 1, 1], [], []>} : vector<8x64xbf16>, vector<64x64xbf16>, vector<8x64xf32> -> vector<8x64xf32>
    %c0_59 = arith.constant 0 : index
    %c0_60 = arith.constant 0 : index
    %156 = vector.load %arg15[%c0_59, %c0_60] : memref<1x64xf32, #tpu.memory_space<vmem>>, vector<1x64xf32>
    %157 = vector.broadcast %156 : vector<1x64xf32> to vector<8x64xf32>
    %158 = arith.addf %155, %157 : vector<8x64xf32>
    %c0_61 = arith.constant 0 : index
    %c0_62 = arith.constant 0 : index
    %159 = vector.load %arg16[%c0_61, %c0_62] : memref<64x64xf32, #tpu.memory_space<vmem>>, vector<64x64xf32>
    %160 = arith.truncf %151 : vector<5x64xf32> to vector<5x64xbf16>
    %161 = arith.truncf %159 : vector<64x64xf32> to vector<64x64xbf16>
    %cst_63 = arith.constant dense<0.000000e+00> : vector<5x64xf32>
    %162 = tpu.matmul %160, %161, %cst_63 {dimension_numbers = #tpu.dot_dimension_numbers<[1], [0], [0], [1], [0, 0, 1, 1], [], []>} : vector<5x64xbf16>, vector<64x64xbf16>, vector<5x64xf32> -> vector<5x64xf32>
    %c0_64 = arith.constant 0 : index
    %c0_65 = arith.constant 0 : index
    %163 = vector.load %arg17[%c0_64, %c0_65] : memref<1x64xf32, #tpu.memory_space<vmem>>, vector<1x64xf32>
    %164 = vector.broadcast %163 : vector<1x64xf32> to vector<5x64xf32>
    %165 = arith.addf %162, %164 : vector<5x64xf32>
    %c0_66 = arith.constant 0 : index
    %c0_67 = arith.constant 0 : index
    %166 = vector.load %arg18[%c0_66, %c0_67] : memref<64x64xf32, #tpu.memory_space<vmem>>, vector<64x64xf32>
    %167 = arith.truncf %151 : vector<5x64xf32> to vector<5x64xbf16>
    %168 = arith.truncf %166 : vector<64x64xf32> to vector<64x64xbf16>
    %cst_68 = arith.constant dense<0.000000e+00> : vector<5x64xf32>
    %169 = tpu.matmul %167, %168, %cst_68 {dimension_numbers = #tpu.dot_dimension_numbers<[1], [0], [0], [1], [0, 0, 1, 1], [], []>} : vector<5x64xbf16>, vector<64x64xbf16>, vector<5x64xf32> -> vector<5x64xf32>
    %c0_69 = arith.constant 0 : index
    %c0_70 = arith.constant 0 : index
    %170 = vector.load %arg19[%c0_69, %c0_70] : memref<1x64xf32, #tpu.memory_space<vmem>>, vector<1x64xf32>
    %171 = vector.broadcast %170 : vector<1x64xf32> to vector<5x64xf32>
    %172 = arith.addf %169, %171 : vector<5x64xf32>
    %173 = vector.extract_strided_slice %158 {offsets = [0, 0], sizes = [8, 16], strides = [1, 1]} : vector<8x64xf32> to vector<8x16xf32>
    %174 = vector.extract_strided_slice %165 {offsets = [0, 0], sizes = [5, 16], strides = [1, 1]} : vector<5x64xf32> to vector<5x16xf32>
    %175 = arith.truncf %173 : vector<8x16xf32> to vector<8x16xbf16>
    %176 = arith.truncf %174 : vector<5x16xf32> to vector<5x16xbf16>
    %cst_71 = arith.constant dense<0.000000e+00> : vector<8x5xf32>
    %177 = tpu.matmul %175, %176, %cst_71 {dimension_numbers = #tpu.dot_dimension_numbers<[1], [1], [0], [0], [0, 0, 1, 0], [], []>} : vector<8x16xbf16>, vector<5x16xbf16>, vector<8x5xf32> -> vector<8x5xf32>
    %cst_72 = arith.constant 2.500000e-01 : f32
    %178 = vector.broadcast %cst_72 : f32 to vector<8x5xf32>
    %179 = arith.mulf %177, %178 : vector<8x5xf32>
    %cst_73 = arith.constant dense<0xFF800000> : vector<8xf32>
    %180 = vector.multi_reduction <maximumf>, %179, %cst_73 [1] : vector<8x5xf32> to vector<8xf32>
    %181 = vector.shape_cast %180 : vector<8xf32> to vector<8x1xf32>
    %182 = vector.broadcast %181 : vector<8x1xf32> to vector<8x5xf32>
    %183 = arith.subf %179, %182 : vector<8x5xf32>
    %184 = math.exp %183 : vector<8x5xf32>
    %cst_74 = arith.constant dense<0.000000e+00> : vector<8xf32>
    %185 = vector.multi_reduction <add>, %184, %cst_74 [1] : vector<8x5xf32> to vector<8xf32>
    %186 = vector.shape_cast %185 : vector<8xf32> to vector<8x1xf32>
    %187 = tpu.reciprocal %186 {approx = true} : vector<8x1xf32> -> vector<8x1xf32>
    %188 = vector.broadcast %187 : vector<8x1xf32> to vector<8x5xf32>
    %189 = arith.mulf %184, %188 : vector<8x5xf32>
    %190 = vector.extract_strided_slice %172 {offsets = [0, 0], sizes = [5, 16], strides = [1, 1]} : vector<5x64xf32> to vector<5x16xf32>
    %191 = arith.truncf %189 : vector<8x5xf32> to vector<8x5xbf16>
    %192 = arith.truncf %190 : vector<5x16xf32> to vector<5x16xbf16>
    %cst_75 = arith.constant dense<0.000000e+00> : vector<8x16xf32>
    %193 = tpu.matmul %191, %192, %cst_75 {dimension_numbers = #tpu.dot_dimension_numbers<[1], [0], [0], [1], [0, 0, 1, 1], [], []>} : vector<8x5xbf16>, vector<5x16xbf16>, vector<8x16xf32> -> vector<8x16xf32>
    %194 = vector.extract_strided_slice %158 {offsets = [0, 16], sizes = [8, 16], strides = [1, 1]} : vector<8x64xf32> to vector<8x16xf32>
    %195 = vector.extract_strided_slice %165 {offsets = [0, 16], sizes = [5, 16], strides = [1, 1]} : vector<5x64xf32> to vector<5x16xf32>
    %196 = arith.truncf %194 : vector<8x16xf32> to vector<8x16xbf16>
    %197 = arith.truncf %195 : vector<5x16xf32> to vector<5x16xbf16>
    %cst_76 = arith.constant dense<0.000000e+00> : vector<8x5xf32>
    %198 = tpu.matmul %196, %197, %cst_76 {dimension_numbers = #tpu.dot_dimension_numbers<[1], [1], [0], [0], [0, 0, 1, 0], [], []>} : vector<8x16xbf16>, vector<5x16xbf16>, vector<8x5xf32> -> vector<8x5xf32>
    %cst_77 = arith.constant 2.500000e-01 : f32
    %199 = vector.broadcast %cst_77 : f32 to vector<8x5xf32>
    %200 = arith.mulf %198, %199 : vector<8x5xf32>
    %cst_78 = arith.constant dense<0xFF800000> : vector<8xf32>
    %201 = vector.multi_reduction <maximumf>, %200, %cst_78 [1] : vector<8x5xf32> to vector<8xf32>
    %202 = vector.shape_cast %201 : vector<8xf32> to vector<8x1xf32>
    %203 = vector.broadcast %202 : vector<8x1xf32> to vector<8x5xf32>
    %204 = arith.subf %200, %203 : vector<8x5xf32>
    %205 = math.exp %204 : vector<8x5xf32>
    %cst_79 = arith.constant dense<0.000000e+00> : vector<8xf32>
    %206 = vector.multi_reduction <add>, %205, %cst_79 [1] : vector<8x5xf32> to vector<8xf32>
    %207 = vector.shape_cast %206 : vector<8xf32> to vector<8x1xf32>
    %208 = tpu.reciprocal %207 {approx = true} : vector<8x1xf32> -> vector<8x1xf32>
    %209 = vector.broadcast %208 : vector<8x1xf32> to vector<8x5xf32>
    %210 = arith.mulf %205, %209 : vector<8x5xf32>
    %211 = vector.extract_strided_slice %172 {offsets = [0, 16], sizes = [5, 16], strides = [1, 1]} : vector<5x64xf32> to vector<5x16xf32>
    %212 = arith.truncf %210 : vector<8x5xf32> to vector<8x5xbf16>
    %213 = arith.truncf %211 : vector<5x16xf32> to vector<5x16xbf16>
    %cst_80 = arith.constant dense<0.000000e+00> : vector<8x16xf32>
    %214 = tpu.matmul %212, %213, %cst_80 {dimension_numbers = #tpu.dot_dimension_numbers<[1], [0], [0], [1], [0, 0, 1, 1], [], []>} : vector<8x5xbf16>, vector<5x16xbf16>, vector<8x16xf32> -> vector<8x16xf32>
    %215 = vector.extract_strided_slice %158 {offsets = [0, 32], sizes = [8, 16], strides = [1, 1]} : vector<8x64xf32> to vector<8x16xf32>
    %216 = vector.extract_strided_slice %165 {offsets = [0, 32], sizes = [5, 16], strides = [1, 1]} : vector<5x64xf32> to vector<5x16xf32>
    %217 = arith.truncf %215 : vector<8x16xf32> to vector<8x16xbf16>
    %218 = arith.truncf %216 : vector<5x16xf32> to vector<5x16xbf16>
    %cst_81 = arith.constant dense<0.000000e+00> : vector<8x5xf32>
    %219 = tpu.matmul %217, %218, %cst_81 {dimension_numbers = #tpu.dot_dimension_numbers<[1], [1], [0], [0], [0, 0, 1, 0], [], []>} : vector<8x16xbf16>, vector<5x16xbf16>, vector<8x5xf32> -> vector<8x5xf32>
    %cst_82 = arith.constant 2.500000e-01 : f32
    %220 = vector.broadcast %cst_82 : f32 to vector<8x5xf32>
    %221 = arith.mulf %219, %220 : vector<8x5xf32>
    %cst_83 = arith.constant dense<0xFF800000> : vector<8xf32>
    %222 = vector.multi_reduction <maximumf>, %221, %cst_83 [1] : vector<8x5xf32> to vector<8xf32>
    %223 = vector.shape_cast %222 : vector<8xf32> to vector<8x1xf32>
    %224 = vector.broadcast %223 : vector<8x1xf32> to vector<8x5xf32>
    %225 = arith.subf %221, %224 : vector<8x5xf32>
    %226 = math.exp %225 : vector<8x5xf32>
    %cst_84 = arith.constant dense<0.000000e+00> : vector<8xf32>
    %227 = vector.multi_reduction <add>, %226, %cst_84 [1] : vector<8x5xf32> to vector<8xf32>
    %228 = vector.shape_cast %227 : vector<8xf32> to vector<8x1xf32>
    %229 = tpu.reciprocal %228 {approx = true} : vector<8x1xf32> -> vector<8x1xf32>
    %230 = vector.broadcast %229 : vector<8x1xf32> to vector<8x5xf32>
    %231 = arith.mulf %226, %230 : vector<8x5xf32>
    %232 = vector.extract_strided_slice %172 {offsets = [0, 32], sizes = [5, 16], strides = [1, 1]} : vector<5x64xf32> to vector<5x16xf32>
    %233 = arith.truncf %231 : vector<8x5xf32> to vector<8x5xbf16>
    %234 = arith.truncf %232 : vector<5x16xf32> to vector<5x16xbf16>
    %cst_85 = arith.constant dense<0.000000e+00> : vector<8x16xf32>
    %235 = tpu.matmul %233, %234, %cst_85 {dimension_numbers = #tpu.dot_dimension_numbers<[1], [0], [0], [1], [0, 0, 1, 1], [], []>} : vector<8x5xbf16>, vector<5x16xbf16>, vector<8x16xf32> -> vector<8x16xf32>
    %236 = vector.extract_strided_slice %158 {offsets = [0, 48], sizes = [8, 16], strides = [1, 1]} : vector<8x64xf32> to vector<8x16xf32>
    %237 = vector.extract_strided_slice %165 {offsets = [0, 48], sizes = [5, 16], strides = [1, 1]} : vector<5x64xf32> to vector<5x16xf32>
    %238 = arith.truncf %236 : vector<8x16xf32> to vector<8x16xbf16>
    %239 = arith.truncf %237 : vector<5x16xf32> to vector<5x16xbf16>
    %cst_86 = arith.constant dense<0.000000e+00> : vector<8x5xf32>
    %240 = tpu.matmul %238, %239, %cst_86 {dimension_numbers = #tpu.dot_dimension_numbers<[1], [1], [0], [0], [0, 0, 1, 0], [], []>} : vector<8x16xbf16>, vector<5x16xbf16>, vector<8x5xf32> -> vector<8x5xf32>
    %cst_87 = arith.constant 2.500000e-01 : f32
    %241 = vector.broadcast %cst_87 : f32 to vector<8x5xf32>
    %242 = arith.mulf %240, %241 : vector<8x5xf32>
    %cst_88 = arith.constant dense<0xFF800000> : vector<8xf32>
    %243 = vector.multi_reduction <maximumf>, %242, %cst_88 [1] : vector<8x5xf32> to vector<8xf32>
    %244 = vector.shape_cast %243 : vector<8xf32> to vector<8x1xf32>
    %245 = vector.broadcast %244 : vector<8x1xf32> to vector<8x5xf32>
    %246 = arith.subf %242, %245 : vector<8x5xf32>
    %247 = math.exp %246 : vector<8x5xf32>
    %cst_89 = arith.constant dense<0.000000e+00> : vector<8xf32>
    %248 = vector.multi_reduction <add>, %247, %cst_89 [1] : vector<8x5xf32> to vector<8xf32>
    %249 = vector.shape_cast %248 : vector<8xf32> to vector<8x1xf32>
    %250 = tpu.reciprocal %249 {approx = true} : vector<8x1xf32> -> vector<8x1xf32>
    %251 = vector.broadcast %250 : vector<8x1xf32> to vector<8x5xf32>
    %252 = arith.mulf %247, %251 : vector<8x5xf32>
    %253 = vector.extract_strided_slice %172 {offsets = [0, 48], sizes = [5, 16], strides = [1, 1]} : vector<5x64xf32> to vector<5x16xf32>
    %254 = arith.truncf %252 : vector<8x5xf32> to vector<8x5xbf16>
    %255 = arith.truncf %253 : vector<5x16xf32> to vector<5x16xbf16>
    %cst_90 = arith.constant dense<0.000000e+00> : vector<8x16xf32>
    %256 = tpu.matmul %254, %255, %cst_90 {dimension_numbers = #tpu.dot_dimension_numbers<[1], [0], [0], [1], [0, 0, 1, 1], [], []>} : vector<8x5xbf16>, vector<5x16xbf16>, vector<8x16xf32> -> vector<8x16xf32>
    %257 = tpu.concatenate %193, %214, %235, %256 in 1 : vector<8x16xf32>, vector<8x16xf32>, vector<8x16xf32>, vector<8x16xf32> -> vector<8x64xf32>
    %c0_91 = arith.constant 0 : index
    %c0_92 = arith.constant 0 : index
    %258 = vector.load %arg20[%c0_91, %c0_92] : memref<64x64xf32, #tpu.memory_space<vmem>>, vector<64x64xf32>
    %259 = arith.truncf %257 : vector<8x64xf32> to vector<8x64xbf16>
    %260 = arith.truncf %258 : vector<64x64xf32> to vector<64x64xbf16>
    %cst_93 = arith.constant dense<0.000000e+00> : vector<8x64xf32>
    %261 = tpu.matmul %259, %260, %cst_93 {dimension_numbers = #tpu.dot_dimension_numbers<[1], [0], [0], [1], [0, 0, 1, 1], [], []>} : vector<8x64xbf16>, vector<64x64xbf16>, vector<8x64xf32> -> vector<8x64xf32>
    %c0_94 = arith.constant 0 : index
    %c0_95 = arith.constant 0 : index
    %262 = vector.load %arg21[%c0_94, %c0_95] : memref<1x64xf32, #tpu.memory_space<vmem>>, vector<1x64xf32>
    %263 = vector.broadcast %262 : vector<1x64xf32> to vector<8x64xf32>
    %264 = arith.addf %261, %263 : vector<8x64xf32>
    %265 = arith.addf %264, %149 : vector<8x64xf32>
    %c0_96 = arith.constant 0 : index
    %c0_97 = arith.constant 0 : index
    %266 = vector.load %arg22[%c0_96, %c0_97] : memref<1x64xf32, #tpu.memory_space<vmem>>, vector<1x64xf32>
    %c0_98 = arith.constant 0 : index
    %c0_99 = arith.constant 0 : index
    %267 = vector.load %arg23[%c0_98, %c0_99] : memref<1x64xf32, #tpu.memory_space<vmem>>, vector<1x64xf32>
    %cst_100 = arith.constant dense<0.000000e+00> : vector<8xf32>
    %268 = vector.multi_reduction <add>, %265, %cst_100 [1] : vector<8x64xf32> to vector<8xf32>
    %269 = vector.shape_cast %268 : vector<8xf32> to vector<8x1xf32>
    %cst_101 = arith.constant 6.400000e+01 : f32
    %270 = vector.broadcast %cst_101 : f32 to vector<8x1xf32>
    %271 = arith.divf %269, %270 : vector<8x1xf32>
    %272 = vector.broadcast %271 : vector<8x1xf32> to vector<8x64xf32>
    %273 = arith.subf %265, %272 : vector<8x64xf32>
    %274 = arith.mulf %273, %273 : vector<8x64xf32>
    %cst_102 = arith.constant dense<0.000000e+00> : vector<8xf32>
    %275 = vector.multi_reduction <add>, %274, %cst_102 [1] : vector<8x64xf32> to vector<8xf32>
    %276 = vector.shape_cast %275 : vector<8xf32> to vector<8x1xf32>
    %cst_103 = arith.constant 6.400000e+01 : f32
    %277 = vector.broadcast %cst_103 : f32 to vector<8x1xf32>
    %278 = arith.divf %276, %277 : vector<8x1xf32>
    %279 = vector.broadcast %271 : vector<8x1xf32> to vector<8x64xf32>
    %280 = arith.subf %265, %279 : vector<8x64xf32>
    %cst_104 = arith.constant 9.99999996E-13 : f32
    %281 = vector.broadcast %cst_104 : f32 to vector<8x1xf32>
    %282 = arith.addf %278, %281 : vector<8x1xf32>
    %283 = math.rsqrt %282 : vector<8x1xf32>
    %284 = vector.broadcast %283 : vector<8x1xf32> to vector<8x64xf32>
    %285 = arith.mulf %280, %284 : vector<8x64xf32>
    %286 = vector.broadcast %266 : vector<1x64xf32> to vector<8x64xf32>
    %287 = arith.mulf %285, %286 : vector<8x64xf32>
    %288 = vector.broadcast %267 : vector<1x64xf32> to vector<8x64xf32>
    %289 = arith.addf %287, %288 : vector<8x64xf32>
    %c0_105 = arith.constant 0 : index
    %c0_106 = arith.constant 0 : index
    %290 = vector.load %arg24[%c0_105, %c0_106] : memref<64x256xf32, #tpu.memory_space<vmem>>, vector<64x256xf32>
    %291 = arith.truncf %289 : vector<8x64xf32> to vector<8x64xbf16>
    %292 = arith.truncf %290 : vector<64x256xf32> to vector<64x256xbf16>
    %cst_107 = arith.constant dense<0.000000e+00> : vector<8x256xf32>
    %293 = tpu.matmul %291, %292, %cst_107 {dimension_numbers = #tpu.dot_dimension_numbers<[1], [0], [0], [1], [0, 0, 1, 1], [], []>} : vector<8x64xbf16>, vector<64x256xbf16>, vector<8x256xf32> -> vector<8x256xf32>
    %c0_108 = arith.constant 0 : index
    %c0_109 = arith.constant 0 : index
    %294 = vector.load %arg25[%c0_108, %c0_109] : memref<1x256xf32, #tpu.memory_space<vmem>>, vector<1x256xf32>
    %295 = vector.broadcast %294 : vector<1x256xf32> to vector<8x256xf32>
    %296 = arith.addf %293, %295 : vector<8x256xf32>
    %cst_110 = arith.constant 5.000000e-01 : f32
    %297 = vector.broadcast %cst_110 : f32 to vector<8x256xf32>
    %298 = arith.mulf %297, %296 : vector<8x256xf32>
    %cst_111 = arith.constant 4.471500e-02 : f32
    %299 = vector.broadcast %cst_111 : f32 to vector<8x256xf32>
    %300 = arith.mulf %299, %296 : vector<8x256xf32>
    %301 = arith.mulf %300, %296 : vector<8x256xf32>
    %302 = arith.mulf %301, %296 : vector<8x256xf32>
    %303 = arith.addf %296, %302 : vector<8x256xf32>
    %cst_112 = arith.constant 0.797884583 : f32
    %304 = vector.broadcast %cst_112 : f32 to vector<8x256xf32>
    %305 = arith.mulf %304, %303 : vector<8x256xf32>
    %306 = math.tanh %305 : vector<8x256xf32>
    %cst_113 = arith.constant 1.000000e+00 : f32
    %307 = vector.broadcast %cst_113 : f32 to vector<8x256xf32>
    %308 = arith.addf %307, %306 : vector<8x256xf32>
    %309 = arith.mulf %298, %308 : vector<8x256xf32>
    %c0_114 = arith.constant 0 : index
    %c0_115 = arith.constant 0 : index
    %310 = vector.load %arg26[%c0_114, %c0_115] : memref<256x64xf32, #tpu.memory_space<vmem>>, vector<256x64xf32>
    %311 = arith.truncf %309 : vector<8x256xf32> to vector<8x256xbf16>
    %312 = arith.truncf %310 : vector<256x64xf32> to vector<256x64xbf16>
    %cst_116 = arith.constant dense<0.000000e+00> : vector<8x64xf32>
    %313 = tpu.matmul %311, %312, %cst_116 {dimension_numbers = #tpu.dot_dimension_numbers<[1], [0], [0], [1], [0, 0, 1, 1], [], []>} : vector<8x256xbf16>, vector<256x64xbf16>, vector<8x64xf32> -> vector<8x64xf32>
    %c0_117 = arith.constant 0 : index
    %c0_118 = arith.constant 0 : index
    %314 = vector.load %arg27[%c0_117, %c0_118] : memref<1x64xf32, #tpu.memory_space<vmem>>, vector<1x64xf32>
    %315 = vector.broadcast %314 : vector<1x64xf32> to vector<8x64xf32>
    %316 = arith.addf %313, %315 : vector<8x64xf32>
    %317 = arith.addf %289, %316 : vector<8x64xf32>
    %c0_119 = arith.constant 0 : index
    %c0_120 = arith.constant 0 : index
    %318 = vector.load %arg28[%c0_119, %c0_120] : memref<1x64xf32, #tpu.memory_space<vmem>>, vector<1x64xf32>
    %c0_121 = arith.constant 0 : index
    %c0_122 = arith.constant 0 : index
    %319 = vector.load %arg29[%c0_121, %c0_122] : memref<1x64xf32, #tpu.memory_space<vmem>>, vector<1x64xf32>
    %cst_123 = arith.constant dense<0.000000e+00> : vector<8xf32>
    %320 = vector.multi_reduction <add>, %317, %cst_123 [1] : vector<8x64xf32> to vector<8xf32>
    %321 = vector.shape_cast %320 : vector<8xf32> to vector<8x1xf32>
    %cst_124 = arith.constant 6.400000e+01 : f32
    %322 = vector.broadcast %cst_124 : f32 to vector<8x1xf32>
    %323 = arith.divf %321, %322 : vector<8x1xf32>
    %324 = vector.broadcast %323 : vector<8x1xf32> to vector<8x64xf32>
    %325 = arith.subf %317, %324 : vector<8x64xf32>
    %326 = arith.mulf %325, %325 : vector<8x64xf32>
    %cst_125 = arith.constant dense<0.000000e+00> : vector<8xf32>
    %327 = vector.multi_reduction <add>, %326, %cst_125 [1] : vector<8x64xf32> to vector<8xf32>
    %328 = vector.shape_cast %327 : vector<8xf32> to vector<8x1xf32>
    %cst_126 = arith.constant 6.400000e+01 : f32
    %329 = vector.broadcast %cst_126 : f32 to vector<8x1xf32>
    %330 = arith.divf %328, %329 : vector<8x1xf32>
    %331 = vector.broadcast %323 : vector<8x1xf32> to vector<8x64xf32>
    %332 = arith.subf %317, %331 : vector<8x64xf32>
    %cst_127 = arith.constant 9.99999996E-13 : f32
    %333 = vector.broadcast %cst_127 : f32 to vector<8x1xf32>
    %334 = arith.addf %330, %333 : vector<8x1xf32>
    %335 = math.rsqrt %334 : vector<8x1xf32>
    %336 = vector.broadcast %335 : vector<8x1xf32> to vector<8x64xf32>
    %337 = arith.mulf %332, %336 : vector<8x64xf32>
    %338 = vector.broadcast %318 : vector<1x64xf32> to vector<8x64xf32>
    %339 = arith.mulf %337, %338 : vector<8x64xf32>
    %340 = vector.broadcast %319 : vector<1x64xf32> to vector<8x64xf32>
    %341 = arith.addf %339, %340 : vector<8x64xf32>
    %c0_128 = arith.constant 0 : index
    %c0_129 = arith.constant 0 : index
    %c0_130 = arith.constant 0 : index
    %342 = vector.load %arg30[%c0_128, %c0_129, %c0_130] : memref<1x8x64xf32, #tpu.memory_space<vmem>>, vector<1x8x64xf32>
    %343 = vector.shape_cast %342 : vector<1x8x64xf32> to vector<8x64xf32>
    %344 = vector.shape_cast %341 : vector<8x64xf32> to vector<1x8x64xf32>
    tpu.vector_store %arg30[%c0_128, %c0_129, %c0_130], %344 {strides = array<i32>} : memref<1x8x64xf32, #tpu.memory_space<vmem>>, vector<1x8x64xf32>,
    return
  }
  func.func @transform_0(%arg0: i32) -> (i32, i32, i32) {
    %c0_i32 = arith.constant 0 : i32
    %c0_i32_0 = arith.constant 0 : i32
    %c0_i32_1 = arith.constant 0 : i32
    return %arg0, %c0_i32, %c0_i32_0 : i32, i32, i32
  }
  func.func @transform_1(%arg0: i32) -> (i32, i32, i32) {
    %c0_i32 = arith.constant 0 : i32
    %c0_i32_0 = arith.constant 0 : i32
    %c0_i32_1 = arith.constant 0 : i32
    return %arg0, %c0_i32, %c0_i32_0 : i32, i32, i32
  }
  func.func @transform_2(%arg0: i32) -> (i32, i32, i32) {
    %c0_i32 = arith.constant 0 : i32
    %c0_i32_0 = arith.constant 0 : i32
    %c0_i32_1 = arith.constant 0 : i32
    return %arg0, %c0_i32, %c0_i32_0 : i32, i32, i32
  }
  func.func @transform_3(%arg0: i32) -> (i32, i32) {
    %c0_i32 = arith.constant 0 : i32
    %c0_i32_0 = arith.constant 0 : i32
    %c0_i32_1 = arith.constant 0 : i32
    return %c0_i32, %c0_i32_0 : i32, i32
  }
  func.func @transform_4(%arg0: i32) -> (i32, i32) {
    %c0_i32 = arith.constant 0 : i32
    %c0_i32_0 = arith.constant 0 : i32
    %c0_i32_1 = arith.constant 0 : i32
    return %c0_i32, %c0_i32_0 : i32, i32
  }
  func.func @transform_5(%arg0: i32) -> (i32, i32) {
    %c0_i32 = arith.constant 0 : i32
    %c0_i32_0 = arith.constant 0 : i32
    %c0_i32_1 = arith.constant 0 : i32
    return %c0_i32, %c0_i32_0 : i32, i32
  }
  func.func @transform_6(%arg0: i32) -> (i32, i32) {
    %c0_i32 = arith.constant 0 : i32
    %c0_i32_0 = arith.constant 0 : i32
    %c0_i32_1 = arith.constant 0 : i32
    return %c0_i32, %c0_i32_0 : i32, i32
  }
  func.func @transform_7(%arg0: i32) -> (i32, i32) {
    %c0_i32 = arith.constant 0 : i32
    %c0_i32_0 = arith.constant 0 : i32
    %c0_i32_1 = arith.constant 0 : i32
    return %c0_i32, %c0_i32_0 : i32, i32
  }
  func.func @transform_8(%arg0: i32) -> (i32, i32) {
    %c0_i32 = arith.constant 0 : i32
    %c0_i32_0 = arith.constant 0 : i32
    %c0_i32_1 = arith.constant 0 : i32
    return %c0_i32, %c0_i32_0 : i32, i32
  }
  func.func @transform_9(%arg0: i32) -> (i32, i32) {
    %c0_i32 = arith.constant 0 : i32
    %c0_i32_0 = arith.constant 0 : i32
    %c0_i32_1 = arith.constant 0 : i32
    return %c0_i32, %c0_i32_0 : i32, i32
  }
  func.func @transform_10(%arg0: i32) -> (i32, i32) {
    %c0_i32 = arith.constant 0 : i32
    %c0_i32_0 = arith.constant 0 : i32
    %c0_i32_1 = arith.constant 0 : i32
    return %c0_i32, %c0_i32_0 : i32, i32
  }
  func.func @transform_11(%arg0: i32) -> (i32, i32) {
    %c0_i32 = arith.constant 0 : i32
    %c0_i32_0 = arith.constant 0 : i32
    %c0_i32_1 = arith.constant 0 : i32
    return %c0_i32, %c0_i32_0 : i32, i32
  }
  func.func @transform_12(%arg0: i32) -> (i32, i32) {
    %c0_i32 = arith.constant 0 : i32
    %c0_i32_0 = arith.constant 0 : i32
    %c0_i32_1 = arith.constant 0 : i32
    return %c0_i32, %c0_i32_0 : i32, i32
  }
  func.func @transform_13(%arg0: i32) -> (i32, i32) {
    %c0_i32 = arith.constant 0 : i32
    %c0_i32_0 = arith.constant 0 : i32
    %c0_i32_1 = arith.constant 0 : i32
    return %c0_i32, %c0_i32_0 : i32, i32
  }
  func.func @transform_14(%arg0: i32) -> (i32, i32) {
    %c0_i32 = arith.constant 0 : i32
    %c0_i32_0 = arith.constant 0 : i32
    %c0_i32_1 = arith.constant 0 : i32
    return %c0_i32, %c0_i32_0 : i32, i32
  }
  func.func @transform_15(%arg0: i32) -> (i32, i32) {
    %c0_i32 = arith.constant 0 : i32
    %c0_i32_0 = arith.constant 0 : i32
    %c0_i32_1 = arith.constant 0 : i32
    return %c0_i32, %c0_i32_0 : i32, i32
  }
  func.func @transform_16(%arg0: i32) -> (i32, i32) {
    %c0_i32 = arith.constant 0 : i32
    %c0_i32_0 = arith.constant 0 : i32
    %c0_i32_1 = arith.constant 0 : i32
    return %c0_i32, %c0_i32_0 : i32, i32
  }
  func.func @transform_17(%arg0: i32) -> (i32, i32) {
    %c0_i32 = arith.constant 0 : i32
    %c0_i32_0 = arith.constant 0 : i32
    %c0_i32_1 = arith.constant 0 : i32
    return %c0_i32, %c0_i32_0 : i32, i32
  }
  func.func @transform_18(%arg0: i32) -> (i32, i32) {
    %c0_i32 = arith.constant 0 : i32
    %c0_i32_0 = arith.constant 0 : i32
    %c0_i32_1 = arith.constant 0 : i32
    return %c0_i32, %c0_i32_0 : i32, i32
  }
  func.func @transform_19(%arg0: i32) -> (i32, i32) {
    %c0_i32 = arith.constant 0 : i32
    %c0_i32_0 = arith.constant 0 : i32
    %c0_i32_1 = arith.constant 0 : i32
    return %c0_i32, %c0_i32_0 : i32, i32
  }
  func.func @transform_20(%arg0: i32) -> (i32, i32) {
    %c0_i32 = arith.constant 0 : i32
    %c0_i32_0 = arith.constant 0 : i32
    %c0_i32_1 = arith.constant 0 : i32
    return %c0_i32, %c0_i32_0 : i32, i32
  }
  func.func @transform_21(%arg0: i32) -> (i32, i32) {
    %c0_i32 = arith.constant 0 : i32
    %c0_i32_0 = arith.constant 0 : i32
    %c0_i32_1 = arith.constant 0 : i32
    return %c0_i32, %c0_i32_0 : i32, i32
  }
  func.func @transform_22(%arg0: i32) -> (i32, i32) {
    %c0_i32 = arith.constant 0 : i32
    %c0_i32_0 = arith.constant 0 : i32
    %c0_i32_1 = arith.constant 0 : i32
    return %c0_i32, %c0_i32_0 : i32, i32
  }
  func.func @transform_23(%arg0: i32) -> (i32, i32) {
    %c0_i32 = arith.constant 0 : i32
    %c0_i32_0 = arith.constant 0 : i32
    %c0_i32_1 = arith.constant 0 : i32
    return %c0_i32, %c0_i32_0 : i32, i32
  }
  func.func @transform_24(%arg0: i32) -> (i32, i32) {
    %c0_i32 = arith.constant 0 : i32
    %c0_i32_0 = arith.constant 0 : i32
    %c0_i32_1 = arith.constant 0 : i32
    return %c0_i32, %c0_i32_0 : i32, i32
  }
  func.func @transform_25(%arg0: i32) -> (i32, i32) {
    %c0_i32 = arith.constant 0 : i32
    %c0_i32_0 = arith.constant 0 : i32
    %c0_i32_1 = arith.constant 0 : i32
    return %c0_i32, %c0_i32_0 : i32, i32
  }
  func.func @transform_26(%arg0: i32) -> (i32, i32) {
    %c0_i32 = arith.constant 0 : i32
    %c0_i32_0 = arith.constant 0 : i32
    %c0_i32_1 = arith.constant 0 : i32
    return %c0_i32, %c0_i32_0 : i32, i32
  }
  func.func @transform_27(%arg0: i32) -> (i32, i32) {
    %c0_i32 = arith.constant 0 : i32
    %c0_i32_0 = arith.constant 0 : i32
    %c0_i32_1 = arith.constant 0 : i32
    return %c0_i32, %c0_i32_0 : i32, i32
  }
  func.func @transform_28(%arg0: i32) -> (i32, i32) {
    %c0_i32 = arith.constant 0 : i32
    %c0_i32_0 = arith.constant 0 : i32
    %c0_i32_1 = arith.constant 0 : i32
    return %c0_i32, %c0_i32_0 : i32, i32
  }
  func.func @transform_29(%arg0: i32) -> (i32, i32, i32) {
    %c0_i32 = arith.constant 0 : i32
    %c0_i32_0 = arith.constant 0 : i32
    %c0_i32_1 = arith.constant 0 : i32
    return %arg0, %c0_i32, %c0_i32_0 : i32, i32, i32
  }
}

module attributes {stable_mosaic.version = 11 : i64} {
  func.func @_cls_head_kernel(%arg0: i32, %arg1: memref<2x64xf32, #tpu.memory_space<vmem>>, %arg2: memref<64x64xf32, #tpu.memory_space<vmem>>, %arg3: memref<1x64xf32, #tpu.memory_space<vmem>>, %arg4: memref<64x2xf32, #tpu.memory_space<vmem>>, %arg5: memref<1x2xf32, #tpu.memory_space<vmem>>, %arg6: memref<2x2xf32, #tpu.memory_space<vmem>>, %arg7: memref<2x2xf32, #tpu.memory_space<vmem>>, %arg8: memref<1x1xf32, #tpu.memory_space<vmem>>) attributes {dimension_semantics = [#tpu.dimension_semantics<arbitrary>], iteration_bounds = array<i64: 1>, scalar_prefetch = 0 : i64, scratch_operands = 0 : i64, tpu.core_type = #tpu.core_type<tc>, window_params = [{pipeline_mode = #tpu.pipeline_mode<synchronous>, transform_indices = @transform_0, window_bounds = array<i64: 2, 64>}, {pipeline_mode = #tpu.pipeline_mode<synchronous>, transform_indices = @transform_1, window_bounds = array<i64: 64, 64>}, {pipeline_mode = #tpu.pipeline_mode<synchronous>, transform_indices = @transform_2, window_bounds = array<i64: 1, 64>}, {pipeline_mode = #tpu.pipeline_mode<synchronous>, transform_indices = @transform_3, window_bounds = array<i64: 64, 2>}, {pipeline_mode = #tpu.pipeline_mode<synchronous>, transform_indices = @transform_4, window_bounds = array<i64: 1, 2>}, {pipeline_mode = #tpu.pipeline_mode<synchronous>, transform_indices = @transform_5, window_bounds = array<i64: 2, 2>}, {pipeline_mode = #tpu.pipeline_mode<synchronous>, transform_indices = @transform_6, window_bounds = array<i64: 2, 2>}, {pipeline_mode = #tpu.pipeline_mode<synchronous>, transform_indices = @transform_7, window_bounds = array<i64: 1, 1>}]} {
    %c0 = arith.constant 0 : index
    %c0_0 = arith.constant 0 : index
    %0 = vector.load %arg1[%c0, %c0_0] : memref<2x64xf32, #tpu.memory_space<vmem>>, vector<2x64xf32>
    %c0_1 = arith.constant 0 : index
    %c0_2 = arith.constant 0 : index
    %1 = vector.load %arg2[%c0_1, %c0_2] : memref<64x64xf32, #tpu.memory_space<vmem>>, vector<64x64xf32>
    %2 = arith.truncf %0 : vector<2x64xf32> to vector<2x64xbf16>
    %3 = arith.truncf %1 : vector<64x64xf32> to vector<64x64xbf16>
    %cst = arith.constant dense<0.000000e+00> : vector<2x64xf32>
    %4 = tpu.matmul %2, %3, %cst {dimension_numbers = #tpu.dot_dimension_numbers<[1], [0], [0], [1], [0, 0, 1, 1], [], []>} : vector<2x64xbf16>, vector<64x64xbf16>, vector<2x64xf32> -> vector<2x64xf32>
    %c0_3 = arith.constant 0 : index
    %c0_4 = arith.constant 0 : index
    %5 = vector.load %arg3[%c0_3, %c0_4] : memref<1x64xf32, #tpu.memory_space<vmem>>, vector<1x64xf32>
    %6 = vector.broadcast %5 : vector<1x64xf32> to vector<2x64xf32>
    %7 = arith.addf %4, %6 : vector<2x64xf32>
    %cst_5 = arith.constant 0.000000e+00 : f32
    %8 = vector.broadcast %cst_5 : f32 to vector<2x64xf32>
    %9 = arith.maximumf %7, %8 : vector<2x64xf32>
    %c0_6 = arith.constant 0 : index
    %c0_7 = arith.constant 0 : index
    %10 = vector.load %arg4[%c0_6, %c0_7] : memref<64x2xf32, #tpu.memory_space<vmem>>, vector<64x2xf32>
    %11 = arith.truncf %9 : vector<2x64xf32> to vector<2x64xbf16>
    %12 = arith.truncf %10 : vector<64x2xf32> to vector<64x2xbf16>
    %cst_8 = arith.constant dense<0.000000e+00> : vector<2x2xf32>
    %13 = tpu.matmul %11, %12, %cst_8 {dimension_numbers = #tpu.dot_dimension_numbers<[1], [0], [0], [1], [0, 0, 1, 1], [], []>} : vector<2x64xbf16>, vector<64x2xbf16>, vector<2x2xf32> -> vector<2x2xf32>
    %c0_9 = arith.constant 0 : index
    %c0_10 = arith.constant 0 : index
    %14 = vector.load %arg5[%c0_9, %c0_10] : memref<1x2xf32, #tpu.memory_space<vmem>>, vector<1x2xf32>
    %15 = vector.broadcast %14 : vector<1x2xf32> to vector<2x2xf32>
    %16 = arith.addf %13, %15 : vector<2x2xf32>
    %c0_11 = arith.constant 0 : index
    %c0_12 = arith.constant 0 : index
    %17 = vector.load %arg7[%c0_11, %c0_12] : memref<2x2xf32, #tpu.memory_space<vmem>>, vector<2x2xf32>
    tpu.vector_store %arg7[%c0_11, %c0_12], %16 {strides = array<i32>} : memref<2x2xf32, #tpu.memory_space<vmem>>, vector<2x2xf32>,
    %cst_13 = arith.constant dense<0xFF800000> : vector<2xf32>
    %18 = vector.multi_reduction <maximumf>, %16, %cst_13 [1] : vector<2x2xf32> to vector<2xf32>
    %19 = vector.shape_cast %18 : vector<2xf32> to vector<2x1xf32>
    %20 = vector.broadcast %19 : vector<2x1xf32> to vector<2x2xf32>
    %21 = arith.subf %16, %20 : vector<2x2xf32>
    %22 = math.exp %21 : vector<2x2xf32>
    %cst_14 = arith.constant dense<0.000000e+00> : vector<2xf32>
    %23 = vector.multi_reduction <add>, %22, %cst_14 [1] : vector<2x2xf32> to vector<2xf32>
    %24 = vector.shape_cast %23 : vector<2xf32> to vector<2x1xf32>
    %25 = math.log %24 : vector<2x1xf32>
    %26 = arith.addf %19, %25 : vector<2x1xf32>
    %c0_15 = arith.constant 0 : index
    %c0_16 = arith.constant 0 : index
    %27 = vector.load %arg6[%c0_15, %c0_16] : memref<2x2xf32, #tpu.memory_space<vmem>>, vector<2x2xf32>
    %28 = arith.mulf %16, %27 : vector<2x2xf32>
    %cst_17 = arith.constant dense<0.000000e+00> : vector<2xf32>
    %29 = vector.multi_reduction <add>, %28, %cst_17 [1] : vector<2x2xf32> to vector<2xf32>
    %30 = vector.shape_cast %29 : vector<2xf32> to vector<2x1xf32>
    %31 = arith.subf %26, %30 : vector<2x1xf32>
    %cst_18 = arith.constant dense<0.000000e+00> : vector<1xf32>
    %32 = vector.multi_reduction <add>, %31, %cst_18 [0] : vector<2x1xf32> to vector<1xf32>
    %33 = vector.shape_cast %32 : vector<1xf32> to vector<1x1xf32>
    %cst_19 = arith.constant 5.000000e-01 : f32
    %34 = vector.broadcast %cst_19 : f32 to vector<1x1xf32>
    %35 = arith.mulf %33, %34 : vector<1x1xf32>
    %c0_20 = arith.constant 0 : index
    %c0_21 = arith.constant 0 : index
    %36 = vector.load %arg8[%c0_20, %c0_21] : memref<1x1xf32, #tpu.memory_space<vmem>>, vector<1x1xf32>
    tpu.vector_store %arg8[%c0_20, %c0_21], %35 {strides = array<i32>} : memref<1x1xf32, #tpu.memory_space<vmem>>, vector<1x1xf32>,
    return
  }
  func.func @transform_0(%arg0: i32) -> (i32, i32) {
    %c0_i32 = arith.constant 0 : i32
    %c0_i32_0 = arith.constant 0 : i32
    %c0_i32_1 = arith.constant 0 : i32
    return %c0_i32, %c0_i32_0 : i32, i32
  }
  func.func @transform_1(%arg0: i32) -> (i32, i32) {
    %c0_i32 = arith.constant 0 : i32
    %c0_i32_0 = arith.constant 0 : i32
    %c0_i32_1 = arith.constant 0 : i32
    return %c0_i32, %c0_i32_0 : i32, i32
  }
  func.func @transform_2(%arg0: i32) -> (i32, i32) {
    %c0_i32 = arith.constant 0 : i32
    %c0_i32_0 = arith.constant 0 : i32
    %c0_i32_1 = arith.constant 0 : i32
    return %c0_i32, %c0_i32_0 : i32, i32
  }
  func.func @transform_3(%arg0: i32) -> (i32, i32) {
    %c0_i32 = arith.constant 0 : i32
    %c0_i32_0 = arith.constant 0 : i32
    %c0_i32_1 = arith.constant 0 : i32
    return %c0_i32, %c0_i32_0 : i32, i32
  }
  func.func @transform_4(%arg0: i32) -> (i32, i32) {
    %c0_i32 = arith.constant 0 : i32
    %c0_i32_0 = arith.constant 0 : i32
    %c0_i32_1 = arith.constant 0 : i32
    return %c0_i32, %c0_i32_0 : i32, i32
  }
  func.func @transform_5(%arg0: i32) -> (i32, i32) {
    %c0_i32 = arith.constant 0 : i32
    %c0_i32_0 = arith.constant 0 : i32
    %c0_i32_1 = arith.constant 0 : i32
    return %c0_i32, %c0_i32_0 : i32, i32
  }
  func.func @transform_6(%arg0: i32) -> (i32, i32) {
    %c0_i32 = arith.constant 0 : i32
    %c0_i32_0 = arith.constant 0 : i32
    %c0_i32_1 = arith.constant 0 : i32
    return %c0_i32, %c0_i32_0 : i32, i32
  }
  func.func @transform_7(%arg0: i32) -> (i32, i32) {
    %c0_i32 = arith.constant 0 : i32
    %c0_i32_0 = arith.constant 0 : i32
    %c0_i32_1 = arith.constant 0 : i32
    return %c0_i32, %c0_i32_0 : i32, i32
  }
}

</mosaic_0001>

<bundles_post_ra>
// kernel: _lambda_.14
= control target key start
LH: loop header
LB: loop body
LE: loop exit
PB: predicated region body
PF: predicated region fallthrough
CT: control target
= control target key end

     0   :  { %vm18_vm0 = vcmask 523264   ;;  %v95_v4 = vmov 64.0   ;;  %s140_s0 = inlined_call_operand.vmem [shape: f32[16,64], index: 0, kind: input, shape index: {}]   ;;  %s141_s1 = inlined_call_operand.vmem [shape: f32[1,64], index: 1, kind: input, shape index: {}]   ;;  %s142_s2 = inlined_call_operand.vmem [shape: f32[1,64], index: 2, kind: input, shape index: {}]   ;;  %s143_s3 = inlined_call_operand.vmem [shape: f32[16,64], index: 3, kind: output, shape index: {}]  }
   0x1   :  { %v14_v0 = vld [vmem:[%s140_s0] sm:$0xff]  ;;  %v15_v2 = vld [vmem:[%s140_s0 + $0x8] sm:$0xff]  ;;  %89 = vrcp.f32 %v95_v4 }
   0x2   :  { %v19_v1 = vsel %vm18_vm0, %v14_v0, 0.0  ;;  %v22_v3 = vsel %vm18_vm0, %v15_v2, 0.0  ;;  %v87_v35 = vld [vmem:[%s141_s1] ss:$0 sm:$0xff] }
   0x3   :  { %20 = vadd.xlane.f32.xlu0 %v19_v1  ;;  %v88_v38 = vld [vmem:[%s142_s2] ss:$0 sm:$0xff] }
   0x7   :  { %v90_v5 = vpop.eup %89 }
   0x8   :  { %v26_v6 = vmul.f32 64.0, %v90_v5  ;;  %vm30_vm1 = vweird.f32 %v90_v5 }
   0xa   :  { %v27_v7 = vsub.f32 1.0, %v26_v6 }
   0xb   :  { %23 = vadd.xlane.f32.xlu0 %v22_v3 }
   0xc   :  { %v28_v8 = vmul.f32 %v90_v5, %v27_v7 }
   0xe   :  { %v29_v9 = vadd.f32 %v90_v5, %v28_v8 }
  0x10   :  { %v31_v10 = vsel %vm30_vm1, %v90_v5, %v29_v9 }
  0x76   :  { %v21_v11 = vpop.xlane.xlu0 %20 }
  0x77   :  { %v32_v12 = vmul.f32 %v31_v10, %v21_v11 }
  0x79   :  { %v34_v13 = vsub.f32 %v14_v0, %v32_v12 }
  0x7b   :  { %v36_v14 = vmul.f32 %v34_v13, %v34_v13 }
  0x7d   :  { %v38_v15 = vsel %vm18_vm0, %v36_v14, 0.0 }
  0x7e   :  { %39 = vadd.xlane.f32.xlu1 %v38_v15  ;;  %v24_v16 = vpop.xlane.xlu0 %23 }
  0x7f   :  { %v33_v17 = vmul.f32 %v31_v10, %v24_v16 }
  0x81   :  { %v35_v18 = vsub.f32 %v15_v2, %v33_v17 }
  0x83   :  { %v37_v19 = vmul.f32 %v35_v18, %v35_v18 }
  0x85   :  { %v41_v20 = vsel %vm18_vm0, %v37_v19, 0.0 }
  0x86   :  { %42 = vadd.xlane.f32.xlu1 %v41_v20 }
  0xf1   :  { %v40_v21 = vpop.xlane.xlu1 %39 }
  0xf2   :  { %v44_v22 = vmul.f32 %v40_v21, %v31_v10 }
  0xf4   :  { %v46_v23 = vadd.f32 1e-12, %v44_v22 }
  0xf6   :  { %91 = vrsqrt.f32 %v46_v23  ;;  %vm54_vm3 = vweird.f32 %v46_v23 }
  0xf9   :  { %v43_v24 = vpop.xlane.xlu1 %42 }
  0xfa   :  { %v45_v25 = vmul.f32 %v43_v24, %v31_v10 }
  0xfc   :  { %v92_v26 = vpop.eup %91  ;;  %v47_v27 = vadd.f32 1e-12, %v45_v25 }
  0xfd   :  { %v49_v28 = vmul.f32 %v92_v26, %v46_v23  ;;  %vm55_vm2 = vweird.f32 %v92_v26 }
  0xfe   :  { %93 = vrsqrt.f32 %v47_v27  ;;  %vm56_vm4 = vmor %vm54_vm3, %vm55_vm2  ;;  %vm64_vm6 = vweird.f32 %v47_v27 }
  0xff   :  { %v50_v29 = vmul.f32 %v92_v26, %v49_v28 }
 0x101   :  { %v51_v30 = vmul.f32 0.5, %v50_v29 }
 0x103   :  { %v52_v31 = vsub.f32 1.5, %v51_v30 }
 0x104   :  { %v94_v32 = vpop.eup %93 }
 0x105   :  { %v53_v33 = vmul.f32 %v92_v26, %v52_v31  ;;  %v59_v34 = vmul.f32 %v94_v32, %v47_v27  ;;  %vm65_vm5 = vweird.f32 %v94_v32 }
 0x106   :  { %vm66_vm7 = vmor %vm64_vm6, %vm65_vm5 }
 0x107   :  { %v57_v36 = vsel %vm56_vm4, %v92_v26, %v53_v33  ;;  %v60_v37 = vmul.f32 %v94_v32, %v59_v34 }
 0x108   :  { %v68_v39 = vmul.f32 %v57_v36, %v34_v13 }
 0x109   :  { %v61_v40 = vmul.f32 0.5, %v60_v37 }
 0x10a   :  { %v73_v41 = vmul.f32 %v87_v35, %v68_v39 }
 0x10b   :  { %v62_v42 = vsub.f32 1.5, %v61_v40 }
 0x10c   :  { %v78_v43 = vadd.f32 %v88_v38, %v73_v41 }
 0x10d   :  { %v63_v44 = vmul.f32 %v94_v32, %v62_v42 }
 0x10e   :  { %80 = vst.msk [vmem:[%s143_s3] sm:$0xff] %vm18_vm0, %v78_v43 }
 0x10f   :  { %v67_v45 = vsel %vm66_vm7, %v94_v32, %v63_v44 }
 0x110   :  { %v69_v46 = vmul.f32 %v67_v45, %v35_v18 }
 0x112   :  { %v74_v47 = vmul.f32 %v87_v35, %v69_v46 }
 0x114   :  { %v79_v48 = vadd.f32 %v88_v38, %v74_v47 }
 0x116   :  { %81 = vst.msk [vmem:[%s143_s3 + $0x8] sm:$0xff] %vm18_vm0, %v79_v48 }

// kernel: _lambda_.15
= control target key start
LH: loop header
LB: loop body
LE: loop exit
PB: predicated region body
PF: predicated region fallthrough
CT: control target
= control target key end

     0   :  { %s1993_s0 = inlined_call_operand.vmem [shape: f32[2,8,64], index: 0, kind: input, shape index: {}]   ;;  %s1994_s1 = inlined_call_operand.vmem [shape: f32[2,1,8], index: 1, kind: input, shape index: {}]   ;;  %s1995_s2 = inlined_call_operand.vmem [shape: f32[64,64], index: 2, kind: input, shape index: {}]   ;;  %s1996_s3 = inlined_call_operand.vmem [shape: f32[1,64], index: 3, kind: input, shape index: {}]   ;;  %s1997_s4 = inlined_call_operand.hbm [shape: f32[64,64], index: 4, kind: input, shape index: {}]   ;;  %s1998_s5 = inlined_call_operand.vmem [shape: f32[1,64], index: 5, kind: input, shape index: {}]   ;;  %s1999_s6 = inlined_call_operand.hbm [shape: f32[64,64], index: 6, kind: input, shape index: {}]   ;;  %s2000_s7 = inlined_call_operand.vmem [shape: f32[1,64], index: 7, kind: input, shape index: {}]   ;;  %s2001_s8 = inlined_call_operand.hbm [shape: f32[64,64], index: 8, kind: input, shape index: {}]   ;;  %s2002_s9 = inlined_call_operand.vmem [shape: f32[1,64], index: 9, kind: input, shape index: {}]   ;;  %s2003_s10 = inlined_call_operand.vmem [shape: f32[1,64], index: 10, kind: input, shape index: {}]   ;;  %s2004_s11 = inlined_call_operand.vmem [shape: f32[1,64], index: 11, kind: input, shape index: {}]   ;;  %s2005_s12 = inlined_call_operand.vmem [shape: f32[64,256], index: 12, kind: input, shape index: {}]   ;;  %s2006_s13 = inlined_call_operand.vmem [shape: f32[1,256], index: 13, kind: input, shape index: {}]   ;;  %s2007_s14 = inlined_call_operand.vmem [shape: f32[256,64], index: 14, kind: input, shape index: {}]   ;;  %s2008_s15 = inlined_call_operand.vmem [shape: f32[1,64], index: 15, kind: input, shape index: {}]   ;;  %s2009_s16 = inlined_call_operand.vmem [shape: f32[1,64], index: 16, kind: input, shape index: {}]   ;;  %s2010_s17 = inlined_call_operand.vmem [shape: f32[1,64], index: 17, kind: input, shape index: {}]   ;;  %s2011_s18 = inlined_call_operand.vmem [shape: f32[2,8,64], index: 18, kind: output, shape index: {}]  }
   0x1   :  { %2014 = sst [smem:[#allocation9_spill]] %s1993_s0 }
   0x2   :  { %2015 = sst [smem:[#allocation10_spill]] %s1994_s1 }
   0x3   :  { %2016 = sst [smem:[#allocation11_spill]] %s1995_s2 }
   0x4   :  { %2017 = sst [smem:[#allocation12_spill]] %s1999_s6 }
   0x5   :  { %23 = vsyncpa [#allocation3], 0 }
   0x6   :  { %24 = vsyncpa [#allocation5], 0  ;;  %s1669_s27 = smov 0  }
   0x7 LB: > { %s1675_s28 = sadd.s32 4294967295, %s1560_s27   ;;  %p1345_p0 = scmp.ge.s32.totalorder %s1560_s27, 1  ;;  %s1560_s27 = sphi %s1669_s27, %s30_s27  }
   0x8   : > { %p449_p1 = scmp.lt.s32.totalorder %s1560_s27, 3  ;;  %p1394_p2 = scmp.eq.s32.totalorder %s1675_s28, 0 }
   0x9   : > { %s2018_s6 = sld [smem:[#allocation12_spill]]  ;;  %s466_s21 = sshll.u32 %s1997_s4, 4  ;;  %s467_s21 = int_to_ptr.hbm [resolvable:$true] %s466_s21 }
   0xa   : > { %p1683_p3 = pnand %p1345_p0, %p449_p1  ;;  %s1562_s22 = smov [#allocation4]  }
   0xb   : > { %s485_s2 = sshll.u32 %s1562_s22, 4  ;;  %s1563_s23 = smov [#allocation2]   ;;  %s486_s2 = int_to_ptr.vmem [resolvable:$true] %s485_s2 }
   0xc   : > { %p1384_p4 = pneg %p1683_p3  ;;  %s468_s24 = sshll.u32 %s1563_s23, 4  ;;  %s469_s24 = int_to_ptr.vmem [resolvable:$true] %s468_s24 }
   0xd   : > { %s500_s29 = sshll.u32 %s2001_s8, 4  ;;  %s1564_s30 = smov 128   ;;  %s501_s29 = int_to_ptr.hbm [resolvable:$true] %s500_s29 }
   0xe   : > { %p1385_p5 = pnand %p1394_p2, %p1384_p4  ;;  %s1566_s1 = smov [#allocation6]  }
   0xf   : > { %s483_s0 = sshll.u32 %s2018_s6, 4  ;;  %s1565_s6 = smov 8   ;;  %s484_s0 = int_to_ptr.hbm [resolvable:$true] %s483_s0 }
  0x10   : > { %1390 = dma.hbm_to_vmem [thread:$0]  (!%p1385_p5), %s484_s0, 1024, %s486_s2, [#allocation5], %s1564_s30, %s1564_s30, %s1565_s6  }
  0x11   : > { %1387 = dma.hbm_to_vmem [thread:$0]  (!%p1385_p5), %s467_s21, 1024, %s469_s24, [#allocation3], %s1564_s30, %s1564_s30, %s1565_s6  }
  0x12   : > { %s502_s20 = sshll.u32 %s1566_s1, 4  ;;  %558 = sbr.rel (%p1683_p3) target bundleno = 1916 (0x77c), region = 92  ;;  %s503_s20 = int_to_ptr.vmem [resolvable:$true] %s502_s20 }
  0x13   : > { %1393 = dma.hbm_to_vmem [thread:$0]  (!%p1385_p5), %s501_s29, 1024, %s503_s20, [#allocation5], %s1564_s30, %s1564_s30, %s1565_s6  }
  0x17   : > { %1551 = dma.done.wait (%p1394_p2), [#allocation3], 1024  }
  0x18   : > { %1553 = vsyncadd (%p1394_p2), [#allocation3], 4294966272 }
  0x19   : > { %1555 = dma.done.wait (%p1394_p2), [#allocation5], 2048  }
  0x1a   : > { %1557 = vsyncadd (%p1394_p2), [#allocation5], 4294965248  ;;  %p624_p6 = scmp.lt.s32.totalorder %s1675_s28, 1  ;;  %s2020_s21 = sld [smem:[#allocation11_spill]]  ;;  %v678_v2 = vld [vmem:[#allocation2 + $0x30] sm:$0xff]  ;;  %v679_v4 = vld [vmem:[#allocation2 + $0x38] sm:$0xff] }
  0x1b   : > { %v683_v7 = vpack.c.bf16 %v679_v4, %v678_v2  ;;  %v676_v8 = vld [vmem:[#allocation2 + $0x20] sm:$0xff]  ;;  %v677_v9 = vld [vmem:[#allocation2 + $0x28] sm:$0xff]  ;;  %v674_v14 = vld [vmem:[#allocation2 + $0x10] sm:$0xff]  ;;  %s2021_s19 = sld [smem:[#allocation10_spill]]  ;;  %vm655_vm0 = vcmask 523264   ;;  %vm732_vm1 = vcmask 130048  }
  0x1c   : > { %s2024_s28 = smov (!%p624_p6, %s1675_s28), 1  ;;  %v682_v11 = vpack.c.bf16 %v677_v9, %v676_v8  ;;  %v675_v15 = vld [vmem:[#allocation2 + $0x18] sm:$0xff]  ;;  %s2022_s30 = sld [smem:[#allocation9_spill]]  ;;  %v672_v20 = vld [vmem:[#allocation2] sm:$0xff]  ;;  %v673_v21 = vld [vmem:[#allocation2 + $0x8] sm:$0xff]  ;;  %vm757_vm2 = vcmask 64512  }
  0x1d   : > { %692 = vmatpush.bf16.msra.mxu1 %v683_v7  ;;  %s1354_s20 = sshll.u32 %s2024_s28, 3  ;;  %v681_v19 = vpack.c.bf16 %v675_v15, %v674_v14  ;;  %v680_v24 = vpack.c.bf16 %v673_v21, %v672_v20  ;;  %v707_v26 = vld [vmem:[#allocation4 + $0x30] sm:$0xff]  ;;  %v708_v27 = vld [vmem:[#allocation4 + $0x38] sm:$0xff]  ;;  %v705_v28 = vld [vmem:[#allocation4 + $0x20] sm:$0xff]  ;;  %s1567_s24 = smov 80   ;;  %vm774_vm3 = vcmask 1043456  }
  0x1e   : > { %v712_v29 = vpack.c.bf16 %v708_v27, %v707_v26  ;;  %v706_v30 = vld [vmem:[#allocation4 + $0x28] sm:$0xff]  ;;  %v1421_v32 = vld [vmem:[%s1998_s5] ss:$0 sm:$0xff]  ;;  %s1568_s25 = smov 96   ;;  %s1569_s26 = smov 112   ;;  %v703_v43 = vld [vmem:[#allocation4 + $0x10] sm:$0xff] }
  0x1f   : > { %v711_v31 = vpack.c.bf16 %v706_v30, %v705_v28  ;;  %v1420_v35 = vld [vmem:[%s1996_s3] ss:$0 sm:$0xff]  ;;  %v704_v44 = vld [vmem:[#allocation4 + $0x18] sm:$0xff]  ;;  %v702_v47 = vld [vmem:[#allocation4 + $0x8] sm:$0xff]  ;;  %s1571_s6 = smov 32   ;;  %s1572_s2 = smov 48  }
  0x20   : > { %v644_v0 = vld [vmem:[%s2020_s21 + $0x30] sm:$0xff]  ;;  %v645_v1 = vld [vmem:[%s2020_s21 + $0x38] sm:$0xff]  ;;  %v642_v5 = vld [vmem:[%s2020_s21 + $0x20] sm:$0xff]  ;;  %721 = vmatpush.bf16.msra.mxu2 %v712_v29  ;;  %v710_v45 = vpack.c.bf16 %v704_v44, %v703_v43  ;;  %vm981_vm4 = vcmask 261120   ;;  %vm983_vm5 = vcmask 392192  }
  0x21   : > { %v650_v3 = vpack.c.bf16 %v645_v1, %v644_v0  ;;  %v643_v6 = vld [vmem:[%s2020_s21 + $0x28] sm:$0xff]  ;;  %v640_v12 = vld [vmem:[%s2020_s21 + $0x10] sm:$0xff]  ;;  %v641_v13 = vld [vmem:[%s2020_s21 + $0x18] sm:$0xff]  ;;  %s630_s22 = scalar_lea.vmem %s2021_s19, %s2024_s28  ;;  %693 = vmatpush.bf16.msra.mxu1 %v682_v11 }
  0x22   : > { %v649_v10 = vpack.c.bf16 %v643_v6, %v642_v5  ;;  %v638_v16 = vld [vmem:[%s2020_s21] sm:$0xff]  ;;  %v639_v17 = vld [vmem:[%s2020_s21 + $0x8] sm:$0xff]  ;;  %v648_v18 = vpack.c.bf16 %v641_v13, %v640_v12  ;;  %s627_s1 = scalar_lea.vmem %s2022_s30, %s1354_s20 }
  0x23   : > { %663 = vmatpush.bf16.msra.mxu0 %v650_v3  ;;  %v647_v22 = vpack.c.bf16 %v639_v17, %v638_v16  ;;  %v1745_v23 = vld [vmem:[%s627_s1] sm:$0xff] }
  0x24   : > { %v646_v25 = vpack.c.bf16 %v1745_v23, %v1745_v23  ;;  %722 = vmatpush.bf16.msra.mxu2 %v711_v31  ;;  %v701_v46 = vld [vmem:[#allocation4] sm:$0xff] }
  0x25   : > { %694 = vmatpush.bf16.msra.mxu1 %v681_v19  ;;  %v709_v48 = vpack.c.bf16 %v702_v47, %v701_v46  ;;  %v1422_v58 = vld [vmem:[%s630_s22] ss:$0 sm:$0xff]  ;;  %s1570_s22 = smov 16  }
  0x26   : > { %v1423_v0 = vld [vmem:[%s2000_s7] ss:$0 sm:$0xff] }
  0x27   : > { %664 = vmatpush.bf16.msra.mxu0 %v649_v10 }
  0x28   : > { %723 = vmatpush.bf16.msra.mxu2 %v710_v45 }
  0x29   : > { %695 = vmatpush.bf16.msra.mxu1 %v680_v24 }
  0x2b   : > { %665 = vmatpush.bf16.msra.mxu0 %v648_v18 }
  0x2c   : > { %1357 = vmatmul.msk.bf16.vlgmr.msra.gmra.mxu1 %vm655_vm0, %v646_v25  ;;  %724 = vmatpush.bf16.msra.mxu2 %v709_v48 }
  0x2f   : > { %666 = vmatpush.bf16.msra.mxu0 %v647_v22  ;;  %1358 = vmatmul.msk.bf16.vlgmr.msra.gmra.mxu2 %vm655_vm0, %v646_v25 }
  0x32   : > { %1356 = vmatmul.msk.bf16.vlgmr.msra.gmra.mxu0 %vm655_vm0, %v646_v25 }
  0xa9   : > { %v697_v34 = vpop.f32.mrf.mxu1 }
  0xaa   : > { %v698_v36 = vadd.f32 %v1421_v32, %v697_v34 }
  0xac   : > { %v731_v37 = vpack.c.bf16 %v698_v36, %v698_v36 }
  0xae   : > { %912 = vrot.lane.b32.xlu2 %v731_v37, %s1567_s24  ;;  %854 = vrot.lane.b32.xlu1 %v731_v37, %s1568_s25  ;;  %v737_v39 = vsel %vm732_vm1, %v731_v37, 0 }
  0xaf   : > { %v668_v33 = vpop.f32.mrf.mxu0  ;;  %795 = vrot.lane.b32.xlu0 %v731_v37, %s1569_s26  ;;  %746 = vmatpush.bf16.xpose.msra.mxu3 %v737_v39 }
  0xb0   : > { %v669_v38 = vadd.f32 %v1420_v35, %v668_v33 }
  0xb1   : > { %v699_v41 = vpop.f32.mrf.mxu1 }
  0xb2   : > { %v730_v42 = vpack.c.bf16 %v669_v38, %v669_v38  ;;  %v726_v1 = vpop.f32.mrf.mxu2 }
  0xb3   : > { %v727_v2 = vadd.f32 %v1423_v0, %v726_v1 }
  0xb5   : > { %v770_v3 = vpack.c.bf16 %v727_v2, %v727_v2 }
  0xb6   : > { %910 = vrot.lane.b32.xlu2 %v730_v42, %s1567_s24  ;;  %852 = vrot.lane.b32.xlu1 %v730_v42, %s1568_s25 }
  0xb7   : > { %v670_v40 = vpop.f32.mrf.mxu0  ;;  %792 = vrot.lane.b32.xlu0 %v730_v42, %s1569_s26  ;;  %1359 = vmatmul.msk.bf16.vlgmr.msra.gmra.mxu3 %vm732_vm1, %v730_v42  ;;  %v776_v4 = vsel %vm774_vm3, %v770_v3, 0 }
  0xb8   : > { %785 = vmatpush.bf16.msrb.mxu3 %v776_v4 }
  0xba   : > { %v728_v5 = vpop.f32.mrf.mxu2 }
 0x108   : > { %v913_v49 = vpop.permute.xlu2 %912 }
 0x109   : > { %v918_v54 = vsel %vm732_vm1, %v913_v49, 0 }
 0x110   : > { %v911_v57 = vpop.permute.xlu2 %910 }
 0x120   : > { %v855_v50 = vpop.permute.xlu1 %854 }
 0x121   : > { %v796_v51 = vpop.permute.xlu0 %795  ;;  %v860_v52 = vsel %vm732_vm1, %v855_v50, 0 }
 0x122   : > { %v801_v53 = vsel %vm732_vm1, %v796_v51, 0  ;;  %869 = vmatpush.bf16.xpose.msrb.mxu2 %v860_v52 }
 0x123   : > { %810 = vmatpush.bf16.xpose.msrb.mxu0 %v801_v53 }
 0x128   : > { %v853_v55 = vpop.permute.xlu1 %852 }
 0x129   : > { %v793_v56 = vpop.permute.xlu0 %792  ;;  %1363 = vmatmul.msk.bf16.vlgmr.msrb.gmra.mxu2 %vm732_vm1, %v853_v55 }
 0x12a   : > { %1361 = vmatmul.msk.bf16.vlgmr.msrb.gmra.mxu0 %vm732_vm1, %v793_v56 }
 0x12b   : > { %927 = vmatpush.bf16.xpose.msra.mxu0 %v918_v54 }
 0x13a   : > { %v748_v59 = vpop.f32.mrf.mxu3  ;;  %1365 = vmatmul.msk.bf16.vlgmr.msra.gmra.mxu0 %vm732_vm1, %v911_v57 }
 0x13b   : > { %v752_v60 = vmul.f32 0.25, %v748_v59 }
 0x13d   : > { %v756_v61 = vadd.f32 %v1422_v58, %v752_v60 }
 0x13f   : > { %v758_v62 = vsel %vm757_vm2, %v756_v61, -inf }
 0x140   : > { %759 = vmax.xlane.f32.xlu0 %v758_v62 }
 0x142   : > { %v750_v63 = vpop.f32.mrf.mxu3 }
 0x1a7   : > { %v812_v6 = vpop.f32.mrf.mxu0 }
 0x1a8   : > { %v816_v7 = vmul.f32 0.25, %v812_v6 }
 0x1aa   : > { %v817_v8 = vadd.f32 %v1422_v58, %v816_v7 }
 0x1ac   : > { %v871_v9 = vpop.f32.mrf.mxu2  ;;  %v818_v10 = vsel %vm757_vm2, %v817_v8, -inf }
 0x1ad   : > { %v875_v11 = vmul.f32 0.25, %v871_v9  ;;  %819 = vmax.xlane.f32.xlu1 %v818_v10  ;;  %v992_v9 = vld [vmem:[#allocation6 + $0x38] sm:$0xff]  ;;  %v989_v10 = vld [vmem:[#allocation6 + $0x20] sm:$0xff] }
 0x1af   : > { %v814_v12 = vpop.f32.mrf.mxu0  ;;  %v876_v13 = vadd.f32 %v1422_v58, %v875_v11 }
 0x1b0   : > { %v990_v12 = vld [vmem:[#allocation6 + $0x28] sm:$0xff] }
 0x1b1   : > { %v877_v14 = vsel %vm757_vm2, %v876_v13, -inf }
 0x1b2   : > { %878 = vmax.xlane.f32.xlu2 %v877_v14  ;;  %v987_v14 = vld [vmem:[#allocation6 + $0x10] sm:$0xff] }
 0x1b3   : > { %v760_v15 = vpop.xlane.xlu0 %759 }
 0x1b4   : > { %v761_v16 = vsub.f32 %v756_v61, %v760_v15  ;;  %v873_v17 = vpop.f32.mrf.mxu2  ;;  %v988_v15 = vld [vmem:[#allocation6 + $0x18] sm:$0xff] }
 0x1b5   : > { %v985_v17 = vld [vmem:[#allocation6] sm:$0xff] }
 0x1b6   : > { %v762_v18 = vmul.f32 1.442695, %v761_v16  ;;  %v995_v16 = vpack.c.bf16 %v988_v15, %v987_v14 }
 0x1b7   : > { %v929_v19 = vpop.f32.mrf.mxu0 }
 0x1b8   : > { %1430 = vpow2.f32 %v762_v18  ;;  %v933_v20 = vmul.f32 0.25, %v929_v19  ;;  %v986_v18 = vld [vmem:[#allocation6 + $0x8] sm:$0xff] }
 0x1b9   : > { %v994_v19 = vpack.c.bf16 %v986_v18, %v985_v17 }
 0x1ba   : > { %v934_v21 = vadd.f32 %v1422_v58, %v933_v20 }
 0x1bc   : > { %v935_v22 = vsel %vm757_vm2, %v934_v21, -inf }
 0x1bd   : > { %936 = vmax.xlane.f32.xlu2 %v935_v22 }
 0x1be   : > { %v1431_v24 = vpop.eup %1430 }
 0x1bf   : > { %v931_v25 = vpop.f32.mrf.mxu0  ;;  %v764_v26 = vsel %vm757_vm2, %v1431_v24, 0.0 }
 0x1c0   : > { %765 = vadd.xlane.f32.xlu0 %v764_v26 }
 0x1d5   : > { %831 = vrot.lane.b32.xlu2 %v770_v3, %s1569_s26 }
 0x220   : > { %v820_v27 = vpop.xlane.xlu1 %819 }
 0x221   : > { %v821_v28 = vsub.f32 %v817_v8, %v820_v27  ;;  %v991_v8 = vld [vmem:[#allocation6 + $0x30] sm:$0xff] }
 0x222   : > { %v997_v11 = vpack.c.bf16 %v992_v9, %v991_v8 }
 0x223   : > { %v822_v29 = vmul.f32 1.442695, %v821_v28  ;;  %v1424_v28 = vld [vmem:[%s2002_s9] ss:$0 sm:$0xff] }
 0x224   : > { %1009 = vmatpush.bf16.msra.mxu2 %v997_v11 }
 0x225   : > { %1432 = vpow2.f32 %v822_v29  ;;  %v879_v30 = vpop.xlane.xlu2 %878 }
 0x226   : > { %v880_v31 = vsub.f32 %v876_v13, %v879_v30  ;;  %v996_v13 = vpack.c.bf16 %v990_v12, %v989_v10  ;;  %v1165_v10 = vld [vmem:[%s2007_s14 + $0xe8] sm:$0xff] }
 0x228   : > { %v881_v32 = vmul.f32 1.442695, %v880_v31  ;;  %1010 = vmatpush.bf16.msra.mxu2 %v996_v13 }
 0x22a   : > { %1434 = vpow2.f32 %v881_v32 }
 0x22b   : > { %v1433_v33 = vpop.eup %1432 }
 0x22c   : > { %v824_v34 = vsel %vm757_vm2, %v1433_v33, 0.0  ;;  %1011 = vmatpush.bf16.msra.mxu2 %v995_v16 }
 0x22d   : > { %825 = vadd.xlane.f32.xlu1 %v824_v34  ;;  %v1573_v34 = vmov 64.0  }
 0x230   : > { %v1435_v35 = vpop.eup %1434  ;;  %v937_v36 = vpop.xlane.xlu2 %936  ;;  %1012 = vmatpush.bf16.msra.mxu2 %v994_v19 }
 0x231   : > { %v938_v37 = vsub.f32 %v934_v21, %v937_v36  ;;  %v883_v38 = vsel %vm757_vm2, %v1435_v35, 0.0 }
 0x232   : > { %884 = vadd.xlane.f32.xlu0 %v883_v38 }
 0x233   : > { %v939_v39 = vmul.f32 1.442695, %v938_v37  ;;  %v766_v40 = vpop.xlane.xlu0 %765 }
 0x234   : > { %1436 = vrcp.f32 %v766_v40 }
 0x235   : > { %1438 = vpow2.f32 %v939_v39 }
 0x238   : > { %v832_v41 = vpop.permute.xlu2 %831 }
 0x239   : > { %v837_v42 = vsel %vm774_vm3, %v832_v41, 0 }
 0x23a   : > { %v1437_v43 = vpop.eup %1436  ;;  %846 = vmatpush.bf16.msra.mxu3 %v837_v42 }
 0x23b   : > { %v1439_v44 = vpop.eup %1438  ;;  %v768_v45 = vmul.f32 %v1437_v43, %v1431_v24 }
 0x23c   : > { %v941_v46 = vsel %vm757_vm2, %v1439_v44, 0.0 }
 0x23d   : > { %942 = vadd.xlane.f32.xlu1 %v941_v46  ;;  %v769_v47 = vpack.c.bf16 %v768_v45, %v768_v45  ;;  %v1070_v45 = vld [vmem:[%s2005_s12 + $0x60] sm:$0xff]  ;;  %v1072_v46 = vld [vmem:[%s2005_s12 + $0x70] sm:$0xff] }
 0x23f   : > { %1360 = vmatmul.msk.bf16.vlgmr.msrb.gmra.mxu3 %vm757_vm2, %v769_v47  ;;  %v1071_v47 = vld [vmem:[%s2005_s12 + $0x68] sm:$0xff] }
 0x246   : > { %889 = vrot.lane.b32.xlu0 %v770_v3, %s1568_s25  ;;  %s634_s25 = scalar_lea.vmem %s2011_s18, %s1354_s20 }
 0x256   : > { %947 = vrot.lane.b32.xlu1 %v770_v3, %s1567_s24 }
 0x2a0   : > { %v826_v48 = vpop.xlane.xlu1 %825 }
 0x2a1   : > { %1440 = vrcp.f32 %v826_v48  ;;  %v1081_v48 = vpack.c.bf16 %v1072_v46, %v1070_v45  ;;  %v1144_v46 = vld [vmem:[%s2007_s14 + $0x40] sm:$0xff] }
 0x2a5   : > { %v885_v52 = vpop.xlane.xlu0 %884 }
 0x2a6   : > { %1442 = vrcp.f32 %v885_v52  ;;  %v1068_v52 = vld [vmem:[%s2005_s12 + $0x50] sm:$0xff] }
 0x2a7   : > { %v1441_v49 = vpop.eup %1440 }
 0x2a8   : > { %v828_v50 = vmul.f32 %v1441_v49, %v1433_v33  ;;  %v1073_v49 = vld [vmem:[%s2005_s12 + $0x78] sm:$0xff] }
 0x2aa   : > { %v829_v51 = vpack.c.bf16 %v828_v50, %v828_v50  ;;  %v1082_v50 = vpack.c.bf16 %v1073_v49, %v1071_v47  ;;  %v1145_v47 = vld [vmem:[%s2007_s14 + $0x48] sm:$0xff]  ;;  %v1156_v49 = vld [vmem:[%s2007_s14 + $0xa0] sm:$0xff] }
 0x2ac   : > { %1362 = vmatmul.msk.bf16.vlgmr.msra.gmra.mxu3 %vm757_vm2, %v829_v51  ;;  %v1443_v53 = vpop.eup %1442  ;;  %1109 = vmatpush.bf16.msrb.mxu0 %v1082_v50  ;;  %v1066_v51 = vld [vmem:[%s2005_s12 + $0x40] sm:$0xff]  ;;  %v1157_v50 = vld [vmem:[%s2007_s14 + $0xa8] sm:$0xff] }
 0x2ad   : > { %v887_v54 = vmul.f32 %v1443_v53, %v1435_v35  ;;  %v1067_v53 = vld [vmem:[%s2005_s12 + $0x48] sm:$0xff] }
 0x2af   : > { %v888_v57 = vpack.c.bf16 %v887_v54, %v887_v54  ;;  %v1079_v54 = vpack.c.bf16 %v1068_v52, %v1066_v51  ;;  %v1180_v51 = vpack.c.bf16 %v1157_v50, %v1156_v49  ;;  %v1142_v52 = vld [vmem:[%s2007_s14 + $0x30] sm:$0xff] }
 0x2b0   : > { %v943_v58 = vpop.xlane.xlu1 %942 }
 0x2b1   : > { %1444 = vrcp.f32 %v943_v58  ;;  %v1064_v58 = vld [vmem:[%s2005_s12 + $0x30] sm:$0xff] }
 0x2b2   : > { %1446 = vrcp.f32 %v1573_v34  ;;  %v1148_v34 = vld [vmem:[%s2007_s14 + $0x60] sm:$0xff] }
 0x2b7   : > { %v1445_v60 = vpop.eup %1444 }
 0x2b8   : > { %v890_v55 = vpop.permute.xlu0 %889  ;;  %v945_v61 = vmul.f32 %v1445_v60, %v1439_v44  ;;  %v1447_v35 = vpop.eup %1446 }
 0x2b9   : > { %v895_v56 = vsel %vm774_vm3, %v890_v55, 0  ;;  %v1025_v36 = vmul.f32 64.0, %v1447_v35  ;;  %vm1029_vm6 = vweird.f32 %v1447_v35  ;;  %v1069_v55 = vld [vmem:[%s2005_s12 + $0x58] sm:$0xff] }
 0x2ba   : > { %904 = vmatpush.bf16.msrb.mxu3 %v895_v56  ;;  %v946_v1 = vpack.c.bf16 %v945_v61, %v945_v61  ;;  %v1080_v56 = vpack.c.bf16 %v1069_v55, %v1067_v53  ;;  %v1065_v61 = vld [vmem:[%s2005_s12 + $0x38] sm:$0xff] }
 0x2bb   : > { %v1026_v37 = vsub.f32 1.0, %v1025_v36  ;;  %v1143_v53 = vld [vmem:[%s2007_s14 + $0x38] sm:$0xff] }
 0x2bc   : > { %1110 = vmatpush.bf16.msrb.mxu0 %v1080_v56  ;;  %v1173_v55 = vpack.c.bf16 %v1143_v53, %v1142_v52  ;;  %v1155_v56 = vld [vmem:[%s2007_s14 + $0x98] sm:$0xff] }
 0x2bd   : > { %1364 = vmatmul.msk.bf16.vlgmr.msrb.gmra.mxu3 %vm757_vm2, %v888_v57  ;;  %v1027_v38 = vmul.f32 %v1447_v35, %v1026_v37  ;;  %v1062_v57 = vld [vmem:[%s2005_s12 + $0x20] sm:$0xff] }
 0x2be   : > { %1096 = vmatpush.bf16.msra.mxu3 %v1081_v48  ;;  %v1077_v60 = vpack.c.bf16 %v1064_v58, %v1062_v57  ;;  %v1160_v37 = vld [vmem:[%s2007_s14 + $0xc0] sm:$0xff]  ;;  %v1174_v48 = vpack.c.bf16 %v1145_v47, %v1144_v46  ;;  %v1141_v58 = vld [vmem:[%s2007_s14 + $0x28] sm:$0xff] }
 0x2bf   : > { %v1028_v39 = vadd.f32 %v1447_v35, %v1027_v38  ;;  %v1161_v38 = vld [vmem:[%s2007_s14 + $0xc8] sm:$0xff]  ;;  %v1140_v57 = vld [vmem:[%s2007_s14 + $0x20] sm:$0xff] }
 0x2c1   : > { %v1806_v40 = vsel %vm1029_vm6, %v1447_v35, %v1028_v39  ;;  %v1149_v35 = vld [vmem:[%s2007_s14 + $0x68] sm:$0xff]  ;;  %v1182_v39 = vpack.c.bf16 %v1161_v38, %v1160_v37  ;;  %v1427_v37 = vld [vmem:[%s2008_s15] ss:$0 sm:$0xff] }
 0x2c2   : > { %v787_v59 = vpop.f32.mrf.mxu3  ;;  %1097 = vmatpush.bf16.msra.mxu3 %v1079_v54  ;;  %v1176_v36 = vpack.c.bf16 %v1149_v35, %v1148_v34  ;;  %v1154_v54 = vld [vmem:[%s2007_s14 + $0x90] sm:$0xff] }
 0x2c6   : > { %1098 = vmatpush.bf16.msra.mxu3 %v1077_v60  ;;  %v1152_v60 = vld [vmem:[%s2007_s14 + $0x80] sm:$0xff] }
 0x2c8   : > { %v948_v62 = vpop.permute.xlu1 %947 }
 0x2c9   : > { %v953_v63 = vsel %vm774_vm3, %v948_v62, 0 }
 0x2ca   : > { %v789_v0 = vpop.f32.mrf.mxu3  ;;  %962 = vmatpush.bf16.msrb.mxu1 %v953_v63  ;;  %v1058_v63 = vld [vmem:[%s2005_s12] sm:$0xff] }
 0x2cb   : > { %v1060_v0 = vld [vmem:[%s2005_s12 + $0x10] sm:$0xff] }
 0x2cd   : > { %1366 = vmatmul.msk.bf16.vlgmr.msrb.gmra.mxu1 %vm757_vm2, %v946_v1  ;;  %v1059_v1 = vld [vmem:[%s2005_s12 + $0x8] sm:$0xff] }
 0x32f   : > { %v848_v2 = vpop.f32.mrf.mxu3 }
 0x330   : > { %969 = vrot.lane.b32.xlu2 %v848_v2, %s1570_s22  ;;  %v1075_v2 = vpack.c.bf16 %v1060_v0, %v1058_v63  ;;  %v1138_v63 = vld [vmem:[%s2007_s14 + $0x10] sm:$0xff]  ;;  %v1139_v0 = vld [vmem:[%s2007_s14 + $0x18] sm:$0xff] }
 0x332   : > { %1099 = vmatpush.bf16.msra.mxu3 %v1075_v2  ;;  %v1171_v2 = vpack.c.bf16 %v1139_v0, %v1138_v63 }
 0x337   : > { %v850_v3 = vpop.f32.mrf.mxu3 }
 0x338   : > { %v1061_v3 = vld [vmem:[%s2005_s12 + $0x18] sm:$0xff] }
 0x340   : > { %v906_v4 = vpop.f32.mrf.mxu3 }
 0x341   : > { %973 = vrot.lane.b32.xlu0 %v906_v4, %s1571_s6  ;;  %v1076_v4 = vpack.c.bf16 %v1061_v3, %v1059_v1  ;;  %v1083_v3 = vld [vmem:[%s2006_s13] sm:$0x3] }
 0x348   : > { %v908_v5 = vpop.f32.mrf.mxu3 }
 0x349   : > { %v1166_v5 = vld [vmem:[%s2007_s14 + $0xf0] sm:$0xff] }
 0x34a   : > { %v964_v6 = vpop.f32.mrf.mxu1 }
 0x34b   : > { %977 = vrot.lane.b32.xlu2 %v964_v6, %s1572_s2  ;;  %v1167_v6 = vld [vmem:[%s2007_s14 + $0xf8] sm:$0xff] }
 0x34c   : > { %v1185_v9 = vpack.c.bf16 %v1167_v6, %v1166_v5  ;;  %v1137_v5 = vld [vmem:[%s2007_s14 + $0x8] sm:$0xff] }
 0x34e   : > { %1203 = vmatpush.bf16.msrb.mxu2 %v1185_v9 }
 0x352   : > { %v966_v7 = vpop.f32.mrf.mxu1 }
 0x353   : > { %v1164_v7 = vld [vmem:[%s2007_s14 + $0xe0] sm:$0xff] }
 0x354   : > { %v1184_v12 = vpack.c.bf16 %v1165_v10, %v1164_v7  ;;  %v1086_v7 = vperm.slane %v1083_v3, 1 }
 0x356   : > { %1204 = vmatpush.bf16.msrb.mxu2 %v1184_v12 }
 0x38a   : > { %v970_v20 = vpop.permute.xlu2 %969 }
 0x38b   : > { %v980_v21 = vsel %vm732_vm1, %v787_v59, %v970_v20  ;;  %v1063_v59 = vld [vmem:[%s2005_s12 + $0x28] sm:$0xff]  ;;  %v1425_v20 = vld [vmem:[%s2003_s10] ss:$0 sm:$0xff] }
 0x38c   : > { %v1078_v62 = vpack.c.bf16 %v1065_v61, %v1063_v59  ;;  %v1179_v59 = vpack.c.bf16 %v1155_v56, %v1154_v54  ;;  %v1153_v61 = vld [vmem:[%s2007_s14 + $0x88] sm:$0xff] }
 0x38d   : > { %v1178_v1 = vpack.c.bf16 %v1153_v61, %v1152_v60 }
 0x38e   : > { %1111 = vmatpush.bf16.msrb.mxu0 %v1078_v62  ;;  %v1172_v62 = vpack.c.bf16 %v1141_v58, %v1140_v57 }
 0x392   : > { %1112 = vmatpush.bf16.msrb.mxu0 %v1076_v4  ;;  %v1136_v4 = vld [vmem:[%s2007_s14] sm:$0xff] }
 0x393   : > { %v1170_v6 = vpack.c.bf16 %v1137_v5, %v1136_v4 }
 0x3a5   : > { %v978_v24 = vpop.permute.xlu2 %977 }
 0x3b3   : > { %v974_v22 = vpop.permute.xlu0 %973 }
 0x3b4   : > { %v982_v25 = vsel %vm981_vm4, %v980_v21, %v974_v22  ;;  %v1426_v22 = vld [vmem:[%s2004_s11] ss:$0 sm:$0xff] }
 0x3b5   : > { %v984_v26 = vsel %vm983_vm5, %v982_v25, %v978_v24 }
 0x3b6   : > { %v993_v27 = vpack.c.bf16 %v984_v26, %v984_v26 }
 0x3b8   : > { %1367 = vmatmul.msk.bf16.vlgmr.msra.gmra.mxu2 %vm655_vm0, %v993_v27 }
 0x43b   : > { %v1014_v29 = vpop.f32.mrf.mxu2 }
 0x43c   : > { %v1015_v30 = vadd.f32 %v1424_v28, %v1014_v29  ;;  %v1150_v28 = vld [vmem:[%s2007_s14 + $0x70] sm:$0xff]  ;;  %v1151_v29 = vld [vmem:[%s2007_s14 + $0x78] sm:$0xff] }
 0x43e   : > { %v1018_v31 = vadd.f32 %v1015_v30, %v1745_v23  ;;  %v1177_v30 = vpack.c.bf16 %v1151_v29, %v1150_v28 }
 0x440   : > { %v1021_v32 = vsel %vm655_vm0, %v1018_v31, 0.0  ;;  %1190 = vmatpush.bf16.msra.mxu1 %v1177_v30 }
 0x441   : > { %1022 = vadd.xlane.f32.xlu1 %v1021_v32  ;;  %v1163_v32 = vld [vmem:[%s2007_s14 + $0xd8] sm:$0xff] }
 0x443   : > { %v1016_v33 = vpop.f32.mrf.mxu2 }
 0x444   : > { %1191 = vmatpush.bf16.msra.mxu1 %v1176_v36 }
 0x4b4   : > { %v1023_v41 = vpop.xlane.xlu1 %1022 }
 0x4b5   : > { %v1031_v42 = vmul.f32 %v1806_v40, %v1023_v41  ;;  %v1146_v41 = vld [vmem:[%s2007_s14 + $0x50] sm:$0xff] }
 0x4b7   : > { %v1032_v43 = vsub.f32 %v1018_v31, %v1031_v42  ;;  %v1162_v31 = vld [vmem:[%s2007_s14 + $0xd0] sm:$0xff]  ;;  %v1147_v42 = vld [vmem:[%s2007_s14 + $0x58] sm:$0xff] }
 0x4b8   : > { %v1183_v33 = vpack.c.bf16 %v1163_v32, %v1162_v31 }
 0x4b9   : > { %v1033_v44 = vmul.f32 %v1032_v43, %v1032_v43 }
 0x4ba   : > { %1205 = vmatpush.bf16.msrb.mxu2 %v1183_v33 }
 0x4bb   : > { %v1034_v23 = vsel %vm655_vm0, %v1033_v44, 0.0  ;;  %v1158_v44 = vld [vmem:[%s2007_s14 + $0xb0] sm:$0xff] }
 0x4bc   : > { %1035 = vadd.xlane.f32.xlu0 %v1034_v23  ;;  %v1159_v23 = vld [vmem:[%s2007_s14 + $0xb8] sm:$0xff] }
 0x4bd   : > { %v1181_v45 = vpack.c.bf16 %v1159_v23, %v1158_v44 }
 0x4be   : > { %1206 = vmatpush.bf16.msrb.mxu2 %v1182_v39 }
 0x4c2   : > { %1207 = vmatpush.bf16.msrb.mxu2 %v1181_v45 }
 0x4c6   : > { %1208 = vmatpush.bf16.msrb.mxu2 %v1180_v51 }
 0x4ca   : > { %1209 = vmatpush.bf16.msrb.mxu2 %v1179_v59  ;;  %v1428_v59 = vld [vmem:[%s2009_s16] ss:$0 sm:$0xff] }
 0x4ce   : > { %1210 = vmatpush.bf16.msrb.mxu2 %v1178_v1 }
 0x52f   : > { %v1036_v8 = vpop.xlane.xlu0 %1035 }
 0x530   : > { %v1037_v11 = vmul.f32 %v1036_v8, %v1806_v40 }
 0x532   : > { %v1038_v13 = vadd.f32 1e-12, %v1037_v11  ;;  %v1085_v11 = vperm.slane %v1083_v3, 0 }
 0x534   : > { %1448 = vrsqrt.f32 %v1038_v13  ;;  %vm1045_vm8 = vweird.f32 %v1038_v13 }
 0x53a   : > { %v1449_v14 = vpop.eup %1448 }
 0x53b   : > { %v1040_v15 = vmul.f32 %v1449_v14, %v1038_v13  ;;  %vm1046_vm7 = vweird.f32 %v1449_v14 }
 0x53c   : > { %vm1047_vm9 = vmor %vm1045_vm8, %vm1046_vm7 }
 0x53d   : > { %v1041_v16 = vmul.f32 %v1449_v14, %v1040_v15 }
 0x53f   : > { %v1042_v17 = vmul.f32 0.5, %v1041_v16 }
 0x541   : > { %v1043_v18 = vsub.f32 1.5, %v1042_v17 }
 0x543   : > { %v1044_v19 = vmul.f32 %v1449_v14, %v1043_v18 }
 0x545   : > { %v1048_v21 = vsel %vm1047_vm9, %v1449_v14, %v1044_v19 }
 0x546   : > { %v1049_v24 = vmul.f32 %v1048_v21, %v1032_v43  ;;  %v1175_v43 = vpack.c.bf16 %v1147_v42, %v1146_v41 }
 0x548   : > { %v1053_v25 = vmul.f32 %v1425_v20, %v1049_v24  ;;  %1192 = vmatpush.bf16.msra.mxu1 %v1175_v43 }
 0x54a   : > { %v1877_v26 = vadd.f32 %v1426_v22, %v1053_v25 }
 0x54c   : > { %v1074_v27 = vpack.c.bf16 %v1877_v26, %v1877_v26  ;;  %1193 = vmatpush.bf16.msra.mxu1 %v1174_v48 }
 0x54e   : > { %1368 = vmatmul.msk.bf16.vlgmr.msra.gmra.mxu3 %vm655_vm0, %v1074_v27  ;;  %1369 = vmatmul.msk.bf16.vlgmr.msrb.gmra.mxu0 %vm655_vm0, %v1074_v27 }
 0x550   : > { %1194 = vmatpush.bf16.msra.mxu1 %v1173_v55 }
 0x554   : > { %1195 = vmatpush.bf16.msra.mxu1 %v1172_v62 }
 0x558   : > { %1196 = vmatpush.bf16.msra.mxu1 %v1171_v2 }
 0x55c   : > { %1197 = vmatpush.bf16.msra.mxu1 %v1170_v6 }
 0x5cb   : > { %v1114_v8 = vpop.f32.mrf.mxu0 }
 0x5cc   : > { %v1115_v9 = vadd.f32 %v1114_v8, %v1086_v7 }
 0x5ce   : > { %v1121_v10 = vmul.f32 0.044715, %v1115_v9  ;;  %v1119_v28 = vmul.f32 0.5, %v1115_v9 }
 0x5d0   : > { %v1123_v12 = vmul.f32 %v1121_v10, %v1115_v9 }
 0x5d1   : > { %v1101_v13 = vpop.f32.mrf.mxu3 }
 0x5d2   : > { %v1125_v14 = vmul.f32 %v1123_v12, %v1115_v9  ;;  %v1102_v15 = vadd.f32 %v1101_v13, %v1085_v11 }
 0x5d3   : > { %v1116_v16 = vpop.f32.mrf.mxu0 }
 0x5d4   : > { %v1120_v17 = vmul.f32 0.044715, %v1102_v15  ;;  %v1127_v18 = vadd.f32 %v1125_v14, %v1115_v9  ;;  %v1118_v33 = vmul.f32 0.5, %v1102_v15 }
 0x5d6   : > { %v1122_v19 = vmul.f32 %v1120_v17, %v1102_v15  ;;  %v1129_v20 = vmul.f32 0.7978846, %v1127_v18 }
 0x5d8   : > { %v1124_v21 = vmul.f32 %v1122_v19, %v1102_v15  ;;  %1450 = vtanh.f32 %v1129_v20 }
 0x5d9   : > { %v1103_v22 = vpop.f32.mrf.mxu3 }
 0x5da   : > { %v1126_v24 = vadd.f32 %v1124_v21, %v1102_v15 }
 0x5dc   : > { %v1128_v25 = vmul.f32 0.7978846, %v1126_v24 }
 0x5de   : > { %v1451_v27 = vpop.eup %1450  ;;  %1452 = vtanh.f32 %v1128_v25 }
 0x5df   : > { %v1133_v29 = vadd.f32 1.0, %v1451_v27 }
 0x5e1   : > { %v1135_v30 = vmul.f32 %v1133_v29, %v1119_v28 }
 0x5e3   : > { %v1169_v31 = vpack.c.bf16 %v1135_v30, %v1135_v30 }
 0x5e4   : > { %v1453_v32 = vpop.eup %1452 }
 0x5e5   : > { %1211 = vmatmul.bf16.vlgmr.msrb.gmra.mxu2 %v1169_v31  ;;  %v1132_v34 = vadd.f32 1.0, %v1453_v32 }
 0x5e7   : > { %v1134_v35 = vmul.f32 %v1132_v34, %v1118_v33 }
 0x5e9   : > { %v1168_v36 = vpack.c.bf16 %v1134_v35, %v1134_v35 }
 0x5eb   : > { %1198 = vmatmul.bf16.vlgmr.msra.gmra.mxu1 %v1168_v36 }
 0x668   : > { %v1199_v38 = vpop.f32.mrf.mxu1  ;;  %v1212_v39 = vpop.f32.mrf.mxu2 }
 0x669   : > { %v1200_v41 = vadd.f32 %v1427_v37, %v1199_v38 }
 0x66b   : > { %v1213_v42 = vadd.f32 %v1212_v39, %v1200_v41 }
 0x66d   : > { %v1216_v43 = vadd.f32 %v1213_v42, %v1877_v26 }
 0x66f   : > { %v1219_v44 = vsel %vm655_vm0, %v1216_v43, 0.0 }
 0x670   : > { %v1201_v23 = vpop.f32.mrf.mxu1  ;;  %v1214_v45 = vpop.f32.mrf.mxu2  ;;  %1220 = vadd.xlane.f32.xlu2 %v1219_v44 }
 0x6e3   : > { %v1221_v46 = vpop.xlane.xlu2 %1220 }
 0x6e4   : > { %v1222_v47 = vmul.f32 %v1221_v46, %v1806_v40 }
 0x6e6   : > { %v1223_v48 = vsub.f32 %v1216_v43, %v1222_v47 }
 0x6e8   : > { %v1224_v49 = vmul.f32 %v1223_v48, %v1223_v48 }
 0x6ea   : > { %v1225_v50 = vsel %vm655_vm0, %v1224_v49, 0.0 }
 0x6eb   : > { %1226 = vadd.xlane.f32.xlu1 %v1225_v50 }
 0x75e   : > { %v1227_v51 = vpop.xlane.xlu1 %1226 }
 0x75f   : > { %v1228_v52 = vmul.f32 %v1227_v51, %v1806_v40  ;;  %v1429_v40 = vld [vmem:[%s2010_s17] ss:$0 sm:$0xff] }
 0x761   : > { %v1229_v53 = vadd.f32 1e-12, %v1228_v52 }
 0x763   : > { %1454 = vrsqrt.f32 %v1229_v53  ;;  %vm1236_vm11 = vweird.f32 %v1229_v53 }
 0x769   : > { %v1455_v26 = vpop.eup %1454 }
 0x76a   : > { %v1231_v54 = vmul.f32 %v1455_v26, %v1229_v53  ;;  %vm1237_vm10 = vweird.f32 %v1455_v26 }
 0x76b   : > { %vm1238_vm12 = vmor %vm1236_vm11, %vm1237_vm10 }
 0x76c   : > { %v1232_v55 = vmul.f32 %v1455_v26, %v1231_v54 }
 0x76e   : > { %v1233_v56 = vmul.f32 0.5, %v1232_v55 }
 0x770   : > { %v1234_v57 = vsub.f32 1.5, %v1233_v56 }
 0x772   : > { %v1235_v58 = vmul.f32 %v1455_v26, %v1234_v57 }
 0x774   : > { %v1239_v60 = vsel %vm1238_vm12, %v1455_v26, %v1235_v58 }
 0x775   : > { %v1240_v61 = vmul.f32 %v1239_v60, %v1223_v48 }
 0x777   : > { %v1244_v62 = vmul.f32 %v1428_v59, %v1240_v61 }
 0x779   : > { %v1248_v63 = vadd.f32 %v1429_v40, %v1244_v62 }
 0x77b   : > { %1249 = vst.msk [vmem:[%s634_s25] sm:$0xff] %vm655_vm0, %v1248_v63 }
 0x77c PF: > { %s30_s27 = sadd.s32 1, %s1560_s27  }
 0x77d   : > { %p27_p7 = scmp.ge.s32.totalorder %s30_s27, 4  }
 0x77f   :  { %29 = sbr.rel (!%p27_p7) target bundleno = 7 (0x7), region = 138 }
 0x784   :  { %1269 = vsyncpa [#allocation3], 1 }
 0x785   :  { %1271 = vsyncpa [#allocation3 + $0x1], 1 }
 0x786   :  { %1272 = vsyncpa [#allocation5], 1 }

// kernel: _lambda_.16
= control target key start
LH: loop header
LB: loop body
LE: loop exit
PB: predicated region body
PF: predicated region fallthrough
CT: control target
= control target key end

     0   :  { %s2062_s0 = inlined_call_operand.vmem [shape: f32[2,8,64], index: 0, kind: input, shape index: {}]   ;;  %s2063_s1 = inlined_call_operand.vmem [shape: f32[2,1,8], index: 1, kind: input, shape index: {}]   ;;  %s2064_s2 = inlined_call_operand.hbm [shape: f32[64,64], index: 2, kind: input, shape index: {}]   ;;  %s2065_s3 = inlined_call_operand.vmem [shape: f32[1,64], index: 3, kind: input, shape index: {}]   ;;  %s2066_s4 = inlined_call_operand.hbm [shape: f32[64,64], index: 4, kind: input, shape index: {}]   ;;  %s2067_s5 = inlined_call_operand.vmem [shape: f32[1,64], index: 5, kind: input, shape index: {}]   ;;  %s2068_s6 = inlined_call_operand.hbm [shape: f32[64,64], index: 6, kind: input, shape index: {}]   ;;  %s2069_s7 = inlined_call_operand.vmem [shape: f32[1,64], index: 7, kind: input, shape index: {}]   ;;  %s2070_s8 = inlined_call_operand.hbm [shape: f32[64,64], index: 8, kind: input, shape index: {}]   ;;  %s2071_s9 = inlined_call_operand.vmem [shape: f32[1,64], index: 9, kind: input, shape index: {}]   ;;  %s2072_s10 = inlined_call_operand.vmem [shape: f32[1,64], index: 10, kind: input, shape index: {}]   ;;  %s2073_s11 = inlined_call_operand.vmem [shape: f32[1,64], index: 11, kind: input, shape index: {}]   ;;  %s2074_s12 = inlined_call_operand.vmem [shape: f32[64,256], index: 12, kind: input, shape index: {}]   ;;  %s2075_s13 = inlined_call_operand.vmem [shape: f32[1,256], index: 13, kind: input, shape index: {}]   ;;  %s2076_s14 = inlined_call_operand.vmem [shape: f32[256,64], index: 14, kind: input, shape index: {}]   ;;  %s2077_s15 = inlined_call_operand.vmem [shape: f32[1,64], index: 15, kind: input, shape index: {}]   ;;  %s2078_s16 = inlined_call_operand.vmem [shape: f32[1,64], index: 16, kind: input, shape index: {}]   ;;  %s2079_s17 = inlined_call_operand.vmem [shape: f32[1,64], index: 17, kind: input, shape index: {}]   ;;  %s2080_s18 = inlined_call_operand.vmem [shape: f32[2,8,64], index: 18, kind: output, shape index: {}]  }
   0x1   :  { %2083 = sst [smem:[#allocation13_spill]] %s2062_s0 }
   0x2   :  { %2084 = sst [smem:[#allocation14_spill]] %s2063_s1 }
   0x3   :  { %2085 = sst [smem:[#allocation15_spill]] %s2064_s2 }
   0x4   :  { %2086 = sst [smem:[#allocation16_spill]] %s2066_s4 }
   0x5   :  { %2087 = sst [smem:[#allocation17_spill]] %s2079_s17 }
   0x6   :  { %2088 = sst [smem:[#allocation18_spill]] %s2080_s18 }
   0x7   :  { %23 = vsyncpa [#allocation3], 0 }
   0x8   :  { %24 = vsyncpa [#allocation5], 0 }
   0x9   :  { %25 = vsyncpa [#allocation8], 0  ;;  %s1743_s27 = smov 0  }
   0xa LB: > { %2089 = sst [smem:[#allocation12_spill]] %s1633_s27  ;;  %s1749_s28 = sadd.s32 4294967295, %s1633_s27   ;;  %s1633_s27 = sphi %s1743_s27, %s31_s27  }
   0xb   : > { %p1372_p0 = scmp.ge.s32.totalorder %s1633_s27, 1  ;;  %p450_p1 = scmp.lt.s32.totalorder %s1633_s27, 3 }
   0xc   : > { %p1430_p2 = scmp.eq.s32.totalorder %s1749_s28, 0  ;;  %s2090_s4 = sld [smem:[#allocation16_spill]] }
   0xd   : > { %p1757_p3 = pnand %p1372_p0, %p450_p1  ;;  %s2092_s21 = sld [smem:[#allocation15_spill]] }
   0xe   : > { %s1635_s2 = smov [#allocation4]   ;;  %s1636_s25 = smov [#allocation2]  }
   0xf   : > { %p1417_p4 = pneg %p1757_p3  ;;  %s480_s23 = sshll.u32 %s1635_s2, 4  ;;  %s481_s23 = int_to_ptr.vmem [resolvable:$true] %s480_s23 }
  0x10   : > { %s463_s26 = sshll.u32 %s1636_s25, 4  ;;  %s495_s1 = sshll.u32 %s2068_s6, 4  ;;  %s464_s26 = int_to_ptr.vmem [resolvable:$true] %s463_s26  ;;  %s496_s1 = int_to_ptr.hbm [resolvable:$true] %s495_s1 }
  0x11   : > { %p1768_p5 = pnand %p1430_p2, %p1417_p4  ;;  %s1637_s20 = smov 128  }
  0x12   : > { %s478_s0 = sshll.u32 %s2090_s4, 4  ;;  %s1639_s2 = smov [#allocation6]   ;;  %s479_s0 = int_to_ptr.hbm [resolvable:$true] %s478_s0 }
  0x13   : > { %s461_s22 = sshll.u32 %s2092_s21, 4  ;;  %s1638_s21 = smov 8   ;;  %s462_s22 = int_to_ptr.hbm [resolvable:$true] %s461_s22 }
  0x14   : > { %1423 = dma.hbm_to_vmem [thread:$0]  (!%p1768_p5), %s479_s0, 1024, %s481_s23, [#allocation5], %s1637_s20, %s1637_s20, %s1638_s21  }
  0x15   : > { %1420 = dma.hbm_to_vmem [thread:$0]  (!%p1768_p5), %s462_s22, 1024, %s464_s26, [#allocation3], %s1637_s20, %s1637_s20, %s1638_s21  }
  0x16   : > { %s497_s4 = sshll.u32 %s1639_s2, 4  ;;  %s512_s17 = sshll.u32 %s2070_s8, 4  ;;  %s498_s4 = int_to_ptr.vmem [resolvable:$true] %s497_s4  ;;  %s513_s17 = int_to_ptr.hbm [resolvable:$true] %s512_s17 }
  0x17   : > { %1426 = dma.hbm_to_vmem [thread:$0]  (!%p1768_p5), %s496_s1, 1024, %s498_s4, [#allocation5], %s1637_s20, %s1637_s20, %s1638_s21  }
  0x18   : > { %s1640_s25 = smov [#allocation7]   ;;  %570 = sbr.rel (%p1757_p3) target bundleno = 1925 (0x785), region = 92 }
  0x19   : > { %s514_s29 = sshll.u32 %s1640_s25, 4  ;;  %s515_s29 = int_to_ptr.vmem [resolvable:$true] %s514_s29 }
  0x1a   : > { %1429 = dma.hbm_to_vmem [thread:$0]  (!%p1768_p5), %s513_s17, 1024, %s515_s29, [#allocation8], %s1637_s20, %s1637_s20, %s1638_s21  }
  0x1d   : > { %1620 = dma.done.wait (%p1430_p2), [#allocation3], 1024  }
  0x1e   : > { %1622 = vsyncadd (%p1430_p2), [#allocation3], 4294966272 }
  0x1f   : > { %1624 = dma.done.wait (%p1430_p2), [#allocation5], 2048  }
  0x20   : > { %1626 = vsyncadd (%p1430_p2), [#allocation5], 4294965248 }
  0x21   : > { %1628 = dma.done.wait (%p1430_p2), [#allocation8], 1024  }
  0x22   : > { %1630 = vsyncadd (%p1430_p2), [#allocation8], 4294966272  ;;  %p641_p6 = scmp.lt.s32.totalorder %s1749_s28, 1  ;;  %v661_v0 = vld [vmem:[#allocation2 + $0x30] sm:$0xff]  ;;  %v662_v1 = vld [vmem:[#allocation2 + $0x38] sm:$0xff]  ;;  %s2094_s27 = sld [smem:[#allocation14_spill]] }
  0x23   : > { %v695_v2 = vld [vmem:[#allocation4 + $0x30] sm:$0xff]  ;;  %v667_v3 = vpack.c.bf16 %v662_v1, %v661_v0  ;;  %v696_v4 = vld [vmem:[#allocation4 + $0x38] sm:$0xff]  ;;  %v659_v5 = vld [vmem:[#allocation2 + $0x20] sm:$0xff]  ;;  %s2096_s24 = sld [smem:[#allocation13_spill]]  ;;  %vm672_vm0 = vcmask 523264   ;;  %vm749_vm1 = vcmask 130048  }
  0x24   : > { %v660_v6 = vld [vmem:[#allocation2 + $0x28] sm:$0xff]  ;;  %s2101_s28 = smov (!%p641_p6, %s1749_s28), 1  ;;  %v700_v7 = vpack.c.bf16 %v696_v4, %v695_v2  ;;  %v693_v8 = vld [vmem:[#allocation4 + $0x20] sm:$0xff]  ;;  %v657_v12 = vld [vmem:[#allocation2 + $0x10] sm:$0xff]  ;;  %s1641_s2 = smov 80   ;;  %vm774_vm2 = vcmask 64512  }
  0x25   : > { %v694_v9 = vld [vmem:[#allocation4 + $0x28] sm:$0xff]  ;;  %680 = vmatpush.bf16.msra.mxu0 %v667_v3  ;;  %v666_v10 = vpack.c.bf16 %v660_v6, %v659_v5  ;;  %v658_v13 = vld [vmem:[#allocation2 + $0x18] sm:$0xff]  ;;  %v691_v14 = vld [vmem:[#allocation4 + $0x10] sm:$0xff]  ;;  %s1383_s4 = sshll.u32 %s2101_s28, 3  ;;  %s1642_s25 = smov 96   ;;  %vm791_vm3 = vcmask 1043456  }
  0x26   : > { %709 = vmatpush.bf16.msra.mxu1 %v700_v7  ;;  %v699_v11 = vpack.c.bf16 %v694_v9, %v693_v8  ;;  %v692_v15 = vld [vmem:[#allocation4 + $0x18] sm:$0xff]  ;;  %v655_v16 = vld [vmem:[#allocation2] sm:$0xff]  ;;  %v656_v17 = vld [vmem:[#allocation2 + $0x8] sm:$0xff]  ;;  %v665_v18 = vpack.c.bf16 %v658_v13, %v657_v12  ;;  %s1643_s29 = smov 112   ;;  %s1645_s23 = smov 32   ;;  %vm998_vm4 = vcmask 261120  }
  0x27   : > { %v698_v19 = vpack.c.bf16 %v692_v15, %v691_v14  ;;  %v689_v20 = vld [vmem:[#allocation4] sm:$0xff]  ;;  %v690_v21 = vld [vmem:[#allocation4 + $0x8] sm:$0xff]  ;;  %v664_v22 = vpack.c.bf16 %v656_v17, %v655_v16  ;;  %v724_v26 = vld [vmem:[#allocation6 + $0x30] sm:$0xff]  ;;  %vm1000_vm5 = vcmask 392192   ;;  %s2098_s17 = sld [smem:[#allocation18_spill]] }
  0x28   : > { %s647_s19 = scalar_lea.vmem %s2094_s27, %s2101_s28  ;;  %v697_v24 = vpack.c.bf16 %v690_v21, %v689_v20  ;;  %v725_v27 = vld [vmem:[#allocation6 + $0x38] sm:$0xff]  ;;  %v722_v28 = vld [vmem:[#allocation6 + $0x20] sm:$0xff]  ;;  %v723_v30 = vld [vmem:[#allocation6 + $0x28] sm:$0xff] }
  0x29   : > { %681 = vmatpush.bf16.msra.mxu0 %v666_v10  ;;  %s644_s26 = scalar_lea.vmem %s2096_s24, %s1383_s4  ;;  %v729_v29 = vpack.c.bf16 %v725_v27, %v724_v26  ;;  %v728_v31 = vpack.c.bf16 %v723_v30, %v722_v28  ;;  %v1460_v32 = vld [vmem:[%s2067_s5] ss:$0 sm:$0xff]  ;;  %v720_v43 = vld [vmem:[#allocation6 + $0x10] sm:$0xff]  ;;  %v721_v44 = vld [vmem:[#allocation6 + $0x18] sm:$0xff]  ;;  %s1646_s24 = smov 48  }
  0x2a   : > { %710 = vmatpush.bf16.msra.mxu1 %v699_v11  ;;  %v1814_v23 = vld [vmem:[%s644_s26] sm:$0xff]  ;;  %v727_v45 = vpack.c.bf16 %v721_v44, %v720_v43  ;;  %v719_v47 = vld [vmem:[#allocation6 + $0x8] sm:$0xff] }
  0x2b   : > { %v663_v25 = vpack.c.bf16 %v1814_v23, %v1814_v23  ;;  %738 = vmatpush.bf16.msra.mxu2 %v729_v29  ;;  %v1459_v35 = vld [vmem:[%s2065_s3] ss:$0 sm:$0xff] }
  0x2c   : > { %v718_v46 = vld [vmem:[#allocation6] sm:$0xff] }
  0x2d   : > { %682 = vmatpush.bf16.msra.mxu0 %v665_v18  ;;  %v726_v48 = vpack.c.bf16 %v719_v47, %v718_v46  ;;  %v1461_v58 = vld [vmem:[%s647_s19] ss:$0 sm:$0xff]  ;;  %s1644_s19 = smov 16   ;;  %s651_s18 = scalar_lea.vmem %s2098_s17, %s1383_s4 }
  0x2e   : > { %711 = vmatpush.bf16.msra.mxu1 %v698_v19  ;;  %v1462_v0 = vld [vmem:[%s2069_s7] ss:$0 sm:$0xff] }
  0x2f   : > { %739 = vmatpush.bf16.msra.mxu2 %v728_v31 }
  0x31   : > { %683 = vmatpush.bf16.msra.mxu0 %v664_v22 }
  0x32   : > { %712 = vmatpush.bf16.msra.mxu1 %v697_v24 }
  0x33   : > { %740 = vmatpush.bf16.msra.mxu2 %v727_v45 }
  0x34   : > { %1385 = vmatmul.msk.bf16.vlgmr.msra.gmra.mxu0 %vm672_vm0, %v663_v25 }
  0x35   : > { %1386 = vmatmul.msk.bf16.vlgmr.msra.gmra.mxu1 %vm672_vm0, %v663_v25 }
  0x37   : > { %741 = vmatpush.bf16.msra.mxu2 %v726_v48 }
  0x3a   : > { %1387 = vmatmul.msk.bf16.vlgmr.msra.gmra.mxu2 %vm672_vm0, %v663_v25 }
  0xb1   : > { %v685_v33 = vpop.f32.mrf.mxu0 }
  0xb2   : > { %v714_v34 = vpop.f32.mrf.mxu1  ;;  %v686_v38 = vadd.f32 %v1459_v35, %v685_v33 }
  0xb3   : > { %v715_v36 = vadd.f32 %v1460_v32, %v714_v34 }
  0xb4   : > { %v747_v42 = vpack.c.bf16 %v686_v38, %v686_v38 }
  0xb5   : > { %v748_v37 = vpack.c.bf16 %v715_v36, %v715_v36 }
  0xb7   : > { %929 = vrot.lane.b32.xlu2 %v748_v37, %s1641_s2  ;;  %871 = vrot.lane.b32.xlu1 %v748_v37, %s1642_s25  ;;  %v754_v39 = vsel %vm749_vm1, %v748_v37, 0 }
  0xb8   : > { %812 = vrot.lane.b32.xlu0 %v748_v37, %s1643_s29  ;;  %763 = vmatpush.bf16.xpose.msra.mxu3 %v754_v39 }
  0xb9   : > { %v687_v40 = vpop.f32.mrf.mxu0 }
  0xba   : > { %v716_v41 = vpop.f32.mrf.mxu1 }
  0xbd   : > { %v743_v1 = vpop.f32.mrf.mxu2 }
  0xbe   : > { %v744_v2 = vadd.f32 %v1462_v0, %v743_v1 }
  0xbf   : > { %927 = vrot.lane.b32.xlu2 %v747_v42, %s1641_s2  ;;  %869 = vrot.lane.b32.xlu1 %v747_v42, %s1642_s25 }
  0xc0   : > { %809 = vrot.lane.b32.xlu0 %v747_v42, %s1643_s29  ;;  %1388 = vmatmul.msk.bf16.vlgmr.msra.gmra.mxu3 %vm749_vm1, %v747_v42  ;;  %v787_v3 = vpack.c.bf16 %v744_v2, %v744_v2 }
  0xc2   : > { %v793_v4 = vsel %vm791_vm3, %v787_v3, 0 }
  0xc3   : > { %802 = vmatpush.bf16.msrb.mxu3 %v793_v4 }
  0xc5   : > { %v745_v5 = vpop.f32.mrf.mxu2 }
 0x111   : > { %v930_v49 = vpop.permute.xlu2 %929 }
 0x112   : > { %v935_v54 = vsel %vm749_vm1, %v930_v49, 0 }
 0x119   : > { %v928_v57 = vpop.permute.xlu2 %927 }
 0x129   : > { %v872_v50 = vpop.permute.xlu1 %871 }
 0x12a   : > { %v813_v51 = vpop.permute.xlu0 %812  ;;  %v877_v52 = vsel %vm749_vm1, %v872_v50, 0 }
 0x12b   : > { %v818_v53 = vsel %vm749_vm1, %v813_v51, 0  ;;  %886 = vmatpush.bf16.xpose.msrb.mxu2 %v877_v52 }
 0x12c   : > { %827 = vmatpush.bf16.xpose.msrb.mxu0 %v818_v53 }
 0x131   : > { %v870_v55 = vpop.permute.xlu1 %869 }
 0x132   : > { %v810_v56 = vpop.permute.xlu0 %809  ;;  %1392 = vmatmul.msk.bf16.vlgmr.msrb.gmra.mxu2 %vm749_vm1, %v870_v55 }
 0x133   : > { %1390 = vmatmul.msk.bf16.vlgmr.msrb.gmra.mxu0 %vm749_vm1, %v810_v56 }
 0x134   : > { %944 = vmatpush.bf16.xpose.msra.mxu0 %v935_v54 }
 0x143   : > { %v765_v59 = vpop.f32.mrf.mxu3  ;;  %1394 = vmatmul.msk.bf16.vlgmr.msra.gmra.mxu0 %vm749_vm1, %v928_v57 }
 0x144   : > { %v769_v60 = vmul.f32 0.25, %v765_v59 }
 0x146   : > { %v773_v61 = vadd.f32 %v1461_v58, %v769_v60 }
 0x148   : > { %v775_v62 = vsel %vm774_vm2, %v773_v61, -inf }
 0x149   : > { %776 = vmax.xlane.f32.xlu0 %v775_v62 }
 0x14b   : > { %v767_v63 = vpop.f32.mrf.mxu3 }
 0x1b0   : > { %v829_v6 = vpop.f32.mrf.mxu0 }
 0x1b1   : > { %v833_v7 = vmul.f32 0.25, %v829_v6 }
 0x1b3   : > { %v834_v8 = vadd.f32 %v1461_v58, %v833_v7 }
 0x1b5   : > { %v888_v9 = vpop.f32.mrf.mxu2  ;;  %v835_v10 = vsel %vm774_vm2, %v834_v8, -inf }
 0x1b6   : > { %v892_v11 = vmul.f32 0.25, %v888_v9  ;;  %836 = vmax.xlane.f32.xlu1 %v835_v10  ;;  %v1009_v9 = vld [vmem:[#allocation7 + $0x38] sm:$0xff]  ;;  %v1006_v10 = vld [vmem:[#allocation7 + $0x20] sm:$0xff] }
 0x1b8   : > { %v831_v12 = vpop.f32.mrf.mxu0  ;;  %v893_v13 = vadd.f32 %v1461_v58, %v892_v11 }
 0x1b9   : > { %v1007_v12 = vld [vmem:[#allocation7 + $0x28] sm:$0xff] }
 0x1ba   : > { %v894_v14 = vsel %vm774_vm2, %v893_v13, -inf }
 0x1bb   : > { %895 = vmax.xlane.f32.xlu2 %v894_v14  ;;  %v1004_v14 = vld [vmem:[#allocation7 + $0x10] sm:$0xff] }
 0x1bc   : > { %v777_v15 = vpop.xlane.xlu0 %776 }
 0x1bd   : > { %v778_v16 = vsub.f32 %v773_v61, %v777_v15  ;;  %v890_v17 = vpop.f32.mrf.mxu2  ;;  %v1005_v15 = vld [vmem:[#allocation7 + $0x18] sm:$0xff] }
 0x1be   : > { %v1002_v17 = vld [vmem:[#allocation7] sm:$0xff] }
 0x1bf   : > { %v779_v18 = vmul.f32 1.442695, %v778_v16  ;;  %v1012_v16 = vpack.c.bf16 %v1005_v15, %v1004_v14 }
 0x1c0   : > { %v946_v19 = vpop.f32.mrf.mxu0 }
 0x1c1   : > { %1469 = vpow2.f32 %v779_v18  ;;  %v950_v20 = vmul.f32 0.25, %v946_v19  ;;  %v1003_v18 = vld [vmem:[#allocation7 + $0x8] sm:$0xff] }
 0x1c2   : > { %v1011_v19 = vpack.c.bf16 %v1003_v18, %v1002_v17 }
 0x1c3   : > { %v951_v21 = vadd.f32 %v1461_v58, %v950_v20 }
 0x1c5   : > { %v952_v22 = vsel %vm774_vm2, %v951_v21, -inf }
 0x1c6   : > { %953 = vmax.xlane.f32.xlu2 %v952_v22 }
 0x1c7   : > { %v1470_v24 = vpop.eup %1469 }
 0x1c8   : > { %v948_v25 = vpop.f32.mrf.mxu0  ;;  %v781_v26 = vsel %vm774_vm2, %v1470_v24, 0.0 }
 0x1c9   : > { %782 = vadd.xlane.f32.xlu0 %v781_v26 }
 0x1de   : > { %848 = vrot.lane.b32.xlu2 %v787_v3, %s1643_s29 }
 0x229   : > { %v837_v27 = vpop.xlane.xlu1 %836 }
 0x22a   : > { %v838_v28 = vsub.f32 %v834_v8, %v837_v27  ;;  %v1008_v8 = vld [vmem:[#allocation7 + $0x30] sm:$0xff] }
 0x22b   : > { %v1014_v11 = vpack.c.bf16 %v1009_v9, %v1008_v8 }
 0x22c   : > { %v839_v29 = vmul.f32 1.442695, %v838_v28  ;;  %v1463_v28 = vld [vmem:[%s2071_s9] ss:$0 sm:$0xff] }
 0x22d   : > { %1026 = vmatpush.bf16.msra.mxu2 %v1014_v11 }
 0x22e   : > { %1471 = vpow2.f32 %v839_v29  ;;  %v896_v30 = vpop.xlane.xlu2 %895 }
 0x22f   : > { %v897_v31 = vsub.f32 %v893_v13, %v896_v30  ;;  %v1013_v13 = vpack.c.bf16 %v1007_v12, %v1006_v10  ;;  %v1182_v10 = vld [vmem:[%s2076_s14 + $0xe8] sm:$0xff] }
 0x231   : > { %v898_v32 = vmul.f32 1.442695, %v897_v31  ;;  %1027 = vmatpush.bf16.msra.mxu2 %v1013_v13 }
 0x233   : > { %1473 = vpow2.f32 %v898_v32 }
 0x234   : > { %v1472_v33 = vpop.eup %1471 }
 0x235   : > { %v841_v34 = vsel %vm774_vm2, %v1472_v33, 0.0  ;;  %1028 = vmatpush.bf16.msra.mxu2 %v1012_v16 }
 0x236   : > { %842 = vadd.xlane.f32.xlu1 %v841_v34  ;;  %v1647_v34 = vmov 64.0  }
 0x239   : > { %v1474_v35 = vpop.eup %1473  ;;  %v954_v36 = vpop.xlane.xlu2 %953  ;;  %1029 = vmatpush.bf16.msra.mxu2 %v1011_v19 }
 0x23a   : > { %v955_v37 = vsub.f32 %v951_v21, %v954_v36  ;;  %v900_v38 = vsel %vm774_vm2, %v1474_v35, 0.0 }
 0x23b   : > { %901 = vadd.xlane.f32.xlu0 %v900_v38 }
 0x23c   : > { %v956_v39 = vmul.f32 1.442695, %v955_v37  ;;  %v783_v40 = vpop.xlane.xlu0 %782 }
 0x23d   : > { %1475 = vrcp.f32 %v783_v40 }
 0x23e   : > { %1477 = vpow2.f32 %v956_v39 }
 0x241   : > { %v849_v41 = vpop.permute.xlu2 %848 }
 0x242   : > { %v854_v42 = vsel %vm791_vm3, %v849_v41, 0 }
 0x243   : > { %v1476_v43 = vpop.eup %1475  ;;  %863 = vmatpush.bf16.msra.mxu3 %v854_v42 }
 0x244   : > { %v1478_v44 = vpop.eup %1477  ;;  %v785_v45 = vmul.f32 %v1476_v43, %v1470_v24 }
 0x245   : > { %v958_v46 = vsel %vm774_vm2, %v1478_v44, 0.0 }
 0x246   : > { %959 = vadd.xlane.f32.xlu1 %v958_v46  ;;  %v786_v47 = vpack.c.bf16 %v785_v45, %v785_v45  ;;  %v1087_v45 = vld [vmem:[%s2074_s12 + $0x60] sm:$0xff]  ;;  %v1089_v46 = vld [vmem:[%s2074_s12 + $0x70] sm:$0xff] }
 0x248   : > { %1389 = vmatmul.msk.bf16.vlgmr.msrb.gmra.mxu3 %vm774_vm2, %v786_v47  ;;  %v1088_v47 = vld [vmem:[%s2074_s12 + $0x68] sm:$0xff] }
 0x24f   : > { %906 = vrot.lane.b32.xlu0 %v787_v3, %s1642_s25 }
 0x25f   : > { %964 = vrot.lane.b32.xlu1 %v787_v3, %s1641_s2  ;;  %s2097_s2 = sld [smem:[#allocation17_spill]] }
 0x2a9   : > { %v843_v48 = vpop.xlane.xlu1 %842 }
 0x2aa   : > { %1479 = vrcp.f32 %v843_v48  ;;  %v1098_v48 = vpack.c.bf16 %v1089_v46, %v1087_v45  ;;  %v1161_v46 = vld [vmem:[%s2076_s14 + $0x40] sm:$0xff] }
 0x2ae   : > { %v902_v52 = vpop.xlane.xlu0 %901 }
 0x2af   : > { %1481 = vrcp.f32 %v902_v52  ;;  %v1085_v52 = vld [vmem:[%s2074_s12 + $0x50] sm:$0xff] }
 0x2b0   : > { %v1480_v49 = vpop.eup %1479 }
 0x2b1   : > { %v845_v50 = vmul.f32 %v1480_v49, %v1472_v33  ;;  %v1090_v49 = vld [vmem:[%s2074_s12 + $0x78] sm:$0xff] }
 0x2b3   : > { %v846_v51 = vpack.c.bf16 %v845_v50, %v845_v50  ;;  %v1099_v50 = vpack.c.bf16 %v1090_v49, %v1088_v47  ;;  %v1162_v47 = vld [vmem:[%s2076_s14 + $0x48] sm:$0xff]  ;;  %v1173_v49 = vld [vmem:[%s2076_s14 + $0xa0] sm:$0xff] }
 0x2b5   : > { %1391 = vmatmul.msk.bf16.vlgmr.msra.gmra.mxu3 %vm774_vm2, %v846_v51  ;;  %v1482_v53 = vpop.eup %1481  ;;  %1126 = vmatpush.bf16.msrb.mxu0 %v1099_v50  ;;  %v1083_v51 = vld [vmem:[%s2074_s12 + $0x40] sm:$0xff]  ;;  %v1174_v50 = vld [vmem:[%s2076_s14 + $0xa8] sm:$0xff] }
 0x2b6   : > { %v904_v54 = vmul.f32 %v1482_v53, %v1474_v35  ;;  %v1084_v53 = vld [vmem:[%s2074_s12 + $0x48] sm:$0xff] }
 0x2b8   : > { %v905_v57 = vpack.c.bf16 %v904_v54, %v904_v54  ;;  %v1096_v54 = vpack.c.bf16 %v1085_v52, %v1083_v51  ;;  %v1197_v51 = vpack.c.bf16 %v1174_v50, %v1173_v49  ;;  %v1159_v52 = vld [vmem:[%s2076_s14 + $0x30] sm:$0xff] }
 0x2b9   : > { %v960_v58 = vpop.xlane.xlu1 %959 }
 0x2ba   : > { %1483 = vrcp.f32 %v960_v58  ;;  %v1081_v58 = vld [vmem:[%s2074_s12 + $0x30] sm:$0xff] }
 0x2bb   : > { %1485 = vrcp.f32 %v1647_v34  ;;  %v1165_v34 = vld [vmem:[%s2076_s14 + $0x60] sm:$0xff] }
 0x2c0   : > { %v1484_v60 = vpop.eup %1483 }
 0x2c1   : > { %v907_v55 = vpop.permute.xlu0 %906  ;;  %v962_v61 = vmul.f32 %v1484_v60, %v1478_v44  ;;  %v1486_v35 = vpop.eup %1485 }
 0x2c2   : > { %v912_v56 = vsel %vm791_vm3, %v907_v55, 0  ;;  %v1042_v36 = vmul.f32 64.0, %v1486_v35  ;;  %vm1046_vm6 = vweird.f32 %v1486_v35  ;;  %v1086_v55 = vld [vmem:[%s2074_s12 + $0x58] sm:$0xff] }
 0x2c3   : > { %921 = vmatpush.bf16.msrb.mxu3 %v912_v56  ;;  %v963_v1 = vpack.c.bf16 %v962_v61, %v962_v61  ;;  %v1097_v56 = vpack.c.bf16 %v1086_v55, %v1084_v53  ;;  %v1082_v61 = vld [vmem:[%s2074_s12 + $0x38] sm:$0xff] }
 0x2c4   : > { %v1043_v37 = vsub.f32 1.0, %v1042_v36  ;;  %v1160_v53 = vld [vmem:[%s2076_s14 + $0x38] sm:$0xff] }
 0x2c5   : > { %1127 = vmatpush.bf16.msrb.mxu0 %v1097_v56  ;;  %v1190_v55 = vpack.c.bf16 %v1160_v53, %v1159_v52  ;;  %v1172_v56 = vld [vmem:[%s2076_s14 + $0x98] sm:$0xff] }
 0x2c6   : > { %1393 = vmatmul.msk.bf16.vlgmr.msrb.gmra.mxu3 %vm774_vm2, %v905_v57  ;;  %v1044_v38 = vmul.f32 %v1486_v35, %v1043_v37  ;;  %v1079_v57 = vld [vmem:[%s2074_s12 + $0x20] sm:$0xff] }
 0x2c7   : > { %1113 = vmatpush.bf16.msra.mxu3 %v1098_v48  ;;  %v1094_v60 = vpack.c.bf16 %v1081_v58, %v1079_v57  ;;  %v1177_v37 = vld [vmem:[%s2076_s14 + $0xc0] sm:$0xff]  ;;  %v1191_v48 = vpack.c.bf16 %v1162_v47, %v1161_v46  ;;  %v1158_v58 = vld [vmem:[%s2076_s14 + $0x28] sm:$0xff] }
 0x2c8   : > { %v1045_v39 = vadd.f32 %v1486_v35, %v1044_v38  ;;  %v1178_v38 = vld [vmem:[%s2076_s14 + $0xc8] sm:$0xff]  ;;  %v1157_v57 = vld [vmem:[%s2076_s14 + $0x20] sm:$0xff] }
 0x2ca   : > { %v1875_v40 = vsel %vm1046_vm6, %v1486_v35, %v1045_v39  ;;  %v1166_v35 = vld [vmem:[%s2076_s14 + $0x68] sm:$0xff]  ;;  %v1199_v39 = vpack.c.bf16 %v1178_v38, %v1177_v37  ;;  %v1466_v37 = vld [vmem:[%s2077_s15] ss:$0 sm:$0xff] }
 0x2cb   : > { %v804_v59 = vpop.f32.mrf.mxu3  ;;  %1114 = vmatpush.bf16.msra.mxu3 %v1096_v54  ;;  %v1193_v36 = vpack.c.bf16 %v1166_v35, %v1165_v34  ;;  %v1171_v54 = vld [vmem:[%s2076_s14 + $0x90] sm:$0xff] }
 0x2cf   : > { %1115 = vmatpush.bf16.msra.mxu3 %v1094_v60  ;;  %v1169_v60 = vld [vmem:[%s2076_s14 + $0x80] sm:$0xff] }
 0x2d1   : > { %v965_v62 = vpop.permute.xlu1 %964 }
 0x2d2   : > { %v970_v63 = vsel %vm791_vm3, %v965_v62, 0 }
 0x2d3   : > { %v806_v0 = vpop.f32.mrf.mxu3  ;;  %979 = vmatpush.bf16.msrb.mxu1 %v970_v63  ;;  %v1075_v63 = vld [vmem:[%s2074_s12] sm:$0xff] }
 0x2d4   : > { %v1077_v0 = vld [vmem:[%s2074_s12 + $0x10] sm:$0xff] }
 0x2d6   : > { %1395 = vmatmul.msk.bf16.vlgmr.msrb.gmra.mxu1 %vm774_vm2, %v963_v1  ;;  %v1076_v1 = vld [vmem:[%s2074_s12 + $0x8] sm:$0xff] }
 0x338   : > { %v865_v2 = vpop.f32.mrf.mxu3 }
 0x339   : > { %986 = vrot.lane.b32.xlu2 %v865_v2, %s1644_s19  ;;  %v1092_v2 = vpack.c.bf16 %v1077_v0, %v1075_v63  ;;  %v1155_v63 = vld [vmem:[%s2076_s14 + $0x10] sm:$0xff]  ;;  %v1156_v0 = vld [vmem:[%s2076_s14 + $0x18] sm:$0xff] }
 0x33b   : > { %1116 = vmatpush.bf16.msra.mxu3 %v1092_v2  ;;  %v1188_v2 = vpack.c.bf16 %v1156_v0, %v1155_v63 }
 0x340   : > { %v867_v3 = vpop.f32.mrf.mxu3 }
 0x341   : > { %v1078_v3 = vld [vmem:[%s2074_s12 + $0x18] sm:$0xff] }
 0x349   : > { %v923_v4 = vpop.f32.mrf.mxu3 }
 0x34a   : > { %990 = vrot.lane.b32.xlu0 %v923_v4, %s1645_s23  ;;  %v1093_v4 = vpack.c.bf16 %v1078_v3, %v1076_v1  ;;  %v1100_v3 = vld [vmem:[%s2075_s13] sm:$0x3] }
 0x351   : > { %v925_v5 = vpop.f32.mrf.mxu3 }
 0x352   : > { %v1183_v5 = vld [vmem:[%s2076_s14 + $0xf0] sm:$0xff] }
 0x353   : > { %v981_v6 = vpop.f32.mrf.mxu1 }
 0x354   : > { %994 = vrot.lane.b32.xlu2 %v981_v6, %s1646_s24  ;;  %v1184_v6 = vld [vmem:[%s2076_s14 + $0xf8] sm:$0xff] }
 0x355   : > { %v1202_v9 = vpack.c.bf16 %v1184_v6, %v1183_v5  ;;  %v1154_v5 = vld [vmem:[%s2076_s14 + $0x8] sm:$0xff] }
 0x357   : > { %1220 = vmatpush.bf16.msrb.mxu2 %v1202_v9 }
 0x35b   : > { %v983_v7 = vpop.f32.mrf.mxu1 }
 0x35c   : > { %v1181_v7 = vld [vmem:[%s2076_s14 + $0xe0] sm:$0xff] }
 0x35d   : > { %v1201_v12 = vpack.c.bf16 %v1182_v10, %v1181_v7  ;;  %v1103_v7 = vperm.slane %v1100_v3, 1 }
 0x35f   : > { %1221 = vmatpush.bf16.msrb.mxu2 %v1201_v12 }
 0x393   : > { %v987_v20 = vpop.permute.xlu2 %986 }
 0x394   : > { %v997_v21 = vsel %vm749_vm1, %v804_v59, %v987_v20  ;;  %v1080_v59 = vld [vmem:[%s2074_s12 + $0x28] sm:$0xff]  ;;  %v1464_v20 = vld [vmem:[%s2072_s10] ss:$0 sm:$0xff] }
 0x395   : > { %v1095_v62 = vpack.c.bf16 %v1082_v61, %v1080_v59  ;;  %v1196_v59 = vpack.c.bf16 %v1172_v56, %v1171_v54  ;;  %v1170_v61 = vld [vmem:[%s2076_s14 + $0x88] sm:$0xff] }
 0x396   : > { %v1195_v1 = vpack.c.bf16 %v1170_v61, %v1169_v60 }
 0x397   : > { %1128 = vmatpush.bf16.msrb.mxu0 %v1095_v62  ;;  %v1189_v62 = vpack.c.bf16 %v1158_v58, %v1157_v57 }
 0x39b   : > { %1129 = vmatpush.bf16.msrb.mxu0 %v1093_v4  ;;  %v1153_v4 = vld [vmem:[%s2076_s14] sm:$0xff] }
 0x39c   : > { %v1187_v6 = vpack.c.bf16 %v1154_v5, %v1153_v4 }
 0x3ae   : > { %v995_v24 = vpop.permute.xlu2 %994 }
 0x3bc   : > { %v991_v22 = vpop.permute.xlu0 %990 }
 0x3bd   : > { %v999_v25 = vsel %vm998_vm4, %v997_v21, %v991_v22  ;;  %v1465_v22 = vld [vmem:[%s2073_s11] ss:$0 sm:$0xff] }
 0x3be   : > { %v1001_v26 = vsel %vm1000_vm5, %v999_v25, %v995_v24 }
 0x3bf   : > { %v1010_v27 = vpack.c.bf16 %v1001_v26, %v1001_v26 }
 0x3c1   : > { %1396 = vmatmul.msk.bf16.vlgmr.msra.gmra.mxu2 %vm672_vm0, %v1010_v27 }
 0x444   : > { %v1031_v29 = vpop.f32.mrf.mxu2 }
 0x445   : > { %v1032_v30 = vadd.f32 %v1463_v28, %v1031_v29  ;;  %v1167_v28 = vld [vmem:[%s2076_s14 + $0x70] sm:$0xff]  ;;  %v1168_v29 = vld [vmem:[%s2076_s14 + $0x78] sm:$0xff] }
 0x447   : > { %v1035_v31 = vadd.f32 %v1032_v30, %v1814_v23  ;;  %v1194_v30 = vpack.c.bf16 %v1168_v29, %v1167_v28 }
 0x449   : > { %v1038_v32 = vsel %vm672_vm0, %v1035_v31, 0.0  ;;  %1207 = vmatpush.bf16.msra.mxu1 %v1194_v30 }
 0x44a   : > { %1039 = vadd.xlane.f32.xlu1 %v1038_v32  ;;  %v1180_v32 = vld [vmem:[%s2076_s14 + $0xd8] sm:$0xff] }
 0x44c   : > { %v1033_v33 = vpop.f32.mrf.mxu2 }
 0x44d   : > { %1208 = vmatpush.bf16.msra.mxu1 %v1193_v36 }
 0x4bd   : > { %v1040_v41 = vpop.xlane.xlu1 %1039 }
 0x4be   : > { %v1048_v42 = vmul.f32 %v1875_v40, %v1040_v41  ;;  %v1163_v41 = vld [vmem:[%s2076_s14 + $0x50] sm:$0xff] }
 0x4c0   : > { %v1049_v43 = vsub.f32 %v1035_v31, %v1048_v42  ;;  %v1179_v31 = vld [vmem:[%s2076_s14 + $0xd0] sm:$0xff]  ;;  %v1164_v42 = vld [vmem:[%s2076_s14 + $0x58] sm:$0xff] }
 0x4c1   : > { %v1200_v33 = vpack.c.bf16 %v1180_v32, %v1179_v31 }
 0x4c2   : > { %v1050_v44 = vmul.f32 %v1049_v43, %v1049_v43 }
 0x4c3   : > { %1222 = vmatpush.bf16.msrb.mxu2 %v1200_v33 }
 0x4c4   : > { %v1051_v23 = vsel %vm672_vm0, %v1050_v44, 0.0  ;;  %v1175_v44 = vld [vmem:[%s2076_s14 + $0xb0] sm:$0xff] }
 0x4c5   : > { %1052 = vadd.xlane.f32.xlu0 %v1051_v23  ;;  %v1176_v23 = vld [vmem:[%s2076_s14 + $0xb8] sm:$0xff] }
 0x4c6   : > { %v1198_v45 = vpack.c.bf16 %v1176_v23, %v1175_v44 }
 0x4c7   : > { %1223 = vmatpush.bf16.msrb.mxu2 %v1199_v39 }
 0x4cb   : > { %1224 = vmatpush.bf16.msrb.mxu2 %v1198_v45 }
 0x4cf   : > { %1225 = vmatpush.bf16.msrb.mxu2 %v1197_v51 }
 0x4d3   : > { %1226 = vmatpush.bf16.msrb.mxu2 %v1196_v59  ;;  %v1467_v59 = vld [vmem:[%s2078_s16] ss:$0 sm:$0xff] }
 0x4d7   : > { %1227 = vmatpush.bf16.msrb.mxu2 %v1195_v1 }
 0x538   : > { %v1053_v8 = vpop.xlane.xlu0 %1052 }
 0x539   : > { %v1054_v11 = vmul.f32 %v1053_v8, %v1875_v40 }
 0x53b   : > { %v1055_v13 = vadd.f32 1e-12, %v1054_v11  ;;  %v1102_v11 = vperm.slane %v1100_v3, 0 }
 0x53d   : > { %1487 = vrsqrt.f32 %v1055_v13  ;;  %vm1062_vm8 = vweird.f32 %v1055_v13 }
 0x543   : > { %v1488_v14 = vpop.eup %1487 }
 0x544   : > { %v1057_v15 = vmul.f32 %v1488_v14, %v1055_v13  ;;  %vm1063_vm7 = vweird.f32 %v1488_v14 }
 0x545   : > { %vm1064_vm9 = vmor %vm1062_vm8, %vm1063_vm7 }
 0x546   : > { %v1058_v16 = vmul.f32 %v1488_v14, %v1057_v15 }
 0x548   : > { %v1059_v17 = vmul.f32 0.5, %v1058_v16 }
 0x54a   : > { %v1060_v18 = vsub.f32 1.5, %v1059_v17 }
 0x54c   : > { %v1061_v19 = vmul.f32 %v1488_v14, %v1060_v18 }
 0x54e   : > { %v1065_v21 = vsel %vm1064_vm9, %v1488_v14, %v1061_v19 }
 0x54f   : > { %v1066_v24 = vmul.f32 %v1065_v21, %v1049_v43  ;;  %v1192_v43 = vpack.c.bf16 %v1164_v42, %v1163_v41 }
 0x551   : > { %v1070_v25 = vmul.f32 %v1464_v20, %v1066_v24  ;;  %1209 = vmatpush.bf16.msra.mxu1 %v1192_v43 }
 0x553   : > { %v1946_v26 = vadd.f32 %v1465_v22, %v1070_v25 }
 0x555   : > { %v1091_v27 = vpack.c.bf16 %v1946_v26, %v1946_v26  ;;  %1210 = vmatpush.bf16.msra.mxu1 %v1191_v48 }
 0x557   : > { %1397 = vmatmul.msk.bf16.vlgmr.msra.gmra.mxu3 %vm672_vm0, %v1091_v27  ;;  %1398 = vmatmul.msk.bf16.vlgmr.msrb.gmra.mxu0 %vm672_vm0, %v1091_v27 }
 0x559   : > { %1211 = vmatpush.bf16.msra.mxu1 %v1190_v55 }
 0x55d   : > { %1212 = vmatpush.bf16.msra.mxu1 %v1189_v62 }
 0x561   : > { %1213 = vmatpush.bf16.msra.mxu1 %v1188_v2 }
 0x565   : > { %1214 = vmatpush.bf16.msra.mxu1 %v1187_v6 }
 0x5d4   : > { %v1131_v8 = vpop.f32.mrf.mxu0 }
 0x5d5   : > { %v1132_v9 = vadd.f32 %v1131_v8, %v1103_v7 }
 0x5d7   : > { %v1138_v10 = vmul.f32 0.044715, %v1132_v9  ;;  %v1136_v28 = vmul.f32 0.5, %v1132_v9 }
 0x5d9   : > { %v1140_v12 = vmul.f32 %v1138_v10, %v1132_v9 }
 0x5da   : > { %v1118_v13 = vpop.f32.mrf.mxu3 }
 0x5db   : > { %v1142_v14 = vmul.f32 %v1140_v12, %v1132_v9  ;;  %v1119_v15 = vadd.f32 %v1118_v13, %v1102_v11 }
 0x5dc   : > { %v1133_v16 = vpop.f32.mrf.mxu0 }
 0x5dd   : > { %v1137_v17 = vmul.f32 0.044715, %v1119_v15  ;;  %v1144_v18 = vadd.f32 %v1142_v14, %v1132_v9  ;;  %v1135_v33 = vmul.f32 0.5, %v1119_v15 }
 0x5df   : > { %v1139_v19 = vmul.f32 %v1137_v17, %v1119_v15  ;;  %v1146_v20 = vmul.f32 0.7978846, %v1144_v18 }
 0x5e1   : > { %v1141_v21 = vmul.f32 %v1139_v19, %v1119_v15  ;;  %1489 = vtanh.f32 %v1146_v20 }
 0x5e2   : > { %v1120_v22 = vpop.f32.mrf.mxu3 }
 0x5e3   : > { %v1143_v24 = vadd.f32 %v1141_v21, %v1119_v15 }
 0x5e5   : > { %v1145_v25 = vmul.f32 0.7978846, %v1143_v24 }
 0x5e7   : > { %v1490_v27 = vpop.eup %1489  ;;  %1491 = vtanh.f32 %v1145_v25 }
 0x5e8   : > { %v1150_v29 = vadd.f32 1.0, %v1490_v27 }
 0x5ea   : > { %v1152_v30 = vmul.f32 %v1150_v29, %v1136_v28 }
 0x5ec   : > { %v1186_v31 = vpack.c.bf16 %v1152_v30, %v1152_v30 }
 0x5ed   : > { %v1492_v32 = vpop.eup %1491 }
 0x5ee   : > { %1228 = vmatmul.bf16.vlgmr.msrb.gmra.mxu2 %v1186_v31  ;;  %v1149_v34 = vadd.f32 1.0, %v1492_v32 }
 0x5f0   : > { %v1151_v35 = vmul.f32 %v1149_v34, %v1135_v33 }
 0x5f2   : > { %v1185_v36 = vpack.c.bf16 %v1151_v35, %v1151_v35 }
 0x5f4   : > { %1215 = vmatmul.bf16.vlgmr.msra.gmra.mxu1 %v1185_v36 }
 0x671   : > { %v1216_v38 = vpop.f32.mrf.mxu1  ;;  %v1229_v39 = vpop.f32.mrf.mxu2 }
 0x672   : > { %v1217_v41 = vadd.f32 %v1466_v37, %v1216_v38 }
 0x674   : > { %v1230_v42 = vadd.f32 %v1229_v39, %v1217_v41 }
 0x676   : > { %v1233_v43 = vadd.f32 %v1230_v42, %v1946_v26 }
 0x678   : > { %v1236_v44 = vsel %vm672_vm0, %v1233_v43, 0.0 }
 0x679   : > { %v1218_v23 = vpop.f32.mrf.mxu1  ;;  %v1231_v45 = vpop.f32.mrf.mxu2  ;;  %1237 = vadd.xlane.f32.xlu2 %v1236_v44 }
 0x6ec   : > { %v1238_v46 = vpop.xlane.xlu2 %1237 }
 0x6ed   : > { %v1239_v47 = vmul.f32 %v1238_v46, %v1875_v40 }
 0x6ef   : > { %v1240_v48 = vsub.f32 %v1233_v43, %v1239_v47 }
 0x6f1   : > { %v1241_v49 = vmul.f32 %v1240_v48, %v1240_v48 }
 0x6f3   : > { %v1242_v50 = vsel %vm672_vm0, %v1241_v49, 0.0 }
 0x6f4   : > { %1243 = vadd.xlane.f32.xlu1 %v1242_v50 }
 0x767   : > { %v1244_v51 = vpop.xlane.xlu1 %1243 }
 0x768   : > { %v1245_v52 = vmul.f32 %v1244_v51, %v1875_v40  ;;  %v1468_v40 = vld [vmem:[%s2097_s2] ss:$0 sm:$0xff] }
 0x76a   : > { %v1246_v53 = vadd.f32 1e-12, %v1245_v52 }
 0x76c   : > { %1493 = vrsqrt.f32 %v1246_v53  ;;  %vm1253_vm11 = vweird.f32 %v1246_v53 }
 0x772   : > { %v1494_v26 = vpop.eup %1493 }
 0x773   : > { %v1248_v54 = vmul.f32 %v1494_v26, %v1246_v53  ;;  %vm1254_vm10 = vweird.f32 %v1494_v26 }
 0x774   : > { %vm1255_vm12 = vmor %vm1253_vm11, %vm1254_vm10 }
 0x775   : > { %v1249_v55 = vmul.f32 %v1494_v26, %v1248_v54 }
 0x777   : > { %v1250_v56 = vmul.f32 0.5, %v1249_v55 }
 0x779   : > { %v1251_v57 = vsub.f32 1.5, %v1250_v56 }
 0x77b   : > { %v1252_v58 = vmul.f32 %v1494_v26, %v1251_v57 }
 0x77d   : > { %v1256_v60 = vsel %vm1255_vm12, %v1494_v26, %v1252_v58 }
 0x77e   : > { %v1257_v61 = vmul.f32 %v1256_v60, %v1240_v48 }
 0x780   : > { %v1261_v62 = vmul.f32 %v1467_v59, %v1257_v61 }
 0x782   : > { %v1265_v63 = vadd.f32 %v1468_v40, %v1261_v62 }
 0x784   : > { %1266 = vst.msk [vmem:[%s651_s18] sm:$0xff] %vm672_vm0, %v1265_v63 }
 0x785 PF: > { %s2099_s27 = sld [smem:[#allocation12_spill]] }
 0x78b   : > { %s31_s27 = sadd.s32 1, %s2099_s27  }
 0x78c   : > { %p28_p7 = scmp.ge.s32.totalorder %s31_s27, 4  }
 0x78e   :  { %30 = sbr.rel (!%p28_p7) target bundleno = 10 (0xa), region = 142 }
 0x793   :  { %1286 = vsyncpa [#allocation3], 1 }
 0x794   :  { %1288 = vsyncpa [#allocation3 + $0x1], 1 }
 0x795   :  { %1289 = vsyncpa [#allocation5], 1 }
 0x796   :  { %1290 = vsyncpa [#allocation8], 1 }

// kernel: _lambda_.10
= control target key start
LH: loop header
LB: loop body
LE: loop exit
PB: predicated region body
PF: predicated region fallthrough
CT: control target
= control target key end

     0   :  { %vm264_vm0 = vcmask 523264   ;;  %s625_s1 = inlined_call_operand.vmem [shape: f32[768,64], index: 1, kind: input, shape index: {}]   ;;  %s626_s0 = inlined_call_operand.vmem [shape: f32[16,768], index: 0, kind: input, shape index: {}]   ;;  %s627_s2 = inlined_call_operand.vmem [shape: f32[1,64], index: 2, kind: input, shape index: {}]   ;;  %s628_s3 = inlined_call_operand.vmem [shape: f32[16,64], index: 3, kind: output, shape index: {}]  }
   0x1   :  { %v40_v0 = vld [vmem:[%s625_s1 + $0x70] sm:$0xff]  ;;  %v41_v1 = vld [vmem:[%s625_s1 + $0x78] sm:$0xff]  ;;  %v38_v9 = vld [vmem:[%s625_s1 + $0x60] sm:$0xff] }
   0x2   :  { %v56_v2 = vld [vmem:[%s625_s1 + $0xf0] sm:$0xff]  ;;  %v135_v3 = vpack.c.bf16 %v41_v1, %v40_v0  ;;  %v57_v4 = vld [vmem:[%s625_s1 + $0xf8] sm:$0xff]  ;;  %v39_v10 = vld [vmem:[%s625_s1 + $0x68] sm:$0xff] }
   0x3   :  { %v72_v5 = vld [vmem:[%s625_s1 + $0x170] sm:$0xff]  ;;  %v73_v6 = vld [vmem:[%s625_s1 + $0x178] sm:$0xff]  ;;  %v143_v7 = vpack.c.bf16 %v57_v4, %v56_v2  ;;  %v54_v11 = vld [vmem:[%s625_s1 + $0xe0] sm:$0xff]  ;;  %v134_v12 = vpack.c.bf16 %v39_v10, %v38_v9 }
   0x4   :  { %v151_v8 = vpack.c.bf16 %v73_v6, %v72_v5  ;;  %180 = vmatpush.bf16.msra.mxu0 %v135_v3  ;;  %v55_v13 = vld [vmem:[%s625_s1 + $0xe8] sm:$0xff]  ;;  %v88_v14 = vld [vmem:[%s625_s1 + $0x1f0] sm:$0xff]  ;;  %v89_v15 = vld [vmem:[%s625_s1 + $0x1f8] sm:$0xff] }
   0x5   :  { %194 = vmatpush.bf16.msra.mxu1 %v143_v7  ;;  %v142_v16 = vpack.c.bf16 %v55_v13, %v54_v11  ;;  %v159_v17 = vpack.c.bf16 %v89_v15, %v88_v14  ;;  %v70_v18 = vld [vmem:[%s625_s1 + $0x160] sm:$0xff]  ;;  %v71_v19 = vld [vmem:[%s625_s1 + $0x168] sm:$0xff]  ;;  %v36_v20 = vld [vmem:[%s625_s1 + $0x50] sm:$0xff] }
   0x6   :  { %208 = vmatpush.bf16.msra.mxu2 %v151_v8  ;;  %v150_v21 = vpack.c.bf16 %v71_v19, %v70_v18  ;;  %v37_v22 = vld [vmem:[%s625_s1 + $0x58] sm:$0xff]  ;;  %v52_v23 = vld [vmem:[%s625_s1 + $0xd0] sm:$0xff]  ;;  %v86_v25 = vld [vmem:[%s625_s1 + $0x1e0] sm:$0xff] }
   0x7   :  { %v53_v24 = vld [vmem:[%s625_s1 + $0xd8] sm:$0xff]  ;;  %222 = vmatpush.bf16.msra.mxu3 %v159_v17  ;;  %v87_v26 = vld [vmem:[%s625_s1 + $0x1e8] sm:$0xff]  ;;  %v68_v27 = vld [vmem:[%s625_s1 + $0x150] sm:$0xff]  ;;  %v133_v28 = vpack.c.bf16 %v37_v22, %v36_v20 }
   0x8   :  { %181 = vmatpush.bf16.msra.mxu0 %v134_v12  ;;  %v158_v29 = vpack.c.bf16 %v87_v26, %v86_v25  ;;  %v69_v30 = vld [vmem:[%s625_s1 + $0x158] sm:$0xff]  ;;  %v34_v31 = vld [vmem:[%s625_s1 + $0x40] sm:$0xff]  ;;  %v35_v32 = vld [vmem:[%s625_s1 + $0x48] sm:$0xff]  ;;  %v141_v33 = vpack.c.bf16 %v53_v24, %v52_v23 }
   0x9   :  { %195 = vmatpush.bf16.msra.mxu1 %v142_v16  ;;  %v149_v34 = vpack.c.bf16 %v69_v30, %v68_v27  ;;  %v50_v35 = vld [vmem:[%s625_s1 + $0xc0] sm:$0xff]  ;;  %v51_v36 = vld [vmem:[%s625_s1 + $0xc8] sm:$0xff]  ;;  %v84_v37 = vld [vmem:[%s625_s1 + $0x1d0] sm:$0xff]  ;;  %v132_v42 = vpack.c.bf16 %v35_v32, %v34_v31 }
   0xa   :  { %209 = vmatpush.bf16.msra.mxu2 %v150_v21  ;;  %v85_v38 = vld [vmem:[%s625_s1 + $0x1d8] sm:$0xff]  ;;  %v66_v39 = vld [vmem:[%s625_s1 + $0x140] sm:$0xff]  ;;  %v67_v40 = vld [vmem:[%s625_s1 + $0x148] sm:$0xff]  ;;  %v140_v45 = vpack.c.bf16 %v51_v36, %v50_v35 }
   0xb   :  { %223 = vmatpush.bf16.msra.mxu3 %v158_v29  ;;  %v157_v41 = vpack.c.bf16 %v85_v38, %v84_v37  ;;  %v82_v43 = vld [vmem:[%s625_s1 + $0x1c0] sm:$0xff]  ;;  %v83_v44 = vld [vmem:[%s625_s1 + $0x1c8] sm:$0xff]  ;;  %v148_v46 = vpack.c.bf16 %v67_v40, %v66_v39  ;;  %v32_v47 = vld [vmem:[%s625_s1 + $0x30] sm:$0xff] }
   0xc   :  { %182 = vmatpush.bf16.msra.mxu0 %v133_v28  ;;  %v33_v48 = vld [vmem:[%s625_s1 + $0x38] sm:$0xff]  ;;  %v48_v49 = vld [vmem:[%s625_s1 + $0xb0] sm:$0xff]  ;;  %v156_v53 = vpack.c.bf16 %v83_v44, %v82_v43  ;;  %v30_v59 = vld [vmem:[%s625_s1 + $0x20] sm:$0xff] }
   0xd   :  { %196 = vmatpush.bf16.msra.mxu1 %v141_v33  ;;  %v49_v50 = vld [vmem:[%s625_s1 + $0xb8] sm:$0xff]  ;;  %v64_v51 = vld [vmem:[%s625_s1 + $0x130] sm:$0xff]  ;;  %v131_v54 = vpack.c.bf16 %v33_v48, %v32_v47  ;;  %v31_v60 = vld [vmem:[%s625_s1 + $0x28] sm:$0xff] }
   0xe   :  { %210 = vmatpush.bf16.msra.mxu2 %v149_v34  ;;  %v65_v52 = vld [vmem:[%s625_s1 + $0x138] sm:$0xff]  ;;  %v80_v55 = vld [vmem:[%s625_s1 + $0x1b0] sm:$0xff]  ;;  %v139_v57 = vpack.c.bf16 %v49_v50, %v48_v49  ;;  %v46_v61 = vld [vmem:[%s625_s1 + $0xa0] sm:$0xff]  ;;  %v130_v2 = vpack.c.bf16 %v31_v60, %v30_v59 }
   0xf   :  { %224 = vmatpush.bf16.msra.mxu3 %v157_v41  ;;  %v81_v56 = vld [vmem:[%s625_s1 + $0x1b8] sm:$0xff]  ;;  %v147_v58 = vpack.c.bf16 %v65_v52, %v64_v51  ;;  %v47_v62 = vld [vmem:[%s625_s1 + $0xa8] sm:$0xff]  ;;  %v62_v63 = vld [vmem:[%s625_s1 + $0x120] sm:$0xff] }
  0x10   :  { %183 = vmatpush.bf16.msra.mxu0 %v132_v42  ;;  %v63_v0 = vld [vmem:[%s625_s1 + $0x128] sm:$0xff]  ;;  %v155_v1 = vpack.c.bf16 %v81_v56, %v80_v55  ;;  %v78_v3 = vld [vmem:[%s625_s1 + $0x1a0] sm:$0xff]  ;;  %v138_v5 = vpack.c.bf16 %v47_v62, %v46_v61  ;;  %v28_v7 = vld [vmem:[%s625_s1 + $0x10] sm:$0xff] }
  0x11   :  { %197 = vmatpush.bf16.msra.mxu1 %v140_v45  ;;  %v79_v4 = vld [vmem:[%s625_s1 + $0x1a8] sm:$0xff]  ;;  %v146_v6 = vpack.c.bf16 %v63_v0, %v62_v63  ;;  %v29_v8 = vld [vmem:[%s625_s1 + $0x18] sm:$0xff]  ;;  %v44_v9 = vld [vmem:[%s625_s1 + $0x90] sm:$0xff] }
  0x12   :  { %211 = vmatpush.bf16.msra.mxu2 %v148_v46  ;;  %v45_v10 = vld [vmem:[%s625_s1 + $0x98] sm:$0xff]  ;;  %v60_v11 = vld [vmem:[%s625_s1 + $0x110] sm:$0xff]  ;;  %v154_v13 = vpack.c.bf16 %v79_v4, %v78_v3  ;;  %v26_v14 = vld [vmem:[%s625_s1] sm:$0xff]  ;;  %v129_v16 = vpack.c.bf16 %v29_v8, %v28_v7 }
  0x13   :  { %225 = vmatpush.bf16.msra.mxu3 %v156_v53  ;;  %v61_v12 = vld [vmem:[%s625_s1 + $0x118] sm:$0xff]  ;;  %v27_v15 = vld [vmem:[%s625_s1 + $0x8] sm:$0xff]  ;;  %v42_v17 = vld [vmem:[%s625_s1 + $0x80] sm:$0xff]  ;;  %v137_v20 = vpack.c.bf16 %v45_v10, %v44_v9 }
  0x14   :  { %184 = vmatpush.bf16.msra.mxu0 %v131_v54  ;;  %v76_v18 = vld [vmem:[%s625_s1 + $0x190] sm:$0xff]  ;;  %v77_v19 = vld [vmem:[%s625_s1 + $0x198] sm:$0xff]  ;;  %v145_v21 = vpack.c.bf16 %v61_v12, %v60_v11  ;;  %v43_v22 = vld [vmem:[%s625_s1 + $0x88] sm:$0xff]  ;;  %v128_v32 = vpack.c.bf16 %v27_v15, %v26_v14 }
  0x15   :  { %198 = vmatpush.bf16.msra.mxu1 %v139_v57  ;;  %v104_v23 = vld [vmem:[%s625_s1 + $0x270] sm:$0xff]  ;;  %v105_v24 = vld [vmem:[%s625_s1 + $0x278] sm:$0xff]  ;;  %v58_v27 = vld [vmem:[%s625_s1 + $0x100] sm:$0xff]  ;;  %v153_v28 = vpack.c.bf16 %v77_v19, %v76_v18  ;;  %v136_v36 = vpack.c.bf16 %v43_v22, %v42_v17 }
  0x16   :  { %212 = vmatpush.bf16.msra.mxu2 %v147_v58  ;;  %v120_v25 = vld [vmem:[%s625_s1 + $0x2f0] sm:$0xff]  ;;  %v121_v26 = vld [vmem:[%s625_s1 + $0x2f8] sm:$0xff]  ;;  %v59_v29 = vld [vmem:[%s625_s1 + $0x108] sm:$0xff]  ;;  %v167_v37 = vpack.c.bf16 %v105_v24, %v104_v23 }
  0x17   :  { %226 = vmatpush.bf16.msra.mxu3 %v155_v1  ;;  %v74_v30 = vld [vmem:[%s625_s1 + $0x180] sm:$0xff]  ;;  %v75_v31 = vld [vmem:[%s625_s1 + $0x188] sm:$0xff]  ;;  %v20_v35 = vld [vmem:[%s626_s0 + $0x30] sm:$0xff]  ;;  %v175_v41 = vpack.c.bf16 %v121_v26, %v120_v25  ;;  %v144_v42 = vpack.c.bf16 %v59_v29, %v58_v27 }
  0x18   :  { %185 = vmatpush.bf16.msra.mxu0 %v130_v2  ;;  %v102_v33 = vld [vmem:[%s625_s1 + $0x260] sm:$0xff]  ;;  %v103_v38 = vld [vmem:[%s625_s1 + $0x268] sm:$0xff]  ;;  %v21_v40 = vld [vmem:[%s626_s0 + $0x38] sm:$0xff]  ;;  %v152_v46 = vpack.c.bf16 %v75_v31, %v74_v30 }
  0x19   :  { %199 = vmatpush.bf16.msra.mxu1 %v138_v5  ;;  %v14_v34 = vld [vmem:[%s626_s0] sm:$0xff]  ;;  %v15_v39 = vld [vmem:[%s626_s0 + $0x8] sm:$0xff]  ;;  %v16_v44 = vld [vmem:[%s626_s0 + $0x10] sm:$0xff]  ;;  %v166_v52 = vpack.c.bf16 %v103_v38, %v102_v33 }
  0x1a   :  { %213 = vmatpush.bf16.msra.mxu2 %v146_v6  ;;  %v118_v43 = vld [vmem:[%s625_s1 + $0x2e0] sm:$0xff]  ;;  %v119_v47 = vld [vmem:[%s625_s1 + $0x2e8] sm:$0xff]  ;;  %v122_v48 = vpack.c.bf16 %v20_v35, %v14_v34  ;;  %v17_v49 = vld [vmem:[%s626_s0 + $0x18] sm:$0xff]  ;;  %v123_v51 = vpack.c.bf16 %v21_v40, %v15_v39 }
  0x1b   :  { %227 = vmatpush.bf16.msra.mxu3 %v154_v13  ;;  %v22_v45 = vld [vmem:[%s626_s0 + $0x40] sm:$0xff]  ;;  %v23_v50 = vld [vmem:[%s626_s0 + $0x48] sm:$0xff]  ;;  %v174_v54 = vpack.c.bf16 %v119_v47, %v118_v43  ;;  %v100_v56 = vld [vmem:[%s625_s1 + $0x250] sm:$0xff] }
  0x1c   :  { %186 = vmatpush.bf16.msra.mxu0 %v129_v16  ;;  %v124_v53 = vpack.c.bf16 %v22_v45, %v16_v44  ;;  %v125_v55 = vpack.c.bf16 %v23_v50, %v17_v49  ;;  %v101_v57 = vld [vmem:[%s625_s1 + $0x258] sm:$0xff]  ;;  %v116_v58 = vld [vmem:[%s625_s1 + $0x2d0] sm:$0xff]  ;;  %v98_v62 = vld [vmem:[%s625_s1 + $0x240] sm:$0xff] }
  0x1d   :  { %200 = vmatpush.bf16.msra.mxu1 %v137_v20  ;;  %v117_v59 = vld [vmem:[%s625_s1 + $0x2d8] sm:$0xff]  ;;  %v165_v60 = vpack.c.bf16 %v101_v57, %v100_v56  ;;  %v99_v63 = vld [vmem:[%s625_s1 + $0x248] sm:$0xff]  ;;  %v114_v0 = vld [vmem:[%s625_s1 + $0x2c0] sm:$0xff] }
  0x1e   :  { %214 = vmatpush.bf16.msra.mxu2 %v145_v21  ;;  %v173_v61 = vpack.c.bf16 %v117_v59, %v116_v58  ;;  %v115_v1 = vld [vmem:[%s625_s1 + $0x2c8] sm:$0xff]  ;;  %v164_v2 = vpack.c.bf16 %v99_v63, %v98_v62  ;;  %v96_v4 = vld [vmem:[%s625_s1 + $0x230] sm:$0xff]  ;;  %v97_v5 = vld [vmem:[%s625_s1 + $0x238] sm:$0xff] }
  0x1f   :  { %228 = vmatpush.bf16.msra.mxu3 %v153_v28  ;;  %v172_v3 = vpack.c.bf16 %v115_v1, %v114_v0  ;;  %v112_v6 = vld [vmem:[%s625_s1 + $0x2b0] sm:$0xff]  ;;  %v113_v7 = vld [vmem:[%s625_s1 + $0x2b8] sm:$0xff]  ;;  %v163_v8 = vpack.c.bf16 %v97_v5, %v96_v4  ;;  %v94_v10 = vld [vmem:[%s625_s1 + $0x220] sm:$0xff] }
  0x20   :  { %187 = vmatpush.bf16.msra.mxu0 %v128_v32  ;;  %v171_v9 = vpack.c.bf16 %v113_v7, %v112_v6  ;;  %v95_v11 = vld [vmem:[%s625_s1 + $0x228] sm:$0xff]  ;;  %v110_v12 = vld [vmem:[%s625_s1 + $0x2a0] sm:$0xff]  ;;  %v92_v16 = vld [vmem:[%s625_s1 + $0x210] sm:$0xff] }
  0x21   :  { %201 = vmatpush.bf16.msra.mxu1 %v136_v36  ;;  %v111_v13 = vld [vmem:[%s625_s1 + $0x2a8] sm:$0xff]  ;;  %v162_v14 = vpack.c.bf16 %v95_v11, %v94_v10  ;;  %v93_v17 = vld [vmem:[%s625_s1 + $0x218] sm:$0xff]  ;;  %v108_v18 = vld [vmem:[%s625_s1 + $0x290] sm:$0xff] }
  0x22   :  { %215 = vmatpush.bf16.msra.mxu2 %v144_v42  ;;  %v170_v15 = vpack.c.bf16 %v111_v13, %v110_v12  ;;  %v109_v19 = vld [vmem:[%s625_s1 + $0x298] sm:$0xff]  ;;  %v161_v20 = vpack.c.bf16 %v93_v17, %v92_v16  ;;  %v90_v22 = vld [vmem:[%s625_s1 + $0x200] sm:$0xff]  ;;  %v91_v23 = vld [vmem:[%s625_s1 + $0x208] sm:$0xff] }
  0x23   :  { %229 = vmatpush.bf16.msra.mxu3 %v152_v46  ;;  %188 = vmatmul.bf16.vlgmr.msra.gmra.mxu0 %v122_v48  ;;  %v169_v21 = vpack.c.bf16 %v109_v19, %v108_v18  ;;  %v106_v24 = vld [vmem:[%s625_s1 + $0x280] sm:$0xff]  ;;  %v107_v25 = vld [vmem:[%s625_s1 + $0x288] sm:$0xff]  ;;  %v160_v26 = vpack.c.bf16 %v91_v23, %v90_v22  ;;  %v24_v28 = vld [vmem:[%s626_s0 + $0x50] sm:$0xff] }
  0x24   :  { %236 = vmatpush.bf16.msrb.mxu0 %v167_v37  ;;  %202 = vmatmul.bf16.vlgmr.msra.gmra.mxu1 %v123_v51  ;;  %v18_v27 = vld [vmem:[%s626_s0 + $0x20] sm:$0xff]  ;;  %v168_v29 = vpack.c.bf16 %v107_v25, %v106_v24  ;;  %v19_v30 = vld [vmem:[%s626_s0 + $0x28] sm:$0xff]  ;;  %v25_v31 = vld [vmem:[%s626_s0 + $0x58] sm:$0xff] }
  0x25   :  { %250 = vmatpush.bf16.msrb.mxu1 %v175_v41  ;;  %216 = vmatmul.bf16.vlgmr.msra.gmra.mxu2 %v124_v53  ;;  %v126_v32 = vpack.c.bf16 %v24_v28, %v18_v27  ;;  %v127_v33 = vpack.c.bf16 %v25_v31, %v19_v30  ;;  %v271_v35 = vld [vmem:[%s627_s2] ss:$0 sm:$0xff] }
  0x26   :  { %230 = vmatmul.bf16.vlgmr.msra.gmra.mxu3 %v125_v55 }
  0x28   :  { %237 = vmatpush.bf16.msrb.mxu0 %v166_v52 }
  0x29   :  { %251 = vmatpush.bf16.msrb.mxu1 %v174_v54 }
  0x2c   :  { %238 = vmatpush.bf16.msrb.mxu0 %v165_v60 }
  0x2d   :  { %252 = vmatpush.bf16.msrb.mxu1 %v173_v61 }
  0x30   :  { %239 = vmatpush.bf16.msrb.mxu0 %v164_v2 }
  0x31   :  { %253 = vmatpush.bf16.msrb.mxu1 %v172_v3 }
  0x34   :  { %240 = vmatpush.bf16.msrb.mxu0 %v163_v8 }
  0x35   :  { %254 = vmatpush.bf16.msrb.mxu1 %v171_v9 }
  0x38   :  { %241 = vmatpush.bf16.msrb.mxu0 %v162_v14 }
  0x39   :  { %255 = vmatpush.bf16.msrb.mxu1 %v170_v15 }
  0x3c   :  { %242 = vmatpush.bf16.msrb.mxu0 %v161_v20 }
  0x3d   :  { %256 = vmatpush.bf16.msrb.mxu1 %v169_v21 }
  0x40   :  { %243 = vmatpush.bf16.msrb.mxu0 %v160_v26 }
  0x41   :  { %257 = vmatpush.bf16.msrb.mxu1 %v168_v29 }
  0x43   :  { %244 = vmatmul.bf16.vlgmr.msrb.gmra.mxu0 %v126_v32 }
  0x44   :  { %258 = vmatmul.bf16.vlgmr.msrb.gmra.mxu1 %v127_v33 }
  0xa0   :  { %v189_v34 = vpop.f32.mrf.mxu0 }
  0xa1   :  { %v203_v36 = vpop.f32.mrf.mxu1  ;;  %v190_v37 = vadd.f32 %v271_v35, %v189_v34 }
  0xa3   :  { %v204_v39 = vadd.f32 %v203_v36, %v190_v37 }
  0xa8   :  { %v217_v38 = vpop.f32.mrf.mxu2  ;;  %v191_v40 = vpop.f32.mrf.mxu0 }
  0xa9   :  { %v205_v41 = vpop.f32.mrf.mxu1  ;;  %v231_v42 = vpop.f32.mrf.mxu3  ;;  %v218_v43 = vadd.f32 %v217_v38, %v204_v39  ;;  %v192_v44 = vadd.f32 %v271_v35, %v191_v40 }
  0xab   :  { %v232_v45 = vadd.f32 %v231_v42, %v218_v43  ;;  %v206_v46 = vadd.f32 %v205_v41, %v192_v44 }
  0xb0   :  { %v219_v47 = vpop.f32.mrf.mxu2 }
  0xb1   :  { %v220_v51 = vadd.f32 %v219_v47, %v206_v46  ;;  %v233_v53 = vpop.f32.mrf.mxu3 }
  0xb3   :  { %v234_v54 = vadd.f32 %v233_v53, %v220_v51 }
  0xc0   :  { %v245_v48 = vpop.f32.mrf.mxu0 }
  0xc1   :  { %v246_v49 = vadd.f32 %v245_v48, %v232_v45  ;;  %v259_v50 = vpop.f32.mrf.mxu1 }
  0xc3   :  { %v260_v52 = vadd.f32 %v259_v50, %v246_v49 }
  0xc5   :  { %265 = vst.msk [vmem:[%s628_s3] sm:$0xff] %vm264_vm0, %v260_v52 }
  0xc8   :  { %v247_v55 = vpop.f32.mrf.mxu0 }
  0xc9   :  { %v248_v56 = vadd.f32 %v247_v55, %v234_v54  ;;  %v261_v57 = vpop.f32.mrf.mxu1 }
  0xcb   :  { %v262_v58 = vadd.f32 %v261_v57, %v248_v56 }
  0xcd   :  { %266 = vst.msk [vmem:[%s628_s3 + $0x8] sm:$0xff] %vm264_vm0, %v262_v58 }

// kernel: _lambda_.13
= control target key start
LH: loop header
LB: loop body
LE: loop exit
PB: predicated region body
PF: predicated region fallthrough
CT: control target
= control target key end

     0   :  { %vm19_vm0 = vcmask 523264   ;;  %vm26_vm1 = vcmask 519168   ;;  %v124_v6 = vmov 64.0   ;;  %s178_s0 = inlined_call_operand.vmem [shape: f32[20,64], index: 0, kind: input, shape index: {}]   ;;  %s179_s1 = inlined_call_operand.vmem [shape: f32[1,64], index: 1, kind: input, shape index: {}]   ;;  %s180_s2 = inlined_call_operand.vmem [shape: f32[1,64], index: 2, kind: input, shape index: {}]   ;;  %s181_s3 = inlined_call_operand.vmem [shape: f32[20,64], index: 3, kind: output, shape index: {}]  }
   0x1   :  { %v14_v0 = vld [vmem:[%s178_s0] sm:$0xff]  ;;  %v16_v1 = vld [vmem:[%s178_s0 + $0x10] sm:$0xf]  ;;  %v15_v4 = vld [vmem:[%s178_s0 + $0x8] sm:$0xff]  ;;  %116 = vrcp.f32 %v124_v6 }
   0x2   :  { %v20_v2 = vsel %vm19_vm0, %v14_v0, 0.0  ;;  %v27_v3 = vsel %vm26_vm1, %v16_v1, 0.0  ;;  %v23_v5 = vsel %vm19_vm0, %v15_v4, 0.0  ;;  %v114_v45 = vld [vmem:[%s179_s1] ss:$0 sm:$0xff] }
   0x3   :  { %21 = vadd.xlane.f32.xlu0 %v20_v2  ;;  %28 = vadd.xlane.f32.xlu1 %v27_v3  ;;  %v115_v48 = vld [vmem:[%s180_s2] ss:$0 sm:$0xff] }
   0x7   :  { %v117_v7 = vpop.eup %116 }
   0x8   :  { %v31_v8 = vmul.f32 64.0, %v117_v7  ;;  %vm35_vm2 = vweird.f32 %v117_v7 }
   0xa   :  { %v32_v9 = vsub.f32 1.0, %v31_v8 }
   0xb   :  { %24 = vadd.xlane.f32.xlu0 %v23_v5 }
   0xc   :  { %v33_v10 = vmul.f32 %v117_v7, %v32_v9 }
   0xe   :  { %v34_v11 = vadd.f32 %v117_v7, %v33_v10 }
  0x10   :  { %v36_v12 = vsel %vm35_vm2, %v117_v7, %v34_v11 }
  0x76   :  { %v22_v13 = vpop.xlane.xlu0 %21  ;;  %v29_v17 = vpop.xlane.xlu1 %28 }
  0x77   :  { %v37_v14 = vmul.f32 %v36_v12, %v22_v13  ;;  %v39_v21 = vmul.f32 %v36_v12, %v29_v17 }
  0x79   :  { %v40_v15 = vsub.f32 %v14_v0, %v37_v14  ;;  %v42_v23 = vsub.f32 %v16_v1, %v39_v21 }
  0x7b   :  { %v43_v16 = vmul.f32 %v40_v15, %v40_v15  ;;  %v45_v26 = vmul.f32 %v42_v23, %v42_v23 }
  0x7d   :  { %v46_v18 = vsel %vm19_vm0, %v43_v16, 0.0  ;;  %v52_v27 = vsel %vm26_vm1, %v45_v26, 0.0 }
  0x7e   :  { %47 = vadd.xlane.f32.xlu1 %v46_v18  ;;  %v25_v19 = vpop.xlane.xlu0 %24 }
  0x7f   :  { %v38_v20 = vmul.f32 %v36_v12, %v25_v19 }
  0x81   :  { %v41_v22 = vsub.f32 %v15_v4, %v38_v20 }
  0x83   :  { %v44_v24 = vmul.f32 %v41_v22, %v41_v22 }
  0x85   :  { %v49_v25 = vsel %vm19_vm0, %v44_v24, 0.0 }
  0x86   :  { %50 = vadd.xlane.f32.xlu2 %v49_v25 }
  0x8e   :  { %53 = vadd.xlane.f32.xlu2 %v52_v27 }
  0xf1   :  { %v48_v28 = vpop.xlane.xlu1 %47 }
  0xf2   :  { %v55_v29 = vmul.f32 %v48_v28, %v36_v12 }
  0xf4   :  { %v58_v30 = vadd.f32 1e-06, %v55_v29 }
  0xf6   :  { %118 = vrsqrt.f32 %v58_v30  ;;  %vm67_vm4 = vweird.f32 %v58_v30 }
  0xf9   :  { %v51_v31 = vpop.xlane.xlu2 %50 }
  0xfa   :  { %v56_v32 = vmul.f32 %v51_v31, %v36_v12 }
  0xfc   :  { %v119_v33 = vpop.eup %118  ;;  %v59_v34 = vadd.f32 1e-06, %v56_v32 }
  0xfd   :  { %v62_v35 = vmul.f32 %v119_v33, %v58_v30  ;;  %vm68_vm3 = vweird.f32 %v119_v33 }
  0xfe   :  { %120 = vrsqrt.f32 %v59_v34  ;;  %vm69_vm5 = vmor %vm67_vm4, %vm68_vm3  ;;  %vm77_vm7 = vweird.f32 %v59_v34 }
  0xff   :  { %v63_v36 = vmul.f32 %v119_v33, %v62_v35 }
 0x101   :  { %v64_v37 = vmul.f32 0.5, %v63_v36  ;;  %v54_v38 = vpop.xlane.xlu2 %53 }
 0x102   :  { %v57_v39 = vmul.f32 %v54_v38, %v36_v12 }
 0x103   :  { %v65_v40 = vsub.f32 1.5, %v64_v37 }
 0x104   :  { %v121_v41 = vpop.eup %120  ;;  %v60_v42 = vadd.f32 1e-06, %v57_v39 }
 0x105   :  { %v66_v43 = vmul.f32 %v119_v33, %v65_v40  ;;  %v72_v44 = vmul.f32 %v121_v41, %v59_v34  ;;  %vm78_vm6 = vweird.f32 %v121_v41 }
 0x106   :  { %122 = vrsqrt.f32 %v60_v42  ;;  %vm79_vm8 = vmor %vm77_vm7, %vm78_vm6  ;;  %vm87_vm10 = vweird.f32 %v60_v42 }
 0x107   :  { %v70_v46 = vsel %vm69_vm5, %v119_v33, %v66_v43  ;;  %v73_v47 = vmul.f32 %v121_v41, %v72_v44 }
 0x108   :  { %v91_v49 = vmul.f32 %v70_v46, %v40_v15 }
 0x109   :  { %v74_v50 = vmul.f32 0.5, %v73_v47 }
 0x10a   :  { %v97_v51 = vmul.f32 %v114_v45, %v91_v49 }
 0x10b   :  { %v75_v52 = vsub.f32 1.5, %v74_v50 }
 0x10c   :  { %v123_v53 = vpop.eup %122  ;;  %v103_v54 = vadd.f32 %v115_v48, %v97_v51 }
 0x10d   :  { %v76_v55 = vmul.f32 %v121_v41, %v75_v52  ;;  %v82_v56 = vmul.f32 %v123_v53, %v60_v42  ;;  %vm88_vm9 = vweird.f32 %v123_v53 }
 0x10e   :  { %106 = vst.msk [vmem:[%s181_s3] sm:$0xff] %vm19_vm0, %v103_v54  ;;  %vm89_vm11 = vmor %vm87_vm10, %vm88_vm9 }
 0x10f   :  { %v80_v57 = vsel %vm79_vm8, %v121_v41, %v76_v55  ;;  %v83_v58 = vmul.f32 %v123_v53, %v82_v56 }
 0x110   :  { %v92_v59 = vmul.f32 %v80_v57, %v41_v22 }
 0x111   :  { %v84_v60 = vmul.f32 0.5, %v83_v58 }
 0x112   :  { %v98_v61 = vmul.f32 %v114_v45, %v92_v59 }
 0x113   :  { %v85_v62 = vsub.f32 1.5, %v84_v60 }
 0x114   :  { %v104_v63 = vadd.f32 %v115_v48, %v98_v61 }
 0x115   :  { %v86_v0 = vmul.f32 %v123_v53, %v85_v62 }
 0x116   :  { %107 = vst.msk [vmem:[%s181_s3 + $0x8] sm:$0xff] %vm19_vm0, %v104_v63 }
 0x117   :  { %v90_v1 = vsel %vm89_vm11, %v123_v53, %v86_v0 }
 0x118   :  { %v93_v2 = vmul.f32 %v90_v1, %v42_v23 }
 0x11a   :  { %v99_v3 = vmul.f32 %v114_v45, %v93_v2 }
 0x11c   :  { %v105_v4 = vadd.f32 %v115_v48, %v99_v3 }
 0x11e   :  { %108 = vst.msk [vmem:[%s181_s3 + $0x10] sm:$0xf] %vm26_vm1, %v105_v4 }

// kernel: _lambda_.11
= control target key start
LH: loop header
LB: loop body
LE: loop exit
PB: predicated region body
PF: predicated region fallthrough
CT: control target
= control target key end

     0   :  { %s1391_s24 = smov 0   ;;  %s1759_s0 = inlined_call_operand.vmem [shape: f32[4,5,64], index: 0, kind: input, shape index: {}]   ;;  %s1760_s1 = inlined_call_operand.vmem [shape: f32[1,64], index: 1, kind: input, shape index: {}]   ;;  %s1761_s2 = inlined_call_operand.vmem [shape: f32[1,64], index: 2, kind: input, shape index: {}]   ;;  %s1762_s3 = inlined_call_operand.vmem [shape: f32[64,64], index: 3, kind: input, shape index: {}]   ;;  %s1763_s4 = inlined_call_operand.vmem [shape: f32[1,64], index: 4, kind: input, shape index: {}]   ;;  %s1764_s5 = inlined_call_operand.vmem [shape: f32[64,64], index: 5, kind: input, shape index: {}]   ;;  %s1765_s6 = inlined_call_operand.vmem [shape: f32[1,64], index: 6, kind: input, shape index: {}]   ;;  %s1766_s7 = inlined_call_operand.vmem [shape: f32[64,64], index: 7, kind: input, shape index: {}]   ;;  %s1767_s8 = inlined_call_operand.vmem [shape: f32[1,64], index: 8, kind: input, shape index: {}]   ;;  %s1768_s9 = inlined_call_operand.vmem [shape: f32[64,64], index: 9, kind: input, shape index: {}]   ;;  %s1769_s10 = inlined_call_operand.vmem [shape: f32[1,64], index: 10, kind: input, shape index: {}]   ;;  %s1770_s11 = inlined_call_operand.vmem [shape: f32[1,64], index: 11, kind: input, shape index: {}]   ;;  %s1771_s12 = inlined_call_operand.vmem [shape: f32[1,64], index: 12, kind: input, shape index: {}]   ;;  %s1772_s13 = inlined_call_operand.vmem [shape: f32[64,256], index: 13, kind: input, shape index: {}]   ;;  %s1773_s14 = inlined_call_operand.vmem [shape: f32[1,256], index: 14, kind: input, shape index: {}]   ;;  %s1774_s15 = inlined_call_operand.vmem [shape: f32[256,64], index: 15, kind: input, shape index: {}]   ;;  %s1775_s16 = inlined_call_operand.vmem [shape: f32[1,64], index: 16, kind: input, shape index: {}]   ;;  %s1776_s17 = inlined_call_operand.vmem [shape: f32[4,5,64], index: 17, kind: output, shape index: {}]  }
   0x1   :  { %1777 = sst [smem:[#allocation2_spill]] %s1759_s0 }
   0x2   :  { %1778 = sst [smem:[#allocation3_spill]] %s1760_s1 }
   0x3 LB: > { %s1211_s25 = sadd.s32 4294967295, %s1291_s24   ;;  %p1215_p0 = scmp.ge.s32.totalorder %s1291_s24, 1  ;;  %s1291_s24 = sphi %s1391_s24, %s27_s24  }
   0x4   : > { %p486_p1 = scmp.lt.s32.totalorder %s1291_s24, 5 }
   0x6   : > { %p487_p2 = pnand %p1215_p0, %p486_p1 }
   0x7   : > { %p536_p3 = scmp.lt.s32.totalorder (!%p487_p2), %s1211_s25, 3  ;;  %s1779_s29 = sld [smem:[#allocation2_spill]] (!%p487_p2) }
   0x8   : > { %490 = sbr.rel (%p487_p2) target bundleno = 1889 (0x761), region = 88  ;;  %s1780_s19 = sld [smem:[#allocation3_spill]] (!%p487_p2) }
   0x9   : > { %s1295_s30 = smov (!%p487_p2), 96   ;;  %s1296_s18 = smov (!%p487_p2), 112  }
   0xa   : > { %s1299_s1 = smov (!%p487_p2), 32   ;;  %s1300_s20 = smov (!%p487_p2), 48  }
   0xd   : > { %s1782_s25 = smov (!%p536_p3, %s1211_s25), 3  ;;  %vm548_vm0 = vcmask 520192   ;;  %v1293_v2 = vmov 64.0   ;;  %v592_v14 = vld [vmem:[%s1762_s3 + $0x30] sm:$0xff]  ;;  %v593_v15 = vld [vmem:[%s1762_s3 + $0x38] sm:$0xff]  ;;  %v590_v23 = vld [vmem:[%s1762_s3 + $0x20] sm:$0xff] }
   0xe   : > { %s1216_s26 = sshll.u32 %s1782_s25, 3  ;;  %1259 = vrcp.f32 %v1293_v2  ;;  %v626_v16 = vld [vmem:[%s1764_s5 + $0x30] sm:$0xff]  ;;  %v598_v17 = vpack.c.bf16 %v593_v15, %v592_v14  ;;  %v627_v18 = vld [vmem:[%s1764_s5 + $0x38] sm:$0xff]  ;;  %v591_v24 = vld [vmem:[%s1762_s3 + $0x28] sm:$0xff]  ;;  %vm603_vm5 = vcmask 523264   ;;  %vm680_vm6 = vcmask 130048  }
   0xf   : > { %s539_s0 = scalar_lea.vmem %s1779_s29, %s1216_s26  ;;  %v655_v19 = vld [vmem:[%s1766_s7 + $0x30] sm:$0xff]  ;;  %v656_v20 = vld [vmem:[%s1766_s7 + $0x38] sm:$0xff]  ;;  %v631_v21 = vpack.c.bf16 %v627_v18, %v626_v16  ;;  %v624_v25 = vld [vmem:[%s1764_s5 + $0x20] sm:$0xff]  ;;  %v597_v26 = vpack.c.bf16 %v591_v24, %v590_v23  ;;  %vm719_vm7 = vcmask 1041408   ;;  %vm720_vm8 = vcmask 1042432   ;;  %s543_s28 = scalar_lea.vmem %s1776_s17, %s1216_s26 }
  0x10   : > { %v1407_v0 = vld [vmem:[%s539_s0] sm:$0x1f]  ;;  %v660_v22 = vpack.c.bf16 %v656_v20, %v655_v19  ;;  %611 = vmatpush.bf16.msra.mxu0 %v598_v17  ;;  %v625_v27 = vld [vmem:[%s1764_s5 + $0x28] sm:$0xff]  ;;  %v588_v32 = vld [vmem:[%s1762_s3 + $0x10] sm:$0xff]  ;;  %s1294_s0 = smov 80   ;;  %vm701_vm9 = vcmask 36864  }
  0x11   : > { %v549_v1 = vsel %vm548_vm0, %v1407_v0, 0.0  ;;  %640 = vmatpush.bf16.msra.mxu1 %v631_v21  ;;  %v653_v28 = vld [vmem:[%s1766_s7 + $0x20] sm:$0xff]  ;;  %v654_v29 = vld [vmem:[%s1766_s7 + $0x28] sm:$0xff]  ;;  %v630_v30 = vpack.c.bf16 %v625_v27, %v624_v25  ;;  %v589_v33 = vld [vmem:[%s1762_s3 + $0x18] sm:$0xff]  ;;  %vm715_vm10 = vcmask 39936   ;;  %vm926_vm11 = vcmask 261120  }
  0x12   : > { %550 = vadd.xlane.f32.xlu0 %v549_v1  ;;  %669 = vmatpush.bf16.msra.mxu2 %v660_v22  ;;  %v659_v31 = vpack.c.bf16 %v654_v29, %v653_v28  ;;  %v622_v34 = vld [vmem:[%s1764_s5 + $0x10] sm:$0xff]  ;;  %v596_v35 = vpack.c.bf16 %v589_v33, %v588_v32  ;;  %v623_v36 = vld [vmem:[%s1764_s5 + $0x18] sm:$0xff]  ;;  %v586_v41 = vld [vmem:[%s1762_s3] sm:$0xff]  ;;  %vm928_vm12 = vcmask 392192  }
  0x13   : > { %v651_v37 = vld [vmem:[%s1766_s7 + $0x10] sm:$0xff]  ;;  %v652_v38 = vld [vmem:[%s1766_s7 + $0x18] sm:$0xff]  ;;  %v629_v39 = vpack.c.bf16 %v623_v36, %v622_v34  ;;  %v587_v42 = vld [vmem:[%s1762_s3 + $0x8] sm:$0xff] }
  0x14   : > { %v1260_v3 = vpop.eup %1259  ;;  %612 = vmatpush.bf16.msra.mxu0 %v597_v26  ;;  %v658_v40 = vpack.c.bf16 %v652_v38, %v651_v37  ;;  %v620_v43 = vld [vmem:[%s1764_s5] sm:$0xff]  ;;  %v595_v44 = vpack.c.bf16 %v587_v42, %v586_v41  ;;  %v621_v45 = vld [vmem:[%s1764_s5 + $0x8] sm:$0xff] }
  0x15   : > { %v553_v4 = vmul.f32 64.0, %v1260_v3  ;;  %vm557_vm1 = vweird.f32 %v1260_v3  ;;  %641 = vmatpush.bf16.msra.mxu1 %v630_v30  ;;  %v649_v46 = vld [vmem:[%s1766_s7] sm:$0xff]  ;;  %v650_v47 = vld [vmem:[%s1766_s7 + $0x8] sm:$0xff]  ;;  %v628_v48 = vpack.c.bf16 %v621_v45, %v620_v43 }
  0x16   : > { %670 = vmatpush.bf16.msra.mxu2 %v659_v31  ;;  %v657_v49 = vpack.c.bf16 %v650_v47, %v649_v46  ;;  %v1250_v59 = vld [vmem:[%s1780_s19] ss:$0 sm:$0xff]  ;;  %s1298_s19 = smov 16  }
  0x17   : > { %v554_v5 = vsub.f32 1.0, %v553_v4  ;;  %v1251_v62 = vld [vmem:[%s1761_s2] ss:$0 sm:$0xff] }
  0x18   : > { %613 = vmatpush.bf16.msra.mxu0 %v596_v35 }
  0x19   : > { %v555_v6 = vmul.f32 %v1260_v3, %v554_v5  ;;  %642 = vmatpush.bf16.msra.mxu1 %v629_v39 }
  0x1a   : > { %671 = vmatpush.bf16.msra.mxu2 %v658_v40 }
  0x1b   : > { %v556_v7 = vadd.f32 %v1260_v3, %v555_v6 }
  0x1c   : > { %614 = vmatpush.bf16.msra.mxu0 %v595_v44 }
  0x1d   : > { %v1411_v8 = vsel %vm557_vm1, %v1260_v3, %v556_v7  ;;  %643 = vmatpush.bf16.msra.mxu1 %v628_v48  ;;  %v1253_v3 = vld [vmem:[%s1765_s6] ss:$0 sm:$0xff] }
  0x1e   : > { %672 = vmatpush.bf16.msra.mxu2 %v657_v49  ;;  %v1252_v7 = vld [vmem:[%s1763_s4] ss:$0 sm:$0xff] }
  0x85   : > { %v551_v9 = vpop.xlane.xlu0 %550 }
  0x86   : > { %v559_v10 = vmul.f32 %v1411_v8, %v551_v9 }
  0x88   : > { %v1415_v11 = vsub.f32 %v1407_v0, %v559_v10  ;;  %v1254_v10 = vld [vmem:[%s1767_s8] ss:$0 sm:$0xff] }
  0x8a   : > { %v561_v12 = vmul.f32 %v1415_v11, %v1415_v11 }
  0x8c   : > { %v562_v13 = vsel %vm548_vm0, %v561_v12, 0.0  ;;  %v1297_v12 = vmov 65535  }
  0x8d   : > { %563 = vadd.xlane.f32.xlu0 %v562_v13  ;;  %v721_v13 = vsel %vm719_vm7, 4294967295, %v1297_v12 }
  0x8e   : > { %v1516_v19 = vsel %vm720_vm8, %v721_v13, 0 }
 0x100   : > { %v564_v50 = vpop.xlane.xlu0 %563 }
 0x101   : > { %v565_v51 = vmul.f32 %v564_v50, %v1411_v8 }
 0x103   : > { %v566_v52 = vadd.f32 1e-06, %v565_v51 }
 0x105   : > { %1261 = vrsqrt.f32 %v566_v52  ;;  %vm573_vm3 = vweird.f32 %v566_v52 }
 0x10b   : > { %v1262_v53 = vpop.eup %1261 }
 0x10c   : > { %v568_v54 = vmul.f32 %v1262_v53, %v566_v52  ;;  %vm574_vm2 = vweird.f32 %v1262_v53 }
 0x10d   : > { %vm575_vm4 = vmor %vm573_vm3, %vm574_vm2 }
 0x10e   : > { %v569_v55 = vmul.f32 %v1262_v53, %v568_v54 }
 0x110   : > { %v570_v56 = vmul.f32 0.5, %v569_v55 }
 0x112   : > { %v571_v57 = vsub.f32 1.5, %v570_v56 }
 0x114   : > { %v572_v58 = vmul.f32 %v1262_v53, %v571_v57 }
 0x116   : > { %v576_v60 = vsel %vm575_vm4, %v1262_v53, %v572_v58 }
 0x117   : > { %v577_v61 = vmul.f32 %v576_v60, %v1415_v11 }
 0x119   : > { %v581_v63 = vmul.f32 %v1250_v59, %v577_v61 }
 0x11b   : > { %v585_v1 = vadd.f32 %v1251_v62, %v581_v63 }
 0x11d   : > { %v594_v2 = vpack.c.bf16 %v585_v1, %v585_v1 }
 0x11f   : > { %1218 = vmatmul.msk.bf16.vlgmr.msra.gmra.mxu0 %vm603_vm5, %v594_v2  ;;  %1219 = vmatmul.msk.bf16.vlgmr.msra.gmra.mxu1 %vm603_vm5, %v594_v2 }
 0x120   : > { %1220 = vmatmul.msk.bf16.vlgmr.msra.gmra.mxu2 %vm603_vm5, %v594_v2 }
 0x19c   : > { %v616_v4 = vpop.f32.mrf.mxu0  ;;  %v645_v5 = vpop.f32.mrf.mxu1 }
 0x19d   : > { %v646_v6 = vadd.f32 %v1253_v3, %v645_v5  ;;  %v617_v14 = vadd.f32 %v1252_v7, %v616_v4 }
 0x19f   : > { %v679_v9 = vpack.c.bf16 %v646_v6, %v646_v6  ;;  %v678_v21 = vpack.c.bf16 %v617_v14, %v617_v14 }
 0x1a1   : > { %858 = vrot.lane.b32.xlu0 %v679_v9, %s1294_s0  ;;  %801 = vrot.lane.b32.xlu2 %v679_v9, %s1295_s30  ;;  %v685_v11 = vsel %vm680_vm6, %v679_v9, 0 }
 0x1a2   : > { %743 = vrot.lane.b32.xlu1 %v679_v9, %s1296_s18  ;;  %694 = vmatpush.bf16.xpose.msra.mxu3 %v685_v11 }
 0x1a3   : > { %v674_v15 = vpop.f32.mrf.mxu2 }
 0x1a4   : > { %v675_v16 = vadd.f32 %v1254_v10, %v674_v15  ;;  %v618_v17 = vpop.f32.mrf.mxu0  ;;  %v647_v18 = vpop.f32.mrf.mxu1 }
 0x1a6   : > { %v1518_v20 = vpack.c.bf16 %v675_v16, %v675_v16 }
 0x1a8   : > { %v724_v22 = vand.u32 %v1516_v19, %v1518_v20 }
 0x1a9   : > { %799 = vrot.lane.b32.xlu2 %v678_v21, %s1295_s30  ;;  %1221 = vmatmul.msk.bf16.vlgmr.msra.gmra.mxu3 %vm680_vm6, %v678_v21 }
 0x1aa   : > { %733 = vmatpush.bf16.msrb.mxu3 %v724_v22  ;;  %740 = vrot.lane.b32.xlu1 %v678_v21, %s1296_s18 }
 0x1ab   : > { %v676_v23 = vpop.f32.mrf.mxu2 }
 0x1b2   : > { %856 = vrot.lane.b32.xlu1 %v678_v21, %s1294_s0 }
 0x1fb   : > { %v802_v24 = vpop.permute.xlu2 %801 }
 0x1fc   : > { %v807_v25 = vsel %vm680_vm6, %v802_v24, 0 }
 0x1fd   : > { %816 = vmatpush.bf16.xpose.msrb.mxu2 %v807_v25 }
 0x203   : > { %v800_v26 = vpop.permute.xlu2 %799 }
 0x204   : > { %1225 = vmatmul.msk.bf16.vlgmr.msrb.gmra.mxu2 %vm680_vm6, %v800_v26 }
 0x213   : > { %v859_v27 = vpop.permute.xlu0 %858 }
 0x214   : > { %v864_v28 = vsel %vm680_vm6, %v859_v27, 0  ;;  %v744_v29 = vpop.permute.xlu1 %743 }
 0x215   : > { %v749_v30 = vsel %vm680_vm6, %v744_v29, 0 }
 0x216   : > { %758 = vmatpush.bf16.xpose.msrb.mxu0 %v749_v30 }
 0x21c   : > { %v741_v31 = vpop.permute.xlu1 %740 }
 0x21d   : > { %1223 = vmatmul.msk.bf16.vlgmr.msrb.gmra.mxu0 %vm680_vm6, %v741_v31 }
 0x21e   : > { %873 = vmatpush.bf16.xpose.msra.mxu0 %v864_v28 }
 0x224   : > { %v857_v32 = vpop.permute.xlu1 %856 }
 0x22c   : > { %v696_v33 = vpop.f32.mrf.mxu3 }
 0x22d   : > { %v700_v34 = vmul.f32 0.25, %v696_v33  ;;  %1227 = vmatmul.msk.bf16.vlgmr.msra.gmra.mxu0 %vm680_vm6, %v857_v32 }
 0x22f   : > { %v702_v35 = vsel %vm701_vm9, %v700_v34, -inf }
 0x230   : > { %703 = vmax.xlane.f32.xlu2 %v702_v35 }
 0x234   : > { %v698_v36 = vpop.f32.mrf.mxu3 }
 0x287   : > { %v818_v37 = vpop.f32.mrf.mxu2 }
 0x288   : > { %v822_v38 = vmul.f32 0.25, %v818_v37 }
 0x28a   : > { %v823_v39 = vsel %vm701_vm9, %v822_v38, -inf }
 0x28b   : > { %824 = vmax.xlane.f32.xlu0 %v823_v39  ;;  %v934_v39 = vld [vmem:[%s1768_s9 + $0x20] sm:$0xff] }
 0x28f   : > { %v820_v40 = vpop.f32.mrf.mxu2 }
 0x29a   : > { %v760_v41 = vpop.f32.mrf.mxu0 }
 0x29b   : > { %v764_v42 = vmul.f32 0.25, %v760_v41  ;;  %v935_v41 = vld [vmem:[%s1768_s9 + $0x28] sm:$0xff] }
 0x29d   : > { %v765_v43 = vsel %vm701_vm9, %v764_v42, -inf }
 0x29e   : > { %766 = vmax.xlane.f32.xlu1 %v765_v43  ;;  %v932_v43 = vld [vmem:[%s1768_s9 + $0x10] sm:$0xff] }
 0x29f   : > { %835 = vrot.lane.b32.xlu0 %v1518_v20, %s1295_s30 }
 0x2a2   : > { %v762_v44 = vpop.f32.mrf.mxu0 }
 0x2a3   : > { %v704_v45 = vpop.xlane.xlu2 %703  ;;  %v933_v44 = vld [vmem:[%s1768_s9 + $0x18] sm:$0xff] }
 0x2a4   : > { %v705_v46 = vsub.f32 %v700_v34, %v704_v45  ;;  %v940_v45 = vpack.c.bf16 %v933_v44, %v932_v43  ;;  %v1256_v43 = vld [vmem:[%s1770_s11] ss:$0 sm:$0xff] }
 0x2a6   : > { %v706_v47 = vmul.f32 1.442695, %v705_v46  ;;  %v930_v46 = vld [vmem:[%s1768_s9] sm:$0xff] }
 0x2a8   : > { %1263 = vpow2.f32 %v706_v47  ;;  %v931_v47 = vld [vmem:[%s1768_s9 + $0x8] sm:$0xff] }
 0x2aa   : > { %v875_v48 = vpop.f32.mrf.mxu0 }
 0x2ab   : > { %v879_v49 = vmul.f32 0.25, %v875_v48  ;;  %v939_v48 = vpack.c.bf16 %v931_v47, %v930_v46 }
 0x2ad   : > { %v880_v50 = vsel %vm701_vm9, %v879_v49, -inf }
 0x2ae   : > { %881 = vmax.xlane.f32.xlu2 %v880_v50  ;;  %v1264_v51 = vpop.eup %1263 }
 0x2af   : > { %v708_v53 = vsel %vm701_vm9, %v1264_v51, 0.0 }
 0x2b2   : > { %v877_v52 = vpop.f32.mrf.mxu0 }
 0x2b6   : > { %709 = vadd.xlane.f32.xlu2 %v708_v53 }
 0x2ce   : > { %778 = vrot.lane.b32.xlu2 %v1518_v20, %s1296_s18 }
 0x2fe   : > { %v825_v54 = vpop.xlane.xlu0 %824 }
 0x2ff   : > { %v826_v57 = vsub.f32 %v822_v38, %v825_v54  ;;  %v937_v38 = vld [vmem:[%s1768_s9 + $0x38] sm:$0xff] }
 0x301   : > { %v827_v59 = vmul.f32 1.442695, %v826_v57 }
 0x311   : > { %v767_v55 = vpop.xlane.xlu1 %766  ;;  %v836_v9 = vpop.permute.xlu0 %835 }
 0x312   : > { %v768_v56 = vsub.f32 %v764_v42, %v767_v55  ;;  %v841_v14 = vand.u32 %v836_v9, %v1516_v19  ;;  %v941_v42 = vpack.c.bf16 %v935_v41, %v934_v39 }
 0x314   : > { %v769_v58 = vmul.f32 1.442695, %v768_v56  ;;  %v1255_v56 = vld [vmem:[%s1769_s10] ss:$0 sm:$0xff] }
 0x316   : > { %1265 = vpow2.f32 %v769_v58 }
 0x317   : > { %1267 = vpow2.f32 %v827_v59 }
 0x31c   : > { %v1266_v60 = vpop.eup %1265 }
 0x31d   : > { %v771_v61 = vsel %vm701_vm9, %v1266_v60, 0.0  ;;  %v1268_v63 = vpop.eup %1267 }
 0x31e   : > { %772 = vadd.xlane.f32.xlu1 %v771_v61  ;;  %v829_v3 = vsel %vm701_vm9, %v1268_v63, 0.0 }
 0x321   : > { %v882_v62 = vpop.xlane.xlu2 %881 }
 0x322   : > { %v883_v1 = vsub.f32 %v879_v49, %v882_v62 }
 0x324   : > { %v884_v2 = vmul.f32 1.442695, %v883_v1 }
 0x326   : > { %1269 = vpow2.f32 %v884_v2  ;;  %830 = vadd.xlane.f32.xlu1 %v829_v3 }
 0x329   : > { %v710_v4 = vpop.xlane.xlu2 %709 }
 0x32a   : > { %1271 = vrcp.f32 %v710_v4  ;;  %v1011_v4 = vld [vmem:[%s1772_s13 + $0x70] sm:$0xff] }
 0x32c   : > { %v1270_v5 = vpop.eup %1269 }
 0x32d   : > { %v886_v6 = vsel %vm701_vm9, %v1270_v5, 0.0 }
 0x32e   : > { %887 = vadd.xlane.f32.xlu1 %v886_v6 }
 0x330   : > { %v1272_v7 = vpop.eup %1271 }
 0x331   : > { %v712_v10 = vmul.f32 %v1272_v7, %v1264_v51  ;;  %v779_v11 = vpop.permute.xlu2 %778  ;;  %v1012_v7 = vld [vmem:[%s1772_s13 + $0x78] sm:$0xff] }
 0x332   : > { %v784_v12 = vand.u32 %v779_v11, %v1516_v19  ;;  %v1007_v11 = vld [vmem:[%s1772_s13 + $0x50] sm:$0xff] }
 0x333   : > { %v713_v13 = vpack.c.bf16 %v712_v10, %v712_v10  ;;  %v1005_v10 = vld [vmem:[%s1772_s13 + $0x40] sm:$0xff] }
 0x334   : > { %793 = vmatpush.bf16.msra.mxu3 %v784_v12  ;;  %v1006_v12 = vld [vmem:[%s1772_s13 + $0x48] sm:$0xff] }
 0x335   : > { %1222 = vmatmul.msk.bf16.vlgmr.msrb.gmra.mxu3 %vm715_vm10, %v713_v13  ;;  %v1018_v13 = vpack.c.bf16 %v1007_v11, %v1005_v10  ;;  %v1081_v11 = vld [vmem:[%s1774_s15 + $0x30] sm:$0xff] }
 0x338   : > { %850 = vmatpush.bf16.msrb.mxu3 %v841_v14  ;;  %v1008_v14 = vld [vmem:[%s1772_s13 + $0x58] sm:$0xff] }
 0x347   : > { %892 = vrot.lane.b32.xlu1 %v1518_v20, %s1294_s0 }
 0x391   : > { %v773_v15 = vpop.xlane.xlu1 %772 }
 0x392   : > { %1273 = vrcp.f32 %v773_v15  ;;  %v1019_v15 = vpack.c.bf16 %v1008_v14, %v1006_v12  ;;  %v1082_v12 = vld [vmem:[%s1774_s15 + $0x38] sm:$0xff] }
 0x393   : > { %v1112_v14 = vpack.c.bf16 %v1082_v12, %v1081_v11 }
 0x398   : > { %v1274_v16 = vpop.eup %1273 }
 0x399   : > { %v775_v17 = vmul.f32 %v1274_v16, %v1266_v60  ;;  %v831_v21 = vpop.xlane.xlu1 %830  ;;  %v1001_v16 = vld [vmem:[%s1772_s13 + $0x20] sm:$0xff] }
 0x39a   : > { %1275 = vrcp.f32 %v831_v21 }
 0x39b   : > { %v776_v18 = vpack.c.bf16 %v775_v17, %v775_v17  ;;  %v1003_v17 = vld [vmem:[%s1772_s13 + $0x30] sm:$0xff] }
 0x39c   : > { %v1016_v21 = vpack.c.bf16 %v1003_v17, %v1001_v16  ;;  %v1079_v16 = vld [vmem:[%s1774_s15 + $0x20] sm:$0xff]  ;;  %v1080_v17 = vld [vmem:[%s1774_s15 + $0x28] sm:$0xff] }
 0x39d   : > { %1224 = vmatmul.msk.bf16.vlgmr.msra.gmra.mxu3 %vm715_vm10, %v776_v18  ;;  %v1002_v18 = vld [vmem:[%s1772_s13 + $0x28] sm:$0xff] }
 0x3a0   : > { %v1276_v22 = vpop.eup %1275 }
 0x3a1   : > { %v833_v23 = vmul.f32 %v1276_v22, %v1268_v63  ;;  %v888_v25 = vpop.xlane.xlu1 %887  ;;  %v1004_v22 = vld [vmem:[%s1772_s13 + $0x38] sm:$0xff] }
 0x3a2   : > { %1277 = vrcp.f32 %v888_v25  ;;  %v999_v25 = vld [vmem:[%s1772_s13 + $0x10] sm:$0xff] }
 0x3a3   : > { %v834_v24 = vpack.c.bf16 %v833_v23, %v833_v23  ;;  %v1017_v23 = vpack.c.bf16 %v1004_v22, %v1002_v18  ;;  %v1092_v22 = vld [vmem:[%s1774_s15 + $0x88] sm:$0xff] }
 0x3a8   : > { %v1278_v26 = vpop.eup %1277 }
 0x3a9   : > { %v890_v28 = vmul.f32 %v1278_v26, %v1270_v5  ;;  %v1010_v5 = vld [vmem:[%s1772_s13 + $0x68] sm:$0xff] }
 0x3aa   : > { %v1021_v9 = vpack.c.bf16 %v1012_v7, %v1010_v5  ;;  %v998_v26 = vld [vmem:[%s1772_s13 + $0x8] sm:$0xff]  ;;  %v1095_v7 = vld [vmem:[%s1774_s15 + $0xa0] sm:$0xff] }
 0x3ab   : > { %v891_v30 = vpack.c.bf16 %v890_v28, %v890_v28  ;;  %v1000_v28 = vld [vmem:[%s1772_s13 + $0x18] sm:$0xff]  ;;  %v1084_v5 = vld [vmem:[%s1774_s15 + $0x48] sm:$0xff] }
 0x3ac   : > { %1048 = vmatpush.bf16.msrb.mxu0 %v1021_v9  ;;  %v1096_v9 = vld [vmem:[%s1774_s15 + $0xa8] sm:$0xff] }
 0x3ad   : > { %1226 = vmatmul.msk.bf16.vlgmr.msrb.gmra.mxu3 %vm715_vm10, %v834_v24  ;;  %v997_v24 = vld [vmem:[%s1772_s13] sm:$0xff]  ;;  %v1119_v10 = vpack.c.bf16 %v1096_v9, %v1095_v7 }
 0x3b0   : > { %1049 = vmatpush.bf16.msrb.mxu0 %v1019_v15  ;;  %v1094_v15 = vld [vmem:[%s1774_s15 + $0x98] sm:$0xff] }
 0x3b4   : > { %1050 = vmatpush.bf16.msrb.mxu0 %v1017_v23  ;;  %v1111_v23 = vpack.c.bf16 %v1080_v17, %v1079_v16 }
 0x3b8   : > { %v735_v27 = vpop.f32.mrf.mxu3 }
 0x3b9   : > { %v893_v20 = vpop.permute.xlu1 %892 }
 0x3ba   : > { %v898_v29 = vand.u32 %v893_v20, %v1516_v19  ;;  %v936_v19 = vld [vmem:[%s1768_s9 + $0x30] sm:$0xff]  ;;  %v1015_v20 = vpack.c.bf16 %v1000_v28, %v998_v26  ;;  %v1022_v28 = vld [vmem:[%s1773_s14] sm:$0x3] }
 0x3bb   : > { %v942_v40 = vpack.c.bf16 %v937_v38, %v936_v19 }
 0x3bc   : > { %907 = vmatpush.bf16.msrb.mxu1 %v898_v29  ;;  %1051 = vmatpush.bf16.msrb.mxu0 %v1015_v20  ;;  %v1105_v29 = vld [vmem:[%s1774_s15 + $0xf0] sm:$0xff]  ;;  %v1075_v20 = vld [vmem:[%s1774_s15] sm:$0xff] }
 0x3bd   : > { %950 = vmatpush.bf16.msra.mxu2 %v942_v40 }
 0x3bf   : > { %1228 = vmatmul.msk.bf16.vlgmr.msrb.gmra.mxu1 %vm715_vm10, %v891_v30  ;;  %v1106_v30 = vld [vmem:[%s1774_s15 + $0xf8] sm:$0xff] }
 0x3c0   : > { %v737_v31 = vpop.f32.mrf.mxu3 }
 0x3c1   : > { %951 = vmatpush.bf16.msra.mxu2 %v941_v42  ;;  %v1103_v31 = vld [vmem:[%s1774_s15 + $0xe0] sm:$0xff] }
 0x3c5   : > { %952 = vmatpush.bf16.msra.mxu2 %v940_v45  ;;  %v1257_v45 = vld [vmem:[%s1771_s12] ss:$0 sm:$0xff] }
 0x3c9   : > { %953 = vmatpush.bf16.msra.mxu2 %v939_v48 }
 0x420   : > { %v795_v32 = vpop.f32.mrf.mxu3 }
 0x421   : > { %914 = vrot.lane.b32.xlu2 %v795_v32, %s1298_s19 }
 0x428   : > { %v797_v33 = vpop.f32.mrf.mxu3 }
 0x429   : > { %v1124_v33 = vpack.c.bf16 %v1106_v30, %v1105_v29  ;;  %v1076_v29 = vld [vmem:[%s1774_s15 + $0x8] sm:$0xff] }
 0x42a   : > { %v1109_v30 = vpack.c.bf16 %v1076_v29, %v1075_v20 }
 0x42b   : > { %1138 = vmatpush.bf16.msrb.mxu2 %v1124_v33 }
 0x430   : > { %v852_v34 = vpop.f32.mrf.mxu3 }
 0x431   : > { %918 = vrot.lane.b32.xlu0 %v852_v34, %s1299_s1  ;;  %v1104_v34 = vld [vmem:[%s1774_s15 + $0xe8] sm:$0xff] }
 0x438   : > { %v854_v35 = vpop.f32.mrf.mxu3 }
 0x43c   : > { %v909_v36 = vpop.f32.mrf.mxu1 }
 0x43d   : > { %922 = vrot.lane.b32.xlu2 %v909_v36, %s1300_s20  ;;  %v1123_v36 = vpack.c.bf16 %v1104_v34, %v1103_v31  ;;  %v1025_v31 = vperm.slane %v1022_v28, 1 }
 0x43f   : > { %1139 = vmatpush.bf16.msrb.mxu2 %v1123_v36 }
 0x444   : > { %v911_v37 = vpop.f32.mrf.mxu1 }
 0x47b   : > { %v915_v49 = vpop.permute.xlu2 %914 }
 0x47c   : > { %v925_v50 = vsel %vm680_vm6, %v735_v27, %v915_v49  ;;  %v1014_v27 = vpack.c.bf16 %v999_v25, %v997_v24  ;;  %v1089_v49 = vld [vmem:[%s1774_s15 + $0x70] sm:$0xff]  ;;  %v1078_v25 = vld [vmem:[%s1774_s15 + $0x18] sm:$0xff] }
 0x47d   : > { %v1077_v24 = vld [vmem:[%s1774_s15 + $0x10] sm:$0xff] }
 0x497   : > { %v923_v52 = vpop.permute.xlu2 %922 }
 0x4a3   : > { %v919_v51 = vpop.permute.xlu0 %918 }
 0x4a4   : > { %v927_v53 = vsel %vm926_vm11, %v925_v50, %v919_v51  ;;  %v1090_v50 = vld [vmem:[%s1774_s15 + $0x78] sm:$0xff] }
 0x4a5   : > { %v929_v54 = vsel %vm928_vm12, %v927_v53, %v923_v52  ;;  %v1116_v51 = vpack.c.bf16 %v1090_v50, %v1089_v49  ;;  %v1101_v52 = vld [vmem:[%s1774_s15 + $0xd0] sm:$0xff]  ;;  %v1102_v53 = vld [vmem:[%s1774_s15 + $0xd8] sm:$0xff] }
 0x4a6   : > { %v938_v55 = vpack.c.bf16 %v929_v54, %v929_v54  ;;  %v1122_v54 = vpack.c.bf16 %v1102_v53, %v1101_v52 }
 0x4a7   : > { %1125 = vmatpush.bf16.msra.mxu1 %v1116_v51 }
 0x4a8   : > { %1229 = vmatmul.msk.bf16.vlgmr.msra.gmra.mxu2 %vm603_vm5, %v938_v55  ;;  %v1087_v55 = vld [vmem:[%s1774_s15 + $0x60] sm:$0xff] }
 0x4a9   : > { %1140 = vmatpush.bf16.msrb.mxu2 %v1122_v54 }
 0x52b   : > { %v955_v57 = vpop.f32.mrf.mxu2 }
 0x52c   : > { %v959_v58 = vadd.f32 %v955_v57, %v1407_v0  ;;  %v1009_v0 = vld [vmem:[%s1772_s13 + $0x60] sm:$0xff] }
 0x52d   : > { %v1020_v6 = vpack.c.bf16 %v1011_v4, %v1009_v0  ;;  %v1083_v4 = vld [vmem:[%s1774_s15 + $0x40] sm:$0xff] }
 0x52e   : > { %v1583_v59 = vadd.f32 %v1255_v56, %v959_v58  ;;  %v1088_v56 = vld [vmem:[%s1774_s15 + $0x68] sm:$0xff]  ;;  %v1099_v58 = vld [vmem:[%s1774_s15 + $0xc0] sm:$0xff] }
 0x52f   : > { %1035 = vmatpush.bf16.msra.mxu3 %v1020_v6  ;;  %v1115_v57 = vpack.c.bf16 %v1088_v56, %v1087_v55  ;;  %v1113_v6 = vpack.c.bf16 %v1084_v5, %v1083_v4 }
 0x530   : > { %v967_v60 = vsel %vm548_vm0, %v1583_v59, 0.0 }
 0x531   : > { %968 = vadd.xlane.f32.xlu0 %v967_v60  ;;  %v1100_v60 = vld [vmem:[%s1774_s15 + $0xc8] sm:$0xff]  ;;  %1126 = vmatpush.bf16.msra.mxu1 %v1115_v57 }
 0x533   : > { %v957_v61 = vpop.f32.mrf.mxu2  ;;  %1036 = vmatpush.bf16.msra.mxu3 %v1018_v13  ;;  %v1093_v13 = vld [vmem:[%s1774_s15 + $0x90] sm:$0xff] }
 0x534   : > { %v1121_v61 = vpack.c.bf16 %v1100_v60, %v1099_v58  ;;  %v1118_v18 = vpack.c.bf16 %v1094_v15, %v1093_v13 }
 0x536   : > { %1141 = vmatpush.bf16.msrb.mxu2 %v1121_v61  ;;  %v1258_v61 = vld [vmem:[%s1775_s16] ss:$0 sm:$0xff] }
 0x537   : > { %1037 = vmatpush.bf16.msra.mxu3 %v1016_v21  ;;  %v1091_v21 = vld [vmem:[%s1774_s15 + $0x80] sm:$0xff] }
 0x538   : > { %v1117_v26 = vpack.c.bf16 %v1092_v22, %v1091_v21 }
 0x53b   : > { %1038 = vmatpush.bf16.msra.mxu3 %v1014_v27  ;;  %v1110_v27 = vpack.c.bf16 %v1078_v25, %v1077_v24 }
 0x5a4   : > { %v969_v62 = vpop.xlane.xlu0 %968 }
 0x5a5   : > { %v970_v63 = vmul.f32 %v969_v62, %v1411_v8  ;;  %v1085_v62 = vld [vmem:[%s1774_s15 + $0x50] sm:$0xff] }
 0x5a7   : > { %v971_v1 = vsub.f32 %v1583_v59, %v970_v63  ;;  %v1086_v63 = vld [vmem:[%s1774_s15 + $0x58] sm:$0xff] }
 0x5a9   : > { %v972_v2 = vmul.f32 %v971_v1, %v971_v1 }
 0x5ab   : > { %v973_v3 = vsel %vm548_vm0, %v972_v2, 0.0  ;;  %v1097_v2 = vld [vmem:[%s1774_s15 + $0xb0] sm:$0xff] }
 0x5ac   : > { %974 = vadd.xlane.f32.xlu2 %v973_v3  ;;  %v1098_v3 = vld [vmem:[%s1774_s15 + $0xb8] sm:$0xff] }
 0x5ad   : > { %v1120_v0 = vpack.c.bf16 %v1098_v3, %v1097_v2 }
 0x5af   : > { %1142 = vmatpush.bf16.msrb.mxu2 %v1120_v0 }
 0x5b3   : > { %1143 = vmatpush.bf16.msrb.mxu2 %v1119_v10 }
 0x5b7   : > { %1144 = vmatpush.bf16.msrb.mxu2 %v1118_v18 }
 0x5bb   : > { %1145 = vmatpush.bf16.msrb.mxu2 %v1117_v26 }
 0x61f   : > { %v975_v32 = vpop.xlane.xlu2 %974 }
 0x620   : > { %v976_v35 = vmul.f32 %v975_v32, %v1411_v8 }
 0x622   : > { %v977_v37 = vadd.f32 1e-06, %v976_v35  ;;  %v1024_v35 = vperm.slane %v1022_v28, 0 }
 0x624   : > { %1279 = vrsqrt.f32 %v977_v37  ;;  %vm984_vm14 = vweird.f32 %v977_v37 }
 0x62a   : > { %v1280_v19 = vpop.eup %1279 }
 0x62b   : > { %v979_v38 = vmul.f32 %v1280_v19, %v977_v37  ;;  %vm985_vm13 = vweird.f32 %v1280_v19 }
 0x62c   : > { %vm986_vm15 = vmor %vm984_vm14, %vm985_vm13 }
 0x62d   : > { %v980_v39 = vmul.f32 %v1280_v19, %v979_v38 }
 0x62f   : > { %v981_v40 = vmul.f32 0.5, %v980_v39 }
 0x631   : > { %v982_v41 = vsub.f32 1.5, %v981_v40 }
 0x633   : > { %v983_v42 = vmul.f32 %v1280_v19, %v982_v41 }
 0x635   : > { %v987_v44 = vsel %vm986_vm15, %v1280_v19, %v983_v42 }
 0x636   : > { %v988_v8 = vmul.f32 %v987_v44, %v971_v1  ;;  %v1114_v1 = vpack.c.bf16 %v1086_v63, %v1085_v62 }
 0x638   : > { %v992_v46 = vmul.f32 %v1256_v43, %v988_v8  ;;  %1127 = vmatpush.bf16.msra.mxu1 %v1114_v1 }
 0x63a   : > { %v996_v47 = vadd.f32 %v1257_v45, %v992_v46 }
 0x63c   : > { %v1013_v48 = vpack.c.bf16 %v996_v47, %v996_v47  ;;  %1128 = vmatpush.bf16.msra.mxu1 %v1113_v6 }
 0x63e   : > { %1230 = vmatmul.msk.bf16.vlgmr.msra.gmra.mxu3 %vm603_vm5, %v1013_v48  ;;  %1231 = vmatmul.msk.bf16.vlgmr.msrb.gmra.mxu0 %vm603_vm5, %v1013_v48 }
 0x640   : > { %1129 = vmatpush.bf16.msra.mxu1 %v1112_v14 }
 0x644   : > { %1130 = vmatpush.bf16.msra.mxu1 %v1111_v23 }
 0x648   : > { %1131 = vmatpush.bf16.msra.mxu1 %v1110_v27 }
 0x64c   : > { %1132 = vmatpush.bf16.msra.mxu1 %v1109_v30 }
 0x6bb   : > { %v1053_v32 = vpop.f32.mrf.mxu0 }
 0x6bc   : > { %v1054_v33 = vadd.f32 %v1053_v32, %v1025_v31 }
 0x6be   : > { %v1060_v34 = vmul.f32 0.044715, %v1054_v33  ;;  %v1058_v48 = vmul.f32 0.5, %v1054_v33 }
 0x6c0   : > { %v1062_v36 = vmul.f32 %v1060_v34, %v1054_v33 }
 0x6c1   : > { %v1040_v37 = vpop.f32.mrf.mxu3 }
 0x6c2   : > { %v1064_v19 = vmul.f32 %v1062_v36, %v1054_v33  ;;  %v1041_v38 = vadd.f32 %v1040_v37, %v1024_v35 }
 0x6c3   : > { %v1055_v39 = vpop.f32.mrf.mxu0 }
 0x6c4   : > { %v1059_v40 = vmul.f32 0.044715, %v1041_v38  ;;  %v1066_v41 = vadd.f32 %v1064_v19, %v1054_v33  ;;  %v1057_v53 = vmul.f32 0.5, %v1041_v38 }
 0x6c6   : > { %v1061_v42 = vmul.f32 %v1059_v40, %v1041_v38  ;;  %v1068_v43 = vmul.f32 0.7978846, %v1066_v41 }
 0x6c8   : > { %v1063_v44 = vmul.f32 %v1061_v42, %v1041_v38  ;;  %1281 = vtanh.f32 %v1068_v43 }
 0x6c9   : > { %v1042_v8 = vpop.f32.mrf.mxu3 }
 0x6ca   : > { %v1065_v45 = vadd.f32 %v1063_v44, %v1041_v38 }
 0x6cc   : > { %v1067_v46 = vmul.f32 0.7978846, %v1065_v45 }
 0x6ce   : > { %v1282_v47 = vpop.eup %1281  ;;  %1283 = vtanh.f32 %v1067_v46 }
 0x6cf   : > { %v1072_v49 = vadd.f32 1.0, %v1282_v47 }
 0x6d1   : > { %v1074_v50 = vmul.f32 %v1072_v49, %v1058_v48 }
 0x6d3   : > { %v1108_v51 = vpack.c.bf16 %v1074_v50, %v1074_v50 }
 0x6d4   : > { %v1284_v52 = vpop.eup %1283 }
 0x6d5   : > { %1146 = vmatmul.bf16.vlgmr.msrb.gmra.mxu2 %v1108_v51  ;;  %v1071_v54 = vadd.f32 1.0, %v1284_v52 }
 0x6d7   : > { %v1073_v55 = vmul.f32 %v1071_v54, %v1057_v53 }
 0x6d9   : > { %v1107_v56 = vpack.c.bf16 %v1073_v55, %v1073_v55 }
 0x6db   : > { %1133 = vmatmul.bf16.vlgmr.msra.gmra.mxu1 %v1107_v56 }
 0x758   : > { %v1134_v57 = vpop.f32.mrf.mxu1  ;;  %v1147_v58 = vpop.f32.mrf.mxu2 }
 0x759   : > { %v1148_v60 = vadd.f32 %v1147_v58, %v1134_v57 }
 0x75b   : > { %v1151_v62 = vadd.f32 %v1148_v60, %v1583_v59 }
 0x75d   : > { %v1156_v63 = vadd.f32 %v1258_v61, %v1151_v62 }
 0x75f   : > { %1157 = vst.msk [vmem:[%s543_s28] sm:$0x1f] %vm548_vm0, %v1156_v63 }
 0x760   : > { %v1136_v1 = vpop.f32.mrf.mxu1  ;;  %v1149_v2 = vpop.f32.mrf.mxu2 }
 0x761 PF: > { %s27_s24 = sadd.s32 1, %s1291_s24  }
 0x762   : > { %p24_p4 = scmp.ge.s32.totalorder %s27_s24, 6  }
 0x764   :  { %26 = sbr.rel (!%p24_p4) target bundleno = 3 (0x3), region = 118 }

// kernel: _lambda_.19
= control target key start
LH: loop header
LB: loop body
LE: loop exit
PB: predicated region body
PF: predicated region fallthrough
CT: control target
= control target key end

     0   :  { %13 = vsyncpa [#allocation3], 0  ;;  %s330_s0 = inlined_call_operand.vmem [shape: f32[2,64], index: 0, kind: input, shape index: {}]   ;;  %s331_s1 = inlined_call_operand.vmem [shape: f32[64,64], index: 1, kind: input, shape index: {}]   ;;  %s332_s2 = inlined_call_operand.vmem [shape: f32[1,64], index: 2, kind: input, shape index: {}]   ;;  %s333_s3 = inlined_call_operand.vmem [shape: f32[64,2], index: 3, kind: input, shape index: {}]   ;;  %s334_s4 = inlined_call_operand.vmem [shape: f32[1,2], index: 4, kind: input, shape index: {}]   ;;  %s335_s5 = inlined_call_operand.vmem [shape: f32[2,2], index: 5, kind: input, shape index: {}]   ;;  %s336_s6 = inlined_call_operand.hbm [shape: f32[2,2], index: 6, kind: output, shape index: {0}]   ;;  %s337_s7 = inlined_call_operand.hbm [shape: f32[1,1], index: 7, kind: output, shape index: {1}]  }
   0x1   :  { %v35_v0 = vld [vmem:[%s331_s1 + $0x30] sm:$0xff]  ;;  %v36_v1 = vld [vmem:[%s331_s1 + $0x38] sm:$0xff]  ;;  %v33_v2 = vld [vmem:[%s331_s1 + $0x20] sm:$0xff] }
   0x2   :  { %v41_v3 = vpack.c.bf16 %v36_v1, %v35_v0  ;;  %v34_v4 = vld [vmem:[%s331_s1 + $0x28] sm:$0xff]  ;;  %v31_v5 = vld [vmem:[%s331_s1 + $0x10] sm:$0xff]  ;;  %v71_v8 = vld [vmem:[%s333_s3 + $0x38] sm:$0xff] }
   0x3   :  { %v40_v6 = vpack.c.bf16 %v34_v4, %v33_v2  ;;  %v70_v7 = vld [vmem:[%s333_s3 + $0x30] sm:$0xff]  ;;  %v68_v9 = vld [vmem:[%s333_s3 + $0x20] sm:$0xff]  ;;  %v32_v10 = vld [vmem:[%s331_s1 + $0x18] sm:$0xff] }
   0x4   :  { %54 = vmatpush.bf16.msra.mxu0 %v41_v3  ;;  %v76_v11 = vpack.c.bf16 %v71_v8, %v70_v7  ;;  %v69_v12 = vld [vmem:[%s333_s3 + $0x28] sm:$0xff] }
   0x5   :  { %14 = vsyncpa [#allocation5], 0  ;;  %v75_v13 = vpack.c.bf16 %v69_v12, %v68_v9  ;;  %v39_v14 = vpack.c.bf16 %v32_v10, %v31_v5  ;;  %v29_v15 = vld [vmem:[%s331_s1] sm:$0xff]  ;;  %v30_v16 = vld [vmem:[%s331_s1 + $0x8] sm:$0xff]  ;;  %vm46_vm0 = vcmask 523264   ;;  %vm97_vm1 = vcmask 9216  }
   0x6   :  { %88 = vmatpush.bf16.msra.mxu1 %v76_v11  ;;  %v38_v17 = vpack.c.bf16 %v30_v16, %v29_v15  ;;  %v28_v18 = vld [vmem:[%s330_s0] sm:$0x3]  ;;  %v66_v20 = vld [vmem:[%s333_s3 + $0x10] sm:$0xff]  ;;  %v67_v21 = vld [vmem:[%s333_s3 + $0x18] sm:$0xff]  ;;  %s135_s15 = sshll.u32 %s336_s6, 4  ;;  %vm117_vm2 = vcmask 1041408   ;;  %s136_s15 = int_to_ptr.hbm [resolvable:$true] %s135_s15 }
   0x7   :  { %v37_v19 = vpack.c.bf16 %v28_v18, %v28_v18  ;;  %v74_v22 = vpack.c.bf16 %v67_v21, %v66_v20  ;;  %v64_v23 = vld [vmem:[%s333_s3] sm:$0xff]  ;;  %v65_v24 = vld [vmem:[%s333_s3 + $0x8] sm:$0xff]  ;;  %s223_s6 = smov [#allocation4]   ;;  %s146_s20 = sshll.u32 %s337_s7, 4  ;;  %vm126_vm3 = vcmask 0   ;;  %s147_s20 = int_to_ptr.hbm [resolvable:$true] %s146_s20 }
   0x8   :  { %55 = vmatpush.bf16.msra.mxu0 %v40_v6  ;;  %v73_v25 = vpack.c.bf16 %v65_v24, %v64_v23  ;;  %v164_v26 = vld [vmem:[%s332_s2] ss:$0 sm:$0xff]  ;;  %s144_s17 = sshll.u32 %s223_s6, 4  ;;  %s145_s17 = int_to_ptr.vmem [resolvable:$true] %s144_s17 }
   0x9   :  { %v165_v32 = vld [vmem:[%s334_s4] ss:$0 sm:$0xff] }
   0xa   :  { %89 = vmatpush.bf16.msra.mxu1 %v75_v13  ;;  %v111_v34 = vld [vmem:[%s335_s5] sm:$0x3]  ;;  %s222_s5 = smov [#allocation2]  }
   0xb   :  { %s133_s16 = sshll.u32 %s222_s5, 4  ;;  %s134_s16 = int_to_ptr.vmem [resolvable:$true] %s133_s16 }
   0xc   :  { %56 = vmatpush.bf16.msra.mxu0 %v39_v14 }
   0xe   :  { %90 = vmatpush.bf16.msra.mxu1 %v74_v22 }
  0x10   :  { %57 = vmatpush.bf16.msra.mxu0 %v38_v17 }
  0x12   :  { %91 = vmatpush.bf16.msra.mxu1 %v73_v25 }
  0x13   :  { %160 = vmatmul.msk.bf16.vlgmr.msra.gmra.mxu0 %vm46_vm0, %v37_v19 }
  0x90   :  { %v59_v27 = vpop.f32.mrf.mxu0 }
  0x91   :  { %v60_v28 = vadd.f32 %v164_v26, %v59_v27 }
  0x93   :  { %v63_v29 = vmax.f32 %v60_v28, 0.0 }
  0x95   :  { %v72_v30 = vpack.c.bf16 %v63_v29, %v63_v29 }
  0x97   :  { %161 = vmatmul.msk.bf16.vlgmr.msra.gmra.mxu1 %vm46_vm0, %v72_v30 }
  0x98   :  { %v61_v31 = vpop.f32.mrf.mxu0 }
 0x114   :  { %v93_v33 = vpop.f32.mrf.mxu1 }
 0x115   :  { %v94_v35 = vadd.f32 %v165_v32, %v93_v33 }
 0x117   :  { %v99_v36 = vsel %vm97_vm1, %v94_v35, -inf  ;;  %98 = vst.msk [vmem:[#allocation2] sm:$0x3] %vm97_vm1, %v94_v35  ;;  %v112_v37 = vmul.f32 %v111_v34, %v94_v35 }
 0x118   :  { %100 = vmax.xlane.f32.xlu0 %v99_v36  ;;  %138 = dma.vmem_to_hbm [thread:$0]  %s134_s16, 32, %s136_s15, [#allocation3]  }
 0x119   :  { %v113_v38 = vsel %vm97_vm1, %v112_v37, 0.0 }
 0x11a   :  { %114 = vadd.xlane.f32.xlu1 %v113_v38 }
 0x11c   :  { %v95_v39 = vpop.f32.mrf.mxu1 }
 0x18b   :  { %v101_v40 = vpop.xlane.xlu0 %100 }
 0x18c   :  { %v102_v41 = vsub.f32 %v94_v35, %v101_v40 }
 0x18d   :  { %v115_v49 = vpop.xlane.xlu1 %114 }
 0x18e   :  { %v103_v42 = vmul.f32 1.442695, %v102_v41 }
 0x190   :  { %166 = vpow2.f32 %v103_v42 }
 0x196   :  { %v167_v43 = vpop.eup %166 }
 0x197   :  { %v105_v44 = vsel %vm97_vm1, %v167_v43, 0.0 }
 0x198   :  { %106 = vadd.xlane.f32.xlu0 %v105_v44 }
 0x20b   :  { %v107_v45 = vpop.xlane.xlu0 %106 }
 0x20c   :  { %168 = vlog2.f32 %v107_v45 }
 0x212   :  { %v169_v46 = vpop.eup %168 }
 0x213   :  { %v109_v47 = vmul.f32 0.6931472, %v169_v46 }
 0x215   :  { %v110_v48 = vadd.f32 %v109_v47, %v101_v40 }
 0x217   :  { %v116_v50 = vsub.f32 %v110_v48, %v115_v49 }
 0x219   :  { %v118_v51 = vsel %vm117_vm2, %v116_v50, 0.0 }
 0x21a   :  { %v119_v52 = vrot.slane %v118_v51, 4 }
 0x21c   :  { %v120_v53 = vadd.f32 %v119_v52, %v118_v51 }
 0x21e   :  { %v121_v54 = vrot.slane %v120_v53, 2 }
 0x220   :  { %v122_v55 = vadd.f32 %v121_v54, %v120_v53 }
 0x222   :  { %v123_v56 = vrot.slane %v122_v55, 1 }
 0x224   :  { %v124_v57 = vadd.f32 %v123_v56, %v122_v55 }
 0x226   :  { %v125_v58 = vmul.f32 0.5, %v124_v57 }
 0x228   :  { %127 = vst.msk [vmem:[#allocation4] sm:$0x1] %vm126_vm3, %v125_v58 }
 0x229   :  { %149 = dma.vmem_to_hbm [thread:$0]  %s145_s17, 16, %s147_s20, [#allocation5]  }
 0x22a   :  { %218 = dma.done.wait [#allocation3], 32  }
 0x22b   :  { %219 = vsyncadd [#allocation3], 4294967264 }
 0x22c   :  { %220 = dma.done.wait [#allocation5], 16  }
 0x22d   :  { %221 = vsyncadd [#allocation5], 4294967280 }
 0x22e   :  { %158 = vsyncpa [#allocation3], 1 }
 0x22f   :  { %159 = vsyncpa [#allocation5], 1 }

// kernel: _lambda_.17
= control target key start
LH: loop header
LB: loop body
LE: loop exit
PB: predicated region body
PF: predicated region fallthrough
CT: control target
= control target key end

     0   :  { %s2487_s6 = smov 1   ;;  %s2488_s10 = smov 2   ;;  %s3029_s0 = inlined_call_operand.smem [shape: u32[30], index: -1, kind: input, shape index: {}] }
   0x1   :  { %s2536_s5 = sld [smem:[%s3029_s0]]   ;;  %s2489_s14 = smov 3  }
   0x2   :  { %s2541_s9 = sld [smem:[%s3029_s0 + %s2487_s6]]   ;;  %s2490_s18 = smov 4  }
   0x3   :  { %s2546_s13 = sld [smem:[%s3029_s0 + %s2488_s10]]   ;;  %s2491_s22 = smov 5  }
   0x4   :  { %s2551_s17 = sld [smem:[%s3029_s0 + %s2489_s14]]   ;;  %s2492_s26 = smov 6  }
   0x5   :  { %s2556_s21 = sld [smem:[%s3029_s0 + %s2490_s18]]   ;;  %s2493_s30 = smov 7  }
   0x6   :  { %s2561_s25 = sld [smem:[%s3029_s0 + %s2491_s22]]   ;;  %s2494_s4 = smov 8  }
   0x7   :  { %s2566_s29 = sld [smem:[%s3029_s0 + %s2492_s26]]   ;;  %s2495_s10 = smov 9  }
   0x8   :  { %s2571_s3 = sld [smem:[%s3029_s0 + %s2493_s30]]   ;;  %s2496_s15 = smov 10  }
   0x9   :  { %s2576_s8 = sld [smem:[%s3029_s0 + %s2494_s4]]   ;;  %s2497_s20 = smov 11  }
   0xa   :  { %s2581_s14 = sld [smem:[%s3029_s0 + %s2495_s10]]   ;;  %s2498_s26 = smov 12  }
   0xb   :  { %s2586_s19 = sld [smem:[%s3029_s0 + %s2496_s15]]   ;;  %s2499_s1 = smov 13  }
   0xc   :  { %s2591_s24 = sld [smem:[%s3029_s0 + %s2497_s20]]   ;;  %s2500_s7 = smov 14  }
   0xd   :  { %s2596_s30 = sld [smem:[%s3029_s0 + %s2498_s26]]   ;;  %s2501_s15 = smov 15  }
   0xe   :  { %s2601_s6 = sld [smem:[%s3029_s0 + %s2499_s1]]   ;;  %s2502_s22 = smov 16  }
   0xf   :  { %s2606_s12 = sld [smem:[%s3029_s0 + %s2500_s7]]   ;;  %s2503_s28 = smov 17  }
  0x10   :  { %s2611_s20 = sld [smem:[%s3029_s0 + %s2501_s15]]   ;;  %s2504_s7 = smov 18  }
  0x11   :  { %s2616_s27 = sld [smem:[%s3029_s0 + %s2502_s22]]   ;;  %s2505_s15 = smov 19  }
  0x12   :  { %3035 = sst [smem:[#allocation12_spill]] %s2591_s24  ;;  %s2506_s22 = smov 20  }
  0x13   :  { %3036 = sst [smem:[#allocation13_spill]] %s2596_s30 }
  0x14   :  { %s2621_s4 = sld [smem:[%s3029_s0 + %s2503_s28]]   ;;  %s2507_s28 = smov 21  }
  0x15   :  { %3037 = sst [smem:[#allocation14_spill]] %s2606_s12 }
  0x16   :  { %s2626_s12 = sld [smem:[%s3029_s0 + %s2504_s7]]   ;;  %s2508_s7 = smov 22  }
  0x17   :  { %3038 = sst [smem:[#allocation15_spill]] %s2616_s27 }
  0x18   :  { %s2631_s30 = sld [smem:[%s3029_s0 + %s2505_s15]]   ;;  %s2509_s15 = smov 23  }
  0x19   :  { %s2636_s27 = sld [smem:[%s3029_s0 + %s2506_s22]]   ;;  %s2510_s22 = smov 24  }
  0x1a   :  { %3039 = sst [smem:[#allocation16_spill]] %s2621_s4 }
  0x1b   :  { %s2641_s4 = sld [smem:[%s3029_s0 + %s2507_s28]]   ;;  %s2511_s28 = smov 25  }
  0x1c   :  { %3040 = sst [smem:[#allocation17_spill]] %s2626_s12 }
  0x1d   :  { %s2646_s12 = sld [smem:[%s3029_s0 + %s2508_s7]]   ;;  %s2512_s7 = smov 26  }
  0x1e   :  { %3041 = sst [smem:[#allocation18_spill]] %s2631_s30 }
  0x1f   :  { %3042 = sst [smem:[#allocation19_spill]] %s2636_s27 }
  0x20   :  { %s2651_s30 = sld [smem:[%s3029_s0 + %s2509_s15]]   ;;  %s2513_s15 = smov 27  }
  0x21   :  { %3043 = sst [smem:[#allocation20_spill]] %s2641_s4 }
  0x22   :  { %s2656_s27 = sld [smem:[%s3029_s0 + %s2510_s22]]   ;;  %s2514_s22 = smov 28  }
  0x23   :  { %s2661_s4 = sld [smem:[%s3029_s0 + %s2511_s28]]   ;;  %s2515_s28 = smov 29  }
  0x24   :  { %s2666_s24 = sld [smem:[%s3029_s0 + %s2512_s7]]  }
  0x26   :  { %3044 = sst [smem:[#allocation21_spill]] %s2651_s30 }
  0x27   :  { %s2671_s30 = sld [smem:[%s3029_s0 + %s2513_s15]]  }
  0x28   :  { %3045 = sst [smem:[#allocation22_spill]] %s2656_s27 }
  0x29   :  { %3046 = sst [smem:[#allocation23_spill]] %s2661_s4 }
  0x2a   :  { %s2676_s27 = sld [smem:[%s3029_s0 + %s2514_s22]]  }
  0x2b   :  { %s2681_s4 = sld [smem:[%s3029_s0 + %s2515_s28]]  }
  0x2c   :  { %64 = vsyncpa [#allocation3], 0 }
  0x2d   :  { %65 = vsyncpa [#allocation5], 0 }
  0x2e   :  { %66 = vsyncpa [#allocation8], 0  ;;  %s2683_s7 = smov 0  }
  0x2f LB: > { %3047 = sst [smem:[#allocation24_spill]] %s2485_s7  ;;  %s817_s10 = sshll.u32 %s2666_s24, 4  ;;  %s2485_s7 = sphi %s2683_s7, %s72_s7   ;;  %s2689_s10 = int_to_ptr.hbm [resolvable:$true] %s817_s10 }
  0x30   : > { %s2692_s0 = sadd.s32 4294967295, %s2485_s7   ;;  %p2159_p0 = scmp.ge.s32.totalorder %s2485_s7, 1 }
  0x31   : > { %p727_p1 = scmp.lt.s32.totalorder %s2485_s7, 3  ;;  %p2230_p2 = scmp.eq.s32.totalorder %s2692_s0, 0 }
  0x32   : > { %s2516_s15 = smov [#allocation4]   ;;  %s796_s18 = sshll.u32 %s2646_s12, 4  ;;  %s2704_s18 = int_to_ptr.hbm [resolvable:$true] %s796_s18 }
  0x33   : > { %p2697_p3 = pnand %p2159_p0, %p727_p1  ;;  %s819_s16 = sshll.u32 %s2516_s15, 4  ;;  %s820_s16 = int_to_ptr.vmem [resolvable:$true] %s819_s16 }
  0x34   : > { %s829_s22 = sshll.u32 %s2671_s30, 4  ;;  %s2517_s26 = smov [#allocation2]   ;;  %s2716_s22 = int_to_ptr.hbm [resolvable:$true] %s829_s22 }
  0x35   : > { %p2217_p4 = pneg %p2697_p3  ;;  %s2713_s28 = sshll.u32 %s2517_s26, 4  ;;  %s799_s28 = int_to_ptr.vmem [resolvable:$true] %s2713_s28 }
  0x36   : > { %s2347_s1 = sshra.s32 %s2689_s10, 4  ;;  %s2354_s15 = scalar_lea.hbm %s2666_s24, 1  ;;  %s2348_s1 = int_to_ptr.hbm [resolvable:$true] %s2347_s1 }
  0x37   : > { %p2709_p5 = pnand %p2230_p2, %p2217_p4  ;;  %s2349_s2 = scalar_lea.hbm %s2348_s1, 1 }
  0x38   : > { %p2350_p6 = scmp.ne.s32.totalorder %s2348_s1, %s2349_s2  ;;  %p2355_p10 = scmp.lt.s32.totalorder %s2348_s1, %s2666_s24 }
  0x39   : > { %p2351_p7 = pneg %p2709_p5  ;;  %p2356_p11 = scmp.lt.s32.totalorder %s2354_s15, %s2349_s2 }
  0x3b   : > { %p2352_p8 = pnand %p2351_p7, %p2350_p6  ;;  %p2357_p12 = por %p2356_p11, %p2355_p10 }
  0x3d   : > { %p2353_p9 = pneg %p2352_p8 }
  0x3f   : > { %p2358_p13 = pnand %p2357_p12, %p2353_p9 }
  0x41   : > { %2361 = shalt.err (!%p2358_p13)
}
  0x42   : > { %2223 = dma.hbm_to_vmem [thread:$0]  (!%p2709_p5), %s2689_s10, 16, %s820_s16, [#allocation5]  }
  0x43   : > { %s2377_s26 = sshra.s32 %s2704_s18, 4  ;;  %s2384_s1 = scalar_lea.hbm %s2646_s12, 1  ;;  %s2378_s26 = int_to_ptr.hbm [resolvable:$true] %s2377_s26 }
  0x44   : > { %s2379_s7 = scalar_lea.hbm %s2378_s26, 1  ;;  %p2385_p6 = scmp.lt.s32.totalorder %s2378_s26, %s2646_s12 }
  0x45   : > { %p2380_p0 = scmp.ne.s32.totalorder %s2378_s26, %s2379_s7  ;;  %p2386_p8 = scmp.lt.s32.totalorder %s2384_s1, %s2379_s7 }
  0x47   : > { %p2382_p1 = pnand %p2380_p0, %p2351_p7  ;;  %p2387_p9 = por %p2386_p8, %p2385_p6 }
  0x49   : > { %p2383_p4 = pneg %p2382_p1 }
  0x4b   : > { %p2388_p10 = pnand %p2387_p9, %p2383_p4 }
  0x4d   : > { %2391 = shalt.err (!%p2388_p10)
}
  0x4e   : > { %2220 = dma.hbm_to_vmem [thread:$0]  (!%p2709_p5), %s2704_s18, 16, %s799_s28, [#allocation3]  }
  0x4f   : > { %s2518_s10 = smov [#allocation6]   ;;  %s841_s2 = sshll.u32 %s2676_s27, 4  ;;  %s842_s2 = int_to_ptr.hbm [resolvable:$true] %s841_s2 }
  0x50   : > { %s831_s16 = sshll.u32 %s2518_s10, 4  ;;  %s2407_s15 = sshra.s32 %s2716_s22, 4  ;;  %s832_s16 = int_to_ptr.vmem [resolvable:$true] %s831_s16  ;;  %s2408_s15 = int_to_ptr.hbm [resolvable:$true] %s2407_s15 }
  0x51   : > { %s2409_s26 = scalar_lea.hbm %s2408_s15, 1  ;;  %s2414_s7 = scalar_lea.hbm %s2671_s30, 1 }
  0x52   : > { %p2410_p11 = scmp.ne.s32.totalorder %s2408_s15, %s2409_s26  ;;  %p2415_p0 = scmp.lt.s32.totalorder %s2408_s15, %s2671_s30 }
  0x53   : > { %p2416_p1 = scmp.lt.s32.totalorder %s2414_s7, %s2409_s26 }
  0x54   : > { %p2412_p12 = pnand %p2410_p11, %p2351_p7 }
  0x55   : > { %p2417_p4 = por %p2416_p1, %p2415_p0 }
  0x56   : > { %p2413_p13 = pneg %p2412_p12 }
  0x58   : > { %p2418_p6 = pnand %p2417_p4, %p2413_p13 }
  0x5a   : > { %2421 = shalt.err (!%p2418_p6)
}
  0x5b   : > { %2226 = dma.hbm_to_vmem [thread:$0]  (!%p2709_p5), %s2716_s22, 16, %s832_s16, [#allocation5]  }
  0x5c   : > { %s2519_s18 = smov [#allocation7]   ;;  %s2437_s1 = sshra.s32 %s842_s2, 4  ;;  %s2438_s1 = int_to_ptr.hbm [resolvable:$true] %s2437_s1 }
  0x5d   : > { %s843_s28 = sshll.u32 %s2519_s18, 4  ;;  %s2439_s10 = scalar_lea.hbm %s2438_s1, 1  ;;  %s844_s28 = int_to_ptr.vmem [resolvable:$true] %s843_s28 }
  0x5e   : > { %p2440_p8 = scmp.ne.s32.totalorder %s2438_s1, %s2439_s10  ;;  %s2444_s15 = scalar_lea.hbm %s2676_s27, 1 }
  0x5f   : > { %p2445_p11 = scmp.lt.s32.totalorder %s2438_s1, %s2676_s27  ;;  %p2446_p12 = scmp.lt.s32.totalorder %s2444_s15, %s2439_s10 }
  0x60   : > { %p2442_p9 = pnand %p2440_p8, %p2351_p7 }
  0x61   : > { %p2447_p13 = por %p2446_p12, %p2445_p11 }
  0x62   : > { %p2443_p10 = pneg %p2442_p9 }
  0x64   : > { %p2448_p0 = pnand %p2447_p13, %p2443_p10 }
  0x66   : > { %2451 = shalt.err (!%p2448_p0)
}
  0x67   : > { %2229 = dma.hbm_to_vmem [thread:$0]  (!%p2709_p5), %s842_s2, 16, %s844_s28, [#allocation8]  }
  0x68   : > { %876 = sbr.rel (%p2697_p3) target bundleno = 3328 (0xd00), region = 136 }
  0x6d   : > { %2472 = dma.done.wait (%p2230_p2), [#allocation3], 16  }
  0x6e   : > { %2474 = vsyncadd (%p2230_p2), [#allocation3], 4294967280 }
  0x6f   : > { %2476 = dma.done.wait (%p2230_p2), [#allocation5], 32  }
  0x70   : > { %2478 = vsyncadd (%p2230_p2), [#allocation5], 4294967264 }
  0x71   : > { %2480 = dma.done.wait (%p2230_p2), [#allocation8], 16  }
  0x72   : > { %2482 = vsyncadd (%p2230_p2), [#allocation8], 4294967280  ;;  %p973_p3 = scmp.lt.s32.totalorder %s2692_s0, 1  ;;  %v997_v0 = vld [vmem:[%s2551_s17 + $0x30] sm:$0xff]  ;;  %v998_v1 = vld [vmem:[%s2551_s17 + $0x38] sm:$0xff]  ;;  %vm1008_vm0 = vcmask 523264  }
  0x73   : > { %v1031_v2 = vld [vmem:[%s2561_s25 + $0x30] sm:$0xff]  ;;  %v1003_v3 = vpack.c.bf16 %v998_v1, %v997_v0  ;;  %v1032_v4 = vld [vmem:[%s2561_s25 + $0x38] sm:$0xff]  ;;  %v995_v5 = vld [vmem:[%s2551_s17 + $0x20] sm:$0xff]  ;;  %vm1085_vm1 = vcmask 130048   ;;  %s2520_s23 = smov 80   ;;  %s2521_s16 = smov 96  }
  0x74   : > { %v996_v6 = vld [vmem:[%s2551_s17 + $0x28] sm:$0xff]  ;;  %s3064_s0 = smov (!%p973_p3, %s2692_s0), 1  ;;  %v1036_v7 = vpack.c.bf16 %v1032_v4, %v1031_v2  ;;  %v1029_v8 = vld [vmem:[%s2561_s25 + $0x20] sm:$0xff]  ;;  %v993_v12 = vld [vmem:[%s2551_s17 + $0x10] sm:$0xff]  ;;  %s2522_s2 = smov 112   ;;  %vm1110_vm2 = vcmask 64512  }
  0x75   : > { %v1030_v9 = vld [vmem:[%s2561_s25 + $0x28] sm:$0xff]  ;;  %1016 = vmatpush.bf16.msra.mxu0 %v1003_v3  ;;  %v1002_v10 = vpack.c.bf16 %v996_v6, %v995_v5  ;;  %v994_v13 = vld [vmem:[%s2551_s17 + $0x18] sm:$0xff]  ;;  %v1027_v14 = vld [vmem:[%s2561_s25 + $0x10] sm:$0xff]  ;;  %s2786_s11 = sshll.u32 %s3064_s0, 3  ;;  %s979_s26 = scalar_lea.vmem %s2541_s9, %s3064_s0  ;;  %vm1127_vm3 = vcmask 1043456   ;;  %vm1334_vm4 = vcmask 261120  }
  0x76   : > { %1045 = vmatpush.bf16.msra.mxu1 %v1036_v7  ;;  %v1035_v11 = vpack.c.bf16 %v1030_v9, %v1029_v8  ;;  %v1028_v15 = vld [vmem:[%s2561_s25 + $0x18] sm:$0xff]  ;;  %v991_v16 = vld [vmem:[%s2551_s17] sm:$0xff]  ;;  %v992_v17 = vld [vmem:[%s2551_s17 + $0x8] sm:$0xff]  ;;  %v1001_v18 = vpack.c.bf16 %v994_v13, %v993_v12  ;;  %s976_s22 = scalar_lea.vmem %s2536_s5, %s2786_s11  ;;  %s2523_s0 = smov 16   ;;  %vm1336_vm5 = vcmask 392192   ;;  %vm1529_vm10 = vcmask 39936  }
  0x77   : > { %v1025_v19 = vld [vmem:[%s2561_s25] sm:$0xff]  ;;  %v1026_v20 = vld [vmem:[%s2561_s25 + $0x8] sm:$0xff]  ;;  %v1034_v21 = vpack.c.bf16 %v1028_v15, %v1027_v14  ;;  %v1000_v22 = vpack.c.bf16 %v992_v17, %v991_v16  ;;  %v1060_v26 = vld [vmem:[%s2571_s3 + $0x30] sm:$0xff]  ;;  %s2524_s7 = smov 32   ;;  %s2525_s18 = smov 48   ;;  %vm1546_vm11 = vcmask 1041408  }
  0x78   : > { %v2794_v23 = vld [vmem:[%s976_s22] sm:$0xff]  ;;  %v1033_v24 = vpack.c.bf16 %v1026_v20, %v1025_v19  ;;  %v1061_v27 = vld [vmem:[%s2571_s3 + $0x38] sm:$0xff]  ;;  %v1059_v30 = vld [vmem:[%s2571_s3 + $0x28] sm:$0xff]  ;;  %s983_s28 = scalar_lea.vmem %s2546_s13, %s2786_s11  ;;  %s3050_s1 = sld [smem:[#allocation12_spill]]  ;;  %vm1547_vm12 = vcmask 1042432  }
  0x79   : > { %1017 = vmatpush.bf16.msra.mxu0 %v1002_v10  ;;  %v999_v25 = vpack.c.bf16 %v2794_v23, %v2794_v23  ;;  %v1058_v28 = vld [vmem:[%s2571_s3 + $0x20] sm:$0xff]  ;;  %v1065_v29 = vpack.c.bf16 %v1061_v27, %v1060_v26  ;;  %v1056_v43 = vld [vmem:[%s2571_s3 + $0x10] sm:$0xff]  ;;  %v1057_v44 = vld [vmem:[%s2571_s3 + $0x18] sm:$0xff]  ;;  %s3051_s10 = sld [smem:[#allocation13_spill]] }
  0x7a   : > { %1046 = vmatpush.bf16.msra.mxu1 %v1035_v11  ;;  %v1064_v31 = vpack.c.bf16 %v1059_v30, %v1058_v28  ;;  %v2288_v32 = vld [vmem:[%s2566_s29] ss:$0 sm:$0xff]  ;;  %v1063_v45 = vpack.c.bf16 %v1057_v44, %v1056_v43  ;;  %v1055_v47 = vld [vmem:[%s2571_s3 + $0x8] sm:$0xff]  ;;  %s3052_s15 = sld [smem:[#allocation15_spill]] }
  0x7b   : > { %1074 = vmatpush.bf16.msra.mxu2 %v1065_v29  ;;  %v2287_v35 = vld [vmem:[%s2556_s21] ss:$0 sm:$0xff]  ;;  %s3053_s22 = sld [smem:[#allocation14_spill]] }
  0x7c   : > { %v1054_v46 = vld [vmem:[%s2571_s3] sm:$0xff] }
  0x7d   : > { %1018 = vmatpush.bf16.msra.mxu0 %v1001_v18  ;;  %v1062_v48 = vpack.c.bf16 %v1055_v47, %v1054_v46  ;;  %v2289_v58 = vld [vmem:[%s979_s26] ss:$0 sm:$0xff]  ;;  %s3054_s26 = sld [smem:[#allocation16_spill]] }
  0x7e   : > { %1047 = vmatpush.bf16.msra.mxu1 %v1034_v21  ;;  %v2290_v0 = vld [vmem:[%s2576_s8] ss:$0 sm:$0xff] }
  0x7f   : > { %1075 = vmatpush.bf16.msra.mxu2 %v1064_v31 }
  0x81   : > { %1019 = vmatpush.bf16.msra.mxu0 %v1000_v22 }
  0x82   : > { %1048 = vmatpush.bf16.msra.mxu1 %v1033_v24 }
  0x83   : > { %1076 = vmatpush.bf16.msra.mxu2 %v1063_v45 }
  0x84   : > { %2173 = vmatmul.msk.bf16.vlgmr.msra.gmra.mxu0 %vm1008_vm0, %v999_v25 }
  0x85   : > { %2174 = vmatmul.msk.bf16.vlgmr.msra.gmra.mxu1 %vm1008_vm0, %v999_v25 }
  0x87   : > { %1077 = vmatpush.bf16.msra.mxu2 %v1062_v48 }
  0x8a   : > { %2175 = vmatmul.msk.bf16.vlgmr.msra.gmra.mxu2 %vm1008_vm0, %v999_v25 }
 0x101   : > { %v1021_v33 = vpop.f32.mrf.mxu0 }
 0x102   : > { %v1050_v34 = vpop.f32.mrf.mxu1  ;;  %v1022_v38 = vadd.f32 %v2287_v35, %v1021_v33 }
 0x103   : > { %v1051_v36 = vadd.f32 %v2288_v32, %v1050_v34 }
 0x104   : > { %v1083_v42 = vpack.c.bf16 %v1022_v38, %v1022_v38 }
 0x105   : > { %v1084_v37 = vpack.c.bf16 %v1051_v36, %v1051_v36 }
 0x107   : > { %1265 = vrot.lane.b32.xlu2 %v1084_v37, %s2520_s23  ;;  %1207 = vrot.lane.b32.xlu1 %v1084_v37, %s2521_s16  ;;  %v1090_v39 = vsel %vm1085_vm1, %v1084_v37, 0 }
 0x108   : > { %1148 = vrot.lane.b32.xlu0 %v1084_v37, %s2522_s2  ;;  %1099 = vmatpush.bf16.xpose.msra.mxu3 %v1090_v39 }
 0x109   : > { %v1023_v40 = vpop.f32.mrf.mxu0 }
 0x10a   : > { %v1052_v41 = vpop.f32.mrf.mxu1 }
 0x10d   : > { %v1079_v1 = vpop.f32.mrf.mxu2 }
 0x10e   : > { %v1080_v2 = vadd.f32 %v2290_v0, %v1079_v1 }
 0x10f   : > { %1263 = vrot.lane.b32.xlu2 %v1083_v42, %s2520_s23  ;;  %1205 = vrot.lane.b32.xlu1 %v1083_v42, %s2521_s16 }
 0x110   : > { %1145 = vrot.lane.b32.xlu0 %v1083_v42, %s2522_s2  ;;  %2176 = vmatmul.msk.bf16.vlgmr.msra.gmra.mxu3 %vm1085_vm1, %v1083_v42  ;;  %v1123_v3 = vpack.c.bf16 %v1080_v2, %v1080_v2 }
 0x112   : > { %v1129_v4 = vsel %vm1127_vm3, %v1123_v3, 0 }
 0x113   : > { %1138 = vmatpush.bf16.msrb.mxu3 %v1129_v4 }
 0x115   : > { %v1081_v5 = vpop.f32.mrf.mxu2 }
 0x161   : > { %v1266_v49 = vpop.permute.xlu2 %1265 }
 0x162   : > { %v1271_v54 = vsel %vm1085_vm1, %v1266_v49, 0 }
 0x169   : > { %v1264_v57 = vpop.permute.xlu2 %1263 }
 0x179   : > { %v1208_v50 = vpop.permute.xlu1 %1207 }
 0x17a   : > { %v1149_v51 = vpop.permute.xlu0 %1148  ;;  %v1213_v52 = vsel %vm1085_vm1, %v1208_v50, 0 }
 0x17b   : > { %v1154_v53 = vsel %vm1085_vm1, %v1149_v51, 0  ;;  %1222 = vmatpush.bf16.xpose.msrb.mxu2 %v1213_v52 }
 0x17c   : > { %1163 = vmatpush.bf16.xpose.msrb.mxu0 %v1154_v53 }
 0x181   : > { %v1206_v55 = vpop.permute.xlu1 %1205 }
 0x182   : > { %v1146_v56 = vpop.permute.xlu0 %1145  ;;  %2180 = vmatmul.msk.bf16.vlgmr.msrb.gmra.mxu2 %vm1085_vm1, %v1206_v55 }
 0x183   : > { %2178 = vmatmul.msk.bf16.vlgmr.msrb.gmra.mxu0 %vm1085_vm1, %v1146_v56 }
 0x184   : > { %1280 = vmatpush.bf16.xpose.msra.mxu0 %v1271_v54 }
 0x193   : > { %v1101_v59 = vpop.f32.mrf.mxu3  ;;  %2182 = vmatmul.msk.bf16.vlgmr.msra.gmra.mxu0 %vm1085_vm1, %v1264_v57 }
 0x194   : > { %v1105_v60 = vmul.f32 0.25, %v1101_v59 }
 0x196   : > { %v1109_v61 = vadd.f32 %v2289_v58, %v1105_v60 }
 0x198   : > { %v1111_v62 = vsel %vm1110_vm2, %v1109_v61, -inf }
 0x199   : > { %1112 = vmax.xlane.f32.xlu0 %v1111_v62 }
 0x19b   : > { %v1103_v63 = vpop.f32.mrf.mxu3 }
 0x200   : > { %v1165_v6 = vpop.f32.mrf.mxu0 }
 0x201   : > { %v1169_v7 = vmul.f32 0.25, %v1165_v6 }
 0x203   : > { %v1170_v8 = vadd.f32 %v2289_v58, %v1169_v7 }
 0x205   : > { %v1224_v9 = vpop.f32.mrf.mxu2  ;;  %v1171_v10 = vsel %vm1110_vm2, %v1170_v8, -inf }
 0x206   : > { %v1228_v11 = vmul.f32 0.25, %v1224_v9  ;;  %1172 = vmax.xlane.f32.xlu1 %v1171_v10  ;;  %v1345_v9 = vld [vmem:[%s2581_s14 + $0x38] sm:$0xff]  ;;  %v1342_v10 = vld [vmem:[%s2581_s14 + $0x20] sm:$0xff] }
 0x208   : > { %v1167_v12 = vpop.f32.mrf.mxu0  ;;  %v1229_v13 = vadd.f32 %v2289_v58, %v1228_v11 }
 0x209   : > { %v1343_v12 = vld [vmem:[%s2581_s14 + $0x28] sm:$0xff] }
 0x20a   : > { %v1230_v14 = vsel %vm1110_vm2, %v1229_v13, -inf }
 0x20b   : > { %1231 = vmax.xlane.f32.xlu2 %v1230_v14  ;;  %v1340_v14 = vld [vmem:[%s2581_s14 + $0x10] sm:$0xff] }
 0x20c   : > { %v1113_v15 = vpop.xlane.xlu0 %1112 }
 0x20d   : > { %v1114_v16 = vsub.f32 %v1109_v61, %v1113_v15  ;;  %v1226_v17 = vpop.f32.mrf.mxu2  ;;  %v1341_v15 = vld [vmem:[%s2581_s14 + $0x18] sm:$0xff] }
 0x20e   : > { %v1338_v17 = vld [vmem:[%s2581_s14] sm:$0xff] }
 0x20f   : > { %v1115_v18 = vmul.f32 1.442695, %v1114_v16  ;;  %v1348_v16 = vpack.c.bf16 %v1341_v15, %v1340_v14 }
 0x210   : > { %v1282_v19 = vpop.f32.mrf.mxu0 }
 0x211   : > { %2303 = vpow2.f32 %v1115_v18  ;;  %v1286_v20 = vmul.f32 0.25, %v1282_v19  ;;  %v1339_v18 = vld [vmem:[%s2581_s14 + $0x8] sm:$0xff] }
 0x212   : > { %v1347_v19 = vpack.c.bf16 %v1339_v18, %v1338_v17  ;;  %v2293_v18 = vld [vmem:[%s3051_s10] ss:$0 sm:$0xff] }
 0x213   : > { %v1287_v21 = vadd.f32 %v2289_v58, %v1286_v20 }
 0x215   : > { %v1288_v22 = vsel %vm1110_vm2, %v1287_v21, -inf }
 0x216   : > { %1289 = vmax.xlane.f32.xlu2 %v1288_v22 }
 0x217   : > { %v2304_v24 = vpop.eup %2303 }
 0x218   : > { %v1284_v25 = vpop.f32.mrf.mxu0  ;;  %v1117_v26 = vsel %vm1110_vm2, %v2304_v24, 0.0 }
 0x219   : > { %1118 = vadd.xlane.f32.xlu0 %v1117_v26 }
 0x22e   : > { %1184 = vrot.lane.b32.xlu2 %v1123_v3, %s2522_s2 }
 0x279   : > { %v1173_v27 = vpop.xlane.xlu1 %1172 }
 0x27a   : > { %v1174_v28 = vsub.f32 %v1170_v8, %v1173_v27  ;;  %v1344_v8 = vld [vmem:[%s2581_s14 + $0x30] sm:$0xff] }
 0x27b   : > { %v1350_v11 = vpack.c.bf16 %v1345_v9, %v1344_v8 }
 0x27c   : > { %v1175_v29 = vmul.f32 1.442695, %v1174_v28  ;;  %v2291_v28 = vld [vmem:[%s2586_s19] ss:$0 sm:$0xff] }
 0x27d   : > { %1362 = vmatpush.bf16.msra.mxu2 %v1350_v11 }
 0x27e   : > { %2305 = vpow2.f32 %v1175_v29  ;;  %v1232_v30 = vpop.xlane.xlu2 %1231 }
 0x27f   : > { %v1233_v31 = vsub.f32 %v1229_v13, %v1232_v30  ;;  %v1349_v13 = vpack.c.bf16 %v1343_v12, %v1342_v10 }
 0x281   : > { %v1234_v32 = vmul.f32 1.442695, %v1233_v31  ;;  %1363 = vmatpush.bf16.msra.mxu2 %v1349_v13 }
 0x283   : > { %2307 = vpow2.f32 %v1234_v32 }
 0x284   : > { %v2306_v33 = vpop.eup %2305 }
 0x285   : > { %v1177_v34 = vsel %vm1110_vm2, %v2306_v33, 0.0  ;;  %1364 = vmatpush.bf16.msra.mxu2 %v1348_v16  ;;  %v2292_v16 = vld [vmem:[%s3050_s1] ss:$0 sm:$0xff]  ;;  %s987_s1 = scalar_lea.vmem %s2681_s4, %s2786_s11 }
 0x286   : > { %1178 = vadd.xlane.f32.xlu1 %v1177_v34  ;;  %v2526_v34 = vmov 64.0  }
 0x289   : > { %v2308_v35 = vpop.eup %2307  ;;  %v1290_v36 = vpop.xlane.xlu2 %1289  ;;  %1365 = vmatpush.bf16.msra.mxu2 %v1347_v19 }
 0x28a   : > { %v1291_v37 = vsub.f32 %v1287_v21, %v1290_v36  ;;  %v1236_v38 = vsel %vm1110_vm2, %v2308_v35, 0.0 }
 0x28b   : > { %1237 = vadd.xlane.f32.xlu0 %v1236_v38 }
 0x28c   : > { %v1292_v39 = vmul.f32 1.442695, %v1291_v37  ;;  %v1119_v40 = vpop.xlane.xlu0 %1118 }
 0x28d   : > { %2309 = vrcp.f32 %v1119_v40 }
 0x28e   : > { %2311 = vpow2.f32 %v1292_v39 }
 0x291   : > { %v1185_v41 = vpop.permute.xlu2 %1184 }
 0x292   : > { %v1190_v42 = vsel %vm1127_vm3, %v1185_v41, 0 }
 0x293   : > { %v2310_v43 = vpop.eup %2309  ;;  %1199 = vmatpush.bf16.msra.mxu3 %v1190_v42 }
 0x294   : > { %v2312_v44 = vpop.eup %2311  ;;  %v1121_v45 = vmul.f32 %v2310_v43, %v2304_v24 }
 0x295   : > { %v1294_v46 = vsel %vm1110_vm2, %v2312_v44, 0.0 }
 0x296   : > { %1295 = vadd.xlane.f32.xlu1 %v1294_v46  ;;  %v1122_v47 = vpack.c.bf16 %v1121_v45, %v1121_v45  ;;  %v1451_v45 = vld [vmem:[%s2611_s20 + $0x30] sm:$0xff]  ;;  %v1452_v46 = vld [vmem:[%s2611_s20 + $0x38] sm:$0xff] }
 0x298   : > { %2177 = vmatmul.msk.bf16.vlgmr.msrb.gmra.mxu3 %vm1110_vm2, %v1122_v47  ;;  %v1457_v47 = vpack.c.bf16 %v1452_v46, %v1451_v45 }
 0x29a   : > { %1469 = vmatpush.bf16.msrb.mxu0 %v1457_v47 }
 0x29f   : > { %1242 = vrot.lane.b32.xlu0 %v1123_v3, %s2521_s16 }
 0x2af   : > { %1300 = vrot.lane.b32.xlu1 %v1123_v3, %s2520_s23 }
 0x2f9   : > { %v1179_v48 = vpop.xlane.xlu1 %1178 }
 0x2fa   : > { %2313 = vrcp.f32 %v1179_v48  ;;  %v1449_v48 = vld [vmem:[%s2611_s20 + $0x20] sm:$0xff] }
 0x2fe   : > { %v1238_v52 = vpop.xlane.xlu0 %1237 }
 0x2ff   : > { %2315 = vrcp.f32 %v1238_v52  ;;  %v1448_v52 = vld [vmem:[%s2611_s20 + $0x18] sm:$0xff] }
 0x300   : > { %v2314_v49 = vpop.eup %2313 }
 0x301   : > { %v1181_v50 = vmul.f32 %v2314_v49, %v2306_v33  ;;  %v1450_v49 = vld [vmem:[%s2611_s20 + $0x28] sm:$0xff] }
 0x303   : > { %v1182_v51 = vpack.c.bf16 %v1181_v50, %v1181_v50  ;;  %v1456_v50 = vpack.c.bf16 %v1450_v49, %v1449_v48  ;;  %v1484_v48 = vld [vmem:[%s3054_s26 + $0x30] sm:$0xff]  ;;  %v1485_v49 = vld [vmem:[%s3054_s26 + $0x38] sm:$0xff] }
 0x305   : > { %2179 = vmatmul.msk.bf16.vlgmr.msra.gmra.mxu3 %vm1110_vm2, %v1182_v51  ;;  %v2316_v53 = vpop.eup %2315  ;;  %1470 = vmatpush.bf16.msrb.mxu0 %v1456_v50  ;;  %v1447_v51 = vld [vmem:[%s2611_s20 + $0x10] sm:$0xff]  ;;  %v1489_v50 = vpack.c.bf16 %v1485_v49, %v1484_v48 }
 0x306   : > { %v1240_v54 = vmul.f32 %v2316_v53, %v2308_v35  ;;  %v1455_v53 = vpack.c.bf16 %v1448_v52, %v1447_v51  ;;  %v1482_v51 = vld [vmem:[%s3054_s26 + $0x20] sm:$0xff]  ;;  %v1483_v52 = vld [vmem:[%s3054_s26 + $0x28] sm:$0xff] }
 0x308   : > { %v1241_v57 = vpack.c.bf16 %v1240_v54, %v1240_v54  ;;  %v1411_v54 = vld [vmem:[%s983_s28] sm:$0x1f]  ;;  %s3055_s28 = sld [smem:[#allocation17_spill]] }
 0x309   : > { %v1296_v58 = vpop.xlane.xlu1 %1295  ;;  %1471 = vmatpush.bf16.msrb.mxu0 %v1455_v53  ;;  %v1488_v53 = vpack.c.bf16 %v1483_v52, %v1482_v51 }
 0x30a   : > { %2317 = vrcp.f32 %v1296_v58  ;;  %v2879_v58 = vpack.c.bf16 %v1411_v54, %v1411_v54  ;;  %v1480_v54 = vld [vmem:[%s3054_s26 + $0x10] sm:$0xff] }
 0x30b   : > { %2319 = vrcp.f32 %v2526_v34 }
 0x310   : > { %v2318_v60 = vpop.eup %2317 }
 0x311   : > { %v1243_v55 = vpop.permute.xlu0 %1242  ;;  %v1298_v61 = vmul.f32 %v2318_v60, %v2312_v44  ;;  %v2320_v35 = vpop.eup %2319  ;;  %v1419_v60 = vld [vmem:[%s2601_s6 + $0x38] sm:$0xff] }
 0x312   : > { %v1248_v56 = vsel %vm1127_vm3, %v1243_v55, 0  ;;  %v1378_v36 = vmul.f32 64.0, %v2320_v35  ;;  %vm1382_vm6 = vweird.f32 %v2320_v35  ;;  %v1445_v55 = vld [vmem:[%s2611_s20] sm:$0xff] }
 0x313   : > { %1257 = vmatpush.bf16.msrb.mxu3 %v1248_v56  ;;  %v1299_v1 = vpack.c.bf16 %v1298_v61, %v1298_v61  ;;  %v1446_v56 = vld [vmem:[%s2611_s20 + $0x8] sm:$0xff] }
 0x314   : > { %v1379_v37 = vsub.f32 1.0, %v1378_v36 }
 0x316   : > { %2181 = vmatmul.msk.bf16.vlgmr.msrb.gmra.mxu3 %vm1110_vm2, %v1241_v57  ;;  %v1380_v38 = vmul.f32 %v2320_v35, %v1379_v37  ;;  %v1454_v57 = vpack.c.bf16 %v1446_v56, %v1445_v55  ;;  %v1481_v55 = vld [vmem:[%s3054_s26 + $0x18] sm:$0xff] }
 0x317   : > { %v1487_v56 = vpack.c.bf16 %v1481_v55, %v1480_v54 }
 0x318   : > { %v1381_v39 = vadd.f32 %v2320_v35, %v1380_v38  ;;  %1472 = vmatpush.bf16.msrb.mxu0 %v1454_v57  ;;  %v1478_v57 = vld [vmem:[%s3054_s26] sm:$0xff] }
 0x31a   : > { %v2865_v40 = vsel %vm1382_vm6, %v2320_v35, %v1381_v39 }
 0x31b   : > { %v1140_v59 = vpop.f32.mrf.mxu3  ;;  %2186 = vmatmul.msk.bf16.vlgmr.msrb.gmra.mxu0 %vm1008_vm0, %v2879_v58 }
 0x321   : > { %v1301_v62 = vpop.permute.xlu1 %1300 }
 0x322   : > { %v1306_v63 = vsel %vm1127_vm3, %v1301_v62, 0  ;;  %v1416_v62 = vld [vmem:[%s2601_s6 + $0x20] sm:$0xff] }
 0x323   : > { %v1142_v0 = vpop.f32.mrf.mxu3  ;;  %1315 = vmatpush.bf16.msrb.mxu1 %v1306_v63  ;;  %v1417_v63 = vld [vmem:[%s2601_s6 + $0x28] sm:$0xff] }
 0x324   : > { %v1423_v0 = vpack.c.bf16 %v1417_v63, %v1416_v62 }
 0x326   : > { %2183 = vmatmul.msk.bf16.vlgmr.msrb.gmra.mxu1 %vm1110_vm2, %v1299_v1  ;;  %v1414_v1 = vld [vmem:[%s2601_s6 + $0x10] sm:$0xff] }
 0x327   : > { %1498 = vmatpush.bf16.msra.mxu1 %v1489_v50 }
 0x32b   : > { %1499 = vmatpush.bf16.msra.mxu1 %v1488_v53 }
 0x32f   : > { %1500 = vmatpush.bf16.msra.mxu1 %v1487_v56 }
 0x388   : > { %v1201_v2 = vpop.f32.mrf.mxu3 }
 0x389   : > { %1322 = vrot.lane.b32.xlu2 %v1201_v2, %s2523_s0  ;;  %v1415_v2 = vld [vmem:[%s2601_s6 + $0x18] sm:$0xff] }
 0x390   : > { %v1203_v3 = vpop.f32.mrf.mxu3 }
 0x391   : > { %v1422_v3 = vpack.c.bf16 %v1415_v2, %v1414_v1 }
 0x399   : > { %v1259_v4 = vpop.f32.mrf.mxu3 }
 0x39a   : > { %1326 = vrot.lane.b32.xlu0 %v1259_v4, %s2524_s7  ;;  %v1412_v4 = vld [vmem:[%s2601_s6] sm:$0xff] }
 0x3a1   : > { %v1261_v5 = vpop.f32.mrf.mxu3 }
 0x3a2   : > { %v1413_v5 = vld [vmem:[%s2601_s6 + $0x8] sm:$0xff] }
 0x3a3   : > { %v1317_v6 = vpop.f32.mrf.mxu1 }
 0x3a4   : > { %1330 = vrot.lane.b32.xlu2 %v1317_v6, %s2525_s18  ;;  %v1421_v6 = vpack.c.bf16 %v1413_v5, %v1412_v4 }
 0x3ab   : > { %v1319_v7 = vpop.f32.mrf.mxu1 }
 0x3e3   : > { %v1323_v20 = vpop.permute.xlu2 %1322 }
 0x3e4   : > { %v1333_v21 = vsel %vm1085_vm1, %v1140_v59, %v1323_v20  ;;  %v1418_v59 = vld [vmem:[%s2601_s6 + $0x30] sm:$0xff] }
 0x3e5   : > { %v1424_v61 = vpack.c.bf16 %v1419_v60, %v1418_v59  ;;  %v1479_v59 = vld [vmem:[%s3054_s26 + $0x8] sm:$0xff] }
 0x3e6   : > { %v1486_v60 = vpack.c.bf16 %v1479_v59, %v1478_v57 }
 0x3e7   : > { %1436 = vmatpush.bf16.msra.mxu3 %v1424_v61 }
 0x3e8   : > { %1501 = vmatpush.bf16.msra.mxu1 %v1486_v60 }
 0x3eb   : > { %1437 = vmatpush.bf16.msra.mxu3 %v1423_v0  ;;  %2187 = vmatmul.msk.bf16.vlgmr.msra.gmra.mxu1 %vm1008_vm0, %v2879_v58 }
 0x3ef   : > { %1438 = vmatpush.bf16.msra.mxu3 %v1422_v3 }
 0x3f3   : > { %1439 = vmatpush.bf16.msra.mxu3 %v1421_v6 }
 0x3fe   : > { %v1331_v24 = vpop.permute.xlu2 %1330 }
 0x40c   : > { %v1327_v22 = vpop.permute.xlu0 %1326 }
 0x40d   : > { %v1335_v25 = vsel %vm1334_vm4, %v1333_v21, %v1327_v22 }
 0x40e   : > { %v1337_v26 = vsel %vm1336_vm5, %v1335_v25, %v1331_v24  ;;  %v2294_v24 = vld [vmem:[%s3052_s15] ss:$0 sm:$0xff]  ;;  %v1474_v25 = vpop.f32.mrf.mxu0 }
 0x40f   : > { %v1346_v27 = vpack.c.bf16 %v1337_v26, %v1337_v26  ;;  %v1475_v26 = vadd.f32 %v2294_v24, %v1474_v25 }
 0x411   : > { %2184 = vmatmul.msk.bf16.vlgmr.msra.gmra.mxu2 %vm1008_vm0, %v1346_v27  ;;  %v1508_v27 = vpack.c.bf16 %v1475_v26, %v1475_v26 }
 0x413   : > { %1570 = vrot.lane.b32.xlu2 %v1508_v27, %s2522_s2 }
 0x41b   : > { %1628 = vrot.lane.b32.xlu2 %v1508_v27, %s2521_s16 }
 0x46d   : > { %v1571_v35 = vpop.permute.xlu2 %1570 }
 0x46e   : > { %v1576_v36 = vsel %vm1085_vm1, %v1571_v35, 0 }
 0x46f   : > { %1585 = vmatpush.bf16.xpose.msra.mxu0 %v1576_v36 }
 0x475   : > { %v1629_v37 = vpop.permute.xlu2 %1628 }
 0x476   : > { %v1634_v38 = vsel %vm1085_vm1, %v1629_v37, 0 }
 0x494   : > { %v1367_v29 = vpop.f32.mrf.mxu2 }
 0x495   : > { %v1368_v30 = vadd.f32 %v2291_v28, %v1367_v29  ;;  %v1513_v28 = vsel %vm1085_vm1, %v1508_v27, 0  ;;  %v1476_v29 = vpop.f32.mrf.mxu0 }
 0x496   : > { %1522 = vmatpush.bf16.xpose.msrb.mxu2 %v1513_v28 }
 0x497   : > { %v1371_v31 = vadd.f32 %v1368_v30, %v2794_v23  ;;  %v2295_v30 = vld [vmem:[%s3053_s22] ss:$0 sm:$0xff] }
 0x499   : > { %v1374_v32 = vsel %vm1008_vm0, %v1371_v31, 0.0 }
 0x49a   : > { %1375 = vadd.xlane.f32.xlu1 %v1374_v32 }
 0x49c   : > { %v1369_v33 = vpop.f32.mrf.mxu2 }
 0x49e   : > { %1643 = vmatpush.bf16.xpose.msra.mxu2 %v1634_v38 }
 0x50d   : > { %v1376_v23 = vpop.xlane.xlu1 %1375 }
 0x50e   : > { %v1384_v41 = vmul.f32 %v2865_v40, %v1376_v23 }
 0x510   : > { %v1385_v42 = vsub.f32 %v1371_v31, %v1384_v41 }
 0x512   : > { %v1386_v43 = vmul.f32 %v1385_v42, %v1385_v42 }
 0x514   : > { %v1387_v44 = vsel %vm1008_vm0, %v1386_v43, 0.0 }
 0x515   : > { %1388 = vadd.xlane.f32.xlu0 %v1387_v44 }
 0x588   : > { %v1389_v7 = vpop.xlane.xlu0 %1388 }
 0x589   : > { %v1390_v8 = vmul.f32 %v1389_v7, %v2865_v40 }
 0x58b   : > { %v1391_v9 = vadd.f32 1e-12, %v1390_v8 }
 0x58d   : > { %2321 = vrsqrt.f32 %v1391_v9  ;;  %vm1398_vm8 = vweird.f32 %v1391_v9 }
 0x593   : > { %v2322_v10 = vpop.eup %2321 }
 0x594   : > { %v1393_v11 = vmul.f32 %v2322_v10, %v1391_v9  ;;  %vm1399_vm7 = vweird.f32 %v2322_v10 }
 0x595   : > { %vm1400_vm9 = vmor %vm1398_vm8, %vm1399_vm7 }
 0x596   : > { %v1394_v12 = vmul.f32 %v2322_v10, %v1393_v11 }
 0x598   : > { %v1395_v13 = vmul.f32 0.5, %v1394_v12 }
 0x59a   : > { %v1396_v14 = vsub.f32 1.5, %v1395_v13  ;;  %v1503_v13 = vpop.f32.mrf.mxu1 }
 0x59c   : > { %v1397_v15 = vmul.f32 %v2322_v10, %v1396_v14  ;;  %v2296_v14 = vld [vmem:[%s3055_s28] ss:$0 sm:$0xff] }
 0x59e   : > { %v1401_v17 = vsel %vm1400_vm9, %v2322_v10, %v1397_v15 }
 0x59f   : > { %v1402_v19 = vmul.f32 %v1401_v17, %v1385_v42 }
 0x5a1   : > { %v1406_v20 = vmul.f32 %v2292_v16, %v1402_v19  ;;  %v1504_v16 = vadd.f32 %v2296_v14, %v1503_v13  ;;  %v2527_v19 = vmov 65535  }
 0x5a2   : > { %v1505_v15 = vpop.f32.mrf.mxu1 }
 0x5a3   : > { %v2894_v21 = vadd.f32 %v2293_v18, %v1406_v20  ;;  %v1542_v18 = vpack.c.bf16 %v1504_v16, %v1504_v16  ;;  %v1548_v20 = vsel %vm1546_vm11, 4294967295, %v2527_v19 }
 0x5a4   : > { %v1549_v24 = vsel %vm1547_vm12, %v1548_v20, 0 }
 0x5a5   : > { %v1420_v22 = vpack.c.bf16 %v2894_v21, %v2894_v21  ;;  %v1551_v25 = vand.u32 %v1549_v24, %v1542_v18 }
 0x5a7   : > { %2185 = vmatmul.msk.bf16.vlgmr.msra.gmra.mxu3 %vm1008_vm0, %v1420_v22 }
 0x5a8   : > { %1560 = vmatpush.bf16.msrb.mxu3 %v1551_v25 }
 0x62a   : > { %v1441_v31 = vpop.f32.mrf.mxu3 }
 0x62b   : > { %v1442_v32 = vadd.f32 %v2295_v30, %v1441_v31 }
 0x62d   : > { %v1507_v33 = vpack.c.bf16 %v1442_v32, %v1442_v32 }
 0x62f   : > { %1683 = vrot.lane.b32.xlu1 %v1507_v33, %s2520_s23  ;;  %1567 = vrot.lane.b32.xlu2 %v1507_v33, %s2522_s2 }
 0x630   : > { %2188 = vmatmul.msk.bf16.vlgmr.msrb.gmra.mxu2 %vm1085_vm1, %v1507_v33 }
 0x632   : > { %v1443_v34 = vpop.f32.mrf.mxu3 }
 0x637   : > { %1626 = vrot.lane.b32.xlu2 %v1507_v33, %s2521_s16 }
 0x63f   : > { %1685 = vrot.lane.b32.xlu2 %v1508_v27, %s2520_s23 }
 0x689   : > { %v1568_v39 = vpop.permute.xlu2 %1567 }
 0x68a   : > { %2190 = vmatmul.msk.bf16.vlgmr.msra.gmra.mxu0 %vm1085_vm1, %v1568_v39 }
 0x691   : > { %v1627_v23 = vpop.permute.xlu2 %1626 }
 0x692   : > { %2192 = vmatmul.msk.bf16.vlgmr.msra.gmra.mxu2 %vm1085_vm1, %v1627_v23 }
 0x699   : > { %v1686_v41 = vpop.permute.xlu2 %1685 }
 0x69a   : > { %v1691_v42 = vsel %vm1085_vm1, %v1686_v41, 0 }
 0x69b   : > { %1700 = vmatpush.bf16.xpose.msrb.mxu0 %v1691_v42 }
 0x6a1   : > { %v1684_v43 = vpop.permute.xlu1 %1683 }
 0x6a2   : > { %2194 = vmatmul.msk.bf16.vlgmr.msrb.gmra.mxu0 %vm1085_vm1, %v1684_v43 }
 0x6b3   : > { %v1524_v44 = vpop.f32.mrf.mxu2 }
 0x6b4   : > { %v1528_v45 = vmul.f32 0.25, %v1524_v44 }
 0x6b6   : > { %v1530_v46 = vsel %vm1529_vm10, %v1528_v45, -inf }
 0x6b7   : > { %1531 = vmax.xlane.f32.xlu0 %v1530_v46 }
 0x6bb   : > { %v1526_v47 = vpop.f32.mrf.mxu2 }
 0x707   : > { %v1587_v61 = vpop.f32.mrf.mxu0 }
 0x708   : > { %v1591_v62 = vmul.f32 0.25, %v1587_v61 }
 0x70a   : > { %v1592_v63 = vsel %vm1529_vm10, %v1591_v62, -inf }
 0x70b   : > { %1593 = vmax.xlane.f32.xlu2 %v1592_v63 }
 0x70f   : > { %v1589_v0 = vpop.f32.mrf.mxu0 }
 0x715   : > { %v1645_v1 = vpop.f32.mrf.mxu2 }
 0x716   : > { %v1649_v2 = vmul.f32 0.25, %v1645_v1 }
 0x718   : > { %v1650_v3 = vsel %vm1529_vm10, %v1649_v2, -inf }
 0x719   : > { %1651 = vmax.xlane.f32.xlu0 %v1650_v3 }
 0x71d   : > { %v1647_v4 = vpop.f32.mrf.mxu2 }
 0x71f   : > { %v1702_v5 = vpop.f32.mrf.mxu0 }
 0x720   : > { %v1706_v6 = vmul.f32 0.25, %v1702_v5 }
 0x722   : > { %v1707_v7 = vsel %vm1529_vm10, %v1706_v6, -inf }
 0x723   : > { %1708 = vmax.xlane.f32.xlu0 %v1707_v7 }
 0x727   : > { %v1704_v8 = vpop.f32.mrf.mxu0 }
 0x72a   : > { %v1532_v58 = vpop.xlane.xlu0 %1531 }
 0x72b   : > { %v1533_v9 = vsub.f32 %v1528_v45, %v1532_v58 }
 0x72d   : > { %v1534_v10 = vmul.f32 1.442695, %v1533_v9 }
 0x72f   : > { %2323 = vpow2.f32 %v1534_v10 }
 0x735   : > { %v2324_v11 = vpop.eup %2323 }
 0x736   : > { %v1536_v12 = vsel %vm1529_vm10, %v2324_v11, 0.0 }
 0x737   : > { %1537 = vadd.xlane.f32.xlu1 %v1536_v12 }
 0x750   : > { %1719 = vrot.lane.b32.xlu1 %v1542_v18, %s2520_s23  ;;  %s3056_s23 = sld [smem:[#allocation18_spill]] }
 0x756   : > { %v1762_v7 = vld [vmem:[%s3056_s23 + $0x38] sm:$0xff]  ;;  %v1759_v8 = vld [vmem:[%s3056_s23 + $0x20] sm:$0xff]  ;;  %v1760_v9 = vld [vmem:[%s3056_s23 + $0x28] sm:$0xff] }
 0x757   : > { %v1766_v10 = vpack.c.bf16 %v1760_v9, %v1759_v8  ;;  %v1758_v12 = vld [vmem:[%s3056_s23 + $0x18] sm:$0xff]  ;;  %v1755_v14 = vld [vmem:[%s3056_s23] sm:$0xff]  ;;  %v1756_v15 = vld [vmem:[%s3056_s23 + $0x8] sm:$0xff] }
 0x758   : > { %v1764_v16 = vpack.c.bf16 %v1756_v15, %v1755_v14 }
 0x77e   : > { %v1594_v17 = vpop.xlane.xlu2 %1593 }
 0x77f   : > { %v1595_v22 = vsub.f32 %v1591_v62, %v1594_v17 }
 0x781   : > { %v1596_v26 = vmul.f32 1.442695, %v1595_v22 }
 0x783   : > { %2325 = vpow2.f32 %v1596_v26 }
 0x789   : > { %v2326_v27 = vpop.eup %2325 }
 0x78a   : > { %v1598_v28 = vsel %vm1529_vm10, %v2326_v27, 0.0 }
 0x78b   : > { %1599 = vadd.xlane.f32.xlu0 %v1598_v28 }
 0x78c   : > { %v1652_v29 = vpop.xlane.xlu0 %1651 }
 0x78d   : > { %v1653_v30 = vsub.f32 %v1649_v2, %v1652_v29 }
 0x78f   : > { %v1654_v31 = vmul.f32 1.442695, %v1653_v30 }
 0x791   : > { %2327 = vpow2.f32 %v1654_v31 }
 0x796   : > { %v1709_v37 = vpop.xlane.xlu0 %1708 }
 0x797   : > { %v2328_v32 = vpop.eup %2327  ;;  %v1710_v39 = vsub.f32 %v1706_v6, %v1709_v37  ;;  %v1761_v6 = vld [vmem:[%s3056_s23 + $0x30] sm:$0xff] }
 0x798   : > { %v1656_v33 = vsel %vm1529_vm10, %v2328_v32, 0.0  ;;  %v1767_v58 = vpack.c.bf16 %v1762_v7, %v1761_v6 }
 0x799   : > { %1657 = vadd.xlane.f32.xlu2 %v1656_v33  ;;  %v1711_v23 = vmul.f32 1.442695, %v1710_v39 }
 0x79a   : > { %1779 = vmatpush.bf16.msrb.mxu2 %v1767_v58 }
 0x79e   : > { %1780 = vmatpush.bf16.msrb.mxu2 %v1766_v10 }
 0x79f   : > { %1605 = vrot.lane.b32.xlu0 %v1542_v18, %s2522_s2  ;;  %s3058_s2 = sld [smem:[#allocation21_spill]] }
 0x7a5   : > { %v1833_v37 = vld [vmem:[%s3058_s2 + $0x60] sm:$0xff] }
 0x7aa   : > { %v1538_v34 = vpop.xlane.xlu1 %1537 }
 0x7ab   : > { %2329 = vrcp.f32 %v1538_v34 }
 0x7ac   : > { %2331 = vpow2.f32 %v1711_v23  ;;  %v1836_v23 = vld [vmem:[%s3058_s2 + $0x78] sm:$0xff] }
 0x7b1   : > { %v2330_v35 = vpop.eup %2329  ;;  %1662 = vrot.lane.b32.xlu2 %v1542_v18, %s2521_s16  ;;  %s3057_s16 = sld [smem:[#allocation19_spill]] }
 0x7b2   : > { %v1540_v36 = vmul.f32 %v2330_v35, %v2324_v11  ;;  %v2332_v41 = vpop.eup %2331  ;;  %v1757_v11 = vld [vmem:[%s3056_s23 + $0x10] sm:$0xff] }
 0x7b3   : > { %v1713_v42 = vsel %vm1529_vm10, %v2332_v41, 0.0  ;;  %v1765_v13 = vpack.c.bf16 %v1758_v12, %v1757_v11 }
 0x7b4   : > { %v1541_v38 = vpack.c.bf16 %v1540_v36, %v1540_v36 }
 0x7b5   : > { %1781 = vmatpush.bf16.msrb.mxu2 %v1765_v13  ;;  %v2299_v13 = vld [vmem:[#allocation2] ss:$0 sm:$0xff] }
 0x7b6   : > { %2189 = vmatmul.msk.bf16.vlgmr.msrb.gmra.mxu3 %vm1529_vm10, %v1541_v38  ;;  %v1835_v38 = vld [vmem:[%s3058_s2 + $0x70] sm:$0xff] }
 0x7b7   : > { %v2297_v26 = vld [vmem:[%s3057_s16] ss:$0 sm:$0xff]  ;;  %v1844_v39 = vpack.c.bf16 %v1835_v38, %v1833_v37 }
 0x7b9   : > { %1782 = vmatpush.bf16.msrb.mxu2 %v1764_v16 }
 0x7c2   : > { %v1720_v46 = vpop.permute.xlu1 %1719 }
 0x7c3   : > { %v1725_v49 = vand.u32 %v1720_v46, %v1549_v24  ;;  %v1832_v46 = vld [vmem:[%s3058_s2 + $0x58] sm:$0xff] }
 0x7c9   : > { %1714 = vadd.xlane.f32.xlu0 %v1713_v42  ;;  %v1829_v42 = vld [vmem:[%s3058_s2 + $0x40] sm:$0xff] }
 0x7fe   : > { %v1600_v43 = vpop.xlane.xlu0 %1599 }
 0x7ff   : > { %2333 = vrcp.f32 %v1600_v43  ;;  %v1831_v43 = vld [vmem:[%s3058_s2 + $0x50] sm:$0xff] }
 0x805   : > { %v2334_v45 = vpop.eup %2333 }
 0x806   : > { %v1602_v47 = vmul.f32 %v2334_v45, %v2326_v27  ;;  %v1842_v45 = vpack.c.bf16 %v1831_v43, %v1829_v42 }
 0x808   : > { %v1603_v54 = vpack.c.bf16 %v1602_v47, %v1602_v47 }
 0x80c   : > { %v1658_v44 = vpop.xlane.xlu2 %1657 }
 0x80d   : > { %2335 = vrcp.f32 %v1658_v44  ;;  %v1830_v44 = vld [vmem:[%s3058_s2 + $0x48] sm:$0xff] }
 0x80e   : > { %v1843_v47 = vpack.c.bf16 %v1832_v46, %v1830_v44 }
 0x811   : > { %v1606_v48 = vpop.permute.xlu0 %1605 }
 0x812   : > { %v1611_v50 = vand.u32 %v1606_v48, %v1549_v24  ;;  %v1825_v48 = vld [vmem:[%s3058_s2 + $0x20] sm:$0xff] }
 0x813   : > { %v2336_v51 = vpop.eup %2335 }
 0x814   : > { %v1660_v52 = vmul.f32 %v2336_v51, %v2328_v32  ;;  %v1663_v53 = vpop.permute.xlu2 %1662  ;;  %1620 = vmatpush.bf16.msrb.mxu1 %v1611_v50  ;;  %v1826_v50 = vld [vmem:[%s3058_s2 + $0x28] sm:$0xff] }
 0x815   : > { %v1668_v55 = vand.u32 %v1663_v53, %v1549_v24 }
 0x816   : > { %v1661_v56 = vpack.c.bf16 %v1660_v52, %v1660_v52  ;;  %v1828_v52 = vld [vmem:[%s3058_s2 + $0x38] sm:$0xff] }
 0x817   : > { %2191 = vmatmul.msk.bf16.vlgmr.msrb.gmra.mxu1 %vm1529_vm10, %v1603_v54  ;;  %1677 = vmatpush.bf16.msra.mxu3 %v1668_v55  ;;  %v1841_v53 = vpack.c.bf16 %v1828_v52, %v1826_v50  ;;  %v1821_v54 = vld [vmem:[%s3058_s2] sm:$0xff]  ;;  %v1823_v55 = vld [vmem:[%s3058_s2 + $0x10] sm:$0xff] }
 0x818   : > { %1734 = vmatpush.bf16.msra.mxu1 %v1725_v49  ;;  %v1827_v49 = vld [vmem:[%s3058_s2 + $0x30] sm:$0xff] }
 0x819   : > { %v1840_v51 = vpack.c.bf16 %v1827_v49, %v1825_v48 }
 0x81a   : > { %2193 = vmatmul.msk.bf16.vlgmr.msra.gmra.mxu3 %vm1529_vm10, %v1661_v56  ;;  %v1822_v56 = vld [vmem:[%s3058_s2 + $0x8] sm:$0xff] }
 0x81b   : > { %1859 = vmatpush.bf16.msrb.mxu3 %v1844_v39 }
 0x81f   : > { %1860 = vmatpush.bf16.msrb.mxu3 %v1842_v45 }
 0x823   : > { %1861 = vmatpush.bf16.msrb.mxu3 %v1840_v51 }
 0x839   : > { %v1562_v57 = vpop.f32.mrf.mxu3 }
 0x83c   : > { %v1715_v59 = vpop.xlane.xlu0 %1714 }
 0x83d   : > { %2337 = vrcp.f32 %v1715_v59  ;;  %v1824_v59 = vld [vmem:[%s3058_s2 + $0x18] sm:$0xff] }
 0x841   : > { %v1564_v60 = vpop.f32.mrf.mxu3 }
 0x842   : > { %v1839_v60 = vpack.c.bf16 %v1824_v59, %v1822_v56 }
 0x843   : > { %v2338_v61 = vpop.eup %2337 }
 0x844   : > { %v1717_v62 = vmul.f32 %v2338_v61, %v2332_v41 }
 0x846   : > { %v1718_v63 = vpack.c.bf16 %v1717_v62, %v1717_v62 }
 0x848   : > { %2195 = vmatmul.msk.bf16.vlgmr.msra.gmra.mxu1 %vm1529_vm10, %v1718_v63 }
 0x894   : > { %v1622_v0 = vpop.f32.mrf.mxu1 }
 0x895   : > { %1741 = vrot.lane.b32.xlu2 %v1622_v0, %s2523_s0  ;;  %s3059_s0 = sld [smem:[#allocation23_spill]] }
 0x89b   : > { %v1929_v61 = vld [vmem:[%s3059_s0 + $0xf0] sm:$0xff]  ;;  %v1930_v62 = vld [vmem:[%s3059_s0 + $0xf8] sm:$0xff]  ;;  %v1927_v63 = vld [vmem:[%s3059_s0 + $0xe0] sm:$0xff] }
 0x89c   : > { %v1624_v1 = vpop.f32.mrf.mxu1  ;;  %v1907_v38 = vld [vmem:[%s3059_s0 + $0x40] sm:$0xff]  ;;  %v1905_v43 = vld [vmem:[%s3059_s0 + $0x30] sm:$0xff]  ;;  %v1906_v44 = vld [vmem:[%s3059_s0 + $0x38] sm:$0xff] }
 0x89d   : > { %v1679_v2 = vpop.f32.mrf.mxu3  ;;  %v1948_v1 = vpack.c.bf16 %v1930_v62, %v1929_v61  ;;  %v1917_v45 = vld [vmem:[%s3059_s0 + $0x90] sm:$0xff]  ;;  %v1936_v46 = vpack.c.bf16 %v1906_v44, %v1905_v43  ;;  %v1903_v48 = vld [vmem:[%s3059_s0 + $0x20] sm:$0xff]  ;;  %v1904_v49 = vld [vmem:[%s3059_s0 + $0x28] sm:$0xff] }
 0x89e   : > { %1745 = vrot.lane.b32.xlu2 %v1679_v2, %s2524_s7  ;;  %s3060_s7 = sld [smem:[#allocation20_spill]]  ;;  %v1928_v2 = vld [vmem:[%s3059_s0 + $0xe8] sm:$0xff]  ;;  %v1915_v51 = vld [vmem:[%s3059_s0 + $0x80] sm:$0xff] }
 0x89f   : > { %1966 = vmatpush.bf16.msra.mxu2 %v1948_v1  ;;  %v1916_v52 = vld [vmem:[%s3059_s0 + $0x88] sm:$0xff] }
 0x8a0   : > { %v1941_v56 = vpack.c.bf16 %v1916_v52, %v1915_v51  ;;  %v1900_v61 = vld [vmem:[%s3059_s0 + $0x8] sm:$0xff]  ;;  %v2302_v52 = vld [vmem:[#allocation7] ss:$0 sm:$0xff] }
 0x8a4   : > { %v2298_v11 = vld [vmem:[%s3060_s7] ss:$0 sm:$0xff] }
 0x8a5   : > { %v1681_v3 = vpop.f32.mrf.mxu3 }
 0x8c5   : > { %v1736_v4 = vpop.f32.mrf.mxu1 }
 0x8c6   : > { %1749 = vrot.lane.b32.xlu1 %v1736_v4, %s2525_s18  ;;  %v1947_v4 = vpack.c.bf16 %v1928_v2, %v1927_v63  ;;  %s3061_s18 = sld [smem:[#allocation22_spill]] }
 0x8c8   : > { %1967 = vmatpush.bf16.msra.mxu2 %v1947_v4 }
 0x8cc   : > { %v1846_v59 = vld [vmem:[%s3061_s18] sm:$0x3] }
 0x8cd   : > { %v1738_v5 = vpop.f32.mrf.mxu1  ;;  %v1849_v63 = vperm.slane %v1846_v59, 1 }
 0x8ef   : > { %v1742_v17 = vpop.permute.xlu2 %1741 }
 0x8f0   : > { %v1752_v19 = vsel %vm1085_vm1, %v1562_v57, %v1742_v17  ;;  %v1838_v57 = vpack.c.bf16 %v1823_v55, %v1821_v54  ;;  %v1901_v54 = vld [vmem:[%s3059_s0 + $0x10] sm:$0xff]  ;;  %v1902_v55 = vld [vmem:[%s3059_s0 + $0x18] sm:$0xff] }
 0x8f2   : > { %1862 = vmatpush.bf16.msrb.mxu3 %v1838_v57  ;;  %v1934_v57 = vpack.c.bf16 %v1902_v55, %v1901_v54 }
 0x8f8   : > { %v1746_v18 = vpop.permute.xlu2 %1745 }
 0x8f9   : > { %v1753_v20 = vsel %vm1334_vm4, %v1752_v19, %v1746_v18  ;;  %v1913_v18 = vld [vmem:[%s3059_s0 + $0x70] sm:$0xff]  ;;  %v1914_v19 = vld [vmem:[%s3059_s0 + $0x78] sm:$0xff] }
 0x938   : > { %v1750_v22 = vpop.permute.xlu1 %1749 }
 0x939   : > { %v1754_v24 = vsel %vm1336_vm5, %v1753_v20, %v1750_v22  ;;  %v1940_v20 = vpack.c.bf16 %v1914_v19, %v1913_v18  ;;  %v1925_v22 = vld [vmem:[%s3059_s0 + $0xd0] sm:$0xff] }
 0x93a   : > { %v1763_v25 = vpack.c.bf16 %v1754_v24, %v1754_v24  ;;  %v1926_v24 = vld [vmem:[%s3059_s0 + $0xd8] sm:$0xff] }
 0x93b   : > { %1953 = vmatpush.bf16.msrb.mxu1 %v1940_v20 }
 0x93c   : > { %2196 = vmatmul.msk.bf16.vlgmr.msrb.gmra.mxu2 %vm1008_vm0, %v1763_v25  ;;  %v1946_v25 = vpack.c.bf16 %v1926_v24, %v1925_v22 }
 0x93e   : > { %1968 = vmatpush.bf16.msra.mxu2 %v1946_v25 }
 0x9bf   : > { %v1784_v27 = vpop.f32.mrf.mxu2 }
 0x9c0   : > { %v1785_v28 = vadd.f32 %v2297_v26, %v1784_v27  ;;  %v1911_v26 = vld [vmem:[%s3059_s0 + $0x60] sm:$0xff]  ;;  %v1912_v27 = vld [vmem:[%s3059_s0 + $0x68] sm:$0xff] }
 0x9c2   : > { %v1788_v29 = vadd.f32 %v1785_v28, %v2894_v21  ;;  %v1834_v21 = vld [vmem:[%s3058_s2 + $0x68] sm:$0xff]  ;;  %v1939_v28 = vpack.c.bf16 %v1912_v27, %v1911_v26 }
 0x9c3   : > { %v1845_v41 = vpack.c.bf16 %v1836_v23, %v1834_v21  ;;  %v1908_v21 = vld [vmem:[%s3059_s0 + $0x48] sm:$0xff]  ;;  %v1919_v23 = vld [vmem:[%s3059_s0 + $0xa0] sm:$0xff] }
 0x9c4   : > { %v1791_v30 = vsel %vm1008_vm0, %v1788_v29, 0.0  ;;  %1954 = vmatpush.bf16.msrb.mxu1 %v1939_v28  ;;  %v1937_v39 = vpack.c.bf16 %v1908_v21, %v1907_v38 }
 0x9c5   : > { %1792 = vadd.xlane.f32.xlu2 %v1791_v30  ;;  %1872 = vmatpush.bf16.msra.mxu0 %v1845_v41  ;;  %v1924_v30 = vld [vmem:[%s3059_s0 + $0xc8] sm:$0xff] }
 0x9c6   : > { %v1920_v41 = vld [vmem:[%s3059_s0 + $0xa8] sm:$0xff] }
 0x9c7   : > { %v1786_v31 = vpop.f32.mrf.mxu2  ;;  %v1943_v42 = vpack.c.bf16 %v1920_v41, %v1919_v23 }
 0x9c9   : > { %1873 = vmatpush.bf16.msra.mxu0 %v1843_v47  ;;  %v1918_v47 = vld [vmem:[%s3059_s0 + $0x98] sm:$0xff] }
 0x9ca   : > { %v1942_v50 = vpack.c.bf16 %v1918_v47, %v1917_v45 }
 0x9cd   : > { %1874 = vmatpush.bf16.msra.mxu0 %v1841_v53  ;;  %v1935_v53 = vpack.c.bf16 %v1904_v49, %v1903_v48 }
 0x9d1   : > { %1875 = vmatpush.bf16.msra.mxu0 %v1839_v60  ;;  %v1899_v60 = vld [vmem:[%s3059_s0] sm:$0xff] }
 0x9d2   : > { %v1933_v62 = vpack.c.bf16 %v1900_v61, %v1899_v60 }
 0xa38   : > { %v1793_v32 = vpop.xlane.xlu2 %1792 }
 0xa39   : > { %v1794_v33 = vmul.f32 %v1793_v32, %v2865_v40  ;;  %v1909_v32 = vld [vmem:[%s3059_s0 + $0x50] sm:$0xff] }
 0xa3b   : > { %v1795_v34 = vsub.f32 %v1788_v29, %v1794_v33  ;;  %v1923_v29 = vld [vmem:[%s3059_s0 + $0xc0] sm:$0xff]  ;;  %v1910_v33 = vld [vmem:[%s3059_s0 + $0x58] sm:$0xff] }
 0xa3c   : > { %v1945_v31 = vpack.c.bf16 %v1924_v30, %v1923_v29  ;;  %v2300_v29 = vld [vmem:[#allocation4] ss:$0 sm:$0xff] }
 0xa3d   : > { %v1796_v35 = vmul.f32 %v1795_v34, %v1795_v34 }
 0xa3e   : > { %1969 = vmatpush.bf16.msra.mxu2 %v1945_v31 }
 0xa3f   : > { %v1797_v36 = vsel %vm1008_vm0, %v1796_v35, 0.0  ;;  %v1921_v35 = vld [vmem:[%s3059_s0 + $0xb0] sm:$0xff] }
 0xa40   : > { %1798 = vadd.xlane.f32.xlu0 %v1797_v36  ;;  %v1922_v36 = vld [vmem:[%s3059_s0 + $0xb8] sm:$0xff] }
 0xa41   : > { %v1944_v37 = vpack.c.bf16 %v1922_v36, %v1921_v35 }
 0xa43   : > { %1970 = vmatpush.bf16.msra.mxu2 %v1944_v37 }
 0xa47   : > { %1971 = vmatpush.bf16.msra.mxu2 %v1943_v42 }
 0xa4b   : > { %1972 = vmatpush.bf16.msra.mxu2 %v1942_v50  ;;  %v2301_v50 = vld [vmem:[#allocation6] ss:$0 sm:$0xff] }
 0xa4f   : > { %1973 = vmatpush.bf16.msra.mxu2 %v1941_v56 }
 0xab3   : > { %v1799_v0 = vpop.xlane.xlu0 %1798 }
 0xab4   : > { %v1800_v3 = vmul.f32 %v1799_v0, %v2865_v40 }
 0xab6   : > { %v1801_v5 = vadd.f32 1e-12, %v1800_v3  ;;  %v1848_v3 = vperm.slane %v1846_v59, 0 }
 0xab8   : > { %2339 = vrsqrt.f32 %v1801_v5  ;;  %vm1808_vm14 = vweird.f32 %v1801_v5 }
 0xabe   : > { %v2340_v6 = vpop.eup %2339 }
 0xabf   : > { %v1803_v7 = vmul.f32 %v2340_v6, %v1801_v5  ;;  %vm1809_vm13 = vweird.f32 %v2340_v6 }
 0xac0   : > { %vm1810_vm15 = vmor %vm1808_vm14, %vm1809_vm13 }
 0xac1   : > { %v1804_v8 = vmul.f32 %v2340_v6, %v1803_v7 }
 0xac3   : > { %v1805_v58 = vmul.f32 0.5, %v1804_v8 }
 0xac5   : > { %v1806_v9 = vsub.f32 1.5, %v1805_v58 }
 0xac7   : > { %v1807_v10 = vmul.f32 %v2340_v6, %v1806_v9 }
 0xac9   : > { %v1811_v12 = vsel %vm1810_vm15, %v2340_v6, %v1807_v10 }
 0xaca   : > { %v1812_v14 = vmul.f32 %v1811_v12, %v1795_v34  ;;  %v1938_v34 = vpack.c.bf16 %v1910_v33, %v1909_v32 }
 0xacc   : > { %v1816_v15 = vmul.f32 %v2298_v11, %v1812_v14  ;;  %1955 = vmatpush.bf16.msrb.mxu1 %v1938_v34 }
 0xace   : > { %v2983_v16 = vadd.f32 %v2299_v13, %v1816_v15 }
 0xad0   : > { %v1837_v17 = vpack.c.bf16 %v2983_v16, %v2983_v16  ;;  %1956 = vmatpush.bf16.msrb.mxu1 %v1937_v39 }
 0xad2   : > { %2197 = vmatmul.msk.bf16.vlgmr.msrb.gmra.mxu3 %vm1008_vm0, %v1837_v17  ;;  %2198 = vmatmul.msk.bf16.vlgmr.msra.gmra.mxu0 %vm1008_vm0, %v1837_v17 }
 0xad4   : > { %1957 = vmatpush.bf16.msrb.mxu1 %v1936_v46 }
 0xad8   : > { %1958 = vmatpush.bf16.msrb.mxu1 %v1935_v53 }
 0xadc   : > { %1959 = vmatpush.bf16.msrb.mxu1 %v1934_v57 }
 0xae0   : > { %1960 = vmatpush.bf16.msrb.mxu1 %v1933_v62 }
 0xb4f   : > { %v1877_v0 = vpop.f32.mrf.mxu0 }
 0xb50   : > { %v1878_v1 = vadd.f32 %v1877_v0, %v1849_v63 }
 0xb52   : > { %v1884_v2 = vmul.f32 0.044715, %v1878_v1  ;;  %v1882_v18 = vmul.f32 0.5, %v1878_v1 }
 0xb54   : > { %v1886_v4 = vmul.f32 %v1884_v2, %v1878_v1 }
 0xb55   : > { %v1864_v5 = vpop.f32.mrf.mxu3 }
 0xb56   : > { %v1888_v6 = vmul.f32 %v1886_v4, %v1878_v1  ;;  %v1865_v7 = vadd.f32 %v1864_v5, %v1848_v3 }
 0xb57   : > { %v1879_v8 = vpop.f32.mrf.mxu0 }
 0xb58   : > { %v1883_v58 = vmul.f32 0.044715, %v1865_v7  ;;  %v1890_v9 = vadd.f32 %v1888_v6, %v1878_v1  ;;  %v1881_v25 = vmul.f32 0.5, %v1865_v7 }
 0xb5a   : > { %v1885_v10 = vmul.f32 %v1883_v58, %v1865_v7  ;;  %v1892_v11 = vmul.f32 0.7978846, %v1890_v9 }
 0xb5c   : > { %v1887_v12 = vmul.f32 %v1885_v10, %v1865_v7  ;;  %2341 = vtanh.f32 %v1892_v11 }
 0xb5d   : > { %v1866_v13 = vpop.f32.mrf.mxu3 }
 0xb5e   : > { %v1889_v14 = vadd.f32 %v1887_v12, %v1865_v7 }
 0xb60   : > { %v1891_v15 = vmul.f32 0.7978846, %v1889_v14 }
 0xb62   : > { %v2342_v17 = vpop.eup %2341  ;;  %2343 = vtanh.f32 %v1891_v15 }
 0xb63   : > { %v1896_v19 = vadd.f32 1.0, %v2342_v17 }
 0xb65   : > { %v1898_v20 = vmul.f32 %v1896_v19, %v1882_v18 }
 0xb67   : > { %v1932_v22 = vpack.c.bf16 %v1898_v20, %v1898_v20 }
 0xb68   : > { %v2344_v24 = vpop.eup %2343 }
 0xb69   : > { %1974 = vmatmul.bf16.vlgmr.msra.gmra.mxu2 %v1932_v22  ;;  %v1895_v26 = vadd.f32 1.0, %v2344_v24 }
 0xb6b   : > { %v1897_v27 = vmul.f32 %v1895_v26, %v1881_v25 }
 0xb6d   : > { %v1931_v28 = vpack.c.bf16 %v1897_v27, %v1897_v27 }
 0xb6f   : > { %1961 = vmatmul.bf16.vlgmr.msrb.gmra.mxu1 %v1931_v28 }
 0xbec   : > { %v1962_v30 = vpop.f32.mrf.mxu1  ;;  %v1975_v31 = vpop.f32.mrf.mxu2 }
 0xbed   : > { %v1963_v32 = vadd.f32 %v2300_v29, %v1962_v30 }
 0xbef   : > { %v1976_v33 = vadd.f32 %v1975_v31, %v1963_v32 }
 0xbf1   : > { %v1979_v34 = vadd.f32 %v1976_v33, %v2983_v16 }
 0xbf3   : > { %v1982_v35 = vsel %vm1008_vm0, %v1979_v34, 0.0 }
 0xbf4   : > { %v1964_v36 = vpop.f32.mrf.mxu1  ;;  %v1977_v37 = vpop.f32.mrf.mxu2  ;;  %1983 = vadd.xlane.f32.xlu1 %v1982_v35 }
 0xc67   : > { %v1984_v38 = vpop.xlane.xlu1 %1983 }
 0xc68   : > { %v1985_v21 = vmul.f32 %v1984_v38, %v2865_v40 }
 0xc6a   : > { %v1986_v39 = vsub.f32 %v1979_v34, %v1985_v21 }
 0xc6c   : > { %v1987_v23 = vmul.f32 %v1986_v39, %v1986_v39 }
 0xc6e   : > { %v1988_v41 = vsel %vm1008_vm0, %v1987_v23, 0.0 }
 0xc6f   : > { %1989 = vadd.xlane.f32.xlu0 %v1988_v41 }
 0xce2   : > { %v1990_v42 = vpop.xlane.xlu0 %1989 }
 0xce3   : > { %v1991_v43 = vmul.f32 %v1990_v42, %v2865_v40 }
 0xce5   : > { %v1992_v44 = vadd.f32 1e-12, %v1991_v43 }
 0xce7   : > { %2345 = vrsqrt.f32 %v1992_v44  ;;  %vm1999_vm2 = vweird.f32 %v1992_v44 }
 0xced   : > { %v2346_v16 = vpop.eup %2345 }
 0xcee   : > { %v1994_v45 = vmul.f32 %v2346_v16, %v1992_v44  ;;  %vm2000_vm1 = vweird.f32 %v2346_v16 }
 0xcef   : > { %vm2001_vm3 = vmor %vm1999_vm2, %vm2000_vm1 }
 0xcf0   : > { %v1995_v46 = vmul.f32 %v2346_v16, %v1994_v45 }
 0xcf2   : > { %v1996_v47 = vmul.f32 0.5, %v1995_v46 }
 0xcf4   : > { %v1997_v48 = vsub.f32 1.5, %v1996_v47 }
 0xcf6   : > { %v1998_v49 = vmul.f32 %v2346_v16, %v1997_v48 }
 0xcf8   : > { %v2002_v51 = vsel %vm2001_vm3, %v2346_v16, %v1998_v49 }
 0xcf9   : > { %v2003_v53 = vmul.f32 %v2002_v51, %v1986_v39 }
 0xcfb   : > { %v2007_v54 = vmul.f32 %v2301_v50, %v2003_v53 }
 0xcfd   : > { %v2011_v40 = vadd.f32 %v2302_v52, %v2007_v54 }
 0xcff   : > { %2012 = vst.msk [vmem:[%s987_s1] sm:$0xff] %vm1008_vm0, %v2011_v40 }
 0xd00 PF: > { %s3062_s10 = sld [smem:[#allocation24_spill]] }
 0xd06   : > { %s72_s7 = sadd.s32 1, %s3062_s10  }
 0xd07   : > { %p69_p2 = scmp.ge.s32.totalorder %s72_s7, 4  }
 0xd09   :  { %71 = sbr.rel (!%p69_p2) target bundleno = 47 (0x2f), region = 218 }
 0xd0e   :  { %2032 = vsyncpa [#allocation3], 1 }
 0xd0f   :  { %2034 = vsyncpa [#allocation3 + $0x1], 1 }
 0xd10   :  { %2035 = vsyncpa [#allocation5], 1 }
 0xd11   :  { %2036 = vsyncpa [#allocation8], 1 }

// kernel: _lambda_.18
= control target key start
LH: loop header
LB: loop body
LE: loop exit
PB: predicated region body
PF: predicated region fallthrough
CT: control target
= control target key end

     0   :  { %s2206_s6 = smov 1   ;;  %s2207_s10 = smov 2   ;;  %s2668_s0 = inlined_call_operand.smem [shape: u32[30], index: -1, kind: input, shape index: {}] }
   0x1   :  { %s2251_s5 = sld [smem:[%s2668_s0]]   ;;  %s2208_s14 = smov 3  }
   0x2   :  { %s2256_s9 = sld [smem:[%s2668_s0 + %s2206_s6]]   ;;  %s2209_s18 = smov 4  }
   0x3   :  { %s2261_s13 = sld [smem:[%s2668_s0 + %s2207_s10]]   ;;  %s2210_s22 = smov 5  }
   0x4   :  { %s2266_s17 = sld [smem:[%s2668_s0 + %s2208_s14]]   ;;  %s2211_s26 = smov 6  }
   0x5   :  { %s2271_s21 = sld [smem:[%s2668_s0 + %s2209_s18]]   ;;  %s2212_s30 = smov 7  }
   0x6   :  { %s2276_s25 = sld [smem:[%s2668_s0 + %s2210_s22]]   ;;  %s2213_s4 = smov 8  }
   0x7   :  { %s2281_s29 = sld [smem:[%s2668_s0 + %s2211_s26]]   ;;  %s2214_s10 = smov 9  }
   0x8   :  { %s2286_s3 = sld [smem:[%s2668_s0 + %s2212_s30]]   ;;  %s2215_s15 = smov 10  }
   0x9   :  { %s2291_s8 = sld [smem:[%s2668_s0 + %s2213_s4]]   ;;  %s2216_s20 = smov 11  }
   0xa   :  { %s2296_s14 = sld [smem:[%s2668_s0 + %s2214_s10]]   ;;  %s2217_s26 = smov 12  }
   0xb   :  { %s2301_s19 = sld [smem:[%s2668_s0 + %s2215_s15]]   ;;  %s2218_s1 = smov 13  }
   0xc   :  { %s2306_s24 = sld [smem:[%s2668_s0 + %s2216_s20]]   ;;  %s2219_s7 = smov 14  }
   0xd   :  { %s2311_s30 = sld [smem:[%s2668_s0 + %s2217_s26]]   ;;  %s2220_s15 = smov 15  }
   0xe   :  { %s2316_s6 = sld [smem:[%s2668_s0 + %s2218_s1]]   ;;  %s2221_s22 = smov 16  }
   0xf   :  { %s2321_s12 = sld [smem:[%s2668_s0 + %s2219_s7]]   ;;  %s2222_s28 = smov 17  }
  0x10   :  { %s2326_s20 = sld [smem:[%s2668_s0 + %s2220_s15]]   ;;  %s2223_s7 = smov 18  }
  0x11   :  { %s2331_s27 = sld [smem:[%s2668_s0 + %s2221_s22]]   ;;  %s2224_s15 = smov 19  }
  0x12   :  { %s2336_s4 = sld [smem:[%s2668_s0 + %s2222_s28]]   ;;  %s2225_s22 = smov 20  }
  0x13   :  { %2673 = sst [smem:[#allocation2_spill]] %s2311_s30  ;;  %s2226_s28 = smov 21  }
  0x14   :  { %s2346_s30 = sld [smem:[%s2668_s0 + %s2224_s15]]   ;;  %s2228_s15 = smov 23  }
  0x15   :  { %2674 = sst [smem:[#allocation3_spill]] %s2321_s12 }
  0x16   :  { %s2341_s12 = sld [smem:[%s2668_s0 + %s2223_s7]]   ;;  %s2227_s7 = smov 22  }
  0x17   :  { %2675 = sst [smem:[#allocation4_spill]] %s2331_s27 }
  0x18   :  { %2676 = sst [smem:[#allocation5_spill]] %s2336_s4 }
  0x19   :  { %s2351_s27 = sld [smem:[%s2668_s0 + %s2225_s22]]   ;;  %s2229_s22 = smov 24  }
  0x1a   :  { %2678 = sst [smem:[#allocation7_spill]] %s2346_s30 }
  0x1b   :  { %s2356_s4 = sld [smem:[%s2668_s0 + %s2226_s28]]   ;;  %s2230_s28 = smov 25  }
  0x1c   :  { %2677 = sst [smem:[#allocation6_spill]] %s2341_s12 }
  0x1d   :  { %s2361_s12 = sld [smem:[%s2668_s0 + %s2227_s7]]   ;;  %s2231_s7 = smov 26  }
  0x1e   :  { %s2366_s30 = sld [smem:[%s2668_s0 + %s2228_s15]]   ;;  %s2232_s15 = smov 27  }
  0x1f   :  { %2679 = sst [smem:[#allocation8_spill]] %s2351_s27 }
  0x20   :  { %s2371_s27 = sld [smem:[%s2668_s0 + %s2229_s22]]   ;;  %s2233_s22 = smov 28  }
  0x21   :  { %2680 = sst [smem:[#allocation9_spill]] %s2356_s4 }
  0x22   :  { %s2376_s4 = sld [smem:[%s2668_s0 + %s2230_s28]]   ;;  %s2234_s28 = smov 29  }
  0x23   :  { %2681 = sst [smem:[#allocation10_spill]] %s2361_s12 }
  0x24   :  { %2682 = sst [smem:[#allocation11_spill]] %s2366_s30 }
  0x25   :  { %s2381_s12 = sld [smem:[%s2668_s0 + %s2231_s7]]   ;;  %s2398_s7 = smov 0  }
  0x26   :  { %2683 = sst [smem:[#allocation12_spill]] %s2371_s27 }
  0x27   :  { %s2386_s30 = sld [smem:[%s2668_s0 + %s2232_s15]]  }
  0x28   :  { %2684 = sst [smem:[#allocation13_spill]] %s2376_s4 }
  0x29   :  { %s2391_s27 = sld [smem:[%s2668_s0 + %s2233_s22]]  }
  0x2a   :  { %s2396_s4 = sld [smem:[%s2668_s0 + %s2234_s28]]  }
  0x2b LB: > { %s2057_s10 = sadd.s32 4294967295, %s2204_s7   ;;  %p2061_p0 = scmp.ge.s32.totalorder %s2204_s7, 1  ;;  %s2204_s7 = sphi %s2398_s7, %s69_s7  }
  0x2c   : > { %p833_p1 = scmp.lt.s32.totalorder %s2204_s7, 3 }
  0x2e   : > { %p834_p2 = pnand %p2061_p0, %p833_p1 }
  0x2f   : > { %p914_p3 = scmp.lt.s32.totalorder (!%p834_p2), %s2057_s10, 1  ;;  %s2235_s15 = smov (!%p834_p2), 80  }
  0x30   : > { %837 = sbr.rel (%p834_p2) target bundleno = 3267 (0xcc3), region = 136  ;;  %s2236_s16 = smov (!%p834_p2), 96  }
  0x31   : > { %s2237_s18 = smov (!%p834_p2), 112   ;;  %s2238_s23 = smov (!%p834_p2), 16  }
  0x32   : > { %s2239_s26 = smov (!%p834_p2), 32   ;;  %s2240_s28 = smov (!%p834_p2), 48  }
  0x33   : > { %s2685_s2 = sld [smem:[#allocation2_spill]] (!%p834_p2) }
  0x35   : > { %v938_v0 = vld [vmem:[%s2266_s17 + $0x30] sm:$0xff]  ;;  %v939_v1 = vld [vmem:[%s2266_s17 + $0x38] sm:$0xff]  ;;  %v936_v5 = vld [vmem:[%s2266_s17 + $0x20] sm:$0xff]  ;;  %s2698_s10 = smov (!%p914_p3, %s2057_s10), 1  ;;  %vm949_vm0 = vcmask 523264   ;;  %vm1026_vm1 = vcmask 130048  }
  0x36   : > { %v972_v2 = vld [vmem:[%s2276_s25 + $0x30] sm:$0xff]  ;;  %v944_v3 = vpack.c.bf16 %v939_v1, %v938_v0  ;;  %v973_v4 = vld [vmem:[%s2276_s25 + $0x38] sm:$0xff]  ;;  %v937_v6 = vld [vmem:[%s2266_s17 + $0x28] sm:$0xff]  ;;  %s2421_s0 = sshll.u32 %s2698_s10, 3  ;;  %s920_s22 = scalar_lea.vmem %s2256_s9, %s2698_s10  ;;  %vm1051_vm2 = vcmask 64512   ;;  %vm1068_vm3 = vcmask 1043456  }
  0x37   : > { %v977_v7 = vpack.c.bf16 %v973_v4, %v972_v2  ;;  %v970_v8 = vld [vmem:[%s2276_s25 + $0x20] sm:$0xff]  ;;  %v971_v9 = vld [vmem:[%s2276_s25 + $0x28] sm:$0xff]  ;;  %v943_v10 = vpack.c.bf16 %v937_v6, %v936_v5  ;;  %v934_v12 = vld [vmem:[%s2266_s17 + $0x10] sm:$0xff]  ;;  %s917_s11 = scalar_lea.vmem %s2251_s5, %s2421_s0  ;;  %vm1275_vm4 = vcmask 261120   ;;  %vm1277_vm5 = vcmask 392192   ;;  %s924_s1 = scalar_lea.vmem %s2261_s13, %s2421_s0 }
  0x38   : > { %957 = vmatpush.bf16.msra.mxu0 %v944_v3  ;;  %v976_v11 = vpack.c.bf16 %v971_v9, %v970_v8  ;;  %v935_v13 = vld [vmem:[%s2266_s17 + $0x18] sm:$0xff]  ;;  %v968_v14 = vld [vmem:[%s2276_s25 + $0x10] sm:$0xff]  ;;  %v932_v16 = vld [vmem:[%s2266_s17] sm:$0xff]  ;;  %s2686_s10 = sld [smem:[#allocation4_spill]]  ;;  %vm1470_vm10 = vcmask 39936   ;;  %vm1487_vm11 = vcmask 1041408  }
  0x39   : > { %986 = vmatpush.bf16.msra.mxu1 %v977_v7  ;;  %v969_v15 = vld [vmem:[%s2276_s25 + $0x18] sm:$0xff]  ;;  %v933_v17 = vld [vmem:[%s2266_s17 + $0x8] sm:$0xff]  ;;  %v942_v18 = vpack.c.bf16 %v935_v13, %v934_v12  ;;  %v966_v19 = vld [vmem:[%s2276_s25] sm:$0xff]  ;;  %vm1488_vm12 = vcmask 1042432  }
  0x3a   : > { %v967_v20 = vld [vmem:[%s2276_s25 + $0x8] sm:$0xff]  ;;  %v975_v21 = vpack.c.bf16 %v969_v15, %v968_v14  ;;  %v941_v22 = vpack.c.bf16 %v933_v17, %v932_v16  ;;  %v2429_v23 = vld [vmem:[%s917_s11] sm:$0xff]  ;;  %v1001_v26 = vld [vmem:[%s2286_s3 + $0x30] sm:$0xff]  ;;  %s2687_s11 = sld [smem:[#allocation3_spill]] }
  0x3b   : > { %v974_v24 = vpack.c.bf16 %v967_v20, %v966_v19  ;;  %v940_v25 = vpack.c.bf16 %v2429_v23, %v2429_v23  ;;  %v1002_v27 = vld [vmem:[%s2286_s3 + $0x38] sm:$0xff]  ;;  %v999_v28 = vld [vmem:[%s2286_s3 + $0x20] sm:$0xff]  ;;  %v1000_v30 = vld [vmem:[%s2286_s3 + $0x28] sm:$0xff] }
  0x3c   : > { %958 = vmatpush.bf16.msra.mxu0 %v943_v10  ;;  %v1006_v29 = vpack.c.bf16 %v1002_v27, %v1001_v26  ;;  %v1005_v31 = vpack.c.bf16 %v1000_v30, %v999_v28  ;;  %v2139_v32 = vld [vmem:[%s2281_s29] ss:$0 sm:$0xff]  ;;  %v997_v43 = vld [vmem:[%s2286_s3 + $0x10] sm:$0xff]  ;;  %v998_v44 = vld [vmem:[%s2286_s3 + $0x18] sm:$0xff] }
  0x3d   : > { %987 = vmatpush.bf16.msra.mxu1 %v976_v11  ;;  %v2138_v35 = vld [vmem:[%s2271_s21] ss:$0 sm:$0xff]  ;;  %v1004_v45 = vpack.c.bf16 %v998_v44, %v997_v43  ;;  %v996_v47 = vld [vmem:[%s2286_s3 + $0x8] sm:$0xff] }
  0x3e   : > { %1015 = vmatpush.bf16.msra.mxu2 %v1006_v29  ;;  %v995_v46 = vld [vmem:[%s2286_s3] sm:$0xff] }
  0x3f   : > { %v1003_v48 = vpack.c.bf16 %v996_v47, %v995_v46  ;;  %v2140_v58 = vld [vmem:[%s920_s22] ss:$0 sm:$0xff]  ;;  %s2688_s22 = sld [smem:[#allocation5_spill]] }
  0x40   : > { %959 = vmatpush.bf16.msra.mxu0 %v942_v18  ;;  %v2141_v0 = vld [vmem:[%s2291_s8] ss:$0 sm:$0xff] }
  0x41   : > { %988 = vmatpush.bf16.msra.mxu1 %v975_v21 }
  0x42   : > { %1016 = vmatpush.bf16.msra.mxu2 %v1005_v31 }
  0x44   : > { %960 = vmatpush.bf16.msra.mxu0 %v941_v22 }
  0x45   : > { %989 = vmatpush.bf16.msra.mxu1 %v974_v24 }
  0x46   : > { %1017 = vmatpush.bf16.msra.mxu2 %v1004_v45 }
  0x47   : > { %2065 = vmatmul.msk.bf16.vlgmr.msra.gmra.mxu0 %vm949_vm0, %v940_v25 }
  0x48   : > { %2066 = vmatmul.msk.bf16.vlgmr.msra.gmra.mxu1 %vm949_vm0, %v940_v25 }
  0x4a   : > { %1018 = vmatpush.bf16.msra.mxu2 %v1003_v48 }
  0x4d   : > { %2067 = vmatmul.msk.bf16.vlgmr.msra.gmra.mxu2 %vm949_vm0, %v940_v25 }
  0xc4   : > { %v962_v33 = vpop.f32.mrf.mxu0 }
  0xc5   : > { %v991_v34 = vpop.f32.mrf.mxu1  ;;  %v963_v38 = vadd.f32 %v2138_v35, %v962_v33 }
  0xc6   : > { %v992_v36 = vadd.f32 %v2139_v32, %v991_v34 }
  0xc7   : > { %v1024_v42 = vpack.c.bf16 %v963_v38, %v963_v38 }
  0xc8   : > { %v1025_v37 = vpack.c.bf16 %v992_v36, %v992_v36 }
  0xca   : > { %1206 = vrot.lane.b32.xlu2 %v1025_v37, %s2235_s15  ;;  %1148 = vrot.lane.b32.xlu1 %v1025_v37, %s2236_s16  ;;  %v1031_v39 = vsel %vm1026_vm1, %v1025_v37, 0 }
  0xcb   : > { %1089 = vrot.lane.b32.xlu0 %v1025_v37, %s2237_s18  ;;  %1040 = vmatpush.bf16.xpose.msra.mxu3 %v1031_v39 }
  0xcc   : > { %v964_v40 = vpop.f32.mrf.mxu0 }
  0xcd   : > { %v993_v41 = vpop.f32.mrf.mxu1 }
  0xd0   : > { %v1020_v1 = vpop.f32.mrf.mxu2 }
  0xd1   : > { %v1021_v2 = vadd.f32 %v2141_v0, %v1020_v1 }
  0xd2   : > { %1204 = vrot.lane.b32.xlu2 %v1024_v42, %s2235_s15  ;;  %1146 = vrot.lane.b32.xlu1 %v1024_v42, %s2236_s16 }
  0xd3   : > { %1086 = vrot.lane.b32.xlu0 %v1024_v42, %s2237_s18  ;;  %2068 = vmatmul.msk.bf16.vlgmr.msra.gmra.mxu3 %vm1026_vm1, %v1024_v42  ;;  %v1064_v3 = vpack.c.bf16 %v1021_v2, %v1021_v2 }
  0xd5   : > { %v1070_v4 = vsel %vm1068_vm3, %v1064_v3, 0 }
  0xd6   : > { %1079 = vmatpush.bf16.msrb.mxu3 %v1070_v4 }
  0xd8   : > { %v1022_v5 = vpop.f32.mrf.mxu2 }
 0x124   : > { %v1207_v49 = vpop.permute.xlu2 %1206 }
 0x125   : > { %v1212_v54 = vsel %vm1026_vm1, %v1207_v49, 0 }
 0x12c   : > { %v1205_v57 = vpop.permute.xlu2 %1204 }
 0x13c   : > { %v1149_v50 = vpop.permute.xlu1 %1148 }
 0x13d   : > { %v1090_v51 = vpop.permute.xlu0 %1089  ;;  %v1154_v52 = vsel %vm1026_vm1, %v1149_v50, 0 }
 0x13e   : > { %v1095_v53 = vsel %vm1026_vm1, %v1090_v51, 0  ;;  %1163 = vmatpush.bf16.xpose.msrb.mxu2 %v1154_v52 }
 0x13f   : > { %1104 = vmatpush.bf16.xpose.msrb.mxu0 %v1095_v53 }
 0x144   : > { %v1147_v55 = vpop.permute.xlu1 %1146 }
 0x145   : > { %v1087_v56 = vpop.permute.xlu0 %1086  ;;  %2072 = vmatmul.msk.bf16.vlgmr.msrb.gmra.mxu2 %vm1026_vm1, %v1147_v55 }
 0x146   : > { %2070 = vmatmul.msk.bf16.vlgmr.msrb.gmra.mxu0 %vm1026_vm1, %v1087_v56 }
 0x147   : > { %1221 = vmatpush.bf16.xpose.msra.mxu0 %v1212_v54 }
 0x156   : > { %v1042_v59 = vpop.f32.mrf.mxu3  ;;  %2074 = vmatmul.msk.bf16.vlgmr.msra.gmra.mxu0 %vm1026_vm1, %v1205_v57 }
 0x157   : > { %v1046_v60 = vmul.f32 0.25, %v1042_v59 }
 0x159   : > { %v1050_v61 = vadd.f32 %v2140_v58, %v1046_v60 }
 0x15b   : > { %v1052_v62 = vsel %vm1051_vm2, %v1050_v61, -inf }
 0x15c   : > { %1053 = vmax.xlane.f32.xlu0 %v1052_v62 }
 0x15e   : > { %v1044_v63 = vpop.f32.mrf.mxu3 }
 0x1c3   : > { %v1106_v6 = vpop.f32.mrf.mxu0 }
 0x1c4   : > { %v1110_v7 = vmul.f32 0.25, %v1106_v6 }
 0x1c6   : > { %v1111_v8 = vadd.f32 %v2140_v58, %v1110_v7 }
 0x1c8   : > { %v1165_v9 = vpop.f32.mrf.mxu2  ;;  %v1112_v10 = vsel %vm1051_vm2, %v1111_v8, -inf }
 0x1c9   : > { %v1169_v11 = vmul.f32 0.25, %v1165_v9  ;;  %1113 = vmax.xlane.f32.xlu1 %v1112_v10  ;;  %v1286_v9 = vld [vmem:[%s2296_s14 + $0x38] sm:$0xff]  ;;  %v1283_v10 = vld [vmem:[%s2296_s14 + $0x20] sm:$0xff] }
 0x1cb   : > { %v1108_v12 = vpop.f32.mrf.mxu0  ;;  %v1170_v13 = vadd.f32 %v2140_v58, %v1169_v11 }
 0x1cc   : > { %v1284_v12 = vld [vmem:[%s2296_s14 + $0x28] sm:$0xff] }
 0x1cd   : > { %v1171_v14 = vsel %vm1051_vm2, %v1170_v13, -inf }
 0x1ce   : > { %1172 = vmax.xlane.f32.xlu2 %v1171_v14  ;;  %v1281_v14 = vld [vmem:[%s2296_s14 + $0x10] sm:$0xff] }
 0x1cf   : > { %v1054_v15 = vpop.xlane.xlu0 %1053 }
 0x1d0   : > { %v1055_v16 = vsub.f32 %v1050_v61, %v1054_v15  ;;  %v1167_v17 = vpop.f32.mrf.mxu2  ;;  %v1282_v15 = vld [vmem:[%s2296_s14 + $0x18] sm:$0xff] }
 0x1d1   : > { %v1279_v17 = vld [vmem:[%s2296_s14] sm:$0xff] }
 0x1d2   : > { %v1056_v18 = vmul.f32 1.442695, %v1055_v16  ;;  %v1289_v16 = vpack.c.bf16 %v1282_v15, %v1281_v14 }
 0x1d3   : > { %v1223_v19 = vpop.f32.mrf.mxu0 }
 0x1d4   : > { %2154 = vpow2.f32 %v1056_v18  ;;  %v1227_v20 = vmul.f32 0.25, %v1223_v19  ;;  %v1280_v18 = vld [vmem:[%s2296_s14 + $0x8] sm:$0xff] }
 0x1d5   : > { %v1288_v19 = vpack.c.bf16 %v1280_v18, %v1279_v17  ;;  %v2144_v18 = vld [vmem:[%s2685_s2] ss:$0 sm:$0xff]  ;;  %s2696_s2 = sld [smem:[#allocation12_spill]] }
 0x1d6   : > { %v1228_v21 = vadd.f32 %v2140_v58, %v1227_v20 }
 0x1d8   : > { %v1229_v22 = vsel %vm1051_vm2, %v1228_v21, -inf }
 0x1d9   : > { %1230 = vmax.xlane.f32.xlu2 %v1229_v22 }
 0x1da   : > { %v2155_v24 = vpop.eup %2154 }
 0x1db   : > { %v1225_v25 = vpop.f32.mrf.mxu0  ;;  %v1058_v26 = vsel %vm1051_vm2, %v2155_v24, 0.0 }
 0x1dc   : > { %1059 = vadd.xlane.f32.xlu0 %v1058_v26 }
 0x1f1   : > { %1125 = vrot.lane.b32.xlu2 %v1064_v3, %s2237_s18 }
 0x23c   : > { %v1114_v27 = vpop.xlane.xlu1 %1113 }
 0x23d   : > { %v1115_v28 = vsub.f32 %v1111_v8, %v1114_v27  ;;  %v1285_v8 = vld [vmem:[%s2296_s14 + $0x30] sm:$0xff] }
 0x23e   : > { %v1291_v11 = vpack.c.bf16 %v1286_v9, %v1285_v8 }
 0x23f   : > { %v1116_v29 = vmul.f32 1.442695, %v1115_v28  ;;  %v2142_v28 = vld [vmem:[%s2301_s19] ss:$0 sm:$0xff] }
 0x240   : > { %1303 = vmatpush.bf16.msra.mxu2 %v1291_v11 }
 0x241   : > { %2156 = vpow2.f32 %v1116_v29  ;;  %v1173_v30 = vpop.xlane.xlu2 %1172 }
 0x242   : > { %v1174_v31 = vsub.f32 %v1170_v13, %v1173_v30  ;;  %v1290_v13 = vpack.c.bf16 %v1284_v12, %v1283_v10 }
 0x244   : > { %v1175_v32 = vmul.f32 1.442695, %v1174_v31  ;;  %1304 = vmatpush.bf16.msra.mxu2 %v1290_v13 }
 0x246   : > { %2158 = vpow2.f32 %v1175_v32 }
 0x247   : > { %v2157_v33 = vpop.eup %2156 }
 0x248   : > { %v1118_v34 = vsel %vm1051_vm2, %v2157_v33, 0.0  ;;  %1305 = vmatpush.bf16.msra.mxu2 %v1289_v16  ;;  %v2143_v16 = vld [vmem:[%s2306_s24] ss:$0 sm:$0xff] }
 0x249   : > { %1119 = vadd.xlane.f32.xlu1 %v1118_v34  ;;  %v2241_v34 = vmov 64.0  }
 0x24c   : > { %v2159_v35 = vpop.eup %2158  ;;  %v1231_v36 = vpop.xlane.xlu2 %1230  ;;  %1306 = vmatpush.bf16.msra.mxu2 %v1288_v19 }
 0x24d   : > { %v1232_v37 = vsub.f32 %v1228_v21, %v1231_v36  ;;  %v1177_v38 = vsel %vm1051_vm2, %v2159_v35, 0.0 }
 0x24e   : > { %1178 = vadd.xlane.f32.xlu0 %v1177_v38 }
 0x24f   : > { %v1233_v39 = vmul.f32 1.442695, %v1232_v37  ;;  %v1060_v40 = vpop.xlane.xlu0 %1059 }
 0x250   : > { %2160 = vrcp.f32 %v1060_v40 }
 0x251   : > { %2162 = vpow2.f32 %v1233_v39 }
 0x254   : > { %v1126_v41 = vpop.permute.xlu2 %1125 }
 0x255   : > { %v1131_v42 = vsel %vm1068_vm3, %v1126_v41, 0 }
 0x256   : > { %v2161_v43 = vpop.eup %2160  ;;  %1140 = vmatpush.bf16.msra.mxu3 %v1131_v42 }
 0x257   : > { %v2163_v44 = vpop.eup %2162  ;;  %v1062_v45 = vmul.f32 %v2161_v43, %v2155_v24 }
 0x258   : > { %v1235_v46 = vsel %vm1051_vm2, %v2163_v44, 0.0 }
 0x259   : > { %1236 = vadd.xlane.f32.xlu1 %v1235_v46  ;;  %v1063_v47 = vpack.c.bf16 %v1062_v45, %v1062_v45  ;;  %v1392_v45 = vld [vmem:[%s2326_s20 + $0x30] sm:$0xff]  ;;  %v1393_v46 = vld [vmem:[%s2326_s20 + $0x38] sm:$0xff] }
 0x25b   : > { %2069 = vmatmul.msk.bf16.vlgmr.msrb.gmra.mxu3 %vm1051_vm2, %v1063_v47  ;;  %v1398_v47 = vpack.c.bf16 %v1393_v46, %v1392_v45 }
 0x25d   : > { %1410 = vmatpush.bf16.msrb.mxu0 %v1398_v47 }
 0x262   : > { %1183 = vrot.lane.b32.xlu0 %v1064_v3, %s2236_s16 }
 0x272   : > { %1241 = vrot.lane.b32.xlu1 %v1064_v3, %s2235_s15 }
 0x2bc   : > { %v1120_v48 = vpop.xlane.xlu1 %1119 }
 0x2bd   : > { %2164 = vrcp.f32 %v1120_v48  ;;  %v1390_v48 = vld [vmem:[%s2326_s20 + $0x20] sm:$0xff] }
 0x2c1   : > { %v1179_v52 = vpop.xlane.xlu0 %1178 }
 0x2c2   : > { %2166 = vrcp.f32 %v1179_v52  ;;  %v1389_v52 = vld [vmem:[%s2326_s20 + $0x18] sm:$0xff] }
 0x2c3   : > { %v2165_v49 = vpop.eup %2164 }
 0x2c4   : > { %v1122_v50 = vmul.f32 %v2165_v49, %v2157_v33  ;;  %v1391_v49 = vld [vmem:[%s2326_s20 + $0x28] sm:$0xff] }
 0x2c6   : > { %v1123_v51 = vpack.c.bf16 %v1122_v50, %v1122_v50  ;;  %v1397_v50 = vpack.c.bf16 %v1391_v49, %v1390_v48  ;;  %v1425_v48 = vld [vmem:[%s2688_s22 + $0x30] sm:$0xff]  ;;  %v1426_v49 = vld [vmem:[%s2688_s22 + $0x38] sm:$0xff] }
 0x2c8   : > { %2071 = vmatmul.msk.bf16.vlgmr.msra.gmra.mxu3 %vm1051_vm2, %v1123_v51  ;;  %v2167_v53 = vpop.eup %2166  ;;  %1411 = vmatpush.bf16.msrb.mxu0 %v1397_v50  ;;  %v1388_v51 = vld [vmem:[%s2326_s20 + $0x10] sm:$0xff]  ;;  %v1430_v50 = vpack.c.bf16 %v1426_v49, %v1425_v48 }
 0x2c9   : > { %v1181_v54 = vmul.f32 %v2167_v53, %v2159_v35  ;;  %v1396_v53 = vpack.c.bf16 %v1389_v52, %v1388_v51  ;;  %v1423_v51 = vld [vmem:[%s2688_s22 + $0x20] sm:$0xff]  ;;  %v1424_v52 = vld [vmem:[%s2688_s22 + $0x28] sm:$0xff] }
 0x2cb   : > { %v1182_v57 = vpack.c.bf16 %v1181_v54, %v1181_v54  ;;  %v1352_v54 = vld [vmem:[%s924_s1] sm:$0x1f]  ;;  %s2689_s1 = sld [smem:[#allocation6_spill]] }
 0x2cc   : > { %v1237_v58 = vpop.xlane.xlu1 %1236  ;;  %1412 = vmatpush.bf16.msrb.mxu0 %v1396_v53  ;;  %v1429_v53 = vpack.c.bf16 %v1424_v52, %v1423_v51 }
 0x2cd   : > { %2168 = vrcp.f32 %v1237_v58  ;;  %v2514_v58 = vpack.c.bf16 %v1352_v54, %v1352_v54  ;;  %v1421_v54 = vld [vmem:[%s2688_s22 + $0x10] sm:$0xff] }
 0x2ce   : > { %2170 = vrcp.f32 %v2241_v34 }
 0x2d3   : > { %v2169_v60 = vpop.eup %2168 }
 0x2d4   : > { %v1184_v55 = vpop.permute.xlu0 %1183  ;;  %v1239_v61 = vmul.f32 %v2169_v60, %v2163_v44  ;;  %v2171_v35 = vpop.eup %2170  ;;  %v1360_v60 = vld [vmem:[%s2316_s6 + $0x38] sm:$0xff] }
 0x2d5   : > { %v1189_v56 = vsel %vm1068_vm3, %v1184_v55, 0  ;;  %v1319_v36 = vmul.f32 64.0, %v2171_v35  ;;  %vm1323_vm6 = vweird.f32 %v2171_v35  ;;  %v1386_v55 = vld [vmem:[%s2326_s20] sm:$0xff] }
 0x2d6   : > { %1198 = vmatpush.bf16.msrb.mxu3 %v1189_v56  ;;  %v1240_v1 = vpack.c.bf16 %v1239_v61, %v1239_v61  ;;  %v1387_v56 = vld [vmem:[%s2326_s20 + $0x8] sm:$0xff] }
 0x2d7   : > { %v1320_v37 = vsub.f32 1.0, %v1319_v36 }
 0x2d9   : > { %2073 = vmatmul.msk.bf16.vlgmr.msrb.gmra.mxu3 %vm1051_vm2, %v1182_v57  ;;  %v1321_v38 = vmul.f32 %v2171_v35, %v1320_v37  ;;  %v1395_v57 = vpack.c.bf16 %v1387_v56, %v1386_v55  ;;  %v1422_v55 = vld [vmem:[%s2688_s22 + $0x18] sm:$0xff] }
 0x2da   : > { %v1428_v56 = vpack.c.bf16 %v1422_v55, %v1421_v54 }
 0x2db   : > { %v1322_v39 = vadd.f32 %v2171_v35, %v1321_v38  ;;  %1413 = vmatpush.bf16.msrb.mxu0 %v1395_v57  ;;  %v1419_v57 = vld [vmem:[%s2688_s22] sm:$0xff] }
 0x2dd   : > { %v2500_v40 = vsel %vm1323_vm6, %v2171_v35, %v1322_v39 }
 0x2de   : > { %v1081_v59 = vpop.f32.mrf.mxu3  ;;  %2078 = vmatmul.msk.bf16.vlgmr.msrb.gmra.mxu0 %vm949_vm0, %v2514_v58 }
 0x2e4   : > { %v1242_v62 = vpop.permute.xlu1 %1241 }
 0x2e5   : > { %v1247_v63 = vsel %vm1068_vm3, %v1242_v62, 0  ;;  %v1357_v62 = vld [vmem:[%s2316_s6 + $0x20] sm:$0xff] }
 0x2e6   : > { %v1083_v0 = vpop.f32.mrf.mxu3  ;;  %1256 = vmatpush.bf16.msrb.mxu1 %v1247_v63  ;;  %v1358_v63 = vld [vmem:[%s2316_s6 + $0x28] sm:$0xff] }
 0x2e7   : > { %v1364_v0 = vpack.c.bf16 %v1358_v63, %v1357_v62 }
 0x2e9   : > { %2075 = vmatmul.msk.bf16.vlgmr.msrb.gmra.mxu1 %vm1051_vm2, %v1240_v1  ;;  %v1355_v1 = vld [vmem:[%s2316_s6 + $0x10] sm:$0xff] }
 0x2ea   : > { %1439 = vmatpush.bf16.msra.mxu1 %v1430_v50 }
 0x2ee   : > { %1440 = vmatpush.bf16.msra.mxu1 %v1429_v53 }
 0x2f2   : > { %1441 = vmatpush.bf16.msra.mxu1 %v1428_v56 }
 0x34b   : > { %v1142_v2 = vpop.f32.mrf.mxu3 }
 0x34c   : > { %1263 = vrot.lane.b32.xlu2 %v1142_v2, %s2238_s23  ;;  %v1356_v2 = vld [vmem:[%s2316_s6 + $0x18] sm:$0xff] }
 0x353   : > { %v1144_v3 = vpop.f32.mrf.mxu3 }
 0x354   : > { %v1363_v3 = vpack.c.bf16 %v1356_v2, %v1355_v1 }
 0x35c   : > { %v1200_v4 = vpop.f32.mrf.mxu3 }
 0x35d   : > { %1267 = vrot.lane.b32.xlu0 %v1200_v4, %s2239_s26  ;;  %v1353_v4 = vld [vmem:[%s2316_s6] sm:$0xff] }
 0x364   : > { %v1202_v5 = vpop.f32.mrf.mxu3 }
 0x365   : > { %v1354_v5 = vld [vmem:[%s2316_s6 + $0x8] sm:$0xff] }
 0x366   : > { %v1258_v6 = vpop.f32.mrf.mxu1 }
 0x367   : > { %1271 = vrot.lane.b32.xlu2 %v1258_v6, %s2240_s28  ;;  %v1362_v6 = vpack.c.bf16 %v1354_v5, %v1353_v4 }
 0x36e   : > { %v1260_v7 = vpop.f32.mrf.mxu1 }
 0x3a6   : > { %v1264_v20 = vpop.permute.xlu2 %1263 }
 0x3a7   : > { %v1274_v21 = vsel %vm1026_vm1, %v1081_v59, %v1264_v20  ;;  %v1359_v59 = vld [vmem:[%s2316_s6 + $0x30] sm:$0xff] }
 0x3a8   : > { %v1365_v61 = vpack.c.bf16 %v1360_v60, %v1359_v59  ;;  %v1420_v59 = vld [vmem:[%s2688_s22 + $0x8] sm:$0xff] }
 0x3a9   : > { %v1427_v60 = vpack.c.bf16 %v1420_v59, %v1419_v57 }
 0x3aa   : > { %1377 = vmatpush.bf16.msra.mxu3 %v1365_v61 }
 0x3ab   : > { %1442 = vmatpush.bf16.msra.mxu1 %v1427_v60 }
 0x3ae   : > { %1378 = vmatpush.bf16.msra.mxu3 %v1364_v0  ;;  %2079 = vmatmul.msk.bf16.vlgmr.msra.gmra.mxu1 %vm949_vm0, %v2514_v58 }
 0x3b2   : > { %1379 = vmatpush.bf16.msra.mxu3 %v1363_v3 }
 0x3b6   : > { %1380 = vmatpush.bf16.msra.mxu3 %v1362_v6 }
 0x3c1   : > { %v1272_v24 = vpop.permute.xlu2 %1271 }
 0x3cf   : > { %v1268_v22 = vpop.permute.xlu0 %1267 }
 0x3d0   : > { %v1276_v25 = vsel %vm1275_vm4, %v1274_v21, %v1268_v22 }
 0x3d1   : > { %v1278_v26 = vsel %vm1277_vm5, %v1276_v25, %v1272_v24  ;;  %v2145_v24 = vld [vmem:[%s2686_s10] ss:$0 sm:$0xff]  ;;  %v1415_v25 = vpop.f32.mrf.mxu0  ;;  %s928_s10 = scalar_lea.vmem %s2396_s4, %s2421_s0 }
 0x3d2   : > { %v1287_v27 = vpack.c.bf16 %v1278_v26, %v1278_v26  ;;  %v1416_v26 = vadd.f32 %v2145_v24, %v1415_v25 }
 0x3d4   : > { %2076 = vmatmul.msk.bf16.vlgmr.msra.gmra.mxu2 %vm949_vm0, %v1287_v27  ;;  %v1449_v27 = vpack.c.bf16 %v1416_v26, %v1416_v26 }
 0x3d6   : > { %1511 = vrot.lane.b32.xlu2 %v1449_v27, %s2237_s18 }
 0x3de   : > { %1569 = vrot.lane.b32.xlu2 %v1449_v27, %s2236_s16 }
 0x430   : > { %v1512_v35 = vpop.permute.xlu2 %1511 }
 0x431   : > { %v1517_v36 = vsel %vm1026_vm1, %v1512_v35, 0 }
 0x432   : > { %1526 = vmatpush.bf16.xpose.msra.mxu0 %v1517_v36 }
 0x438   : > { %v1570_v37 = vpop.permute.xlu2 %1569 }
 0x439   : > { %v1575_v38 = vsel %vm1026_vm1, %v1570_v37, 0 }
 0x457   : > { %v1308_v29 = vpop.f32.mrf.mxu2 }
 0x458   : > { %v1309_v30 = vadd.f32 %v2142_v28, %v1308_v29  ;;  %v1454_v28 = vsel %vm1026_vm1, %v1449_v27, 0  ;;  %v1417_v29 = vpop.f32.mrf.mxu0 }
 0x459   : > { %1463 = vmatpush.bf16.xpose.msrb.mxu2 %v1454_v28 }
 0x45a   : > { %v1312_v31 = vadd.f32 %v1309_v30, %v2429_v23  ;;  %v2146_v30 = vld [vmem:[%s2687_s11] ss:$0 sm:$0xff] }
 0x45c   : > { %v1315_v32 = vsel %vm949_vm0, %v1312_v31, 0.0 }
 0x45d   : > { %1316 = vadd.xlane.f32.xlu1 %v1315_v32 }
 0x45f   : > { %v1310_v33 = vpop.f32.mrf.mxu2 }
 0x461   : > { %1584 = vmatpush.bf16.xpose.msra.mxu2 %v1575_v38 }
 0x4d0   : > { %v1317_v23 = vpop.xlane.xlu1 %1316 }
 0x4d1   : > { %v1325_v41 = vmul.f32 %v2500_v40, %v1317_v23 }
 0x4d3   : > { %v1326_v42 = vsub.f32 %v1312_v31, %v1325_v41 }
 0x4d5   : > { %v1327_v43 = vmul.f32 %v1326_v42, %v1326_v42 }
 0x4d7   : > { %v1328_v44 = vsel %vm949_vm0, %v1327_v43, 0.0 }
 0x4d8   : > { %1329 = vadd.xlane.f32.xlu0 %v1328_v44 }
 0x54b   : > { %v1330_v7 = vpop.xlane.xlu0 %1329 }
 0x54c   : > { %v1331_v8 = vmul.f32 %v1330_v7, %v2500_v40 }
 0x54e   : > { %v1332_v9 = vadd.f32 1e-12, %v1331_v8 }
 0x550   : > { %2172 = vrsqrt.f32 %v1332_v9  ;;  %vm1339_vm8 = vweird.f32 %v1332_v9 }
 0x556   : > { %v2173_v10 = vpop.eup %2172 }
 0x557   : > { %v1334_v11 = vmul.f32 %v2173_v10, %v1332_v9  ;;  %vm1340_vm7 = vweird.f32 %v2173_v10 }
 0x558   : > { %vm1341_vm9 = vmor %vm1339_vm8, %vm1340_vm7 }
 0x559   : > { %v1335_v12 = vmul.f32 %v2173_v10, %v1334_v11 }
 0x55b   : > { %v1336_v13 = vmul.f32 0.5, %v1335_v12 }
 0x55d   : > { %v1337_v14 = vsub.f32 1.5, %v1336_v13  ;;  %v1444_v13 = vpop.f32.mrf.mxu1 }
 0x55f   : > { %v1338_v15 = vmul.f32 %v2173_v10, %v1337_v14  ;;  %v2147_v14 = vld [vmem:[%s2689_s1] ss:$0 sm:$0xff] }
 0x561   : > { %v1342_v17 = vsel %vm1341_vm9, %v2173_v10, %v1338_v15 }
 0x562   : > { %v1343_v19 = vmul.f32 %v1342_v17, %v1326_v42 }
 0x564   : > { %v1347_v20 = vmul.f32 %v2143_v16, %v1343_v19  ;;  %v1445_v16 = vadd.f32 %v2147_v14, %v1444_v13  ;;  %v2242_v19 = vmov 65535  }
 0x565   : > { %v1446_v15 = vpop.f32.mrf.mxu1 }
 0x566   : > { %v2529_v21 = vadd.f32 %v2144_v18, %v1347_v20  ;;  %v1483_v18 = vpack.c.bf16 %v1445_v16, %v1445_v16  ;;  %v1489_v20 = vsel %vm1487_vm11, 4294967295, %v2242_v19 }
 0x567   : > { %v1490_v24 = vsel %vm1488_vm12, %v1489_v20, 0 }
 0x568   : > { %v1361_v22 = vpack.c.bf16 %v2529_v21, %v2529_v21  ;;  %v1492_v25 = vand.u32 %v1490_v24, %v1483_v18 }
 0x56a   : > { %2077 = vmatmul.msk.bf16.vlgmr.msra.gmra.mxu3 %vm949_vm0, %v1361_v22 }
 0x56b   : > { %1501 = vmatpush.bf16.msrb.mxu3 %v1492_v25 }
 0x5ed   : > { %v1382_v31 = vpop.f32.mrf.mxu3 }
 0x5ee   : > { %v1383_v32 = vadd.f32 %v2146_v30, %v1382_v31 }
 0x5f0   : > { %v1448_v33 = vpack.c.bf16 %v1383_v32, %v1383_v32 }
 0x5f2   : > { %1624 = vrot.lane.b32.xlu1 %v1448_v33, %s2235_s15  ;;  %1508 = vrot.lane.b32.xlu2 %v1448_v33, %s2237_s18 }
 0x5f3   : > { %2080 = vmatmul.msk.bf16.vlgmr.msrb.gmra.mxu2 %vm1026_vm1, %v1448_v33 }
 0x5f5   : > { %v1384_v34 = vpop.f32.mrf.mxu3 }
 0x5fa   : > { %1567 = vrot.lane.b32.xlu2 %v1448_v33, %s2236_s16 }
 0x602   : > { %1626 = vrot.lane.b32.xlu2 %v1449_v27, %s2235_s15 }
 0x64c   : > { %v1509_v39 = vpop.permute.xlu2 %1508 }
 0x64d   : > { %2082 = vmatmul.msk.bf16.vlgmr.msra.gmra.mxu0 %vm1026_vm1, %v1509_v39 }
 0x654   : > { %v1568_v23 = vpop.permute.xlu2 %1567 }
 0x655   : > { %2084 = vmatmul.msk.bf16.vlgmr.msra.gmra.mxu2 %vm1026_vm1, %v1568_v23 }
 0x65c   : > { %v1627_v41 = vpop.permute.xlu2 %1626 }
 0x65d   : > { %v1632_v42 = vsel %vm1026_vm1, %v1627_v41, 0 }
 0x65e   : > { %1641 = vmatpush.bf16.xpose.msrb.mxu0 %v1632_v42 }
 0x664   : > { %v1625_v43 = vpop.permute.xlu1 %1624 }
 0x665   : > { %2086 = vmatmul.msk.bf16.vlgmr.msrb.gmra.mxu0 %vm1026_vm1, %v1625_v43 }
 0x676   : > { %v1465_v44 = vpop.f32.mrf.mxu2 }
 0x677   : > { %v1469_v45 = vmul.f32 0.25, %v1465_v44 }
 0x679   : > { %v1471_v46 = vsel %vm1470_vm10, %v1469_v45, -inf }
 0x67a   : > { %1472 = vmax.xlane.f32.xlu0 %v1471_v46 }
 0x67e   : > { %v1467_v47 = vpop.f32.mrf.mxu2 }
 0x6ca   : > { %v1528_v61 = vpop.f32.mrf.mxu0 }
 0x6cb   : > { %v1532_v62 = vmul.f32 0.25, %v1528_v61 }
 0x6cd   : > { %v1533_v63 = vsel %vm1470_vm10, %v1532_v62, -inf }
 0x6ce   : > { %1534 = vmax.xlane.f32.xlu2 %v1533_v63 }
 0x6d2   : > { %v1530_v0 = vpop.f32.mrf.mxu0 }
 0x6d8   : > { %v1586_v1 = vpop.f32.mrf.mxu2 }
 0x6d9   : > { %v1590_v2 = vmul.f32 0.25, %v1586_v1 }
 0x6db   : > { %v1591_v3 = vsel %vm1470_vm10, %v1590_v2, -inf }
 0x6dc   : > { %1592 = vmax.xlane.f32.xlu0 %v1591_v3 }
 0x6e0   : > { %v1588_v4 = vpop.f32.mrf.mxu2 }
 0x6e2   : > { %v1643_v5 = vpop.f32.mrf.mxu0 }
 0x6e3   : > { %v1647_v6 = vmul.f32 0.25, %v1643_v5 }
 0x6e5   : > { %v1648_v7 = vsel %vm1470_vm10, %v1647_v6, -inf }
 0x6e6   : > { %1649 = vmax.xlane.f32.xlu0 %v1648_v7 }
 0x6ea   : > { %v1645_v8 = vpop.f32.mrf.mxu0 }
 0x6ed   : > { %v1473_v58 = vpop.xlane.xlu0 %1472 }
 0x6ee   : > { %v1474_v9 = vsub.f32 %v1469_v45, %v1473_v58 }
 0x6f0   : > { %v1475_v10 = vmul.f32 1.442695, %v1474_v9 }
 0x6f2   : > { %2174 = vpow2.f32 %v1475_v10 }
 0x6f8   : > { %v2175_v11 = vpop.eup %2174 }
 0x6f9   : > { %v1477_v12 = vsel %vm1470_vm10, %v2175_v11, 0.0 }
 0x6fa   : > { %1478 = vadd.xlane.f32.xlu1 %v1477_v12 }
 0x713   : > { %1660 = vrot.lane.b32.xlu1 %v1483_v18, %s2235_s15  ;;  %s2690_s15 = sld [smem:[#allocation7_spill]] }
 0x719   : > { %v1703_v7 = vld [vmem:[%s2690_s15 + $0x38] sm:$0xff]  ;;  %v1700_v8 = vld [vmem:[%s2690_s15 + $0x20] sm:$0xff]  ;;  %v1701_v9 = vld [vmem:[%s2690_s15 + $0x28] sm:$0xff] }
 0x71a   : > { %v1707_v10 = vpack.c.bf16 %v1701_v9, %v1700_v8  ;;  %v1699_v12 = vld [vmem:[%s2690_s15 + $0x18] sm:$0xff]  ;;  %v1696_v14 = vld [vmem:[%s2690_s15] sm:$0xff]  ;;  %v1697_v15 = vld [vmem:[%s2690_s15 + $0x8] sm:$0xff] }
 0x71b   : > { %v1705_v16 = vpack.c.bf16 %v1697_v15, %v1696_v14 }
 0x741   : > { %v1535_v17 = vpop.xlane.xlu2 %1534 }
 0x742   : > { %v1536_v22 = vsub.f32 %v1532_v62, %v1535_v17 }
 0x744   : > { %v1537_v26 = vmul.f32 1.442695, %v1536_v22 }
 0x746   : > { %2176 = vpow2.f32 %v1537_v26 }
 0x74c   : > { %v2177_v27 = vpop.eup %2176 }
 0x74d   : > { %v1539_v28 = vsel %vm1470_vm10, %v2177_v27, 0.0 }
 0x74e   : > { %1540 = vadd.xlane.f32.xlu0 %v1539_v28 }
 0x74f   : > { %v1593_v29 = vpop.xlane.xlu0 %1592 }
 0x750   : > { %v1594_v30 = vsub.f32 %v1590_v2, %v1593_v29 }
 0x752   : > { %v1595_v31 = vmul.f32 1.442695, %v1594_v30 }
 0x754   : > { %2178 = vpow2.f32 %v1595_v31 }
 0x759   : > { %v1650_v37 = vpop.xlane.xlu0 %1649 }
 0x75a   : > { %v2179_v32 = vpop.eup %2178  ;;  %v1651_v39 = vsub.f32 %v1647_v6, %v1650_v37  ;;  %v1702_v6 = vld [vmem:[%s2690_s15 + $0x30] sm:$0xff] }
 0x75b   : > { %v1597_v33 = vsel %vm1470_vm10, %v2179_v32, 0.0  ;;  %v1708_v58 = vpack.c.bf16 %v1703_v7, %v1702_v6 }
 0x75c   : > { %1598 = vadd.xlane.f32.xlu2 %v1597_v33  ;;  %v1652_v23 = vmul.f32 1.442695, %v1651_v39 }
 0x75d   : > { %1720 = vmatpush.bf16.msrb.mxu2 %v1708_v58 }
 0x761   : > { %1721 = vmatpush.bf16.msrb.mxu2 %v1707_v10 }
 0x762   : > { %1546 = vrot.lane.b32.xlu0 %v1483_v18, %s2237_s18  ;;  %s2692_s18 = sld [smem:[#allocation11_spill]] }
 0x768   : > { %v1774_v37 = vld [vmem:[%s2692_s18 + $0x60] sm:$0xff] }
 0x76d   : > { %v1479_v34 = vpop.xlane.xlu1 %1478 }
 0x76e   : > { %2180 = vrcp.f32 %v1479_v34 }
 0x76f   : > { %2182 = vpow2.f32 %v1652_v23  ;;  %v1777_v23 = vld [vmem:[%s2692_s18 + $0x78] sm:$0xff] }
 0x774   : > { %v2181_v35 = vpop.eup %2180  ;;  %1603 = vrot.lane.b32.xlu2 %v1483_v18, %s2236_s16  ;;  %s2691_s16 = sld [smem:[#allocation8_spill]] }
 0x775   : > { %v1481_v36 = vmul.f32 %v2181_v35, %v2175_v11  ;;  %v2183_v41 = vpop.eup %2182  ;;  %v1698_v11 = vld [vmem:[%s2690_s15 + $0x10] sm:$0xff] }
 0x776   : > { %v1654_v42 = vsel %vm1470_vm10, %v2183_v41, 0.0  ;;  %v1706_v13 = vpack.c.bf16 %v1699_v12, %v1698_v11 }
 0x777   : > { %v1482_v38 = vpack.c.bf16 %v1481_v36, %v1481_v36 }
 0x778   : > { %1722 = vmatpush.bf16.msrb.mxu2 %v1706_v13 }
 0x779   : > { %2081 = vmatmul.msk.bf16.vlgmr.msrb.gmra.mxu3 %vm1470_vm10, %v1482_v38  ;;  %v1776_v38 = vld [vmem:[%s2692_s18 + $0x70] sm:$0xff] }
 0x77a   : > { %v2148_v26 = vld [vmem:[%s2691_s16] ss:$0 sm:$0xff]  ;;  %v1785_v39 = vpack.c.bf16 %v1776_v38, %v1774_v37 }
 0x77c   : > { %1723 = vmatpush.bf16.msrb.mxu2 %v1705_v16 }
 0x785   : > { %v1661_v46 = vpop.permute.xlu1 %1660 }
 0x786   : > { %v1666_v49 = vand.u32 %v1661_v46, %v1490_v24  ;;  %v1773_v46 = vld [vmem:[%s2692_s18 + $0x58] sm:$0xff] }
 0x78c   : > { %1655 = vadd.xlane.f32.xlu0 %v1654_v42  ;;  %v1770_v42 = vld [vmem:[%s2692_s18 + $0x40] sm:$0xff] }
 0x7c1   : > { %v1541_v43 = vpop.xlane.xlu0 %1540 }
 0x7c2   : > { %2184 = vrcp.f32 %v1541_v43  ;;  %v1772_v43 = vld [vmem:[%s2692_s18 + $0x50] sm:$0xff] }
 0x7c8   : > { %v2185_v45 = vpop.eup %2184 }
 0x7c9   : > { %v1543_v47 = vmul.f32 %v2185_v45, %v2177_v27  ;;  %v1783_v45 = vpack.c.bf16 %v1772_v43, %v1770_v42 }
 0x7cb   : > { %v1544_v54 = vpack.c.bf16 %v1543_v47, %v1543_v47 }
 0x7cf   : > { %v1599_v44 = vpop.xlane.xlu2 %1598 }
 0x7d0   : > { %2186 = vrcp.f32 %v1599_v44  ;;  %v1771_v44 = vld [vmem:[%s2692_s18 + $0x48] sm:$0xff] }
 0x7d1   : > { %v1784_v47 = vpack.c.bf16 %v1773_v46, %v1771_v44 }
 0x7d4   : > { %v1547_v48 = vpop.permute.xlu0 %1546 }
 0x7d5   : > { %v1552_v50 = vand.u32 %v1547_v48, %v1490_v24  ;;  %v1766_v48 = vld [vmem:[%s2692_s18 + $0x20] sm:$0xff] }
 0x7d6   : > { %v2187_v51 = vpop.eup %2186 }
 0x7d7   : > { %v1601_v52 = vmul.f32 %v2187_v51, %v2179_v32  ;;  %v1604_v53 = vpop.permute.xlu2 %1603  ;;  %1561 = vmatpush.bf16.msrb.mxu1 %v1552_v50  ;;  %v1767_v50 = vld [vmem:[%s2692_s18 + $0x28] sm:$0xff] }
 0x7d8   : > { %v1609_v55 = vand.u32 %v1604_v53, %v1490_v24 }
 0x7d9   : > { %v1602_v56 = vpack.c.bf16 %v1601_v52, %v1601_v52  ;;  %v1769_v52 = vld [vmem:[%s2692_s18 + $0x38] sm:$0xff] }
 0x7da   : > { %2083 = vmatmul.msk.bf16.vlgmr.msrb.gmra.mxu1 %vm1470_vm10, %v1544_v54  ;;  %1618 = vmatpush.bf16.msra.mxu3 %v1609_v55  ;;  %v1782_v53 = vpack.c.bf16 %v1769_v52, %v1767_v50  ;;  %v1762_v54 = vld [vmem:[%s2692_s18] sm:$0xff]  ;;  %v1764_v55 = vld [vmem:[%s2692_s18 + $0x10] sm:$0xff] }
 0x7db   : > { %1675 = vmatpush.bf16.msra.mxu1 %v1666_v49  ;;  %v1768_v49 = vld [vmem:[%s2692_s18 + $0x30] sm:$0xff] }
 0x7dc   : > { %v1781_v51 = vpack.c.bf16 %v1768_v49, %v1766_v48 }
 0x7dd   : > { %2085 = vmatmul.msk.bf16.vlgmr.msra.gmra.mxu3 %vm1470_vm10, %v1602_v56  ;;  %v1763_v56 = vld [vmem:[%s2692_s18 + $0x8] sm:$0xff] }
 0x7de   : > { %1800 = vmatpush.bf16.msrb.mxu3 %v1785_v39 }
 0x7e2   : > { %1801 = vmatpush.bf16.msrb.mxu3 %v1783_v45 }
 0x7e6   : > { %1802 = vmatpush.bf16.msrb.mxu3 %v1781_v51 }
 0x7fc   : > { %v1503_v57 = vpop.f32.mrf.mxu3 }
 0x7ff   : > { %v1656_v59 = vpop.xlane.xlu0 %1655 }
 0x800   : > { %2188 = vrcp.f32 %v1656_v59  ;;  %v1765_v59 = vld [vmem:[%s2692_s18 + $0x18] sm:$0xff] }
 0x804   : > { %v1505_v60 = vpop.f32.mrf.mxu3 }
 0x805   : > { %v1780_v60 = vpack.c.bf16 %v1765_v59, %v1763_v56  ;;  %v1787_v59 = vld [vmem:[%s2696_s2] sm:$0x3] }
 0x806   : > { %v2189_v61 = vpop.eup %2188 }
 0x807   : > { %v1658_v62 = vmul.f32 %v2189_v61, %v2183_v41 }
 0x809   : > { %v1659_v63 = vpack.c.bf16 %v1658_v62, %v1658_v62 }
 0x80b   : > { %2087 = vmatmul.msk.bf16.vlgmr.msra.gmra.mxu1 %vm1470_vm10, %v1659_v63 }
 0x857   : > { %v1563_v0 = vpop.f32.mrf.mxu1 }
 0x858   : > { %1682 = vrot.lane.b32.xlu2 %v1563_v0, %s2238_s23  ;;  %s2693_s23 = sld [smem:[#allocation13_spill]] }
 0x85e   : > { %v1870_v61 = vld [vmem:[%s2693_s23 + $0xf0] sm:$0xff]  ;;  %v1871_v62 = vld [vmem:[%s2693_s23 + $0xf8] sm:$0xff]  ;;  %v1868_v63 = vld [vmem:[%s2693_s23 + $0xe0] sm:$0xff] }
 0x85f   : > { %v1565_v1 = vpop.f32.mrf.mxu1  ;;  %v1848_v38 = vld [vmem:[%s2693_s23 + $0x40] sm:$0xff]  ;;  %v1846_v43 = vld [vmem:[%s2693_s23 + $0x30] sm:$0xff]  ;;  %v1847_v44 = vld [vmem:[%s2693_s23 + $0x38] sm:$0xff] }
 0x860   : > { %v1620_v2 = vpop.f32.mrf.mxu3  ;;  %v1889_v1 = vpack.c.bf16 %v1871_v62, %v1870_v61  ;;  %v1858_v45 = vld [vmem:[%s2693_s23 + $0x90] sm:$0xff]  ;;  %v1877_v46 = vpack.c.bf16 %v1847_v44, %v1846_v43  ;;  %v1844_v48 = vld [vmem:[%s2693_s23 + $0x20] sm:$0xff]  ;;  %v1845_v49 = vld [vmem:[%s2693_s23 + $0x28] sm:$0xff] }
 0x861   : > { %1686 = vrot.lane.b32.xlu2 %v1620_v2, %s2239_s26  ;;  %s2694_s26 = sld [smem:[#allocation9_spill]]  ;;  %v1869_v2 = vld [vmem:[%s2693_s23 + $0xe8] sm:$0xff]  ;;  %v1856_v51 = vld [vmem:[%s2693_s23 + $0x80] sm:$0xff] }
 0x862   : > { %1907 = vmatpush.bf16.msra.mxu2 %v1889_v1  ;;  %v1857_v52 = vld [vmem:[%s2693_s23 + $0x88] sm:$0xff] }
 0x863   : > { %v1882_v56 = vpack.c.bf16 %v1857_v52, %v1856_v51  ;;  %v1841_v61 = vld [vmem:[%s2693_s23 + $0x8] sm:$0xff]  ;;  %v2153_v52 = vld [vmem:[%s2391_s27] ss:$0 sm:$0xff] }
 0x867   : > { %v2149_v11 = vld [vmem:[%s2694_s26] ss:$0 sm:$0xff] }
 0x868   : > { %v1622_v3 = vpop.f32.mrf.mxu3 }
 0x888   : > { %v1677_v4 = vpop.f32.mrf.mxu1 }
 0x889   : > { %1690 = vrot.lane.b32.xlu1 %v1677_v4, %s2240_s28  ;;  %s2695_s28 = sld [smem:[#allocation10_spill]]  ;;  %v1888_v4 = vpack.c.bf16 %v1869_v2, %v1868_v63  ;;  %v1790_v63 = vperm.slane %v1787_v59, 1 }
 0x88b   : > { %1908 = vmatpush.bf16.msra.mxu2 %v1888_v4 }
 0x88f   : > { %v2150_v13 = vld [vmem:[%s2695_s28] ss:$0 sm:$0xff] }
 0x890   : > { %v1679_v5 = vpop.f32.mrf.mxu1 }
 0x8b2   : > { %v1683_v17 = vpop.permute.xlu2 %1682 }
 0x8b3   : > { %v1693_v19 = vsel %vm1026_vm1, %v1503_v57, %v1683_v17  ;;  %v1779_v57 = vpack.c.bf16 %v1764_v55, %v1762_v54  ;;  %v1842_v54 = vld [vmem:[%s2693_s23 + $0x10] sm:$0xff]  ;;  %v1843_v55 = vld [vmem:[%s2693_s23 + $0x18] sm:$0xff] }
 0x8b5   : > { %1803 = vmatpush.bf16.msrb.mxu3 %v1779_v57  ;;  %v1875_v57 = vpack.c.bf16 %v1843_v55, %v1842_v54 }
 0x8bb   : > { %v1687_v18 = vpop.permute.xlu2 %1686 }
 0x8bc   : > { %v1694_v20 = vsel %vm1275_vm4, %v1693_v19, %v1687_v18  ;;  %v1854_v18 = vld [vmem:[%s2693_s23 + $0x70] sm:$0xff]  ;;  %v1855_v19 = vld [vmem:[%s2693_s23 + $0x78] sm:$0xff] }
 0x8fb   : > { %v1691_v22 = vpop.permute.xlu1 %1690 }
 0x8fc   : > { %v1695_v24 = vsel %vm1277_vm5, %v1694_v20, %v1691_v22  ;;  %v1881_v20 = vpack.c.bf16 %v1855_v19, %v1854_v18  ;;  %v1866_v22 = vld [vmem:[%s2693_s23 + $0xd0] sm:$0xff] }
 0x8fd   : > { %v1704_v25 = vpack.c.bf16 %v1695_v24, %v1695_v24  ;;  %v1867_v24 = vld [vmem:[%s2693_s23 + $0xd8] sm:$0xff] }
 0x8fe   : > { %1894 = vmatpush.bf16.msrb.mxu1 %v1881_v20 }
 0x8ff   : > { %2088 = vmatmul.msk.bf16.vlgmr.msrb.gmra.mxu2 %vm949_vm0, %v1704_v25  ;;  %v1887_v25 = vpack.c.bf16 %v1867_v24, %v1866_v22 }
 0x901   : > { %1909 = vmatpush.bf16.msra.mxu2 %v1887_v25 }
 0x982   : > { %v1725_v27 = vpop.f32.mrf.mxu2 }
 0x983   : > { %v1726_v28 = vadd.f32 %v2148_v26, %v1725_v27  ;;  %v1852_v26 = vld [vmem:[%s2693_s23 + $0x60] sm:$0xff]  ;;  %v1853_v27 = vld [vmem:[%s2693_s23 + $0x68] sm:$0xff] }
 0x985   : > { %v1729_v29 = vadd.f32 %v1726_v28, %v2529_v21  ;;  %v1775_v21 = vld [vmem:[%s2692_s18 + $0x68] sm:$0xff]  ;;  %v1880_v28 = vpack.c.bf16 %v1853_v27, %v1852_v26 }
 0x986   : > { %v1786_v41 = vpack.c.bf16 %v1777_v23, %v1775_v21  ;;  %v1849_v21 = vld [vmem:[%s2693_s23 + $0x48] sm:$0xff]  ;;  %v1860_v23 = vld [vmem:[%s2693_s23 + $0xa0] sm:$0xff] }
 0x987   : > { %v1732_v30 = vsel %vm949_vm0, %v1729_v29, 0.0  ;;  %1895 = vmatpush.bf16.msrb.mxu1 %v1880_v28  ;;  %v1878_v39 = vpack.c.bf16 %v1849_v21, %v1848_v38 }
 0x988   : > { %1733 = vadd.xlane.f32.xlu2 %v1732_v30  ;;  %1813 = vmatpush.bf16.msra.mxu0 %v1786_v41  ;;  %v1865_v30 = vld [vmem:[%s2693_s23 + $0xc8] sm:$0xff] }
 0x989   : > { %v1861_v41 = vld [vmem:[%s2693_s23 + $0xa8] sm:$0xff] }
 0x98a   : > { %v1727_v31 = vpop.f32.mrf.mxu2  ;;  %v1884_v42 = vpack.c.bf16 %v1861_v41, %v1860_v23 }
 0x98c   : > { %1814 = vmatpush.bf16.msra.mxu0 %v1784_v47  ;;  %v1859_v47 = vld [vmem:[%s2693_s23 + $0x98] sm:$0xff] }
 0x98d   : > { %v1883_v50 = vpack.c.bf16 %v1859_v47, %v1858_v45 }
 0x990   : > { %1815 = vmatpush.bf16.msra.mxu0 %v1782_v53  ;;  %v1876_v53 = vpack.c.bf16 %v1845_v49, %v1844_v48 }
 0x994   : > { %1816 = vmatpush.bf16.msra.mxu0 %v1780_v60  ;;  %v1840_v60 = vld [vmem:[%s2693_s23] sm:$0xff] }
 0x995   : > { %v1874_v62 = vpack.c.bf16 %v1841_v61, %v1840_v60 }
 0x9fb   : > { %v1734_v32 = vpop.xlane.xlu2 %1733 }
 0x9fc   : > { %v1735_v33 = vmul.f32 %v1734_v32, %v2500_v40  ;;  %v1850_v32 = vld [vmem:[%s2693_s23 + $0x50] sm:$0xff] }
 0x9fe   : > { %v1736_v34 = vsub.f32 %v1729_v29, %v1735_v33  ;;  %v1864_v29 = vld [vmem:[%s2693_s23 + $0xc0] sm:$0xff]  ;;  %v1851_v33 = vld [vmem:[%s2693_s23 + $0x58] sm:$0xff] }
 0x9ff   : > { %v1886_v31 = vpack.c.bf16 %v1865_v30, %v1864_v29  ;;  %v2151_v29 = vld [vmem:[%s2381_s12] ss:$0 sm:$0xff] }
 0xa00   : > { %v1737_v35 = vmul.f32 %v1736_v34, %v1736_v34 }
 0xa01   : > { %1910 = vmatpush.bf16.msra.mxu2 %v1886_v31 }
 0xa02   : > { %v1738_v36 = vsel %vm949_vm0, %v1737_v35, 0.0  ;;  %v1862_v35 = vld [vmem:[%s2693_s23 + $0xb0] sm:$0xff] }
 0xa03   : > { %1739 = vadd.xlane.f32.xlu0 %v1738_v36  ;;  %v1863_v36 = vld [vmem:[%s2693_s23 + $0xb8] sm:$0xff] }
 0xa04   : > { %v1885_v37 = vpack.c.bf16 %v1863_v36, %v1862_v35 }
 0xa06   : > { %1911 = vmatpush.bf16.msra.mxu2 %v1885_v37 }
 0xa0a   : > { %1912 = vmatpush.bf16.msra.mxu2 %v1884_v42 }
 0xa0e   : > { %1913 = vmatpush.bf16.msra.mxu2 %v1883_v50  ;;  %v2152_v50 = vld [vmem:[%s2386_s30] ss:$0 sm:$0xff] }
 0xa12   : > { %1914 = vmatpush.bf16.msra.mxu2 %v1882_v56 }
 0xa76   : > { %v1740_v0 = vpop.xlane.xlu0 %1739 }
 0xa77   : > { %v1741_v3 = vmul.f32 %v1740_v0, %v2500_v40 }
 0xa79   : > { %v1742_v5 = vadd.f32 1e-12, %v1741_v3  ;;  %v1789_v3 = vperm.slane %v1787_v59, 0 }
 0xa7b   : > { %2190 = vrsqrt.f32 %v1742_v5  ;;  %vm1749_vm14 = vweird.f32 %v1742_v5 }
 0xa81   : > { %v2191_v6 = vpop.eup %2190 }
 0xa82   : > { %v1744_v7 = vmul.f32 %v2191_v6, %v1742_v5  ;;  %vm1750_vm13 = vweird.f32 %v2191_v6 }
 0xa83   : > { %vm1751_vm15 = vmor %vm1749_vm14, %vm1750_vm13 }
 0xa84   : > { %v1745_v8 = vmul.f32 %v2191_v6, %v1744_v7 }
 0xa86   : > { %v1746_v58 = vmul.f32 0.5, %v1745_v8 }
 0xa88   : > { %v1747_v9 = vsub.f32 1.5, %v1746_v58 }
 0xa8a   : > { %v1748_v10 = vmul.f32 %v2191_v6, %v1747_v9 }
 0xa8c   : > { %v1752_v12 = vsel %vm1751_vm15, %v2191_v6, %v1748_v10 }
 0xa8d   : > { %v1753_v14 = vmul.f32 %v1752_v12, %v1736_v34  ;;  %v1879_v34 = vpack.c.bf16 %v1851_v33, %v1850_v32 }
 0xa8f   : > { %v1757_v15 = vmul.f32 %v2149_v11, %v1753_v14  ;;  %1896 = vmatpush.bf16.msrb.mxu1 %v1879_v34 }
 0xa91   : > { %v2619_v16 = vadd.f32 %v2150_v13, %v1757_v15 }
 0xa93   : > { %v1778_v17 = vpack.c.bf16 %v2619_v16, %v2619_v16  ;;  %1897 = vmatpush.bf16.msrb.mxu1 %v1878_v39 }
 0xa95   : > { %2089 = vmatmul.msk.bf16.vlgmr.msrb.gmra.mxu3 %vm949_vm0, %v1778_v17  ;;  %2090 = vmatmul.msk.bf16.vlgmr.msra.gmra.mxu0 %vm949_vm0, %v1778_v17 }
 0xa97   : > { %1898 = vmatpush.bf16.msrb.mxu1 %v1877_v46 }
 0xa9b   : > { %1899 = vmatpush.bf16.msrb.mxu1 %v1876_v53 }
 0xa9f   : > { %1900 = vmatpush.bf16.msrb.mxu1 %v1875_v57 }
 0xaa3   : > { %1901 = vmatpush.bf16.msrb.mxu1 %v1874_v62 }
 0xb12   : > { %v1818_v0 = vpop.f32.mrf.mxu0 }
 0xb13   : > { %v1819_v1 = vadd.f32 %v1818_v0, %v1790_v63 }
 0xb15   : > { %v1825_v2 = vmul.f32 0.044715, %v1819_v1  ;;  %v1823_v18 = vmul.f32 0.5, %v1819_v1 }
 0xb17   : > { %v1827_v4 = vmul.f32 %v1825_v2, %v1819_v1 }
 0xb18   : > { %v1805_v5 = vpop.f32.mrf.mxu3 }
 0xb19   : > { %v1829_v6 = vmul.f32 %v1827_v4, %v1819_v1  ;;  %v1806_v7 = vadd.f32 %v1805_v5, %v1789_v3 }
 0xb1a   : > { %v1820_v8 = vpop.f32.mrf.mxu0 }
 0xb1b   : > { %v1824_v58 = vmul.f32 0.044715, %v1806_v7  ;;  %v1831_v9 = vadd.f32 %v1829_v6, %v1819_v1  ;;  %v1822_v25 = vmul.f32 0.5, %v1806_v7 }
 0xb1d   : > { %v1826_v10 = vmul.f32 %v1824_v58, %v1806_v7  ;;  %v1833_v11 = vmul.f32 0.7978846, %v1831_v9 }
 0xb1f   : > { %v1828_v12 = vmul.f32 %v1826_v10, %v1806_v7  ;;  %2192 = vtanh.f32 %v1833_v11 }
 0xb20   : > { %v1807_v13 = vpop.f32.mrf.mxu3 }
 0xb21   : > { %v1830_v14 = vadd.f32 %v1828_v12, %v1806_v7 }
 0xb23   : > { %v1832_v15 = vmul.f32 0.7978846, %v1830_v14 }
 0xb25   : > { %v2193_v17 = vpop.eup %2192  ;;  %2194 = vtanh.f32 %v1832_v15 }
 0xb26   : > { %v1837_v19 = vadd.f32 1.0, %v2193_v17 }
 0xb28   : > { %v1839_v20 = vmul.f32 %v1837_v19, %v1823_v18 }
 0xb2a   : > { %v1873_v22 = vpack.c.bf16 %v1839_v20, %v1839_v20 }
 0xb2b   : > { %v2195_v24 = vpop.eup %2194 }
 0xb2c   : > { %1915 = vmatmul.bf16.vlgmr.msra.gmra.mxu2 %v1873_v22  ;;  %v1836_v26 = vadd.f32 1.0, %v2195_v24 }
 0xb2e   : > { %v1838_v27 = vmul.f32 %v1836_v26, %v1822_v25 }
 0xb30   : > { %v1872_v28 = vpack.c.bf16 %v1838_v27, %v1838_v27 }
 0xb32   : > { %1902 = vmatmul.bf16.vlgmr.msrb.gmra.mxu1 %v1872_v28 }
 0xbaf   : > { %v1903_v30 = vpop.f32.mrf.mxu1  ;;  %v1916_v31 = vpop.f32.mrf.mxu2 }
 0xbb0   : > { %v1904_v32 = vadd.f32 %v2151_v29, %v1903_v30 }
 0xbb2   : > { %v1917_v33 = vadd.f32 %v1916_v31, %v1904_v32 }
 0xbb4   : > { %v1920_v34 = vadd.f32 %v1917_v33, %v2619_v16 }
 0xbb6   : > { %v1923_v35 = vsel %vm949_vm0, %v1920_v34, 0.0 }
 0xbb7   : > { %v1905_v36 = vpop.f32.mrf.mxu1  ;;  %v1918_v37 = vpop.f32.mrf.mxu2  ;;  %1924 = vadd.xlane.f32.xlu1 %v1923_v35 }
 0xc2a   : > { %v1925_v38 = vpop.xlane.xlu1 %1924 }
 0xc2b   : > { %v1926_v21 = vmul.f32 %v1925_v38, %v2500_v40 }
 0xc2d   : > { %v1927_v39 = vsub.f32 %v1920_v34, %v1926_v21 }
 0xc2f   : > { %v1928_v23 = vmul.f32 %v1927_v39, %v1927_v39 }
 0xc31   : > { %v1929_v41 = vsel %vm949_vm0, %v1928_v23, 0.0 }
 0xc32   : > { %1930 = vadd.xlane.f32.xlu0 %v1929_v41 }
 0xca5   : > { %v1931_v42 = vpop.xlane.xlu0 %1930 }
 0xca6   : > { %v1932_v43 = vmul.f32 %v1931_v42, %v2500_v40 }
 0xca8   : > { %v1933_v44 = vadd.f32 1e-12, %v1932_v43 }
 0xcaa   : > { %2196 = vrsqrt.f32 %v1933_v44  ;;  %vm1940_vm2 = vweird.f32 %v1933_v44 }
 0xcb0   : > { %v2197_v16 = vpop.eup %2196 }
 0xcb1   : > { %v1935_v45 = vmul.f32 %v2197_v16, %v1933_v44  ;;  %vm1941_vm1 = vweird.f32 %v2197_v16 }
 0xcb2   : > { %vm1942_vm3 = vmor %vm1940_vm2, %vm1941_vm1 }
 0xcb3   : > { %v1936_v46 = vmul.f32 %v2197_v16, %v1935_v45 }
 0xcb5   : > { %v1937_v47 = vmul.f32 0.5, %v1936_v46 }
 0xcb7   : > { %v1938_v48 = vsub.f32 1.5, %v1937_v47 }
 0xcb9   : > { %v1939_v49 = vmul.f32 %v2197_v16, %v1938_v48 }
 0xcbb   : > { %v1943_v51 = vsel %vm1942_vm3, %v2197_v16, %v1939_v49 }
 0xcbc   : > { %v1944_v53 = vmul.f32 %v1943_v51, %v1927_v39 }
 0xcbe   : > { %v1948_v54 = vmul.f32 %v2152_v50, %v1944_v53 }
 0xcc0   : > { %v1952_v40 = vadd.f32 %v2153_v52, %v1948_v54 }
 0xcc2   : > { %1953 = vst.msk [vmem:[%s928_s10] sm:$0xff] %vm949_vm0, %v1952_v40 }
 0xcc3 PF: > { %s69_s7 = sadd.s32 1, %s2204_s7  }
 0xcc4   : > { %p66_p4 = scmp.ge.s32.totalorder %s69_s7, 4  }
 0xcc6   :  { %68 = sbr.rel (!%p66_p4) target bundleno = 43 (0x2b), region = 201 }

</bundles_post_ra>
